<compile_context>
chip_gen: v7x
topology: tpu7x:2x2x1
jax: 0.10.0
libtpu: 0.0.40
codegen_flags: <defaults>
</compile_context>

<pallas_src>
import jax
import jax.numpy as jnp
from jax.experimental import pallas as pl
from jax.experimental.pallas import tpu as pltpu

KSIZE = 5
STRIDE = 2
BN_EPS = 1e-5
BATCH_ALIGN = 16  # bf16 sublane packing: keeps all tap-slice starts tile-aligned

_VMEM = pl.BlockSpec(memory_space=pltpu.MemorySpace.VMEM)


def conv2d_size_out(size, kernel_size=KSIZE, stride=STRIDE):
    return (size - (kernel_size - 1) - 1) // stride + 1


# ---------------------------------------------------------------------------
# Parameter packing (all layout work hoisted to init, out of the forward).
# ---------------------------------------------------------------------------

def _build_row_conv_weight(w_hwio, w_in):
    """Pack a (5,5,Cin,Cout) conv weight into a 'row convolution' matrix.

    wb[ki, w*Cin+ci, q*Cout+co] = w_hwio[ki, w-2q, ci, co]  if 0 <= w-2q < 5
    so that   out_row_p = sum_ki  in_row_{2p+ki} @ wb[ki]
    realises the whole 5x5 stride-2 convolution of one output row with one MXU
    matmul per kernel row (W-direction conv + stride folded into the zero
    structure).  Shape: (5, W_in*Cin, Wo*Cout).
    TODO(synk): optionally zero-pad the K dim to a multiple of 128 (and the
    matching activation lane width) to avoid mostly-empty MXU K-passes on v5e.
    """
    kh, kw, cin, cout = w_hwio.shape
    wo = conv2d_size_out(w_in)
    wb = jnp.zeros((kh, w_in * cin, wo * cout), jnp.float32)
    for kj in range(kw):
        for q in range(wo):
            col = STRIDE * q + kj
            wb = wb.at[:, col * cin:(col + 1) * cin,
                       q * cout:(q + 1) * cout].set(w_hwio[:, kj])
    return wb


def _group_sum_mats(wo, c):
    """S (Wo*C, C) sums the Wo width-groups per channel; S^T broadcasts back."""
    s = jnp.tile(jnp.eye(c, dtype=jnp.float32), (wo, 1))
    return s, jnp.transpose(s)


def init_params(key, c, h, w, outputs):
    """Params in the kernel's pre-packed layouts.

    Conv/Linear weights ~ U(-1/sqrt(fan_in), 1/sqrt(fan_in)) (torch default),
    BN weight=1 / bias=0.  Conv biases are NOT created: under training-mode
    BatchNorm they are exactly cancelled by the batch-mean subtraction (and do
    not affect the centred variance), so they are mathematical no-ops.
    Returns (packed_params, raw_weights_for_reference).
    """
    ho1, wo1 = conv2d_size_out(h), conv2d_size_out(w)
    ho2, wo2 = conv2d_size_out(ho1), conv2d_size_out(wo1)
    ho3, wo3 = conv2d_size_out(ho2), conv2d_size_out(wo2)
    lin_in = ho3 * wo3 * 32
    keys = jax.random.split(key, 5)

    def conv_init(k, cin, cout):
        bound = 1.0 / float(cin * KSIZE * KSIZE) ** 0.5
        return jax.random.uniform(k, (KSIZE, KSIZE, cin, cout), jnp.float32,
                                  -bound, bound)

    w1 = conv_init(keys[0], c, 16)
    w2 = conv_init(keys[1], 16, 32)
    w3 = conv_init(keys[2], 32, 32)
    bound = 1.0 / float(lin_in) ** 0.5
    wh = jax.random.uniform(keys[3], (outputs, lin_in), jnp.float32, -bound, bound)
    bh = jax.random.uniform(keys[4], (outputs,), jnp.float32, -bound, bound)

    p = {}
    # Conv weights packed as row-convolution matrices, bf16 for the MXU.
    p["wb1"] = _build_row_conv_weight(w1, w).astype(jnp.bfloat16)
    p["wb2"] = _build_row_conv_weight(w2, wo1).astype(jnp.bfloat16)
    p["wb3"] = _build_row_conv_weight(w3, wo2).astype(jnp.bfloat16)
    # BatchNorm affine params (torch default init: weight=1, bias=0).
    p["g1"], p["be1"] = jnp.ones((1, 16), jnp.float32), jnp.zeros((1, 16), jnp.float32)
    p["g2"], p["be2"] = jnp.ones((1, 32), jnp.float32), jnp.zeros((1, 32), jnp.float32)
    p["g3"], p["be3"] = jnp.ones((1, 32), jnp.float32), jnp.zeros((1, 32), jnp.float32)
    # Lane-group reduction / broadcast matrices for per-channel BN statistics.
    p["s1"], p["st1"] = _group_sum_mats(wo1, 16)
    p["s2"], p["st2"] = _group_sum_mats(wo2, 32)
    p["s3"], p["st3"] = _group_sum_mats(wo3, 32)
    # Head weight: torch (outputs, C*H3*W3) -> (H3, W3*C, outputs) so torch's
    # x.view(N, -1) flatten order is matched with zero transposes in forward.
    p["whp"] = (wh.reshape(outputs, 32, ho3, wo3)
                .transpose(2, 3, 1, 0)
                .reshape(ho3, wo3 * 32, outputs)).astype(jnp.bfloat16)
    p["bh"] = bh.reshape(1, outputs)

    raw = {"w1": w1, "w2": w2, "w3": w3, "wh": wh, "bh": bh}
    return p, raw


# ---------------------------------------------------------------------------
# Fused Pallas kernel
# ---------------------------------------------------------------------------

def _make_kernel(n_real, n_tot, ho1, wo1, ho2, wo2, ho3, wo3):
    he = ho1 // 2          # even/odd output-row count of layer 1 (ho1 is even)
    n_pad = n_tot - n_real  # zero-padded batch rows (static)

    def kernel(x_ref,
               w1_ref, g1_ref, be1_ref, s1_ref, st1_ref, m1_ref,
               w2_ref, g2_ref, be2_ref, s2_ref, st2_ref, m2_ref,
               w3_ref, g3_ref, be3_ref, s3_ref, st3_ref, m3_ref,
               wh_ref, bh_ref, o_ref):

        def conv_taps(lhs_fn, w_ref):
            # sum_ki lhs(ki) @ w[ki] -- bf16 MXU operands, f32 accumulation.
            # TODO(synk): on v7x, drive the MXU explicitly
            # (matmul_push_rhs / matmul_acc_lhs / matmul_pop into one MRB
            # address) if the bundle dump shows 5 pops + 4 full-size f32 vadds.
            acc = None
            for ki in range(KSIZE):
                t = jnp.dot(lhs_fn(ki), w_ref[ki],
                            preferred_element_type=jnp.float32)
                acc = t if acc is None else acc + t
            return acc

        def bn_relu(blocks, ho, wo, g_ref, be_ref, s_ref, st_ref, m_ref):
            # Training-mode BatchNorm2d + ReLU over (rows, Wo*C) f32 blocks
            # (channels repeat with period C on the lane axis).  Per-channel
            # stats via tiny constant matmuls (S / S^T): no in-kernel reshapes
            # or cross-lane shuffles.  The mean is folded into the affine
            # shift, so centred blocks never persist.  Zero-padded batch rows
            # contribute 0 to the column sums and a known cnt_pad*mean^2 to
            # the centred sum of squares (corrected below); the per-row mask
            # re-zeroes them so the next layer's statistics stay exact.
            s = s_ref[...]                                   # (Wo*C, C)
            st = st_ref[...]                                 # (C, Wo*C)
            cnt_real = n_real * ho * wo
            cnt_pad = n_pad * ho * wo
            inv_r = 1.0 / float(cnt_real)

            colsum = None
            for y in blocks:
                t = jnp.sum(y, axis=0, keepdims=True)
                colsum = t if colsum is None else colsum + t
            mean_c = jnp.dot(colsum, s, preferred_element_type=jnp.float32) * inv_r
            mean_row = jnp.dot(mean_c, st, preferred_element_type=jnp.float32)

            sqsum = None
            for y in blocks:
                d = y - mean_row                             # transient only
                t = jnp.sum(d * d, axis=0, keepdims=True)
                sqsum = t if sqsum is None else sqsum + t
            var_c = jnp.dot(sqsum, s, preferred_element_type=jnp.float32)
            if cnt_pad:
                var_c = var_c - float(cnt_pad) * (mean_c * mean_c)
            var_c = var_c * inv_r

            scale_c = g_ref[...] * jax.lax.rsqrt(var_c + BN_EPS)
            shift_c = be_ref[...] - mean_c * scale_c          # mean folded in
            scale_row = jnp.dot(scale_c, st, preferred_element_type=jnp.float32)
            shift_row = jnp.dot(shift_c, st, preferred_element_type=jnp.float32)

            out = []
            for y in blocks:
                z = jnp.maximum(y * scale_row + shift_row, 0.0)
                if n_pad:
                    z = z * m_ref[...]        # (rows,1) mask: padded rows -> 0
                out.append(z)
            return out

        # ---- conv1 + bn1 + relu -------------------------------------------
        # x_ref: 4 row-phase blocks of the input (h % 4), rows ordered (h//4, n).
        xcls = [x_ref[r] for r in range(4)]        # each (H/4*Ntot, W*Cin) bf16
        y1 = []
        for parity in range(2):                    # even / odd output rows
            def lhs1(ki, parity=parity):
                src = (ki + 2 * parity) % 4
                q0 = (ki + 2 * parity) // 4
                return xcls[src][q0 * n_tot:(q0 + he) * n_tot, :]
            y1.append(conv_taps(lhs1, w1_ref))     # (He*Ntot, Wo1*16) f32
        y1 = bn_relu(y1, ho1, wo1, g1_ref, be1_ref, s1_ref, st1_ref, m1_ref)
        a1 = [y.astype(jnp.bfloat16) for y in y1]  # [even rows, odd rows]

        # ---- conv2 + bn2 + relu -------------------------------------------
        def lhs2(ki):
            return a1[ki % 2][(ki // 2) * n_tot:(ki // 2 + ho2) * n_tot, :]
        y2 = conv_taps(lhs2, w2_ref)               # (Ho2*Ntot, Wo2*32)
        (y2,) = bn_relu([y2], ho2, wo2, g2_ref, be2_ref, s2_ref, st2_ref, m2_ref)
        a2 = y2.astype(jnp.bfloat16)

        # ---- conv3 + bn3 + relu  (Ho3 is tiny -> per-output-row) ----------
        y3 = []
        for p in range(ho3):
            def lhs3(ki, p=p):
                hrow = 2 * p + ki
                return a2[hrow * n_tot:(hrow + 1) * n_tot, :]
            y3.append(conv_taps(lhs3, w3_ref))     # (Ntot, Wo3*32) f32
        y3 = bn_relu(y3, ho3, wo3, g3_ref, be3_ref, s3_ref, st3_ref, m3_ref)

        # ---- linear head (weight pre-permuted to (h, w*c, outputs)) -------
        # (A lane-concat of the ho3 blocks + single matmul was considered but
        # is in the latency-bound tail and not worth the lowering risk.)
        acc = None
        for p in range(ho3):
            t = jnp.dot(y3[p].astype(jnp.bfloat16), wh_ref[p],
                        preferred_element_type=jnp.float32)
            acc = t if acc is None else acc + t
        o_ref[...] = (acc + bh_ref[...]).astype(o_ref.dtype)

    return kernel


# ---------------------------------------------------------------------------
# Forward
# ---------------------------------------------------------------------------

def _vmem_limit_bytes():
    # Generation-aware VMEM budget: ~80% of physical capacity
    # (v5e/v6e 128 MiB -> ~102 MiB, v7x 64 MiB -> ~51 MiB), never below the
    # 32 MiB that is known-safe everywhere.
    try:
        cap = int(pltpu.get_tpu_info().vmem_capacity_bytes)
    except Exception:
        cap = 64 * 1024 * 1024
    return max(32 * 1024 * 1024, int(cap * 0.8))


@jax.jit
def dqnbn_forward(params, x_nchw):
    n, c, h, w = x_nchw.shape
    ho1, wo1 = conv2d_size_out(h), conv2d_size_out(w)
    ho2, wo2 = conv2d_size_out(ho1), conv2d_size_out(wo1)
    ho3, wo3 = conv2d_size_out(ho2), conv2d_size_out(wo2)
    n_out = params["bh"].shape[-1]
    if h % 4 != 0 or ho1 % 2 != 0:
        # TODO(synk): pad H to a multiple of 4 for other input sizes
        # (Atari-style 40 / 84 inputs satisfy this already).
        raise ValueError("fused kernel expects H % 4 == 0 (e.g. 40 or 84)")
    if ho2 < KSIZE or ho3 < 1 or wo3 < 1:
        raise ValueError("spatial size too small for three 5x5 stride-2 convs")

    # Sublane alignment: pad the batch to a multiple of 16 so every in-kernel
    # tap slice starts on a (16,128)/(8,128) tile boundary (no relayouts).
    n_tot = ((n + BATCH_ALIGN - 1) // BATCH_ALIGN) * BATCH_ALIGN
    if n_tot != n:
        x_nchw = jnp.pad(x_nchw, ((0, n_tot - n), (0, 0), (0, 0), (0, 0)))

    # NCHW -> 4 row-phase blocks (h % 4), rows ordered (h//4, batch), channels
    # on the lane axis: (4, H//4*Ntot, W*C).  bf16 cast first halves the bytes
    # this (only remaining) XLA layout op moves.
    # TODO(synk): accept NHWC input, or pass x with memory_space=pl.ANY and DMA
    # row-phase slabs in-kernel, to remove this HBM round-trip at large batch.
    xr = x_nchw.astype(jnp.bfloat16)
    xr = jnp.transpose(xr, (2, 0, 3, 1))                  # (H, Ntot, W, C)
    xr = xr.reshape(h // 4, 4, n_tot, w * c)
    xr = jnp.transpose(xr, (1, 0, 2, 3)).reshape(4, (h // 4) * n_tot, w * c)

    # Per-row batch masks (1.0 real / 0.0 padded) in the kernel's (row, batch)
    # ordering; only read by the kernel when the batch was actually padded.
    mrow = (jnp.arange(n_tot) < n).astype(jnp.float32)
    m1 = jnp.tile(mrow, ho1 // 2)[:, None]                # (He*Ntot, 1)
    m2 = jnp.tile(mrow, ho2)[:, None]                     # (Ho2*Ntot, 1)
    m3 = mrow[:, None]                                    # (Ntot, 1)

    operands = (
        xr,
        params["wb1"], params["g1"], params["be1"], params["s1"], params["st1"], m1,
        params["wb2"], params["g2"], params["be2"], params["s2"], params["st2"], m2,
        params["wb3"], params["g3"], params["be3"], params["s3"], params["st3"], m3,
        params["whp"], params["bh"],
    )

    k1, md1 = w * c, wo1 * 16
    k2, md2 = wo1 * 16, wo2 * 32
    k3, md3 = wo2 * 32, wo3 * 32
    flops = 2 * n_tot * (ho1 * KSIZE * k1 * md1 + ho2 * KSIZE * k2 * md2
                         + ho3 * KSIZE * k3 * md3 + ho3 * md3 * n_out)
    bytes_accessed = sum(int(a.size) * a.dtype.itemsize for a in operands)
    bytes_accessed += n_tot * n_out * 4

    kernel = _make_kernel(n, n_tot, ho1, wo1, ho2, wo2, ho3, wo3)

    # TODO(synk): for large batches (N >~ 128), add a batch-tiled grid with
    # dimension_semantics=("parallel",) and two-pass BN (per-tile sum /
    # sum-of-squares reduced across tiles/cores) so v7x's 64 MiB VMEM and
    # second TensorCore are usable; at small/medium N one fused call wins.
    out = pl.pallas_call(
        kernel,
        out_shape=jax.ShapeDtypeStruct((n_tot, n_out), jnp.float32),
        in_specs=[_VMEM] * len(operands),
        out_specs=_VMEM,
        compiler_params=pltpu.CompilerParams(
            vmem_limit_bytes=_vmem_limit_bytes()),
        cost_estimate=pl.CostEstimate(
            flops=int(flops),
            transcendentals=16 + 32 + 32,          # three per-channel rsqrt's
            bytes_accessed=int(bytes_accessed)),
    )(*operands)
    return out[:n]


# ---------------------------------------------------------------------------
# Pure-JAX f32 reference (training-mode BN; conv bias is a no-op under it).
# ---------------------------------------------------------------------------

def _reference_forward(raw, x_nchw):
    def conv(x, w_hwio):
        return jax.lax.conv_general_dilated(
            x, w_hwio, window_strides=(STRIDE, STRIDE), padding="VALID",
            dimension_numbers=("NCHW", "HWIO", "NCHW"))

    def bn_relu(x):
        mean = jnp.mean(x, axis=(0, 2, 3), keepdims=True)
        var = jnp.mean((x - mean) ** 2, axis=(0, 2, 3), keepdims=True)
        return jnp.maximum((x - mean) * jax.lax.rsqrt(var + BN_EPS), 0.0)

    x = bn_relu(conv(x_nchw, raw["w1"]))
    x = bn_relu(conv(x, raw["w2"]))
    x = bn_relu(conv(x, raw["w3"]))
    x = x.reshape(x.shape[0], -1)                 # torch view order (c, h, w)
    return x @ raw["wh"].T + raw["bh"]


if __name__ == "__main__":
    # Smallest convenient spatial size surviving three 5x5 stride-2 convs.
    N, C, H, W, OUT = 2, 4, 40, 40, 6
    key = jax.random.PRNGKey(0)
    kx, kp = jax.random.split(key)
    x = jax.random.uniform(kx, (N, C, H, W), jnp.float32, 0.0, 255.0)
    params, raw = init_params(kp, C, H, W, OUT)

    out = dqnbn_forward(params, x)
    jax.block_until_ready(out)
    assert out.shape == (N, OUT) and out.dtype == jnp.float32
    assert bool(jnp.all(jnp.isfinite(out)))

    # Loose tolerance: kernel uses bf16 MXU operands (f32 accumulation/stats),
    # reference is full f32.
    ref = _reference_forward(raw, x)
    err = float(jnp.max(jnp.abs(out - ref)))
    tol = 0.1 * (1.0 + float(jnp.max(jnp.abs(ref))))
    assert err < tol, f"kernel/reference mismatch: max|diff|={err} tol={tol}"
    print("KERNEL_OK")
</pallas_src>

<mosaic_0001>
module attributes {stable_mosaic.version = 11 : i64} {
  func.func @kernel(%arg0: memref<4x160x160xbf16, #tpu.memory_space<vmem>>, %arg1: memref<5x160x288xbf16, #tpu.memory_space<vmem>>, %arg2: memref<1x16xf32, #tpu.memory_space<vmem>>, %arg3: memref<1x16xf32, #tpu.memory_space<vmem>>, %arg4: memref<288x16xf32, #tpu.memory_space<vmem>>, %arg5: memref<16x288xf32, #tpu.memory_space<vmem>>, %arg6: memref<144x1xf32, #tpu.memory_space<vmem>>, %arg7: memref<5x288x224xbf16, #tpu.memory_space<vmem>>, %arg8: memref<1x32xf32, #tpu.memory_space<vmem>>, %arg9: memref<1x32xf32, #tpu.memory_space<vmem>>, %arg10: memref<224x32xf32, #tpu.memory_space<vmem>>, %arg11: memref<32x224xf32, #tpu.memory_space<vmem>>, %arg12: memref<112x1xf32, #tpu.memory_space<vmem>>, %arg13: memref<5x224x64xbf16, #tpu.memory_space<vmem>>, %arg14: memref<1x32xf32, #tpu.memory_space<vmem>>, %arg15: memref<1x32xf32, #tpu.memory_space<vmem>>, %arg16: memref<64x32xf32, #tpu.memory_space<vmem>>, %arg17: memref<32x64xf32, #tpu.memory_space<vmem>>, %arg18: memref<16x1xf32, #tpu.memory_space<vmem>>, %arg19: memref<2x64x6xbf16, #tpu.memory_space<vmem>>, %arg20: memref<1x6xf32, #tpu.memory_space<vmem>>, %arg21: memref<16x6xf32, #tpu.memory_space<vmem>>) attributes {dimension_semantics = [], scalar_prefetch = 0 : i64, scratch_operands = 0 : i64, tpu.core_type = #tpu.core_type<tc>} {
    %c0 = arith.constant 0 : index
    %c0_0 = arith.constant 0 : index
    %c0_1 = arith.constant 0 : index
    %0 = vector.load %arg0[%c0, %c0_0, %c0_1] : memref<4x160x160xbf16, #tpu.memory_space<vmem>>, vector<1x160x160xbf16>
    %1 = vector.shape_cast %0 : vector<1x160x160xbf16> to vector<160x160xbf16>
    %c1 = arith.constant 1 : index
    %c0_2 = arith.constant 0 : index
    %c0_3 = arith.constant 0 : index
    %2 = vector.load %arg0[%c1, %c0_2, %c0_3] : memref<4x160x160xbf16, #tpu.memory_space<vmem>>, vector<1x160x160xbf16>
    %3 = vector.shape_cast %2 : vector<1x160x160xbf16> to vector<160x160xbf16>
    %c2 = arith.constant 2 : index
    %c0_4 = arith.constant 0 : index
    %c0_5 = arith.constant 0 : index
    %4 = vector.load %arg0[%c2, %c0_4, %c0_5] : memref<4x160x160xbf16, #tpu.memory_space<vmem>>, vector<1x160x160xbf16>
    %5 = vector.shape_cast %4 : vector<1x160x160xbf16> to vector<160x160xbf16>
    %c3 = arith.constant 3 : index
    %c0_6 = arith.constant 0 : index
    %c0_7 = arith.constant 0 : index
    %6 = vector.load %arg0[%c3, %c0_6, %c0_7] : memref<4x160x160xbf16, #tpu.memory_space<vmem>>, vector<1x160x160xbf16>
    %7 = vector.shape_cast %6 : vector<1x160x160xbf16> to vector<160x160xbf16>
    %8 = vector.extract_strided_slice %1 {offsets = [0, 0], sizes = [144, 160], strides = [1, 1]} : vector<160x160xbf16> to vector<144x160xbf16>
    %c0_8 = arith.constant 0 : index
    %c0_9 = arith.constant 0 : index
    %c0_10 = arith.constant 0 : index
    %9 = vector.load %arg1[%c0_8, %c0_9, %c0_10] : memref<5x160x288xbf16, #tpu.memory_space<vmem>>, vector<1x160x288xbf16>
    %10 = vector.shape_cast %9 : vector<1x160x288xbf16> to vector<160x288xbf16>
    %cst = arith.constant dense<0.000000e+00> : vector<144x288xf32>
    %11 = tpu.matmul %8, %10, %cst {dimension_numbers = #tpu.dot_dimension_numbers<[1], [0], [0], [1], [0, 0, 1, 1], [], []>} : vector<144x160xbf16>, vector<160x288xbf16>, vector<144x288xf32> -> vector<144x288xf32>
    %12 = vector.extract_strided_slice %3 {offsets = [0, 0], sizes = [144, 160], strides = [1, 1]} : vector<160x160xbf16> to vector<144x160xbf16>
    %c1_11 = arith.constant 1 : index
    %c0_12 = arith.constant 0 : index
    %c0_13 = arith.constant 0 : index
    %13 = vector.load %arg1[%c1_11, %c0_12, %c0_13] : memref<5x160x288xbf16, #tpu.memory_space<vmem>>, vector<1x160x288xbf16>
    %14 = vector.shape_cast %13 : vector<1x160x288xbf16> to vector<160x288xbf16>
    %cst_14 = arith.constant dense<0.000000e+00> : vector<144x288xf32>
    %15 = tpu.matmul %12, %14, %cst_14 {dimension_numbers = #tpu.dot_dimension_numbers<[1], [0], [0], [1], [0, 0, 1, 1], [], []>} : vector<144x160xbf16>, vector<160x288xbf16>, vector<144x288xf32> -> vector<144x288xf32>
    %16 = arith.addf %11, %15 : vector<144x288xf32>
    %17 = vector.extract_strided_slice %5 {offsets = [0, 0], sizes = [144, 160], strides = [1, 1]} : vector<160x160xbf16> to vector<144x160xbf16>
    %c2_15 = arith.constant 2 : index
    %c0_16 = arith.constant 0 : index
    %c0_17 = arith.constant 0 : index
    %18 = vector.load %arg1[%c2_15, %c0_16, %c0_17] : memref<5x160x288xbf16, #tpu.memory_space<vmem>>, vector<1x160x288xbf16>
    %19 = vector.shape_cast %18 : vector<1x160x288xbf16> to vector<160x288xbf16>
    %cst_18 = arith.constant dense<0.000000e+00> : vector<144x288xf32>
    %20 = tpu.matmul %17, %19, %cst_18 {dimension_numbers = #tpu.dot_dimension_numbers<[1], [0], [0], [1], [0, 0, 1, 1], [], []>} : vector<144x160xbf16>, vector<160x288xbf16>, vector<144x288xf32> -> vector<144x288xf32>
    %21 = arith.addf %16, %20 : vector<144x288xf32>
    %22 = vector.extract_strided_slice %7 {offsets = [0, 0], sizes = [144, 160], strides = [1, 1]} : vector<160x160xbf16> to vector<144x160xbf16>
    %c3_19 = arith.constant 3 : index
    %c0_20 = arith.constant 0 : index
    %c0_21 = arith.constant 0 : index
    %23 = vector.load %arg1[%c3_19, %c0_20, %c0_21] : memref<5x160x288xbf16, #tpu.memory_space<vmem>>, vector<1x160x288xbf16>
    %24 = vector.shape_cast %23 : vector<1x160x288xbf16> to vector<160x288xbf16>
    %cst_22 = arith.constant dense<0.000000e+00> : vector<144x288xf32>
    %25 = tpu.matmul %22, %24, %cst_22 {dimension_numbers = #tpu.dot_dimension_numbers<[1], [0], [0], [1], [0, 0, 1, 1], [], []>} : vector<144x160xbf16>, vector<160x288xbf16>, vector<144x288xf32> -> vector<144x288xf32>
    %26 = arith.addf %21, %25 : vector<144x288xf32>
    %27 = vector.extract_strided_slice %1 {offsets = [16, 0], sizes = [144, 160], strides = [1, 1]} : vector<160x160xbf16> to vector<144x160xbf16>
    %c4 = arith.constant 4 : index
    %c0_23 = arith.constant 0 : index
    %c0_24 = arith.constant 0 : index
    %28 = vector.load %arg1[%c4, %c0_23, %c0_24] : memref<5x160x288xbf16, #tpu.memory_space<vmem>>, vector<1x160x288xbf16>
    %29 = vector.shape_cast %28 : vector<1x160x288xbf16> to vector<160x288xbf16>
    %cst_25 = arith.constant dense<0.000000e+00> : vector<144x288xf32>
    %30 = tpu.matmul %27, %29, %cst_25 {dimension_numbers = #tpu.dot_dimension_numbers<[1], [0], [0], [1], [0, 0, 1, 1], [], []>} : vector<144x160xbf16>, vector<160x288xbf16>, vector<144x288xf32> -> vector<144x288xf32>
    %31 = arith.addf %26, %30 : vector<144x288xf32>
    %32 = vector.extract_strided_slice %5 {offsets = [0, 0], sizes = [144, 160], strides = [1, 1]} : vector<160x160xbf16> to vector<144x160xbf16>
    %c0_26 = arith.constant 0 : index
    %c0_27 = arith.constant 0 : index
    %c0_28 = arith.constant 0 : index
    %33 = vector.load %arg1[%c0_26, %c0_27, %c0_28] : memref<5x160x288xbf16, #tpu.memory_space<vmem>>, vector<1x160x288xbf16>
    %34 = vector.shape_cast %33 : vector<1x160x288xbf16> to vector<160x288xbf16>
    %cst_29 = arith.constant dense<0.000000e+00> : vector<144x288xf32>
    %35 = tpu.matmul %32, %34, %cst_29 {dimension_numbers = #tpu.dot_dimension_numbers<[1], [0], [0], [1], [0, 0, 1, 1], [], []>} : vector<144x160xbf16>, vector<160x288xbf16>, vector<144x288xf32> -> vector<144x288xf32>
    %36 = vector.extract_strided_slice %7 {offsets = [0, 0], sizes = [144, 160], strides = [1, 1]} : vector<160x160xbf16> to vector<144x160xbf16>
    %c1_30 = arith.constant 1 : index
    %c0_31 = arith.constant 0 : index
    %c0_32 = arith.constant 0 : index
    %37 = vector.load %arg1[%c1_30, %c0_31, %c0_32] : memref<5x160x288xbf16, #tpu.memory_space<vmem>>, vector<1x160x288xbf16>
    %38 = vector.shape_cast %37 : vector<1x160x288xbf16> to vector<160x288xbf16>
    %cst_33 = arith.constant dense<0.000000e+00> : vector<144x288xf32>
    %39 = tpu.matmul %36, %38, %cst_33 {dimension_numbers = #tpu.dot_dimension_numbers<[1], [0], [0], [1], [0, 0, 1, 1], [], []>} : vector<144x160xbf16>, vector<160x288xbf16>, vector<144x288xf32> -> vector<144x288xf32>
    %40 = arith.addf %35, %39 : vector<144x288xf32>
    %41 = vector.extract_strided_slice %1 {offsets = [16, 0], sizes = [144, 160], strides = [1, 1]} : vector<160x160xbf16> to vector<144x160xbf16>
    %c2_34 = arith.constant 2 : index
    %c0_35 = arith.constant 0 : index
    %c0_36 = arith.constant 0 : index
    %42 = vector.load %arg1[%c2_34, %c0_35, %c0_36] : memref<5x160x288xbf16, #tpu.memory_space<vmem>>, vector<1x160x288xbf16>
    %43 = vector.shape_cast %42 : vector<1x160x288xbf16> to vector<160x288xbf16>
    %cst_37 = arith.constant dense<0.000000e+00> : vector<144x288xf32>
    %44 = tpu.matmul %41, %43, %cst_37 {dimension_numbers = #tpu.dot_dimension_numbers<[1], [0], [0], [1], [0, 0, 1, 1], [], []>} : vector<144x160xbf16>, vector<160x288xbf16>, vector<144x288xf32> -> vector<144x288xf32>
    %45 = arith.addf %40, %44 : vector<144x288xf32>
    %46 = vector.extract_strided_slice %3 {offsets = [16, 0], sizes = [144, 160], strides = [1, 1]} : vector<160x160xbf16> to vector<144x160xbf16>
    %c3_38 = arith.constant 3 : index
    %c0_39 = arith.constant 0 : index
    %c0_40 = arith.constant 0 : index
    %47 = vector.load %arg1[%c3_38, %c0_39, %c0_40] : memref<5x160x288xbf16, #tpu.memory_space<vmem>>, vector<1x160x288xbf16>
    %48 = vector.shape_cast %47 : vector<1x160x288xbf16> to vector<160x288xbf16>
    %cst_41 = arith.constant dense<0.000000e+00> : vector<144x288xf32>
    %49 = tpu.matmul %46, %48, %cst_41 {dimension_numbers = #tpu.dot_dimension_numbers<[1], [0], [0], [1], [0, 0, 1, 1], [], []>} : vector<144x160xbf16>, vector<160x288xbf16>, vector<144x288xf32> -> vector<144x288xf32>
    %50 = arith.addf %45, %49 : vector<144x288xf32>
    %51 = vector.extract_strided_slice %5 {offsets = [16, 0], sizes = [144, 160], strides = [1, 1]} : vector<160x160xbf16> to vector<144x160xbf16>
    %c4_42 = arith.constant 4 : index
    %c0_43 = arith.constant 0 : index
    %c0_44 = arith.constant 0 : index
    %52 = vector.load %arg1[%c4_42, %c0_43, %c0_44] : memref<5x160x288xbf16, #tpu.memory_space<vmem>>, vector<1x160x288xbf16>
    %53 = vector.shape_cast %52 : vector<1x160x288xbf16> to vector<160x288xbf16>
    %cst_45 = arith.constant dense<0.000000e+00> : vector<144x288xf32>
    %54 = tpu.matmul %51, %53, %cst_45 {dimension_numbers = #tpu.dot_dimension_numbers<[1], [0], [0], [1], [0, 0, 1, 1], [], []>} : vector<144x160xbf16>, vector<160x288xbf16>, vector<144x288xf32> -> vector<144x288xf32>
    %55 = arith.addf %50, %54 : vector<144x288xf32>
    %c0_46 = arith.constant 0 : index
    %c0_47 = arith.constant 0 : index
    %56 = vector.load %arg4[%c0_46, %c0_47] : memref<288x16xf32, #tpu.memory_space<vmem>>, vector<288x16xf32>
    %c0_48 = arith.constant 0 : index
    %c0_49 = arith.constant 0 : index
    %57 = vector.load %arg5[%c0_48, %c0_49] : memref<16x288xf32, #tpu.memory_space<vmem>>, vector<16x288xf32>
    %cst_50 = arith.constant dense<0.000000e+00> : vector<288xf32>
    %58 = vector.multi_reduction <add>, %31, %cst_50 [0] : vector<144x288xf32> to vector<288xf32>
    %59 = vector.shape_cast %58 : vector<288xf32> to vector<1x288xf32>
    %cst_51 = arith.constant dense<0.000000e+00> : vector<288xf32>
    %60 = vector.multi_reduction <add>, %55, %cst_51 [0] : vector<144x288xf32> to vector<288xf32>
    %61 = vector.shape_cast %60 : vector<288xf32> to vector<1x288xf32>
    %62 = arith.addf %59, %61 : vector<1x288xf32>
    %cst_52 = arith.constant dense<0.000000e+00> : vector<1x16xf32>
    %63 = tpu.matmul %62, %56, %cst_52 {dimension_numbers = #tpu.dot_dimension_numbers<[1], [0], [0], [1], [0, 0, 1, 1], [], []>} : vector<1x288xf32>, vector<288x16xf32>, vector<1x16xf32> -> vector<1x16xf32>
    %cst_53 = arith.constant 0.00154320989 : f32
    %64 = vector.broadcast %cst_53 : f32 to vector<1x16xf32>
    %65 = arith.mulf %63, %64 : vector<1x16xf32>
    %cst_54 = arith.constant dense<0.000000e+00> : vector<1x288xf32>
    %66 = tpu.matmul %65, %57, %cst_54 {dimension_numbers = #tpu.dot_dimension_numbers<[1], [0], [0], [1], [0, 0, 1, 1], [], []>} : vector<1x16xf32>, vector<16x288xf32>, vector<1x288xf32> -> vector<1x288xf32>
    %67 = vector.broadcast %66 : vector<1x288xf32> to vector<144x288xf32>
    %68 = arith.subf %31, %67 : vector<144x288xf32>
    %69 = arith.mulf %68, %68 : vector<144x288xf32>
    %cst_55 = arith.constant dense<0.000000e+00> : vector<288xf32>
    %70 = vector.multi_reduction <add>, %69, %cst_55 [0] : vector<144x288xf32> to vector<288xf32>
    %71 = vector.shape_cast %70 : vector<288xf32> to vector<1x288xf32>
    %72 = vector.broadcast %66 : vector<1x288xf32> to vector<144x288xf32>
    %73 = arith.subf %55, %72 : vector<144x288xf32>
    %74 = arith.mulf %73, %73 : vector<144x288xf32>
    %cst_56 = arith.constant dense<0.000000e+00> : vector<288xf32>
    %75 = vector.multi_reduction <add>, %74, %cst_56 [0] : vector<144x288xf32> to vector<288xf32>
    %76 = vector.shape_cast %75 : vector<288xf32> to vector<1x288xf32>
    %77 = arith.addf %71, %76 : vector<1x288xf32>
    %cst_57 = arith.constant dense<0.000000e+00> : vector<1x16xf32>
    %78 = tpu.matmul %77, %56, %cst_57 {dimension_numbers = #tpu.dot_dimension_numbers<[1], [0], [0], [1], [0, 0, 1, 1], [], []>} : vector<1x288xf32>, vector<288x16xf32>, vector<1x16xf32> -> vector<1x16xf32>
    %79 = arith.mulf %65, %65 : vector<1x16xf32>
    %cst_58 = arith.constant 4.536000e+03 : f32
    %80 = vector.broadcast %cst_58 : f32 to vector<1x16xf32>
    %81 = arith.mulf %80, %79 : vector<1x16xf32>
    %82 = arith.subf %78, %81 : vector<1x16xf32>
    %cst_59 = arith.constant 0.00154320989 : f32
    %83 = vector.broadcast %cst_59 : f32 to vector<1x16xf32>
    %84 = arith.mulf %82, %83 : vector<1x16xf32>
    %c0_60 = arith.constant 0 : index
    %c0_61 = arith.constant 0 : index
    %85 = vector.load %arg2[%c0_60, %c0_61] : memref<1x16xf32, #tpu.memory_space<vmem>>, vector<1x16xf32>
    %cst_62 = arith.constant 9.99999974E-6 : f32
    %86 = vector.broadcast %cst_62 : f32 to vector<1x16xf32>
    %87 = arith.addf %84, %86 : vector<1x16xf32>
    %88 = math.rsqrt %87 : vector<1x16xf32>
    %89 = arith.mulf %85, %88 : vector<1x16xf32>
    %c0_63 = arith.constant 0 : index
    %c0_64 = arith.constant 0 : index
    %90 = vector.load %arg3[%c0_63, %c0_64] : memref<1x16xf32, #tpu.memory_space<vmem>>, vector<1x16xf32>
    %91 = arith.mulf %65, %89 : vector<1x16xf32>
    %92 = arith.subf %90, %91 : vector<1x16xf32>
    %cst_65 = arith.constant dense<0.000000e+00> : vector<1x288xf32>
    %93 = tpu.matmul %89, %57, %cst_65 {dimension_numbers = #tpu.dot_dimension_numbers<[1], [0], [0], [1], [0, 0, 1, 1], [], []>} : vector<1x16xf32>, vector<16x288xf32>, vector<1x288xf32> -> vector<1x288xf32>
    %cst_66 = arith.constant dense<0.000000e+00> : vector<1x288xf32>
    %94 = tpu.matmul %92, %57, %cst_66 {dimension_numbers = #tpu.dot_dimension_numbers<[1], [0], [0], [1], [0, 0, 1, 1], [], []>} : vector<1x16xf32>, vector<16x288xf32>, vector<1x288xf32> -> vector<1x288xf32>
    %95 = vector.broadcast %93 : vector<1x288xf32> to vector<144x288xf32>
    %96 = arith.mulf %31, %95 : vector<144x288xf32>
    %97 = vector.broadcast %94 : vector<1x288xf32> to vector<144x288xf32>
    %98 = arith.addf %96, %97 : vector<144x288xf32>
    %cst_67 = arith.constant 0.000000e+00 : f32
    %99 = vector.broadcast %cst_67 : f32 to vector<144x288xf32>
    %100 = arith.maximumf %98, %99 : vector<144x288xf32>
    %c0_68 = arith.constant 0 : index
    %c0_69 = arith.constant 0 : index
    %101 = vector.load %arg6[%c0_68, %c0_69] : memref<144x1xf32, #tpu.memory_space<vmem>>, vector<144x1xf32>
    %102 = vector.broadcast %101 : vector<144x1xf32> to vector<144x288xf32>
    %103 = arith.mulf %100, %102 : vector<144x288xf32>
    %104 = vector.broadcast %93 : vector<1x288xf32> to vector<144x288xf32>
    %105 = arith.mulf %55, %104 : vector<144x288xf32>
    %106 = vector.broadcast %94 : vector<1x288xf32> to vector<144x288xf32>
    %107 = arith.addf %105, %106 : vector<144x288xf32>
    %cst_70 = arith.constant 0.000000e+00 : f32
    %108 = vector.broadcast %cst_70 : f32 to vector<144x288xf32>
    %109 = arith.maximumf %107, %108 : vector<144x288xf32>
    %c0_71 = arith.constant 0 : index
    %c0_72 = arith.constant 0 : index
    %110 = vector.load %arg6[%c0_71, %c0_72] : memref<144x1xf32, #tpu.memory_space<vmem>>, vector<144x1xf32>
    %111 = vector.broadcast %110 : vector<144x1xf32> to vector<144x288xf32>
    %112 = arith.mulf %109, %111 : vector<144x288xf32>
    %113 = arith.truncf %103 : vector<144x288xf32> to vector<144x288xbf16>
    %114 = arith.truncf %112 : vector<144x288xf32> to vector<144x288xbf16>
    %115 = vector.extract_strided_slice %113 {offsets = [0, 0], sizes = [112, 288], strides = [1, 1]} : vector<144x288xbf16> to vector<112x288xbf16>
    %c0_73 = arith.constant 0 : index
    %c0_74 = arith.constant 0 : index
    %c0_75 = arith.constant 0 : index
    %116 = vector.load %arg7[%c0_73, %c0_74, %c0_75] : memref<5x288x224xbf16, #tpu.memory_space<vmem>>, vector<1x288x224xbf16>
    %117 = vector.shape_cast %116 : vector<1x288x224xbf16> to vector<288x224xbf16>
    %cst_76 = arith.constant dense<0.000000e+00> : vector<112x224xf32>
    %118 = tpu.matmul %115, %117, %cst_76 {dimension_numbers = #tpu.dot_dimension_numbers<[1], [0], [0], [1], [0, 0, 1, 1], [], []>} : vector<112x288xbf16>, vector<288x224xbf16>, vector<112x224xf32> -> vector<112x224xf32>
    %119 = vector.extract_strided_slice %114 {offsets = [0, 0], sizes = [112, 288], strides = [1, 1]} : vector<144x288xbf16> to vector<112x288xbf16>
    %c1_77 = arith.constant 1 : index
    %c0_78 = arith.constant 0 : index
    %c0_79 = arith.constant 0 : index
    %120 = vector.load %arg7[%c1_77, %c0_78, %c0_79] : memref<5x288x224xbf16, #tpu.memory_space<vmem>>, vector<1x288x224xbf16>
    %121 = vector.shape_cast %120 : vector<1x288x224xbf16> to vector<288x224xbf16>
    %cst_80 = arith.constant dense<0.000000e+00> : vector<112x224xf32>
    %122 = tpu.matmul %119, %121, %cst_80 {dimension_numbers = #tpu.dot_dimension_numbers<[1], [0], [0], [1], [0, 0, 1, 1], [], []>} : vector<112x288xbf16>, vector<288x224xbf16>, vector<112x224xf32> -> vector<112x224xf32>
    %123 = arith.addf %118, %122 : vector<112x224xf32>
    %124 = vector.extract_strided_slice %113 {offsets = [16, 0], sizes = [112, 288], strides = [1, 1]} : vector<144x288xbf16> to vector<112x288xbf16>
    %c2_81 = arith.constant 2 : index
    %c0_82 = arith.constant 0 : index
    %c0_83 = arith.constant 0 : index
    %125 = vector.load %arg7[%c2_81, %c0_82, %c0_83] : memref<5x288x224xbf16, #tpu.memory_space<vmem>>, vector<1x288x224xbf16>
    %126 = vector.shape_cast %125 : vector<1x288x224xbf16> to vector<288x224xbf16>
    %cst_84 = arith.constant dense<0.000000e+00> : vector<112x224xf32>
    %127 = tpu.matmul %124, %126, %cst_84 {dimension_numbers = #tpu.dot_dimension_numbers<[1], [0], [0], [1], [0, 0, 1, 1], [], []>} : vector<112x288xbf16>, vector<288x224xbf16>, vector<112x224xf32> -> vector<112x224xf32>
    %128 = arith.addf %123, %127 : vector<112x224xf32>
    %129 = vector.extract_strided_slice %114 {offsets = [16, 0], sizes = [112, 288], strides = [1, 1]} : vector<144x288xbf16> to vector<112x288xbf16>
    %c3_85 = arith.constant 3 : index
    %c0_86 = arith.constant 0 : index
    %c0_87 = arith.constant 0 : index
    %130 = vector.load %arg7[%c3_85, %c0_86, %c0_87] : memref<5x288x224xbf16, #tpu.memory_space<vmem>>, vector<1x288x224xbf16>
    %131 = vector.shape_cast %130 : vector<1x288x224xbf16> to vector<288x224xbf16>
    %cst_88 = arith.constant dense<0.000000e+00> : vector<112x224xf32>
    %132 = tpu.matmul %129, %131, %cst_88 {dimension_numbers = #tpu.dot_dimension_numbers<[1], [0], [0], [1], [0, 0, 1, 1], [], []>} : vector<112x288xbf16>, vector<288x224xbf16>, vector<112x224xf32> -> vector<112x224xf32>
    %133 = arith.addf %128, %132 : vector<112x224xf32>
    %134 = vector.extract_strided_slice %113 {offsets = [32, 0], sizes = [112, 288], strides = [1, 1]} : vector<144x288xbf16> to vector<112x288xbf16>
    %c4_89 = arith.constant 4 : index
    %c0_90 = arith.constant 0 : index
    %c0_91 = arith.constant 0 : index
    %135 = vector.load %arg7[%c4_89, %c0_90, %c0_91] : memref<5x288x224xbf16, #tpu.memory_space<vmem>>, vector<1x288x224xbf16>
    %136 = vector.shape_cast %135 : vector<1x288x224xbf16> to vector<288x224xbf16>
    %cst_92 = arith.constant dense<0.000000e+00> : vector<112x224xf32>
    %137 = tpu.matmul %134, %136, %cst_92 {dimension_numbers = #tpu.dot_dimension_numbers<[1], [0], [0], [1], [0, 0, 1, 1], [], []>} : vector<112x288xbf16>, vector<288x224xbf16>, vector<112x224xf32> -> vector<112x224xf32>
    %138 = arith.addf %133, %137 : vector<112x224xf32>
    %c0_93 = arith.constant 0 : index
    %c0_94 = arith.constant 0 : index
    %139 = vector.load %arg10[%c0_93, %c0_94] : memref<224x32xf32, #tpu.memory_space<vmem>>, vector<224x32xf32>
    %c0_95 = arith.constant 0 : index
    %c0_96 = arith.constant 0 : index
    %140 = vector.load %arg11[%c0_95, %c0_96] : memref<32x224xf32, #tpu.memory_space<vmem>>, vector<32x224xf32>
    %cst_97 = arith.constant dense<0.000000e+00> : vector<224xf32>
    %141 = vector.multi_reduction <add>, %138, %cst_97 [0] : vector<112x224xf32> to vector<224xf32>
    %142 = vector.shape_cast %141 : vector<224xf32> to vector<1x224xf32>
    %cst_98 = arith.constant dense<0.000000e+00> : vector<1x32xf32>
    %143 = tpu.matmul %142, %139, %cst_98 {dimension_numbers = #tpu.dot_dimension_numbers<[1], [0], [0], [1], [0, 0, 1, 1], [], []>} : vector<1x224xf32>, vector<224x32xf32>, vector<1x32xf32> -> vector<1x32xf32>
    %cst_99 = arith.constant 0.0102040814 : f32
    %144 = vector.broadcast %cst_99 : f32 to vector<1x32xf32>
    %145 = arith.mulf %143, %144 : vector<1x32xf32>
    %cst_100 = arith.constant dense<0.000000e+00> : vector<1x224xf32>
    %146 = tpu.matmul %145, %140, %cst_100 {dimension_numbers = #tpu.dot_dimension_numbers<[1], [0], [0], [1], [0, 0, 1, 1], [], []>} : vector<1x32xf32>, vector<32x224xf32>, vector<1x224xf32> -> vector<1x224xf32>
    %147 = vector.broadcast %146 : vector<1x224xf32> to vector<112x224xf32>
    %148 = arith.subf %138, %147 : vector<112x224xf32>
    %149 = arith.mulf %148, %148 : vector<112x224xf32>
    %cst_101 = arith.constant dense<0.000000e+00> : vector<224xf32>
    %150 = vector.multi_reduction <add>, %149, %cst_101 [0] : vector<112x224xf32> to vector<224xf32>
    %151 = vector.shape_cast %150 : vector<224xf32> to vector<1x224xf32>
    %cst_102 = arith.constant dense<0.000000e+00> : vector<1x32xf32>
    %152 = tpu.matmul %151, %139, %cst_102 {dimension_numbers = #tpu.dot_dimension_numbers<[1], [0], [0], [1], [0, 0, 1, 1], [], []>} : vector<1x224xf32>, vector<224x32xf32>, vector<1x32xf32> -> vector<1x32xf32>
    %153 = arith.mulf %145, %145 : vector<1x32xf32>
    %cst_103 = arith.constant 6.860000e+02 : f32
    %154 = vector.broadcast %cst_103 : f32 to vector<1x32xf32>
    %155 = arith.mulf %154, %153 : vector<1x32xf32>
    %156 = arith.subf %152, %155 : vector<1x32xf32>
    %cst_104 = arith.constant 0.0102040814 : f32
    %157 = vector.broadcast %cst_104 : f32 to vector<1x32xf32>
    %158 = arith.mulf %156, %157 : vector<1x32xf32>
    %c0_105 = arith.constant 0 : index
    %c0_106 = arith.constant 0 : index
    %159 = vector.load %arg8[%c0_105, %c0_106] : memref<1x32xf32, #tpu.memory_space<vmem>>, vector<1x32xf32>
    %cst_107 = arith.constant 9.99999974E-6 : f32
    %160 = vector.broadcast %cst_107 : f32 to vector<1x32xf32>
    %161 = arith.addf %158, %160 : vector<1x32xf32>
    %162 = math.rsqrt %161 : vector<1x32xf32>
    %163 = arith.mulf %159, %162 : vector<1x32xf32>
    %c0_108 = arith.constant 0 : index
    %c0_109 = arith.constant 0 : index
    %164 = vector.load %arg9[%c0_108, %c0_109] : memref<1x32xf32, #tpu.memory_space<vmem>>, vector<1x32xf32>
    %165 = arith.mulf %145, %163 : vector<1x32xf32>
    %166 = arith.subf %164, %165 : vector<1x32xf32>
    %cst_110 = arith.constant dense<0.000000e+00> : vector<1x224xf32>
    %167 = tpu.matmul %163, %140, %cst_110 {dimension_numbers = #tpu.dot_dimension_numbers<[1], [0], [0], [1], [0, 0, 1, 1], [], []>} : vector<1x32xf32>, vector<32x224xf32>, vector<1x224xf32> -> vector<1x224xf32>
    %cst_111 = arith.constant dense<0.000000e+00> : vector<1x224xf32>
    %168 = tpu.matmul %166, %140, %cst_111 {dimension_numbers = #tpu.dot_dimension_numbers<[1], [0], [0], [1], [0, 0, 1, 1], [], []>} : vector<1x32xf32>, vector<32x224xf32>, vector<1x224xf32> -> vector<1x224xf32>
    %169 = vector.broadcast %167 : vector<1x224xf32> to vector<112x224xf32>
    %170 = arith.mulf %138, %169 : vector<112x224xf32>
    %171 = vector.broadcast %168 : vector<1x224xf32> to vector<112x224xf32>
    %172 = arith.addf %170, %171 : vector<112x224xf32>
    %cst_112 = arith.constant 0.000000e+00 : f32
    %173 = vector.broadcast %cst_112 : f32 to vector<112x224xf32>
    %174 = arith.maximumf %172, %173 : vector<112x224xf32>
    %c0_113 = arith.constant 0 : index
    %c0_114 = arith.constant 0 : index
    %175 = vector.load %arg12[%c0_113, %c0_114] : memref<112x1xf32, #tpu.memory_space<vmem>>, vector<112x1xf32>
    %176 = vector.broadcast %175 : vector<112x1xf32> to vector<112x224xf32>
    %177 = arith.mulf %174, %176 : vector<112x224xf32>
    %178 = arith.truncf %177 : vector<112x224xf32> to vector<112x224xbf16>
    %179 = vector.extract_strided_slice %178 {offsets = [0, 0], sizes = [16, 224], strides = [1, 1]} : vector<112x224xbf16> to vector<16x224xbf16>
    %c0_115 = arith.constant 0 : index
    %c0_116 = arith.constant 0 : index
    %c0_117 = arith.constant 0 : index
    %180 = vector.load %arg13[%c0_115, %c0_116, %c0_117] : memref<5x224x64xbf16, #tpu.memory_space<vmem>>, vector<1x224x64xbf16>
    %181 = vector.shape_cast %180 : vector<1x224x64xbf16> to vector<224x64xbf16>
    %cst_118 = arith.constant dense<0.000000e+00> : vector<16x64xf32>
    %182 = tpu.matmul %179, %181, %cst_118 {dimension_numbers = #tpu.dot_dimension_numbers<[1], [0], [0], [1], [0, 0, 1, 1], [], []>} : vector<16x224xbf16>, vector<224x64xbf16>, vector<16x64xf32> -> vector<16x64xf32>
    %183 = vector.extract_strided_slice %178 {offsets = [16, 0], sizes = [16, 224], strides = [1, 1]} : vector<112x224xbf16> to vector<16x224xbf16>
    %c1_119 = arith.constant 1 : index
    %c0_120 = arith.constant 0 : index
    %c0_121 = arith.constant 0 : index
    %184 = vector.load %arg13[%c1_119, %c0_120, %c0_121] : memref<5x224x64xbf16, #tpu.memory_space<vmem>>, vector<1x224x64xbf16>
    %185 = vector.shape_cast %184 : vector<1x224x64xbf16> to vector<224x64xbf16>
    %cst_122 = arith.constant dense<0.000000e+00> : vector<16x64xf32>
    %186 = tpu.matmul %183, %185, %cst_122 {dimension_numbers = #tpu.dot_dimension_numbers<[1], [0], [0], [1], [0, 0, 1, 1], [], []>} : vector<16x224xbf16>, vector<224x64xbf16>, vector<16x64xf32> -> vector<16x64xf32>
    %187 = arith.addf %182, %186 : vector<16x64xf32>
    %188 = vector.extract_strided_slice %178 {offsets = [32, 0], sizes = [16, 224], strides = [1, 1]} : vector<112x224xbf16> to vector<16x224xbf16>
    %c2_123 = arith.constant 2 : index
    %c0_124 = arith.constant 0 : index
    %c0_125 = arith.constant 0 : index
    %189 = vector.load %arg13[%c2_123, %c0_124, %c0_125] : memref<5x224x64xbf16, #tpu.memory_space<vmem>>, vector<1x224x64xbf16>
    %190 = vector.shape_cast %189 : vector<1x224x64xbf16> to vector<224x64xbf16>
    %cst_126 = arith.constant dense<0.000000e+00> : vector<16x64xf32>
    %191 = tpu.matmul %188, %190, %cst_126 {dimension_numbers = #tpu.dot_dimension_numbers<[1], [0], [0], [1], [0, 0, 1, 1], [], []>} : vector<16x224xbf16>, vector<224x64xbf16>, vector<16x64xf32> -> vector<16x64xf32>
    %192 = arith.addf %187, %191 : vector<16x64xf32>
    %193 = vector.extract_strided_slice %178 {offsets = [48, 0], sizes = [16, 224], strides = [1, 1]} : vector<112x224xbf16> to vector<16x224xbf16>
    %c3_127 = arith.constant 3 : index
    %c0_128 = arith.constant 0 : index
    %c0_129 = arith.constant 0 : index
    %194 = vector.load %arg13[%c3_127, %c0_128, %c0_129] : memref<5x224x64xbf16, #tpu.memory_space<vmem>>, vector<1x224x64xbf16>
    %195 = vector.shape_cast %194 : vector<1x224x64xbf16> to vector<224x64xbf16>
    %cst_130 = arith.constant dense<0.000000e+00> : vector<16x64xf32>
    %196 = tpu.matmul %193, %195, %cst_130 {dimension_numbers = #tpu.dot_dimension_numbers<[1], [0], [0], [1], [0, 0, 1, 1], [], []>} : vector<16x224xbf16>, vector<224x64xbf16>, vector<16x64xf32> -> vector<16x64xf32>
    %197 = arith.addf %192, %196 : vector<16x64xf32>
    %198 = vector.extract_strided_slice %178 {offsets = [64, 0], sizes = [16, 224], strides = [1, 1]} : vector<112x224xbf16> to vector<16x224xbf16>
    %c4_131 = arith.constant 4 : index
    %c0_132 = arith.constant 0 : index
    %c0_133 = arith.constant 0 : index
    %199 = vector.load %arg13[%c4_131, %c0_132, %c0_133] : memref<5x224x64xbf16, #tpu.memory_space<vmem>>, vector<1x224x64xbf16>
    %200 = vector.shape_cast %199 : vector<1x224x64xbf16> to vector<224x64xbf16>
    %cst_134 = arith.constant dense<0.000000e+00> : vector<16x64xf32>
    %201 = tpu.matmul %198, %200, %cst_134 {dimension_numbers = #tpu.dot_dimension_numbers<[1], [0], [0], [1], [0, 0, 1, 1], [], []>} : vector<16x224xbf16>, vector<224x64xbf16>, vector<16x64xf32> -> vector<16x64xf32>
    %202 = arith.addf %197, %201 : vector<16x64xf32>
    %203 = vector.extract_strided_slice %178 {offsets = [32, 0], sizes = [16, 224], strides = [1, 1]} : vector<112x224xbf16> to vector<16x224xbf16>
    %c0_135 = arith.constant 0 : index
    %c0_136 = arith.constant 0 : index
    %c0_137 = arith.constant 0 : index
    %204 = vector.load %arg13[%c0_135, %c0_136, %c0_137] : memref<5x224x64xbf16, #tpu.memory_space<vmem>>, vector<1x224x64xbf16>
    %205 = vector.shape_cast %204 : vector<1x224x64xbf16> to vector<224x64xbf16>
    %cst_138 = arith.constant dense<0.000000e+00> : vector<16x64xf32>
    %206 = tpu.matmul %203, %205, %cst_138 {dimension_numbers = #tpu.dot_dimension_numbers<[1], [0], [0], [1], [0, 0, 1, 1], [], []>} : vector<16x224xbf16>, vector<224x64xbf16>, vector<16x64xf32> -> vector<16x64xf32>
    %207 = vector.extract_strided_slice %178 {offsets = [48, 0], sizes = [16, 224], strides = [1, 1]} : vector<112x224xbf16> to vector<16x224xbf16>
    %c1_139 = arith.constant 1 : index
    %c0_140 = arith.constant 0 : index
    %c0_141 = arith.constant 0 : index
    %208 = vector.load %arg13[%c1_139, %c0_140, %c0_141] : memref<5x224x64xbf16, #tpu.memory_space<vmem>>, vector<1x224x64xbf16>
    %209 = vector.shape_cast %208 : vector<1x224x64xbf16> to vector<224x64xbf16>
    %cst_142 = arith.constant dense<0.000000e+00> : vector<16x64xf32>
    %210 = tpu.matmul %207, %209, %cst_142 {dimension_numbers = #tpu.dot_dimension_numbers<[1], [0], [0], [1], [0, 0, 1, 1], [], []>} : vector<16x224xbf16>, vector<224x64xbf16>, vector<16x64xf32> -> vector<16x64xf32>
    %211 = arith.addf %206, %210 : vector<16x64xf32>
    %212 = vector.extract_strided_slice %178 {offsets = [64, 0], sizes = [16, 224], strides = [1, 1]} : vector<112x224xbf16> to vector<16x224xbf16>
    %c2_143 = arith.constant 2 : index
    %c0_144 = arith.constant 0 : index
    %c0_145 = arith.constant 0 : index
    %213 = vector.load %arg13[%c2_143, %c0_144, %c0_145] : memref<5x224x64xbf16, #tpu.memory_space<vmem>>, vector<1x224x64xbf16>
    %214 = vector.shape_cast %213 : vector<1x224x64xbf16> to vector<224x64xbf16>
    %cst_146 = arith.constant dense<0.000000e+00> : vector<16x64xf32>
    %215 = tpu.matmul %212, %214, %cst_146 {dimension_numbers = #tpu.dot_dimension_numbers<[1], [0], [0], [1], [0, 0, 1, 1], [], []>} : vector<16x224xbf16>, vector<224x64xbf16>, vector<16x64xf32> -> vector<16x64xf32>
    %216 = arith.addf %211, %215 : vector<16x64xf32>
    %217 = vector.extract_strided_slice %178 {offsets = [80, 0], sizes = [16, 224], strides = [1, 1]} : vector<112x224xbf16> to vector<16x224xbf16>
    %c3_147 = arith.constant 3 : index
    %c0_148 = arith.constant 0 : index
    %c0_149 = arith.constant 0 : index
    %218 = vector.load %arg13[%c3_147, %c0_148, %c0_149] : memref<5x224x64xbf16, #tpu.memory_space<vmem>>, vector<1x224x64xbf16>
    %219 = vector.shape_cast %218 : vector<1x224x64xbf16> to vector<224x64xbf16>
    %cst_150 = arith.constant dense<0.000000e+00> : vector<16x64xf32>
    %220 = tpu.matmul %217, %219, %cst_150 {dimension_numbers = #tpu.dot_dimension_numbers<[1], [0], [0], [1], [0, 0, 1, 1], [], []>} : vector<16x224xbf16>, vector<224x64xbf16>, vector<16x64xf32> -> vector<16x64xf32>
    %221 = arith.addf %216, %220 : vector<16x64xf32>
    %222 = vector.extract_strided_slice %178 {offsets = [96, 0], sizes = [16, 224], strides = [1, 1]} : vector<112x224xbf16> to vector<16x224xbf16>
    %c4_151 = arith.constant 4 : index
    %c0_152 = arith.constant 0 : index
    %c0_153 = arith.constant 0 : index
    %223 = vector.load %arg13[%c4_151, %c0_152, %c0_153] : memref<5x224x64xbf16, #tpu.memory_space<vmem>>, vector<1x224x64xbf16>
    %224 = vector.shape_cast %223 : vector<1x224x64xbf16> to vector<224x64xbf16>
    %cst_154 = arith.constant dense<0.000000e+00> : vector<16x64xf32>
    %225 = tpu.matmul %222, %224, %cst_154 {dimension_numbers = #tpu.dot_dimension_numbers<[1], [0], [0], [1], [0, 0, 1, 1], [], []>} : vector<16x224xbf16>, vector<224x64xbf16>, vector<16x64xf32> -> vector<16x64xf32>
    %226 = arith.addf %221, %225 : vector<16x64xf32>
    %c0_155 = arith.constant 0 : index
    %c0_156 = arith.constant 0 : index
    %227 = vector.load %arg16[%c0_155, %c0_156] : memref<64x32xf32, #tpu.memory_space<vmem>>, vector<64x32xf32>
    %c0_157 = arith.constant 0 : index
    %c0_158 = arith.constant 0 : index
    %228 = vector.load %arg17[%c0_157, %c0_158] : memref<32x64xf32, #tpu.memory_space<vmem>>, vector<32x64xf32>
    %cst_159 = arith.constant dense<0.000000e+00> : vector<64xf32>
    %229 = vector.multi_reduction <add>, %202, %cst_159 [0] : vector<16x64xf32> to vector<64xf32>
    %230 = vector.shape_cast %229 : vector<64xf32> to vector<1x64xf32>
    %cst_160 = arith.constant dense<0.000000e+00> : vector<64xf32>
    %231 = vector.multi_reduction <add>, %226, %cst_160 [0] : vector<16x64xf32> to vector<64xf32>
    %232 = vector.shape_cast %231 : vector<64xf32> to vector<1x64xf32>
    %233 = arith.addf %230, %232 : vector<1x64xf32>
    %cst_161 = arith.constant dense<0.000000e+00> : vector<1x32xf32>
    %234 = tpu.matmul %233, %227, %cst_161 {dimension_numbers = #tpu.dot_dimension_numbers<[1], [0], [0], [1], [0, 0, 1, 1], [], []>} : vector<1x64xf32>, vector<64x32xf32>, vector<1x32xf32> -> vector<1x32xf32>
    %cst_162 = arith.constant 1.250000e-01 : f32
    %235 = vector.broadcast %cst_162 : f32 to vector<1x32xf32>
    %236 = arith.mulf %234, %235 : vector<1x32xf32>
    %cst_163 = arith.constant dense<0.000000e+00> : vector<1x64xf32>
    %237 = tpu.matmul %236, %228, %cst_163 {dimension_numbers = #tpu.dot_dimension_numbers<[1], [0], [0], [1], [0, 0, 1, 1], [], []>} : vector<1x32xf32>, vector<32x64xf32>, vector<1x64xf32> -> vector<1x64xf32>
    %238 = vector.broadcast %237 : vector<1x64xf32> to vector<16x64xf32>
    %239 = arith.subf %202, %238 : vector<16x64xf32>
    %240 = arith.mulf %239, %239 : vector<16x64xf32>
    %cst_164 = arith.constant dense<0.000000e+00> : vector<64xf32>
    %241 = vector.multi_reduction <add>, %240, %cst_164 [0] : vector<16x64xf32> to vector<64xf32>
    %242 = vector.shape_cast %241 : vector<64xf32> to vector<1x64xf32>
    %243 = vector.broadcast %237 : vector<1x64xf32> to vector<16x64xf32>
    %244 = arith.subf %226, %243 : vector<16x64xf32>
    %245 = arith.mulf %244, %244 : vector<16x64xf32>
    %cst_165 = arith.constant dense<0.000000e+00> : vector<64xf32>
    %246 = vector.multi_reduction <add>, %245, %cst_165 [0] : vector<16x64xf32> to vector<64xf32>
    %247 = vector.shape_cast %246 : vector<64xf32> to vector<1x64xf32>
    %248 = arith.addf %242, %247 : vector<1x64xf32>
    %cst_166 = arith.constant dense<0.000000e+00> : vector<1x32xf32>
    %249 = tpu.matmul %248, %227, %cst_166 {dimension_numbers = #tpu.dot_dimension_numbers<[1], [0], [0], [1], [0, 0, 1, 1], [], []>} : vector<1x64xf32>, vector<64x32xf32>, vector<1x32xf32> -> vector<1x32xf32>
    %250 = arith.mulf %236, %236 : vector<1x32xf32>
    %cst_167 = arith.constant 5.600000e+01 : f32
    %251 = vector.broadcast %cst_167 : f32 to vector<1x32xf32>
    %252 = arith.mulf %251, %250 : vector<1x32xf32>
    %253 = arith.subf %249, %252 : vector<1x32xf32>
    %cst_168 = arith.constant 1.250000e-01 : f32
    %254 = vector.broadcast %cst_168 : f32 to vector<1x32xf32>
    %255 = arith.mulf %253, %254 : vector<1x32xf32>
    %c0_169 = arith.constant 0 : index
    %c0_170 = arith.constant 0 : index
    %256 = vector.load %arg14[%c0_169, %c0_170] : memref<1x32xf32, #tpu.memory_space<vmem>>, vector<1x32xf32>
    %cst_171 = arith.constant 9.99999974E-6 : f32
    %257 = vector.broadcast %cst_171 : f32 to vector<1x32xf32>
    %258 = arith.addf %255, %257 : vector<1x32xf32>
    %259 = math.rsqrt %258 : vector<1x32xf32>
    %260 = arith.mulf %256, %259 : vector<1x32xf32>
    %c0_172 = arith.constant 0 : index
    %c0_173 = arith.constant 0 : index
    %261 = vector.load %arg15[%c0_172, %c0_173] : memref<1x32xf32, #tpu.memory_space<vmem>>, vector<1x32xf32>
    %262 = arith.mulf %236, %260 : vector<1x32xf32>
    %263 = arith.subf %261, %262 : vector<1x32xf32>
    %cst_174 = arith.constant dense<0.000000e+00> : vector<1x64xf32>
    %264 = tpu.matmul %260, %228, %cst_174 {dimension_numbers = #tpu.dot_dimension_numbers<[1], [0], [0], [1], [0, 0, 1, 1], [], []>} : vector<1x32xf32>, vector<32x64xf32>, vector<1x64xf32> -> vector<1x64xf32>
    %cst_175 = arith.constant dense<0.000000e+00> : vector<1x64xf32>
    %265 = tpu.matmul %263, %228, %cst_175 {dimension_numbers = #tpu.dot_dimension_numbers<[1], [0], [0], [1], [0, 0, 1, 1], [], []>} : vector<1x32xf32>, vector<32x64xf32>, vector<1x64xf32> -> vector<1x64xf32>
    %266 = vector.broadcast %264 : vector<1x64xf32> to vector<16x64xf32>
    %267 = arith.mulf %202, %266 : vector<16x64xf32>
    %268 = vector.broadcast %265 : vector<1x64xf32> to vector<16x64xf32>
    %269 = arith.addf %267, %268 : vector<16x64xf32>
    %cst_176 = arith.constant 0.000000e+00 : f32
    %270 = vector.broadcast %cst_176 : f32 to vector<16x64xf32>
    %271 = arith.maximumf %269, %270 : vector<16x64xf32>
    %c0_177 = arith.constant 0 : index
    %c0_178 = arith.constant 0 : index
    %272 = vector.load %arg18[%c0_177, %c0_178] : memref<16x1xf32, #tpu.memory_space<vmem>>, vector<16x1xf32>
    %273 = vector.broadcast %272 : vector<16x1xf32> to vector<16x64xf32>
    %274 = arith.mulf %271, %273 : vector<16x64xf32>
    %275 = vector.broadcast %264 : vector<1x64xf32> to vector<16x64xf32>
    %276 = arith.mulf %226, %275 : vector<16x64xf32>
    %277 = vector.broadcast %265 : vector<1x64xf32> to vector<16x64xf32>
    %278 = arith.addf %276, %277 : vector<16x64xf32>
    %cst_179 = arith.constant 0.000000e+00 : f32
    %279 = vector.broadcast %cst_179 : f32 to vector<16x64xf32>
    %280 = arith.maximumf %278, %279 : vector<16x64xf32>
    %c0_180 = arith.constant 0 : index
    %c0_181 = arith.constant 0 : index
    %281 = vector.load %arg18[%c0_180, %c0_181] : memref<16x1xf32, #tpu.memory_space<vmem>>, vector<16x1xf32>
    %282 = vector.broadcast %281 : vector<16x1xf32> to vector<16x64xf32>
    %283 = arith.mulf %280, %282 : vector<16x64xf32>
    %284 = arith.truncf %274 : vector<16x64xf32> to vector<16x64xbf16>
    %c0_182 = arith.constant 0 : index
    %c0_183 = arith.constant 0 : index
    %c0_184 = arith.constant 0 : index
    %285 = vector.load %arg19[%c0_182, %c0_183, %c0_184] : memref<2x64x6xbf16, #tpu.memory_space<vmem>>, vector<1x64x6xbf16>
    %286 = vector.shape_cast %285 : vector<1x64x6xbf16> to vector<64x6xbf16>
    %cst_185 = arith.constant dense<0.000000e+00> : vector<16x6xf32>
    %287 = tpu.matmul %284, %286, %cst_185 {dimension_numbers = #tpu.dot_dimension_numbers<[1], [0], [0], [1], [0, 0, 1, 1], [], []>} : vector<16x64xbf16>, vector<64x6xbf16>, vector<16x6xf32> -> vector<16x6xf32>
    %288 = arith.truncf %283 : vector<16x64xf32> to vector<16x64xbf16>
    %c1_186 = arith.constant 1 : index
    %c0_187 = arith.constant 0 : index
    %c0_188 = arith.constant 0 : index
    %289 = vector.load %arg19[%c1_186, %c0_187, %c0_188] : memref<2x64x6xbf16, #tpu.memory_space<vmem>>, vector<1x64x6xbf16>
    %290 = vector.shape_cast %289 : vector<1x64x6xbf16> to vector<64x6xbf16>
    %cst_189 = arith.constant dense<0.000000e+00> : vector<16x6xf32>
    %291 = tpu.matmul %288, %290, %cst_189 {dimension_numbers = #tpu.dot_dimension_numbers<[1], [0], [0], [1], [0, 0, 1, 1], [], []>} : vector<16x64xbf16>, vector<64x6xbf16>, vector<16x6xf32> -> vector<16x6xf32>
    %292 = arith.addf %287, %291 : vector<16x6xf32>
    %c0_190 = arith.constant 0 : index
    %c0_191 = arith.constant 0 : index
    %293 = vector.load %arg20[%c0_190, %c0_191] : memref<1x6xf32, #tpu.memory_space<vmem>>, vector<1x6xf32>
    %294 = vector.broadcast %293 : vector<1x6xf32> to vector<16x6xf32>
    %295 = arith.addf %292, %294 : vector<16x6xf32>
    %c0_192 = arith.constant 0 : index
    %c0_193 = arith.constant 0 : index
    %296 = vector.load %arg21[%c0_192, %c0_193] : memref<16x6xf32, #tpu.memory_space<vmem>>, vector<16x6xf32>
    tpu.vector_store %arg21[%c0_192, %c0_193], %295 {strides = array<i32>} : memref<16x6xf32, #tpu.memory_space<vmem>>, vector<16x6xf32>,
    return
  }
}

</mosaic_0001>

<bundles_post_ra>
// kernel: tile.13
= control target key start
LH: loop header
LB: loop body
LE: loop exit
PB: predicated region body
PF: predicated region fallthrough
CT: control target
= control target key end

     0   :  { %s28_s0 = inlined_call_operand.vmem [shape: f32[16], index: 0, kind: input, shape index: {}]   ;;  %s29_s1 = inlined_call_operand.vmem [shape: f32[9,16], index: 1, kind: output, shape index: {}]  }
   0x1   :  { %v4_v0 = vld [vmem:[%s28_s0] ss:$0 sm:$0xff] }
   0x2   :  { %5 = vst [vmem:[%s29_s1] sm:$0xff] %v4_v0  ;;  %8 = vst [vmem:[%s29_s1 + $0x8] sm:$0xff] %v4_v0 }

// kernel: tile.0
= control target key start
LH: loop header
LB: loop body
LE: loop exit
PB: predicated region body
PF: predicated region fallthrough
CT: control target
= control target key end

     0   :  { %vm3_vm0 = vcmask 7168   ;;  %s405_s8 = smov 126   ;;  %s406_s9 = smov 127   ;;  %s822_s0 = inlined_call_operand.vmem [shape: f32[9,16], index: 0, kind: input, shape index: {}]   ;;  %s823_s1 = inlined_call_operand.vmem [shape: f32[144,1], index: 1, kind: output, shape index: {}]  }
   0x1   :  { %v433_v0 = vld [vmem:[%s822_s0] sm:$0xff]   ;;  %v310_v1 = vld [vmem:[%s822_s0 + $0x8] sm:$0x1]   ;;  %s407_s24 = smov 125   ;;  %s408_s27 = smov 124  }
   0x2   :  { %33 = vrot.lane.b32.xlu1 %v433_v0, %s405_s8  ;;  %14 = vrot.lane.b32.xlu0 %v433_v0, %s406_s9  ;;  %4 = vst.msk [vmem:[%s823_s1] ss:$16 sm:$0x3] %vm3_vm0, %v433_v0   ;;  %5 = vst.msk [vmem:[%s823_s1] ss:$16 sm:$0xc] %vm3_vm0, %v433_v0  }
   0x3   :  { %6 = vst.msk [vmem:[%s823_s1] ss:$16 sm:$0x30] %vm3_vm0, %v433_v0   ;;  %7 = vst.msk [vmem:[%s823_s1] ss:$16 sm:$0xc0] %vm3_vm0, %v433_v0  }
   0x4   :  { %v304_v2 = vld [vmem:[%s822_s0 + $0x8] sm:$0x1]   ;;  %s409_s30 = smov 123   ;;  %s410_s4 = smov 122  }
   0x5   :  { %v316_v3 = vld [vmem:[%s822_s0 + $0x8] sm:$0x1]   ;;  %s411_s7 = smov 121   ;;  %s412_s10 = smov 120  }
   0x6   :  { %46 = vrot.lane.b32.xlu1 %v310_v1, %s405_s8  ;;  %27 = vrot.lane.b32.xlu0 %v304_v2, %s406_s9  ;;  %v322_v4 = vld [vmem:[%s822_s0 + $0x8] sm:$0x1]   ;;  %s413_s13 = smov 119   ;;  %s414_s16 = smov 118  }
   0x7   :  { %v328_v5 = vld [vmem:[%s822_s0 + $0x8] sm:$0x1]   ;;  %s415_s19 = smov 117   ;;  %s416_s26 = smov 116  }
   0x8   :  { %v334_v6 = vld [vmem:[%s822_s0 + $0x8] sm:$0x1]   ;;  %s417_s29 = smov 115   ;;  %s418_s3 = smov 114  }
   0x9   :  { %v340_v7 = vld [vmem:[%s822_s0 + $0x8] sm:$0x1]  }
   0xa   :  { %65 = vrot.lane.b32.xlu1 %v316_v3, %s407_s24  ;;  %52 = vrot.lane.b32.xlu0 %v433_v0, %s407_s24  ;;  %v346_v8 = vld [vmem:[%s822_s0 + $0x8] sm:$0x1]  }
   0xb   :  { %v352_v9 = vld [vmem:[%s822_s0 + $0x8] sm:$0x1]  }
   0xc   :  { %v358_v10 = vld [vmem:[%s822_s0 + $0x8] sm:$0x1]  }
   0xd   :  { %v364_v11 = vld [vmem:[%s822_s0 + $0x8] sm:$0x1]  }
   0xe   :  { %84 = vrot.lane.b32.xlu1 %v322_v4, %s408_s27  ;;  %71 = vrot.lane.b32.xlu0 %v433_v0, %s408_s27  ;;  %v370_v12 = vld [vmem:[%s822_s0 + $0x8] sm:$0x1]  }
   0xf   :  { %v298_v13 = vld [vmem:[%s822_s0 + $0x8] sm:$0x1]  }
  0x10   :  { %299 = vst.msk [vmem:[%s823_s1 + $0x80] sm:$0x1] %vm3_vm0, %v298_v13   ;;  %v376_v14 = vld [vmem:[%s822_s0 + $0x8] sm:$0x1]  }
  0x11   :  { %v382_v15 = vld [vmem:[%s822_s0 + $0x8] sm:$0x1]  }
  0x12   :  { %103 = vrot.lane.b32.xlu1 %v328_v5, %s409_s30  ;;  %90 = vrot.lane.b32.xlu0 %v433_v0, %s409_s30  ;;  %v388_v16 = vld [vmem:[%s822_s0 + $0x8] sm:$0x1]   ;;  %s419_s0 = smov 113  }
  0x16   :  { %122 = vrot.lane.b32.xlu1 %v334_v6, %s410_s4  ;;  %109 = vrot.lane.b32.xlu0 %v433_v0, %s410_s4 }
  0x1a   :  { %141 = vrot.lane.b32.xlu1 %v340_v7, %s411_s7  ;;  %128 = vrot.lane.b32.xlu0 %v433_v0, %s411_s7 }
  0x1e   :  { %160 = vrot.lane.b32.xlu1 %v346_v8, %s412_s10  ;;  %147 = vrot.lane.b32.xlu0 %v433_v0, %s412_s10 }
  0x22   :  { %179 = vrot.lane.b32.xlu1 %v352_v9, %s413_s13  ;;  %166 = vrot.lane.b32.xlu0 %v433_v0, %s413_s13 }
  0x26   :  { %198 = vrot.lane.b32.xlu1 %v358_v10, %s414_s16  ;;  %185 = vrot.lane.b32.xlu0 %v433_v0, %s414_s16 }
  0x2a   :  { %217 = vrot.lane.b32.xlu1 %v364_v11, %s415_s19  ;;  %204 = vrot.lane.b32.xlu0 %v433_v0, %s415_s19 }
  0x2e   :  { %236 = vrot.lane.b32.xlu1 %v370_v12, %s416_s26  ;;  %223 = vrot.lane.b32.xlu0 %v433_v0, %s416_s26 }
  0x32   :  { %255 = vrot.lane.b32.xlu1 %v376_v14, %s417_s29  ;;  %242 = vrot.lane.b32.xlu0 %v433_v0, %s417_s29 }
  0x36   :  { %274 = vrot.lane.b32.xlu1 %v382_v15, %s418_s3  ;;  %261 = vrot.lane.b32.xlu0 %v433_v0, %s418_s3 }
  0x3a   :  { %293 = vrot.lane.b32.xlu1 %v388_v16, %s419_s0  ;;  %280 = vrot.lane.b32.xlu0 %v433_v0, %s419_s0 }
  0x74   :  { %v34_v17 = vpop.permute.xlu1 %33   ;;  %v15_v18 = vpop.permute.xlu0 %14  }
  0x75   :  { %306 = vst.msk [vmem:[%s823_s1 + $0x2] ss:$16 sm:$0x3] %vm3_vm0, %v34_v17   ;;  %307 = vst.msk [vmem:[%s823_s1 + $0x2] ss:$16 sm:$0xc] %vm3_vm0, %v34_v17  }
  0x76   :  { %308 = vst.msk [vmem:[%s823_s1 + $0x2] ss:$16 sm:$0x30] %vm3_vm0, %v34_v17   ;;  %309 = vst.msk [vmem:[%s823_s1 + $0x2] ss:$16 sm:$0xc0] %vm3_vm0, %v34_v17  }
  0x77   :  { %300 = vst.msk [vmem:[%s823_s1 + $0x1] ss:$16 sm:$0x3] %vm3_vm0, %v15_v18   ;;  %301 = vst.msk [vmem:[%s823_s1 + $0x1] ss:$16 sm:$0xc] %vm3_vm0, %v15_v18  }
  0x78   :  { %302 = vst.msk [vmem:[%s823_s1 + $0x1] ss:$16 sm:$0x30] %vm3_vm0, %v15_v18   ;;  %303 = vst.msk [vmem:[%s823_s1 + $0x1] ss:$16 sm:$0xc0] %vm3_vm0, %v15_v18   ;;  %v47_v19 = vpop.permute.xlu1 %46   ;;  %v28_v20 = vpop.permute.xlu0 %27  }
  0x79   :  { %311 = vst.msk [vmem:[%s823_s1 + $0x82] sm:$0x1] %vm3_vm0, %v47_v19   ;;  %305 = vst.msk [vmem:[%s823_s1 + $0x81] sm:$0x1] %vm3_vm0, %v28_v20  }
  0x7c   :  { %v66_v21 = vpop.permute.xlu1 %65   ;;  %v53_v22 = vpop.permute.xlu0 %52  }
  0x7d   :  { %317 = vst.msk [vmem:[%s823_s1 + $0x83] sm:$0x1] %vm3_vm0, %v66_v21   ;;  %312 = vst.msk [vmem:[%s823_s1 + $0x3] ss:$16 sm:$0x3] %vm3_vm0, %v53_v22  }
  0x7e   :  { %313 = vst.msk [vmem:[%s823_s1 + $0x3] ss:$16 sm:$0xc] %vm3_vm0, %v53_v22   ;;  %314 = vst.msk [vmem:[%s823_s1 + $0x3] ss:$16 sm:$0x30] %vm3_vm0, %v53_v22  }
  0x7f   :  { %315 = vst.msk [vmem:[%s823_s1 + $0x3] ss:$16 sm:$0xc0] %vm3_vm0, %v53_v22  }
  0x80   :  { %v85_v23 = vpop.permute.xlu1 %84   ;;  %v72_v24 = vpop.permute.xlu0 %71  }
  0x81   :  { %323 = vst.msk [vmem:[%s823_s1 + $0x84] sm:$0x1] %vm3_vm0, %v85_v23   ;;  %318 = vst.msk [vmem:[%s823_s1 + $0x4] ss:$16 sm:$0x3] %vm3_vm0, %v72_v24  }
  0x82   :  { %319 = vst.msk [vmem:[%s823_s1 + $0x4] ss:$16 sm:$0xc] %vm3_vm0, %v72_v24   ;;  %320 = vst.msk [vmem:[%s823_s1 + $0x4] ss:$16 sm:$0x30] %vm3_vm0, %v72_v24  }
  0x83   :  { %321 = vst.msk [vmem:[%s823_s1 + $0x4] ss:$16 sm:$0xc0] %vm3_vm0, %v72_v24  }
  0x84   :  { %v104_v25 = vpop.permute.xlu1 %103   ;;  %v91_v26 = vpop.permute.xlu0 %90  }
  0x85   :  { %329 = vst.msk [vmem:[%s823_s1 + $0x85] sm:$0x1] %vm3_vm0, %v104_v25   ;;  %324 = vst.msk [vmem:[%s823_s1 + $0x5] ss:$16 sm:$0x3] %vm3_vm0, %v91_v26  }
  0x86   :  { %325 = vst.msk [vmem:[%s823_s1 + $0x5] ss:$16 sm:$0xc] %vm3_vm0, %v91_v26   ;;  %326 = vst.msk [vmem:[%s823_s1 + $0x5] ss:$16 sm:$0x30] %vm3_vm0, %v91_v26  }
  0x87   :  { %327 = vst.msk [vmem:[%s823_s1 + $0x5] ss:$16 sm:$0xc0] %vm3_vm0, %v91_v26  }
  0x88   :  { %v123_v27 = vpop.permute.xlu1 %122   ;;  %v110_v28 = vpop.permute.xlu0 %109  }
  0x89   :  { %335 = vst.msk [vmem:[%s823_s1 + $0x86] sm:$0x1] %vm3_vm0, %v123_v27   ;;  %330 = vst.msk [vmem:[%s823_s1 + $0x6] ss:$16 sm:$0x3] %vm3_vm0, %v110_v28  }
  0x8a   :  { %331 = vst.msk [vmem:[%s823_s1 + $0x6] ss:$16 sm:$0xc] %vm3_vm0, %v110_v28   ;;  %332 = vst.msk [vmem:[%s823_s1 + $0x6] ss:$16 sm:$0x30] %vm3_vm0, %v110_v28  }
  0x8b   :  { %333 = vst.msk [vmem:[%s823_s1 + $0x6] ss:$16 sm:$0xc0] %vm3_vm0, %v110_v28  }
  0x8c   :  { %v142_v29 = vpop.permute.xlu1 %141   ;;  %v129_v30 = vpop.permute.xlu0 %128  }
  0x8d   :  { %341 = vst.msk [vmem:[%s823_s1 + $0x87] sm:$0x1] %vm3_vm0, %v142_v29   ;;  %336 = vst.msk [vmem:[%s823_s1 + $0x7] ss:$16 sm:$0x3] %vm3_vm0, %v129_v30  }
  0x8e   :  { %337 = vst.msk [vmem:[%s823_s1 + $0x7] ss:$16 sm:$0xc] %vm3_vm0, %v129_v30   ;;  %338 = vst.msk [vmem:[%s823_s1 + $0x7] ss:$16 sm:$0x30] %vm3_vm0, %v129_v30  }
  0x8f   :  { %339 = vst.msk [vmem:[%s823_s1 + $0x7] ss:$16 sm:$0xc0] %vm3_vm0, %v129_v30  }
  0x90   :  { %v161_v31 = vpop.permute.xlu1 %160   ;;  %v148_v32 = vpop.permute.xlu0 %147  }
  0x91   :  { %347 = vst.msk [vmem:[%s823_s1 + $0x88] sm:$0x1] %vm3_vm0, %v161_v31   ;;  %342 = vst.msk [vmem:[%s823_s1 + $0x8] ss:$16 sm:$0x3] %vm3_vm0, %v148_v32  }
  0x92   :  { %343 = vst.msk [vmem:[%s823_s1 + $0x8] ss:$16 sm:$0xc] %vm3_vm0, %v148_v32   ;;  %344 = vst.msk [vmem:[%s823_s1 + $0x8] ss:$16 sm:$0x30] %vm3_vm0, %v148_v32  }
  0x93   :  { %345 = vst.msk [vmem:[%s823_s1 + $0x8] ss:$16 sm:$0xc0] %vm3_vm0, %v148_v32  }
  0x94   :  { %v180_v33 = vpop.permute.xlu1 %179   ;;  %v167_v34 = vpop.permute.xlu0 %166  }
  0x95   :  { %353 = vst.msk [vmem:[%s823_s1 + $0x89] sm:$0x1] %vm3_vm0, %v180_v33   ;;  %348 = vst.msk [vmem:[%s823_s1 + $0x9] ss:$16 sm:$0x3] %vm3_vm0, %v167_v34  }
  0x96   :  { %349 = vst.msk [vmem:[%s823_s1 + $0x9] ss:$16 sm:$0xc] %vm3_vm0, %v167_v34   ;;  %350 = vst.msk [vmem:[%s823_s1 + $0x9] ss:$16 sm:$0x30] %vm3_vm0, %v167_v34  }
  0x97   :  { %351 = vst.msk [vmem:[%s823_s1 + $0x9] ss:$16 sm:$0xc0] %vm3_vm0, %v167_v34  }
  0x98   :  { %v199_v35 = vpop.permute.xlu1 %198   ;;  %v186_v36 = vpop.permute.xlu0 %185  }
  0x99   :  { %359 = vst.msk [vmem:[%s823_s1 + $0x8a] sm:$0x1] %vm3_vm0, %v199_v35   ;;  %354 = vst.msk [vmem:[%s823_s1 + $0xa] ss:$16 sm:$0x3] %vm3_vm0, %v186_v36  }
  0x9a   :  { %355 = vst.msk [vmem:[%s823_s1 + $0xa] ss:$16 sm:$0xc] %vm3_vm0, %v186_v36   ;;  %356 = vst.msk [vmem:[%s823_s1 + $0xa] ss:$16 sm:$0x30] %vm3_vm0, %v186_v36  }
  0x9b   :  { %357 = vst.msk [vmem:[%s823_s1 + $0xa] ss:$16 sm:$0xc0] %vm3_vm0, %v186_v36  }
  0x9c   :  { %v218_v37 = vpop.permute.xlu1 %217   ;;  %v205_v38 = vpop.permute.xlu0 %204  }
  0x9d   :  { %365 = vst.msk [vmem:[%s823_s1 + $0x8b] sm:$0x1] %vm3_vm0, %v218_v37   ;;  %360 = vst.msk [vmem:[%s823_s1 + $0xb] ss:$16 sm:$0x3] %vm3_vm0, %v205_v38  }
  0x9e   :  { %361 = vst.msk [vmem:[%s823_s1 + $0xb] ss:$16 sm:$0xc] %vm3_vm0, %v205_v38   ;;  %362 = vst.msk [vmem:[%s823_s1 + $0xb] ss:$16 sm:$0x30] %vm3_vm0, %v205_v38  }
  0x9f   :  { %363 = vst.msk [vmem:[%s823_s1 + $0xb] ss:$16 sm:$0xc0] %vm3_vm0, %v205_v38  }
  0xa0   :  { %v237_v39 = vpop.permute.xlu1 %236   ;;  %v224_v40 = vpop.permute.xlu0 %223  }
  0xa1   :  { %371 = vst.msk [vmem:[%s823_s1 + $0x8c] sm:$0x1] %vm3_vm0, %v237_v39   ;;  %366 = vst.msk [vmem:[%s823_s1 + $0xc] ss:$16 sm:$0x3] %vm3_vm0, %v224_v40  }
  0xa2   :  { %367 = vst.msk [vmem:[%s823_s1 + $0xc] ss:$16 sm:$0xc] %vm3_vm0, %v224_v40   ;;  %368 = vst.msk [vmem:[%s823_s1 + $0xc] ss:$16 sm:$0x30] %vm3_vm0, %v224_v40  }
  0xa3   :  { %369 = vst.msk [vmem:[%s823_s1 + $0xc] ss:$16 sm:$0xc0] %vm3_vm0, %v224_v40  }
  0xa4   :  { %v256_v41 = vpop.permute.xlu1 %255   ;;  %v243_v42 = vpop.permute.xlu0 %242  }
  0xa5   :  { %377 = vst.msk [vmem:[%s823_s1 + $0x8d] sm:$0x1] %vm3_vm0, %v256_v41   ;;  %372 = vst.msk [vmem:[%s823_s1 + $0xd] ss:$16 sm:$0x3] %vm3_vm0, %v243_v42  }
  0xa6   :  { %373 = vst.msk [vmem:[%s823_s1 + $0xd] ss:$16 sm:$0xc] %vm3_vm0, %v243_v42   ;;  %374 = vst.msk [vmem:[%s823_s1 + $0xd] ss:$16 sm:$0x30] %vm3_vm0, %v243_v42  }
  0xa7   :  { %375 = vst.msk [vmem:[%s823_s1 + $0xd] ss:$16 sm:$0xc0] %vm3_vm0, %v243_v42  }
  0xa8   :  { %v275_v43 = vpop.permute.xlu1 %274   ;;  %v262_v44 = vpop.permute.xlu0 %261  }
  0xa9   :  { %383 = vst.msk [vmem:[%s823_s1 + $0x8e] sm:$0x1] %vm3_vm0, %v275_v43   ;;  %378 = vst.msk [vmem:[%s823_s1 + $0xe] ss:$16 sm:$0x3] %vm3_vm0, %v262_v44  }
  0xaa   :  { %379 = vst.msk [vmem:[%s823_s1 + $0xe] ss:$16 sm:$0xc] %vm3_vm0, %v262_v44   ;;  %380 = vst.msk [vmem:[%s823_s1 + $0xe] ss:$16 sm:$0x30] %vm3_vm0, %v262_v44  }
  0xab   :  { %381 = vst.msk [vmem:[%s823_s1 + $0xe] ss:$16 sm:$0xc0] %vm3_vm0, %v262_v44  }
  0xac   :  { %v294_v45 = vpop.permute.xlu1 %293   ;;  %v281_v46 = vpop.permute.xlu0 %280  }
  0xad   :  { %389 = vst.msk [vmem:[%s823_s1 + $0x8f] sm:$0x1] %vm3_vm0, %v294_v45   ;;  %384 = vst.msk [vmem:[%s823_s1 + $0xf] ss:$16 sm:$0x3] %vm3_vm0, %v281_v46  }
  0xae   :  { %385 = vst.msk [vmem:[%s823_s1 + $0xf] ss:$16 sm:$0xc] %vm3_vm0, %v281_v46   ;;  %386 = vst.msk [vmem:[%s823_s1 + $0xf] ss:$16 sm:$0x30] %vm3_vm0, %v281_v46  }
  0xaf   :  { %387 = vst.msk [vmem:[%s823_s1 + $0xf] ss:$16 sm:$0xc0] %vm3_vm0, %v281_v46  }

// kernel: tile.18
= control target key start
LH: loop header
LB: loop body
LE: loop exit
PB: predicated region body
PF: predicated region fallthrough
CT: control target
= control target key end

     0   :  { %s22_s0 = inlined_call_operand.vmem [shape: f32[16], index: 0, kind: input, shape index: {}]   ;;  %s23_s1 = inlined_call_operand.vmem [shape: f32[7,16], index: 1, kind: output, shape index: {}]  }
   0x1   :  { %v4_v0 = vld [vmem:[%s22_s0] ss:$0 sm:$0xff] }
   0x2   :  { %5 = vst [vmem:[%s23_s1] sm:$0xff] %v4_v0 }

// kernel: tile.1
= control target key start
LH: loop header
LB: loop body
LE: loop exit
PB: predicated region body
PF: predicated region fallthrough
CT: control target
= control target key end

     0   :  { %s265_s10 = smov 127   ;;  %s266_s11 = smov 125   ;;  %vm3_vm0 = vcmask 7168   ;;  %s594_s0 = inlined_call_operand.vmem [shape: f32[7,16], index: 0, kind: input, shape index: {}]   ;;  %s595_s1 = inlined_call_operand.vmem [shape: f32[112,1], index: 1, kind: output, shape index: {}]  }
   0x1   :  { %v9_v0 = vld [vmem:[%s594_s0] sm:$0x7f]   ;;  %s267_s16 = smov 126   ;;  %s268_s17 = smov 124  }
   0x2   :  { %v33_v1 = vld [vmem:[%s594_s0] sm:$0x7f]   ;;  %10 = vrot.lane.b32.xlu0 %v9_v0, %s265_s10  ;;  %s269_s22 = smov 123   ;;  %s270_s23 = smov 122  }
   0x3   :  { %34 = vrot.lane.b32.xlu1 %v33_v1, %s266_s11  ;;  %v21_v2 = vld [vmem:[%s594_s0] sm:$0x7f]   ;;  %s271_s28 = smov 121   ;;  %s272_s29 = smov 120  }
   0x4   :  { %v45_v3 = vld [vmem:[%s594_s0] sm:$0x7f]   ;;  %s273_s15 = smov 119   ;;  %s275_s21 = smov 117  }
   0x5   :  { %v57_v4 = vld [vmem:[%s594_s0] sm:$0x7f]   ;;  %s277_s27 = smov 115  }
   0x6   :  { %22 = vrot.lane.b32.xlu0 %v21_v2, %s267_s16  ;;  %v69_v5 = vld [vmem:[%s594_s0] sm:$0x7f]   ;;  %s274_s16 = smov 118  }
   0x7   :  { %46 = vrot.lane.b32.xlu1 %v45_v3, %s268_s17  ;;  %v81_v6 = vld [vmem:[%s594_s0] sm:$0x7f]  }
   0x8   :  { %v93_v7 = vld [vmem:[%s594_s0] sm:$0x7f]  }
   0x9   :  { %v105_v8 = vld [vmem:[%s594_s0] sm:$0x7f]  }
   0xa   :  { %58 = vrot.lane.b32.xlu0 %v57_v4, %s269_s22  ;;  %v117_v9 = vld [vmem:[%s594_s0] sm:$0x7f]   ;;  %s276_s22 = smov 116  }
   0xb   :  { %70 = vrot.lane.b32.xlu1 %v69_v5, %s270_s23  ;;  %v2_v10 = vld [vmem:[%s594_s0] sm:$0x7f]  }
   0xc   :  { %4 = vst.msk [vmem:[%s595_s1] ss:$16 sm:$0x3] %vm3_vm0, %v2_v10   ;;  %5 = vst.msk [vmem:[%s595_s1] ss:$16 sm:$0xc] %vm3_vm0, %v2_v10  }
   0xd   :  { %6 = vst.msk [vmem:[%s595_s1] ss:$16 sm:$0x30] %vm3_vm0, %v2_v10   ;;  %189 = vst.msk [vmem:[%s595_s1 + $0x5a] sm:$0x40] %vm3_vm0, %v2_v10  }
   0xe   :  { %82 = vrot.lane.b32.xlu0 %v81_v6, %s271_s28  ;;  %v129_v11 = vld [vmem:[%s594_s0] sm:$0x7f]   ;;  %s278_s28 = smov 114  }
   0xf   :  { %94 = vrot.lane.b32.xlu1 %v93_v7, %s272_s29  ;;  %v141_v12 = vld [vmem:[%s594_s0] sm:$0x7f]  }
  0x10   :  { %v153_v13 = vld [vmem:[%s594_s0] sm:$0x7f]  }
  0x11   :  { %v165_v14 = vld [vmem:[%s594_s0] sm:$0x7f]  }
  0x12   :  { %106 = vrot.lane.b32.xlu0 %v105_v8, %s273_s15  ;;  %v177_v15 = vld [vmem:[%s594_s0] sm:$0x7f]   ;;  %s279_s0 = smov 113  }
  0x13   :  { %118 = vrot.lane.b32.xlu1 %v117_v9, %s274_s16 }
  0x16   :  { %130 = vrot.lane.b32.xlu0 %v129_v11, %s275_s21 }
  0x17   :  { %142 = vrot.lane.b32.xlu1 %v141_v12, %s276_s22 }
  0x1a   :  { %154 = vrot.lane.b32.xlu0 %v153_v13, %s277_s27 }
  0x1b   :  { %166 = vrot.lane.b32.xlu1 %v165_v14, %s278_s28 }
  0x1e   :  { %178 = vrot.lane.b32.xlu0 %v177_v15, %s279_s0 }
  0x74   :  { %v11_v16 = vpop.permute.xlu0 %10  }
  0x75   :  { %v35_v17 = vpop.permute.xlu1 %34   ;;  %190 = vst.msk [vmem:[%s595_s1 + $0x1] ss:$16 sm:$0x3] %vm3_vm0, %v11_v16   ;;  %191 = vst.msk [vmem:[%s595_s1 + $0x1] ss:$16 sm:$0xc] %vm3_vm0, %v11_v16  }
  0x76   :  { %192 = vst.msk [vmem:[%s595_s1 + $0x1] ss:$16 sm:$0x30] %vm3_vm0, %v11_v16   ;;  %193 = vst.msk [vmem:[%s595_s1 + $0x5b] sm:$0x40] %vm3_vm0, %v11_v16  }
  0x77   :  { %198 = vst.msk [vmem:[%s595_s1 + $0x3] ss:$16 sm:$0x3] %vm3_vm0, %v35_v17   ;;  %199 = vst.msk [vmem:[%s595_s1 + $0x3] ss:$16 sm:$0xc] %vm3_vm0, %v35_v17  }
  0x78   :  { %200 = vst.msk [vmem:[%s595_s1 + $0x3] ss:$16 sm:$0x30] %vm3_vm0, %v35_v17   ;;  %201 = vst.msk [vmem:[%s595_s1 + $0x5d] sm:$0x40] %vm3_vm0, %v35_v17   ;;  %v23_v18 = vpop.permute.xlu0 %22  }
  0x79   :  { %v47_v19 = vpop.permute.xlu1 %46   ;;  %194 = vst.msk [vmem:[%s595_s1 + $0x2] ss:$16 sm:$0x3] %vm3_vm0, %v23_v18   ;;  %195 = vst.msk [vmem:[%s595_s1 + $0x2] ss:$16 sm:$0xc] %vm3_vm0, %v23_v18  }
  0x7a   :  { %196 = vst.msk [vmem:[%s595_s1 + $0x2] ss:$16 sm:$0x30] %vm3_vm0, %v23_v18   ;;  %197 = vst.msk [vmem:[%s595_s1 + $0x5c] sm:$0x40] %vm3_vm0, %v23_v18  }
  0x7b   :  { %202 = vst.msk [vmem:[%s595_s1 + $0x4] ss:$16 sm:$0x3] %vm3_vm0, %v47_v19   ;;  %203 = vst.msk [vmem:[%s595_s1 + $0x4] ss:$16 sm:$0xc] %vm3_vm0, %v47_v19  }
  0x7c   :  { %204 = vst.msk [vmem:[%s595_s1 + $0x4] ss:$16 sm:$0x30] %vm3_vm0, %v47_v19   ;;  %205 = vst.msk [vmem:[%s595_s1 + $0x5e] sm:$0x40] %vm3_vm0, %v47_v19   ;;  %v59_v20 = vpop.permute.xlu0 %58  }
  0x7d   :  { %v71_v21 = vpop.permute.xlu1 %70   ;;  %206 = vst.msk [vmem:[%s595_s1 + $0x5] ss:$16 sm:$0x3] %vm3_vm0, %v59_v20   ;;  %207 = vst.msk [vmem:[%s595_s1 + $0x5] ss:$16 sm:$0xc] %vm3_vm0, %v59_v20  }
  0x7e   :  { %208 = vst.msk [vmem:[%s595_s1 + $0x5] ss:$16 sm:$0x30] %vm3_vm0, %v59_v20   ;;  %209 = vst.msk [vmem:[%s595_s1 + $0x5f] sm:$0x40] %vm3_vm0, %v59_v20  }
  0x7f   :  { %210 = vst.msk [vmem:[%s595_s1 + $0x6] ss:$16 sm:$0x3] %vm3_vm0, %v71_v21   ;;  %211 = vst.msk [vmem:[%s595_s1 + $0x6] ss:$16 sm:$0xc] %vm3_vm0, %v71_v21  }
  0x80   :  { %212 = vst.msk [vmem:[%s595_s1 + $0x6] ss:$16 sm:$0x30] %vm3_vm0, %v71_v21   ;;  %213 = vst.msk [vmem:[%s595_s1 + $0x60] sm:$0x40] %vm3_vm0, %v71_v21   ;;  %v83_v22 = vpop.permute.xlu0 %82  }
  0x81   :  { %v95_v23 = vpop.permute.xlu1 %94   ;;  %214 = vst.msk [vmem:[%s595_s1 + $0x7] ss:$16 sm:$0x3] %vm3_vm0, %v83_v22   ;;  %215 = vst.msk [vmem:[%s595_s1 + $0x7] ss:$16 sm:$0xc] %vm3_vm0, %v83_v22  }
  0x82   :  { %216 = vst.msk [vmem:[%s595_s1 + $0x7] ss:$16 sm:$0x30] %vm3_vm0, %v83_v22   ;;  %217 = vst.msk [vmem:[%s595_s1 + $0x61] sm:$0x40] %vm3_vm0, %v83_v22  }
  0x83   :  { %218 = vst.msk [vmem:[%s595_s1 + $0x8] ss:$16 sm:$0x3] %vm3_vm0, %v95_v23   ;;  %219 = vst.msk [vmem:[%s595_s1 + $0x8] ss:$16 sm:$0xc] %vm3_vm0, %v95_v23  }
  0x84   :  { %220 = vst.msk [vmem:[%s595_s1 + $0x8] ss:$16 sm:$0x30] %vm3_vm0, %v95_v23   ;;  %221 = vst.msk [vmem:[%s595_s1 + $0x62] sm:$0x40] %vm3_vm0, %v95_v23   ;;  %v107_v24 = vpop.permute.xlu0 %106  }
  0x85   :  { %v119_v25 = vpop.permute.xlu1 %118   ;;  %222 = vst.msk [vmem:[%s595_s1 + $0x9] ss:$16 sm:$0x3] %vm3_vm0, %v107_v24   ;;  %223 = vst.msk [vmem:[%s595_s1 + $0x9] ss:$16 sm:$0xc] %vm3_vm0, %v107_v24  }
  0x86   :  { %224 = vst.msk [vmem:[%s595_s1 + $0x9] ss:$16 sm:$0x30] %vm3_vm0, %v107_v24   ;;  %225 = vst.msk [vmem:[%s595_s1 + $0x63] sm:$0x40] %vm3_vm0, %v107_v24  }
  0x87   :  { %226 = vst.msk [vmem:[%s595_s1 + $0xa] ss:$16 sm:$0x3] %vm3_vm0, %v119_v25   ;;  %227 = vst.msk [vmem:[%s595_s1 + $0xa] ss:$16 sm:$0xc] %vm3_vm0, %v119_v25  }
  0x88   :  { %228 = vst.msk [vmem:[%s595_s1 + $0xa] ss:$16 sm:$0x30] %vm3_vm0, %v119_v25   ;;  %229 = vst.msk [vmem:[%s595_s1 + $0x64] sm:$0x40] %vm3_vm0, %v119_v25   ;;  %v131_v26 = vpop.permute.xlu0 %130  }
  0x89   :  { %v143_v27 = vpop.permute.xlu1 %142   ;;  %230 = vst.msk [vmem:[%s595_s1 + $0xb] ss:$16 sm:$0x3] %vm3_vm0, %v131_v26   ;;  %231 = vst.msk [vmem:[%s595_s1 + $0xb] ss:$16 sm:$0xc] %vm3_vm0, %v131_v26  }
  0x8a   :  { %232 = vst.msk [vmem:[%s595_s1 + $0xb] ss:$16 sm:$0x30] %vm3_vm0, %v131_v26   ;;  %233 = vst.msk [vmem:[%s595_s1 + $0x65] sm:$0x40] %vm3_vm0, %v131_v26  }
  0x8b   :  { %234 = vst.msk [vmem:[%s595_s1 + $0xc] ss:$16 sm:$0x3] %vm3_vm0, %v143_v27   ;;  %235 = vst.msk [vmem:[%s595_s1 + $0xc] ss:$16 sm:$0xc] %vm3_vm0, %v143_v27  }
  0x8c   :  { %236 = vst.msk [vmem:[%s595_s1 + $0xc] ss:$16 sm:$0x30] %vm3_vm0, %v143_v27   ;;  %237 = vst.msk [vmem:[%s595_s1 + $0x66] sm:$0x40] %vm3_vm0, %v143_v27   ;;  %v155_v28 = vpop.permute.xlu0 %154  }
  0x8d   :  { %v167_v29 = vpop.permute.xlu1 %166   ;;  %238 = vst.msk [vmem:[%s595_s1 + $0xd] ss:$16 sm:$0x3] %vm3_vm0, %v155_v28   ;;  %239 = vst.msk [vmem:[%s595_s1 + $0xd] ss:$16 sm:$0xc] %vm3_vm0, %v155_v28  }
  0x8e   :  { %240 = vst.msk [vmem:[%s595_s1 + $0xd] ss:$16 sm:$0x30] %vm3_vm0, %v155_v28   ;;  %241 = vst.msk [vmem:[%s595_s1 + $0x67] sm:$0x40] %vm3_vm0, %v155_v28  }
  0x8f   :  { %242 = vst.msk [vmem:[%s595_s1 + $0xe] ss:$16 sm:$0x3] %vm3_vm0, %v167_v29   ;;  %243 = vst.msk [vmem:[%s595_s1 + $0xe] ss:$16 sm:$0xc] %vm3_vm0, %v167_v29  }
  0x90   :  { %244 = vst.msk [vmem:[%s595_s1 + $0xe] ss:$16 sm:$0x30] %vm3_vm0, %v167_v29   ;;  %245 = vst.msk [vmem:[%s595_s1 + $0x68] sm:$0x40] %vm3_vm0, %v167_v29   ;;  %v179_v30 = vpop.permute.xlu0 %178  }
  0x91   :  { %246 = vst.msk [vmem:[%s595_s1 + $0xf] ss:$16 sm:$0x3] %vm3_vm0, %v179_v30   ;;  %247 = vst.msk [vmem:[%s595_s1 + $0xf] ss:$16 sm:$0xc] %vm3_vm0, %v179_v30  }
  0x92   :  { %248 = vst.msk [vmem:[%s595_s1 + $0xf] ss:$16 sm:$0x30] %vm3_vm0, %v179_v30   ;;  %249 = vst.msk [vmem:[%s595_s1 + $0x69] sm:$0x40] %vm3_vm0, %v179_v30  }

// kernel: dqnbn_forward.1
= control target key start
LH: loop header
LB: loop body
LE: loop exit
PB: predicated region body
PF: predicated region fallthrough
CT: control target
= control target key end

     0   :  { %v21411_v0 = vmov 0   ;;  %vm472_vm0 = vcmask 261120   ;;  %vm14340_vm1 = vmmov 0   ;;  %vm4590_vm2 = vcmask 130048   ;;  %s21383_s1 = inlined_call_operand.vmem [shape: bf16[5,160,288], index: 1, kind: input, shape index: {}]   ;;  %s21384_s0 = inlined_call_operand.vmem [shape: bf16[4,160,160], index: 0, kind: input, shape index: {}]   ;;  %s21385_s4 = inlined_call_operand.vmem [shape: f32[288,16], index: 4, kind: input, shape index: {}]   ;;  %s21386_s5 = inlined_call_operand.vmem [shape: f32[16,288], index: 5, kind: input, shape index: {}]   ;;  %s21387_s6 = inlined_call_operand.vmem [shape: f32[144,1], index: 6, kind: input, shape index: {}]   ;;  %s21388_s7 = inlined_call_operand.vmem [shape: bf16[5,288,224], index: 7, kind: input, shape index: {}]   ;;  %s21389_s12 = inlined_call_operand.vmem [shape: f32[112,1], index: 12, kind: input, shape index: {}]   ;;  %s21390_s18 = inlined_call_operand.vmem [shape: f32[16,1], index: 18, kind: input, shape index: {}]   ;;  %s21391_s2 = inlined_call_operand.vmem [shape: f32[1,16], index: 2, kind: input, shape index: {}]   ;;  %s21392_s3 = inlined_call_operand.vmem [shape: f32[1,16], index: 3, kind: input, shape index: {}]   ;;  %s21393_s10 = inlined_call_operand.vmem [shape: f32[224,32], index: 10, kind: input, shape index: {}]   ;;  %s21394_s11 = inlined_call_operand.vmem [shape: f32[32,224], index: 11, kind: input, shape index: {}]   ;;  %s21395_s13 = inlined_call_operand.vmem [shape: bf16[5,224,64], index: 13, kind: input, shape index: {}]   ;;  %s21396_s8 = inlined_call_operand.vmem [shape: f32[1,32], index: 8, kind: input, shape index: {}]   ;;  %s21397_s9 = inlined_call_operand.vmem [shape: f32[1,32], index: 9, kind: input, shape index: {}]   ;;  %s21398_s16 = inlined_call_operand.vmem [shape: f32[64,32], index: 16, kind: input, shape index: {}]   ;;  %s21399_s17 = inlined_call_operand.vmem [shape: f32[32,64], index: 17, kind: input, shape index: {}]   ;;  %s21400_s14 = inlined_call_operand.vmem [shape: f32[1,32], index: 14, kind: input, shape index: {}]   ;;  %s21401_s15 = inlined_call_operand.vmem [shape: f32[1,32], index: 15, kind: input, shape index: {}]   ;;  %s21402_s19 = inlined_call_operand.vmem [shape: bf16[2,64,6], index: 19, kind: input, shape index: {}]   ;;  %s21403_s20 = inlined_call_operand.vmem [shape: f32[1,6], index: 20, kind: input, shape index: {}]   ;;  %s21404_s21 = inlined_call_operand.vmem [shape: f32[16,6], index: 21, kind: output, shape index: {}]  }
   0x1   :  { %21761 = sst [smem:[#allocation166_spill]] %s21383_s1  ;;  %623 = vmatprep.subr.bf16.mxu1 %v21411_v0  ;;  %13482 = vset.pattern.permute.xlu0 %v21411_v0  ;;  %vm8477_vm3 = vcmask 785408   ;;  %vm10252_vm4 = vcmask 523264   ;;  %vm10880_vm5 = vcmask 48128  }
   0x2   :  { %21762 = sst [smem:[#allocation167_spill]] %s21384_s0  ;;  %s21767_s26 = sld [smem:[#allocation166_spill]]  ;;  %13483 = vset.pattern.permute.xlu1 %v21411_v0 }
   0x3   :  { %21763 = sst [smem:[#allocation168_spill]] %s21385_s4  ;;  %s21768_s27 = sld [smem:[#allocation167_spill]] }
   0x4   :  { %21764 = sst [smem:[#allocation169_spill]] %s21386_s5  ;;  %s21836_s0 = sld [smem:[#allocation168_spill]] }
   0x5   :  { %21765 = sst [smem:[#allocation170_spill]] %s21387_s6  ;;  %s21893_s4 = sld [smem:[#allocation169_spill]] }
   0x6   :  { %21766 = sst [smem:[#allocation171_spill]] %s21388_s7 }
   0x7   :  { %s22133_s7 = sld [smem:[#allocation171_spill]] }
   0x8   :  { %v13484_v1 = vld [vmem:[%s21767_s26 + $0xf4] ss:$12 sps:$4 sm:$0xff]   ;;  %v13486_v2 = vld [vmem:[%s21767_s26 + $0xf8] ss:$12 sps:$4 sm:$0xff]   ;;  %v13487_v3 = vld [vmem:[%s21767_s26 + $0xf0] ss:$12 sps:$4 sm:$0xff]  }
   0x9   :  { %500 = vmatprep.subr.bf16.mxu0 %v13484_v1  ;;  %624 = vmatpush1.bf16.msra.mxu1 %v13486_v2  ;;  %v13488_v4 = vld [vmem:[%s21767_s26 + $0x10c] ss:$12 sps:$4 sm:$0xff]   ;;  %v13490_v5 = vld [vmem:[%s21767_s26 + $0x110] ss:$12 sps:$4 sm:$0xff]   ;;  %v13491_v6 = vld [vmem:[%s21767_s26 + $0x108] ss:$12 sps:$4 sm:$0xff]  }
   0xa   :  { %501 = vmatpush1.bf16.msra.mxu0 %v13487_v3  ;;  %625 = vmatprep.subr.bf16.mxu1 %v21411_v0  ;;  %v13492_v7 = vld [vmem:[%s21767_s26 + $0x124] ss:$12 sps:$4 sm:$0xff]   ;;  %v13494_v8 = vld [vmem:[%s21767_s26 + $0x128] ss:$12 sps:$4 sm:$0xff]   ;;  %v13495_v9 = vld [vmem:[%s21767_s26 + $0x120] ss:$12 sps:$4 sm:$0xff]  }
   0xb   :  { %502 = vmatprep.subr.bf16.mxu0 %v13488_v4  ;;  %v13496_v10 = vld [vmem:[%s21767_s26 + $0x13c] ss:$12 sps:$4 sm:$0xff]   ;;  %v13498_v11 = vld [vmem:[%s21767_s26 + $0x140] ss:$12 sps:$4 sm:$0xff]   ;;  %v13499_v12 = vld [vmem:[%s21767_s26 + $0x138] ss:$12 sps:$4 sm:$0xff]  }
   0xc   :  { %v13500_v13 = vld [vmem:[%s21767_s26 + $0x154] ss:$12 sps:$4 sm:$0xff]   ;;  %v13502_v14 = vld [vmem:[%s21767_s26 + $0x158] ss:$12 sps:$4 sm:$0xff]   ;;  %v13503_v15 = vld [vmem:[%s21767_s26 + $0x150] ss:$12 sps:$4 sm:$0xff]  }
   0xd   :  { %626 = vmatpush1.bf16.msra.mxu1 %v13490_v5  ;;  %v13504_v16 = vld [vmem:[%s21767_s26 + $0x16c] ss:$12 sps:$4 sm:$0xff]   ;;  %v13506_v17 = vld [vmem:[%s21767_s26 + $0x170] ss:$12 sps:$4 sm:$0xff]   ;;  %v13507_v18 = vld [vmem:[%s21767_s26 + $0x168] ss:$12 sps:$4 sm:$0xff]  }
   0xe   :  { %503 = vmatpush1.bf16.msra.mxu0 %v13491_v6  ;;  %627 = vmatprep.subr.bf16.mxu1 %v21411_v0  ;;  %v13508_v19 = vld [vmem:[%s21767_s26 + $0x184] ss:$12 sps:$4 sm:$0xff]   ;;  %v13510_v20 = vld [vmem:[%s21767_s26 + $0x188] ss:$12 sps:$4 sm:$0xff]   ;;  %v13511_v21 = vld [vmem:[%s21767_s26 + $0x180] ss:$12 sps:$4 sm:$0xff]  }
   0xf   :  { %504 = vmatprep.subr.bf16.mxu0 %v13492_v7  ;;  %v13526_v22 = vld [vmem:[%s21768_s27 + $0xa4] ss:$8 sps:$4 sm:$0xff]   ;;  %v13512_v23 = vld [vmem:[%s21767_s26 + $0x19c] ss:$12 sps:$4 sm:$0xff]   ;;  %v13516_v26 = vld [vmem:[%s21767_s26 + $0x1b4] ss:$12 sps:$4 sm:$0xff]  }
  0x10   :  { %11042 = vmatprep.mubr.msk.bf16.mxu1 %vm472_vm0, %v13526_v22  ;;  %11033 = vmatprep.mubr.msk.bf16.mxu0 %vm472_vm0, %v13526_v22  ;;  %v13514_v24 = vld [vmem:[%s21767_s26 + $0x1a0] ss:$12 sps:$4 sm:$0xff]   ;;  %v13515_v25 = vld [vmem:[%s21767_s26 + $0x198] ss:$12 sps:$4 sm:$0xff]   ;;  %v13519_v28 = vld [vmem:[%s21767_s26 + $0x1b0] ss:$12 sps:$4 sm:$0xff]  }
  0x11   :  { %628 = vmatpush1.bf16.msra.mxu1 %v13494_v8  ;;  %v13518_v27 = vld [vmem:[%s21767_s26 + $0x1b8] ss:$12 sps:$4 sm:$0xff]   ;;  %v13522_v30 = vld [vmem:[%s21767_s26 + $0x1d0] ss:$12 sps:$4 sm:$0xff]   ;;  %v13523_v31 = vld [vmem:[%s21767_s26 + $0x1c8] ss:$12 sps:$4 sm:$0xff]  }
  0x12   :  { %505 = vmatpush1.bf16.msra.mxu0 %v13495_v9  ;;  %629 = vmatprep.subr.bf16.mxu1 %v21411_v0  ;;  %v13520_v29 = vld [vmem:[%s21767_s26 + $0x1cc] ss:$12 sps:$4 sm:$0xff]   ;;  %v13529_v32 = vld [vmem:[%s21767_s26 + $0x4] ss:$12 sps:$4 sm:$0xff]   ;;  %v13524_v33 = vld [vmem:[%s21768_s27 + $0xa0] ss:$8 sps:$4 sm:$0xff]  }
  0x13   :  { %506 = vmatprep.subr.bf16.mxu0 %v13496_v10  ;;  %v13530_v34 = vld [vmem:[%s21767_s26 + $0x8] ss:$12 sps:$4 sm:$0xff]   ;;  %v13527_v35 = vld [vmem:[%s21767_s26] ss:$12 sps:$4 sm:$0xff]   ;;  %v13534_v39 = vld [vmem:[%s21767_s26 + $0x18] ss:$12 sps:$4 sm:$0xff]  }
  0x14   :  { %v13531_v36 = vld [vmem:[%s21768_s27 + $0xb4] ss:$8 sps:$4 sm:$0xff]   ;;  %v13537_v38 = vld [vmem:[%s21767_s26 + $0x20] ss:$12 sps:$4 sm:$0xff]   ;;  %v13533_v41 = vld [vmem:[%s21768_s27 + $0xb0] ss:$8 sps:$4 sm:$0xff]  }
  0x15   :  { %630 = vmatpush1.bf16.msra.mxu1 %v13498_v11  ;;  %v13536_v37 = vld [vmem:[%s21767_s26 + $0x1c] ss:$12 sps:$4 sm:$0xff]   ;;  %v13543_v40 = vld [vmem:[%s21767_s26 + $0x34] ss:$12 sps:$4 sm:$0xff]   ;;  %v13538_v42 = vld [vmem:[%s21768_s27 + $0xc4] ss:$8 sps:$4 sm:$0xff]  }
  0x16   :  { %507 = vmatpush1.bf16.msra.mxu0 %v13499_v12  ;;  %631 = vmatprep.subr.bf16.mxu1 %v21411_v0  ;;  %v13541_v43 = vld [vmem:[%s21767_s26 + $0x30] ss:$12 sps:$4 sm:$0xff]   ;;  %v13544_v44 = vld [vmem:[%s21767_s26 + $0x38] ss:$12 sps:$4 sm:$0xff]   ;;  %v13547_v46 = vld [vmem:[%s21767_s26 + $0x48] ss:$12 sps:$4 sm:$0xff]  }
  0x17   :  { %508 = vmatprep.subr.bf16.mxu0 %v13500_v13  ;;  %v13549_v45 = vld [vmem:[%s21767_s26 + $0x4c] ss:$12 sps:$4 sm:$0xff]   ;;  %v13551_v47 = vld [vmem:[%s21767_s26 + $0x50] ss:$12 sps:$4 sm:$0xff]   ;;  %v13540_v49 = vld [vmem:[%s21768_s27 + $0xc0] ss:$8 sps:$4 sm:$0xff]  }
  0x18   :  { %v13554_v48 = vld [vmem:[%s21767_s26 + $0x64] ss:$12 sps:$4 sm:$0xff]   ;;  %v13545_v50 = vld [vmem:[%s21768_s27 + $0xd4] ss:$8 sps:$4 sm:$0xff]   ;;  %v13552_v51 = vld [vmem:[%s21767_s26 + $0x60] ss:$12 sps:$4 sm:$0xff]  }
  0x19   :  { %632 = vmatpush1.bf16.msra.mxu1 %v13502_v14  ;;  %v13558_v52 = vld [vmem:[%s21767_s26 + $0x68] ss:$12 sps:$4 sm:$0xff]   ;;  %v13559_v54 = vld [vmem:[%s21767_s26 + $0x78] ss:$12 sps:$4 sm:$0xff]   ;;  %v13565_v55 = vld [vmem:[%s21767_s26 + $0x80] ss:$12 sps:$4 sm:$0xff]  }
  0x1a   :  { %509 = vmatpush1.bf16.msra.mxu0 %v13503_v15  ;;  %633 = vmatprep.subr.bf16.mxu1 %v21411_v0  ;;  %v13561_v53 = vld [vmem:[%s21767_s26 + $0x7c] ss:$12 sps:$4 sm:$0xff]   ;;  %v13568_v56 = vld [vmem:[%s21767_s26 + $0x94] ss:$12 sps:$4 sm:$0xff]   ;;  %v13550_v57 = vld [vmem:[%s21768_s27 + $0xd0] ss:$8 sps:$4 sm:$0xff]  }
  0x1b   :  { %510 = vmatprep.subr.bf16.mxu0 %v13504_v16  ;;  %v13555_v58 = vld [vmem:[%s21768_s27 + $0xe4] ss:$8 sps:$4 sm:$0xff]   ;;  %v13566_v59 = vld [vmem:[%s21767_s26 + $0x90] ss:$12 sps:$4 sm:$0xff]   ;;  %v13573_v62 = vld [vmem:[%s21767_s26 + $0xa8] ss:$12 sps:$4 sm:$0xff]  }
  0x1c   :  { %v13572_v60 = vld [vmem:[%s21767_s26 + $0x98] ss:$12 sps:$4 sm:$0xff]   ;;  %v13579_v63 = vld [vmem:[%s21767_s26 + $0xb0] ss:$12 sps:$4 sm:$0xff]   ;;  %v13557_v2 = vld [vmem:[%s21768_s27 + $0xe0] ss:$8 sps:$4 sm:$0xff]  }
  0x1d   :  { %634 = vmatpush1.bf16.msra.mxu1 %v13506_v17  ;;  %v13575_v61 = vld [vmem:[%s21767_s26 + $0xac] ss:$12 sps:$4 sm:$0xff]   ;;  %v13582_v1 = vld [vmem:[%s21767_s26 + $0xc4] ss:$12 sps:$4 sm:$0xff]   ;;  %v13562_v3 = vld [vmem:[%s21768_s27 + $0xf4] ss:$8 sps:$4 sm:$0xff]  }
  0x1e   :  { %511 = vmatpush1.bf16.msra.mxu0 %v13507_v18  ;;  %635 = vmatprep.subr.bf16.mxu1 %v21411_v0  ;;  %v13580_v4 = vld [vmem:[%s21767_s26 + $0xc0] ss:$12 sps:$4 sm:$0xff]   ;;  %v13586_v5 = vld [vmem:[%s21767_s26 + $0xc8] ss:$12 sps:$4 sm:$0xff]   ;;  %v13587_v7 = vld [vmem:[%s21767_s26 + $0xd8] ss:$12 sps:$4 sm:$0xff]  }
  0x1f   :  { %512 = vmatprep.subr.bf16.mxu0 %v13508_v19  ;;  %v13589_v6 = vld [vmem:[%s21767_s26 + $0xdc] ss:$12 sps:$4 sm:$0xff]   ;;  %v13590_v8 = vld [vmem:[%s21767_s26 + $0xe0] ss:$12 sps:$4 sm:$0xff]   ;;  %v13596_v9 = vld [vmem:[%s21767_s26 + $0x1e4] ss:$12 sps:$4 sm:$0xff]  }
  0x20   :  { %v13564_v10 = vld [vmem:[%s21768_s27 + $0xf0] ss:$8 sps:$4 sm:$0xff]   ;;  %v13569_v11 = vld [vmem:[%s21768_s27 + $0x104] ss:$8 sps:$4 sm:$0xff]   ;;  %v13571_v12 = vld [vmem:[%s21768_s27 + $0x100] ss:$8 sps:$4 sm:$0xff]  }
  0x21   :  { %636 = vmatpush1.bf16.msra.mxu1 %v13510_v20  ;;  %v13576_v13 = vld [vmem:[%s21768_s27 + $0x114] ss:$8 sps:$4 sm:$0xff]   ;;  %v13578_v14 = vld [vmem:[%s21768_s27 + $0x110] ss:$8 sps:$4 sm:$0xff]   ;;  %v13583_v15 = vld [vmem:[%s21768_s27 + $0x124] ss:$8 sps:$4 sm:$0xff]  }
  0x22   :  { %513 = vmatpush1.bf16.msra.mxu0 %v13511_v21  ;;  %637 = vmatprep.subr.bf16.mxu1 %v21411_v0  ;;  %v13585_v16 = vld [vmem:[%s21768_s27 + $0x120] ss:$8 sps:$4 sm:$0xff]   ;;  %v13593_v17 = vld [vmem:[%s21768_s27 + $0x4] ss:$8 sps:$4 sm:$0xff]   ;;  %v14747_v21 = vld [vmem:[%s21768_s27 + $0x14] ss:$8 sps:$4 sm:$0xff]  }
  0x23   :  { %514 = vmatprep.subr.bf16.mxu0 %v13512_v23  ;;  %v13591_v18 = vld [vmem:[%s21768_s27] ss:$8 sps:$4 sm:$0xff]  }
  0x24   :  { %v13594_v19 = vld [vmem:[%s21767_s26 + $0x1e0] ss:$12 sps:$4 sm:$0xff]   ;;  %v13597_v20 = vld [vmem:[%s21767_s26 + $0x1e8] ss:$12 sps:$4 sm:$0xff]  }
  0x25   :  { %638 = vmatpush1.bf16.msra.mxu1 %v13514_v24  ;;  %v13603_v22 = vld [vmem:[%s21767_s26 + $0x1fc] ss:$12 sps:$4 sm:$0xff]   ;;  %v13604_v23 = vld [vmem:[%s21767_s26 + $0x200] ss:$12 sps:$4 sm:$0xff]   ;;  %v13601_v24 = vld [vmem:[%s21767_s26 + $0x1f8] ss:$12 sps:$4 sm:$0xff]  }
  0x26   :  { %515 = vmatpush1.bf16.msra.mxu0 %v13515_v25  ;;  %639 = vmatprep.subr.bf16.mxu1 %v21411_v0  ;;  %v13610_v25 = vld [vmem:[%s21767_s26 + $0x214] ss:$12 sps:$4 sm:$0xff]  }
  0x27   :  { %516 = vmatprep.subr.bf16.mxu0 %v13516_v26  ;;  %v14768_v26 = vld [vmem:[%s21768_s27 + $0x10] ss:$8 sps:$4 sm:$0xff]  }
  0x29   :  { %640 = vmatpush1.bf16.msra.mxu1 %v13518_v27  ;;  %v14774_v27 = vld [vmem:[%s21768_s27 + $0x24] ss:$8 sps:$4 sm:$0xff]  }
  0x2a   :  { %517 = vmatpush1.bf16.msra.mxu0 %v13519_v28  ;;  %641 = vmatprep.subr.bf16.mxu1 %v21411_v0  ;;  %v13608_v28 = vld [vmem:[%s21767_s26 + $0x210] ss:$12 sps:$4 sm:$0xff]  }
  0x2b   :  { %518 = vmatprep.subr.bf16.mxu0 %v13520_v29  ;;  %v13611_v29 = vld [vmem:[%s21767_s26 + $0x218] ss:$12 sps:$4 sm:$0xff]  }
  0x2d   :  { %642 = vmatpush1.bf16.msra.mxu1 %v13522_v30  ;;  %v13616_v30 = vld [vmem:[%s21767_s26 + $0x22c] ss:$12 sps:$4 sm:$0xff]  }
  0x2e   :  { %519 = vmatpush1.bf16.msra.mxu0 %v13523_v31  ;;  %1119 = vmatprep.subr.bf16.mxu1 %v21411_v0  ;;  %v14795_v31 = vld [vmem:[%s21768_s27 + $0x20] ss:$8 sps:$4 sm:$0xff]  }
  0x2f   :  { %996 = vmatprep.subr.bf16.mxu0 %v13529_v32  ;;  %v13614_v32 = vld [vmem:[%s21767_s26 + $0x228] ss:$12 sps:$4 sm:$0xff]  }
  0x30   :  { %656 = vmatmul.mubr.bf16.vlgmr.msra.gmra.mrb[0].mxu1 %v13524_v33 }
  0x31   :  { %533 = vmatmul.mubr.bf16.vlgmr.msra.gmra.mrb[0].mxu0 %v13524_v33  ;;  %1120 = vmatpush1.bf16.msra.mxu1 %v13530_v34  ;;  %v13618_v33 = vld [vmem:[%s21767_s26 + $0x230] ss:$12 sps:$4 sm:$0xff]  }
  0x32   :  { %997 = vmatpush1.bf16.msra.mxu0 %v13527_v35  ;;  %11043 = vmatprep.mubr.msk.bf16.mxu1 %vm472_vm0, %v13531_v36  ;;  %v13621_v34 = vld [vmem:[%s21767_s26 + $0x244] ss:$12 sps:$4 sm:$0xff]   ;;  %v14809_v35 = vld [vmem:[%s21768_s27 + $0x34] ss:$8 sps:$4 sm:$0xff]  }
  0x33   :  { %11034 = vmatprep.mubr.msk.bf16.mxu0 %vm472_vm0, %v13531_v36  ;;  %998 = vmatprep.subr.bf16.mxu0 %v13536_v37  ;;  %v13619_v36 = vld [vmem:[%s21767_s26 + $0x240] ss:$12 sps:$4 sm:$0xff]   ;;  %v13625_v37 = vld [vmem:[%s21767_s26 + $0x248] ss:$12 sps:$4 sm:$0xff]  }
  0x34   :  { %1121 = vmatprep.subr.bf16.mxu1 %v21411_v0 }
  0x35   :  { %1122 = vmatpush1.bf16.msra.mxu1 %v13537_v38  ;;  %v13628_v38 = vld [vmem:[%s21767_s26 + $0x25c] ss:$12 sps:$4 sm:$0xff]  }
  0x36   :  { %999 = vmatpush1.bf16.msra.mxu0 %v13534_v39  ;;  %1123 = vmatprep.subr.bf16.mxu1 %v21411_v0  ;;  %v13626_v39 = vld [vmem:[%s21767_s26 + $0x258] ss:$12 sps:$4 sm:$0xff]  }
  0x37   :  { %1000 = vmatprep.subr.bf16.mxu0 %v13543_v40  ;;  %v14834_v40 = vld [vmem:[%s21768_s27 + $0x30] ss:$8 sps:$4 sm:$0xff]  }
  0x38   :  { %664 = vmatmul.mubr.bf16.gmra.mrb[4].mxu1 %v13533_v41 }
  0x39   :  { %543 = vmatmul.mubr.bf16.gmra.mrb[4].mxu0 %v13533_v41  ;;  %11044 = vmatprep.mubr.msk.bf16.mxu1 %vm472_vm0, %v13538_v42  ;;  %v13632_v41 = vld [vmem:[%s21767_s26 + $0x260] ss:$12 sps:$4 sm:$0xff]  }
  0x3a   :  { %11035 = vmatprep.mubr.msk.bf16.mxu0 %vm472_vm0, %v13538_v42  ;;  %1001 = vmatpush1.bf16.msra.mxu0 %v13541_v43  ;;  %v14842_v42 = vld [vmem:[%s21768_s27 + $0x44] ss:$8 sps:$4 sm:$0xff]   ;;  %v13635_v43 = vld [vmem:[%s21767_s26 + $0x274] ss:$12 sps:$4 sm:$0xff]  }
  0x3b   :  { %1124 = vmatpush1.bf16.msra.mxu1 %v13544_v44  ;;  %1002 = vmatprep.subr.bf16.mxu0 %v13549_v45  ;;  %v13633_v44 = vld [vmem:[%s21767_s26 + $0x270] ss:$12 sps:$4 sm:$0xff]   ;;  %v13639_v45 = vld [vmem:[%s21767_s26 + $0x278] ss:$12 sps:$4 sm:$0xff]  }
  0x3c   :  { %1125 = vmatprep.subr.bf16.mxu1 %v21411_v0 }
  0x3e   :  { %1003 = vmatpush1.bf16.msra.mxu0 %v13547_v46  ;;  %v13642_v46 = vld [vmem:[%s21767_s26 + $0x28c] ss:$12 sps:$4 sm:$0xff]  }
  0x3f   :  { %1126 = vmatpush1.bf16.msra.mxu1 %v13551_v47  ;;  %1004 = vmatprep.subr.bf16.mxu0 %v13554_v48  ;;  %v13640_v47 = vld [vmem:[%s21767_s26 + $0x288] ss:$12 sps:$4 sm:$0xff]  }
  0x40   :  { %672 = vmatmul.mubr.bf16.gmra.mrb[8].mxu1 %v13540_v49  ;;  %1127 = vmatprep.subr.bf16.mxu1 %v21411_v0  ;;  %v14870_v48 = vld [vmem:[%s21768_s27 + $0x40] ss:$8 sps:$4 sm:$0xff]  }
  0x41   :  { %553 = vmatmul.mubr.bf16.gmra.mrb[8].mxu0 %v13540_v49  ;;  %11045 = vmatprep.mubr.msk.bf16.mxu1 %vm472_vm0, %v13545_v50  ;;  %v13646_v49 = vld [vmem:[%s21767_s26 + $0x290] ss:$12 sps:$4 sm:$0xff]  }
  0x42   :  { %11036 = vmatprep.mubr.msk.bf16.mxu0 %vm472_vm0, %v13545_v50  ;;  %1005 = vmatpush1.bf16.msra.mxu0 %v13552_v51  ;;  %v13649_v50 = vld [vmem:[%s21767_s26 + $0x2a4] ss:$12 sps:$4 sm:$0xff]   ;;  %v14881_v51 = vld [vmem:[%s21768_s27 + $0x54] ss:$8 sps:$4 sm:$0xff]  }
  0x43   :  { %1128 = vmatpush1.bf16.msra.mxu1 %v13558_v52  ;;  %1006 = vmatprep.subr.bf16.mxu0 %v13561_v53  ;;  %v13647_v52 = vld [vmem:[%s21767_s26 + $0x2a0] ss:$12 sps:$4 sm:$0xff]   ;;  %v13653_v53 = vld [vmem:[%s21767_s26 + $0x2a8] ss:$12 sps:$4 sm:$0xff]  }
  0x44   :  { %1129 = vmatprep.subr.bf16.mxu1 %v21411_v0 }
  0x46   :  { %1007 = vmatpush1.bf16.msra.mxu0 %v13559_v54  ;;  %v13656_v54 = vld [vmem:[%s21767_s26 + $0x2bc] ss:$12 sps:$4 sm:$0xff]  }
  0x47   :  { %1130 = vmatpush1.bf16.msra.mxu1 %v13565_v55  ;;  %1008 = vmatprep.subr.bf16.mxu0 %v13568_v56  ;;  %v13654_v55 = vld [vmem:[%s21767_s26 + $0x2b8] ss:$12 sps:$4 sm:$0xff]  }
  0x48   :  { %680 = vmatmul.mubr.bf16.gmra.mrb[12].mxu1 %v13550_v57  ;;  %1131 = vmatprep.subr.bf16.mxu1 %v21411_v0  ;;  %v14906_v56 = vld [vmem:[%s21768_s27 + $0x50] ss:$8 sps:$4 sm:$0xff]  }
  0x49   :  { %563 = vmatmul.mubr.bf16.gmra.mrb[12].mxu0 %v13550_v57  ;;  %11046 = vmatprep.mubr.msk.bf16.mxu1 %vm472_vm0, %v13555_v58  ;;  %v13657_v57 = vld [vmem:[%s21767_s26 + $0x2c0] ss:$12 sps:$4 sm:$0xff]  }
  0x4a   :  { %11037 = vmatprep.mubr.msk.bf16.mxu0 %vm472_vm0, %v13555_v58  ;;  %1009 = vmatpush1.bf16.msra.mxu0 %v13566_v59  ;;  %v13663_v58 = vld [vmem:[%s21767_s26 + $0x2d4] ss:$12 sps:$4 sm:$0xff]   ;;  %v14917_v59 = vld [vmem:[%s21768_s27 + $0x64] ss:$8 sps:$4 sm:$0xff]  }
  0x4b   :  { %1132 = vmatpush1.bf16.msra.mxu1 %v13572_v60  ;;  %1010 = vmatprep.subr.bf16.mxu0 %v13575_v61  ;;  %v14930_v60 = vld [vmem:[%s21768_s27 + $0x60] ss:$8 sps:$4 sm:$0xff]   ;;  %v14935_v61 = vld [vmem:[%s21768_s27 + $0x74] ss:$8 sps:$4 sm:$0xff]  }
  0x4c   :  { %1133 = vmatprep.subr.bf16.mxu1 %v21411_v0 }
  0x4e   :  { %1011 = vmatpush1.bf16.msra.mxu0 %v13573_v62  ;;  %v14946_v62 = vld [vmem:[%s21768_s27 + $0x70] ss:$8 sps:$4 sm:$0xff]  }
  0x4f   :  { %1134 = vmatpush1.bf16.msra.mxu1 %v13579_v63  ;;  %1012 = vmatprep.subr.bf16.mxu0 %v13582_v1  ;;  %v14951_v63 = vld [vmem:[%s21768_s27 + $0x84] ss:$8 sps:$4 sm:$0xff]   ;;  %v14962_v1 = vld [vmem:[%s21768_s27 + $0x80] ss:$8 sps:$4 sm:$0xff]  }
  0x50   :  { %688 = vmatmul.mubr.bf16.gmra.mrb[16].mxu1 %v13557_v2  ;;  %1135 = vmatprep.subr.bf16.mxu1 %v21411_v0 }
  0x51   :  { %573 = vmatmul.mubr.bf16.gmra.mrb[16].mxu0 %v13557_v2  ;;  %11047 = vmatprep.mubr.msk.bf16.mxu1 %vm472_vm0, %v13562_v3  ;;  %v14967_v2 = vld [vmem:[%s21768_s27 + $0x144] ss:$8 sps:$4 sm:$0xff]  }
  0x52   :  { %11038 = vmatprep.mubr.msk.bf16.mxu0 %vm472_vm0, %v13562_v3  ;;  %1013 = vmatpush1.bf16.msra.mxu0 %v13580_v4  ;;  %v14978_v3 = vld [vmem:[%s21768_s27 + $0x140] ss:$8 sps:$4 sm:$0xff]   ;;  %v14983_v4 = vld [vmem:[%s21767_s26 + $0x2d8] ss:$12 sps:$4 sm:$0xff]  }
  0x53   :  { %1136 = vmatpush1.bf16.msra.mxu1 %v13586_v5  ;;  %1014 = vmatprep.subr.bf16.mxu0 %v13589_v6  ;;  %v14988_v5 = vld [vmem:[%s21767_s26 + $0x2d0] ss:$12 sps:$4 sm:$0xff]  }
  0x54   :  { %1137 = vmatprep.subr.bf16.mxu1 %v21411_v0  ;;  %v14993_v6 = vld [vmem:[%s21768_s27 + $0x154] ss:$8 sps:$4 sm:$0xff]  }
  0x56   :  { %1015 = vmatpush1.bf16.msra.mxu0 %v13587_v7  ;;  %v14998_v7 = vld [vmem:[%s21767_s26 + $0x2ec] ss:$12 sps:$4 sm:$0xff]  }
  0x57   :  { %1138 = vmatpush1.bf16.msra.mxu1 %v13590_v8  ;;  %1533 = vmatprep.subr.bf16.mxu0 %v13596_v9  ;;  %v15006_v8 = vld [vmem:[%s21767_s26 + $0x2f0] ss:$12 sps:$4 sm:$0xff]   ;;  %v15014_v9 = vld [vmem:[%s21767_s26 + $0x2e8] ss:$12 sps:$4 sm:$0xff]  }
  0x58   :  { %696 = vmatmul.mubr.bf16.gmra.mrb[20].mxu1 %v13564_v10  ;;  %1656 = vmatprep.subr.bf16.mxu1 %v21411_v0 }
  0x59   :  { %583 = vmatmul.mubr.bf16.gmra.mrb[20].mxu0 %v13564_v10  ;;  %11048 = vmatprep.mubr.msk.bf16.mxu1 %vm472_vm0, %v13569_v11  ;;  %v15022_v10 = vld [vmem:[%s21767_s26 + $0x304] ss:$12 sps:$4 sm:$0xff]  }
  0x5a   :  { %11039 = vmatprep.mubr.msk.bf16.mxu0 %vm472_vm0, %v13569_v11  ;;  %v15027_v11 = vld [vmem:[%s21768_s27 + $0x150] ss:$8 sps:$4 sm:$0xff]  }
  0x60   :  { %704 = vmatmul.mubr.bf16.gmra.mrb[24].mxu1 %v13571_v12 }
  0x61   :  { %593 = vmatmul.mubr.bf16.gmra.mrb[24].mxu0 %v13571_v12  ;;  %11049 = vmatprep.mubr.msk.bf16.mxu1 %vm472_vm0, %v13576_v13  ;;  %v15034_v12 = vld [vmem:[%s21768_s27 + $0x164] ss:$8 sps:$4 sm:$0xff]  }
  0x62   :  { %11040 = vmatprep.mubr.msk.bf16.mxu0 %vm472_vm0, %v13576_v13  ;;  %v15040_v13 = vld [vmem:[%s21767_s26 + $0x300] ss:$12 sps:$4 sm:$0xff]  }
  0x68   :  { %712 = vmatmul.mubr.bf16.gmra.mrb[28].mxu1 %v13578_v14 }
  0x69   :  { %603 = vmatmul.mubr.bf16.gmra.mrb[28].mxu0 %v13578_v14  ;;  %11050 = vmatprep.mubr.msk.bf16.mxu1 %vm472_vm0, %v13583_v15  ;;  %v15047_v14 = vld [vmem:[%s21767_s26 + $0x308] ss:$12 sps:$4 sm:$0xff]  }
  0x6a   :  { %11041 = vmatprep.mubr.msk.bf16.mxu0 %vm472_vm0, %v13583_v15  ;;  %v15052_v15 = vld [vmem:[%s21767_s26 + $0x31c] ss:$12 sps:$4 sm:$0xff]  }
  0x70   :  { %720 = vmatmul.mubr.bf16.gmra.mrb[32].mxu1 %v13585_v16 }
  0x71   :  { %613 = vmatmul.mubr.bf16.gmra.mrb[32].mxu0 %v13585_v16  ;;  %11108 = vmatprep.mubr.msk.bf16.mxu1 %vm472_vm0, %v13593_v17  ;;  %v15064_v16 = vld [vmem:[%s21767_s26 + $0x318] ss:$12 sps:$4 sm:$0xff]  }
  0x72   :  { %11099 = vmatprep.mubr.msk.bf16.mxu0 %vm472_vm0, %v13593_v17  ;;  %21769 = vst [vmem:[#allocation2_spill] sm:$0xff] %v15064_v16  ;;  %v15071_v17 = vld [vmem:[%s21767_s26 + $0x320] ss:$12 sps:$4 sm:$0xff]  }
  0x73   :  { %21770 = vst [vmem:[#allocation3_spill] sm:$0xff] %v15071_v17 }
  0x78   :  { %1152 = vmatmul.mubr.bf16.vlgmr.msra.gmra.mrb[0].mxu1 %v13591_v18 }
  0x79   :  { %1029 = vmatmul.mubr.bf16.vlgmr.msra.gmra.mrb[0].mxu0 %v13591_v18  ;;  %1657 = vmatpush1.bf16.msra.mxu1 %v13597_v20  ;;  %v15076_v18 = vld [vmem:[%s21767_s26 + $0x334] ss:$12 sps:$4 sm:$0xff]  }
  0x7a   :  { %1534 = vmatpush1.bf16.msra.mxu0 %v13594_v19  ;;  %11109 = vmatprep.mubr.msk.bf16.mxu1 %vm472_vm0, %v14747_v21  ;;  %21771 = vst [vmem:[#allocation4_spill] sm:$0xff] %v15076_v18  ;;  %v15081_v19 = vld [vmem:[%s21768_s27 + $0x160] ss:$8 sps:$4 sm:$0xff]   ;;  %v15087_v20 = vld [vmem:[%s21768_s27 + $0x174] ss:$8 sps:$4 sm:$0xff]  }
  0x7b   :  { %11100 = vmatprep.mubr.msk.bf16.mxu0 %vm472_vm0, %v14747_v21  ;;  %1535 = vmatprep.subr.bf16.mxu0 %v13603_v22  ;;  %v15093_v22 = vld [vmem:[%s21767_s26 + $0x330] ss:$12 sps:$4 sm:$0xff]  }
  0x7c   :  { %1658 = vmatprep.subr.bf16.mxu1 %v21411_v0  ;;  %21772 = vst [vmem:[#allocation5_spill] sm:$0xff] %v15093_v22 }
  0x7d   :  { %1659 = vmatpush1.bf16.msra.mxu1 %v13604_v23  ;;  %v15100_v23 = vld [vmem:[%s21767_s26 + $0x338] ss:$12 sps:$4 sm:$0xff]  }
  0x7e   :  { %1536 = vmatpush1.bf16.msra.mxu0 %v13601_v24  ;;  %1660 = vmatprep.subr.bf16.mxu1 %v21411_v0  ;;  %21773 = vst [vmem:[#allocation6_spill] sm:$0xff] %v15100_v23  ;;  %v15105_v24 = vld [vmem:[%s21767_s26 + $0x34c] ss:$12 sps:$4 sm:$0xff]  }
  0x7f   :  { %1537 = vmatprep.subr.bf16.mxu0 %v13610_v25  ;;  %21774 = vst [vmem:[#allocation7_spill] sm:$0xff] %v15105_v24  ;;  %v13693_v25 = vld [vmem:[%s21767_s26 + $0x348] ss:$12 sps:$4 sm:$0xff]  }
  0x80   :  { %1160 = vmatmul.mubr.bf16.gmra.mrb[4].mxu1 %v14768_v26 }
  0x81   :  { %1039 = vmatmul.mubr.bf16.gmra.mrb[4].mxu0 %v14768_v26  ;;  %11110 = vmatprep.mubr.msk.bf16.mxu1 %vm472_vm0, %v14774_v27 }
  0x82   :  { %11101 = vmatprep.mubr.msk.bf16.mxu0 %vm472_vm0, %v14774_v27  ;;  %1538 = vmatpush1.bf16.msra.mxu0 %v13608_v28  ;;  %v13699_v28 = vld [vmem:[%s21767_s26 + $0x350] ss:$12 sps:$4 sm:$0xff]  }
  0x83   :  { %1661 = vmatpush1.bf16.msra.mxu1 %v13611_v29  ;;  %1539 = vmatprep.subr.bf16.mxu0 %v13616_v30  ;;  %v13702_v29 = vld [vmem:[%s21767_s26 + $0x364] ss:$12 sps:$4 sm:$0xff]  }
  0x84   :  { %1662 = vmatprep.subr.bf16.mxu1 %v21411_v0  ;;  %v15129_v30 = vld [vmem:[%s21768_s27 + $0x170] ss:$8 sps:$4 sm:$0xff]  }
  0x86   :  { %1540 = vmatpush1.bf16.msra.mxu0 %v13614_v32  ;;  %v15135_v32 = vld [vmem:[%s21768_s27 + $0x184] ss:$8 sps:$4 sm:$0xff]  }
  0x87   :  { %1663 = vmatpush1.bf16.msra.mxu1 %v13618_v33  ;;  %1541 = vmatprep.subr.bf16.mxu0 %v13621_v34  ;;  %v13700_v33 = vld [vmem:[%s21767_s26 + $0x360] ss:$12 sps:$4 sm:$0xff]   ;;  %v13706_v34 = vld [vmem:[%s21767_s26 + $0x368] ss:$12 sps:$4 sm:$0xff]  }
  0x88   :  { %1168 = vmatmul.mubr.bf16.gmra.mrb[8].mxu1 %v14795_v31  ;;  %1664 = vmatprep.subr.bf16.mxu1 %v21411_v0 }
  0x89   :  { %1049 = vmatmul.mubr.bf16.gmra.mrb[8].mxu0 %v14795_v31  ;;  %11111 = vmatprep.mubr.msk.bf16.mxu1 %vm472_vm0, %v14809_v35 }
  0x8a   :  { %11102 = vmatprep.mubr.msk.bf16.mxu0 %vm472_vm0, %v14809_v35  ;;  %1542 = vmatpush1.bf16.msra.mxu0 %v13619_v36  ;;  %v13709_v36 = vld [vmem:[%s21767_s26 + $0x37c] ss:$12 sps:$4 sm:$0xff]  }
  0x8b   :  { %1665 = vmatpush1.bf16.msra.mxu1 %v13625_v37  ;;  %1543 = vmatprep.subr.bf16.mxu0 %v13628_v38  ;;  %v13707_v37 = vld [vmem:[%s21767_s26 + $0x378] ss:$12 sps:$4 sm:$0xff]   ;;  %v13713_v38 = vld [vmem:[%s21767_s26 + $0x380] ss:$12 sps:$4 sm:$0xff]  }
  0x8c   :  { %1666 = vmatprep.subr.bf16.mxu1 %v21411_v0 }
  0x8e   :  { %1544 = vmatpush1.bf16.msra.mxu0 %v13626_v39  ;;  %v13716_v39 = vld [vmem:[%s21767_s26 + $0x394] ss:$12 sps:$4 sm:$0xff]  }
  0x8f   :  { %1667 = vmatpush1.bf16.msra.mxu1 %v13632_v41  ;;  %1545 = vmatprep.subr.bf16.mxu0 %v13635_v43  ;;  %v15165_v41 = vld [vmem:[%s21768_s27 + $0x180] ss:$8 sps:$4 sm:$0xff]   ;;  %v15171_v43 = vld [vmem:[%s21768_s27 + $0x194] ss:$8 sps:$4 sm:$0xff]  }
  0x90   :  { %1176 = vmatmul.mubr.bf16.gmra.mrb[12].mxu1 %v14834_v40  ;;  %1668 = vmatprep.subr.bf16.mxu1 %v21411_v0 }
  0x91   :  { %1059 = vmatmul.mubr.bf16.gmra.mrb[12].mxu0 %v14834_v40  ;;  %11112 = vmatprep.mubr.msk.bf16.mxu1 %vm472_vm0, %v14842_v42 }
  0x92   :  { %11103 = vmatprep.mubr.msk.bf16.mxu0 %vm472_vm0, %v14842_v42  ;;  %1546 = vmatpush1.bf16.msra.mxu0 %v13633_v44  ;;  %v13714_v44 = vld [vmem:[%s21767_s26 + $0x390] ss:$12 sps:$4 sm:$0xff]  }
  0x93   :  { %1669 = vmatpush1.bf16.msra.mxu1 %v13639_v45  ;;  %1547 = vmatprep.subr.bf16.mxu0 %v13642_v46  ;;  %v13720_v45 = vld [vmem:[%s21767_s26 + $0x398] ss:$12 sps:$4 sm:$0xff]  }
  0x94   :  { %1670 = vmatprep.subr.bf16.mxu1 %v21411_v0  ;;  %v13723_v46 = vld [vmem:[%s21767_s26 + $0x3ac] ss:$12 sps:$4 sm:$0xff]  }
  0x96   :  { %1548 = vmatpush1.bf16.msra.mxu0 %v13640_v47  ;;  %v13721_v47 = vld [vmem:[%s21767_s26 + $0x3a8] ss:$12 sps:$4 sm:$0xff]  }
  0x97   :  { %1671 = vmatpush1.bf16.msra.mxu1 %v13646_v49  ;;  %1549 = vmatprep.subr.bf16.mxu0 %v13649_v50  ;;  %v13724_v49 = vld [vmem:[%s21767_s26 + $0x3b0] ss:$12 sps:$4 sm:$0xff]  }
  0x98   :  { %1184 = vmatmul.mubr.bf16.gmra.mrb[16].mxu1 %v14870_v48  ;;  %1672 = vmatprep.subr.bf16.mxu1 %v21411_v0  ;;  %v13730_v50 = vld [vmem:[%s21767_s26 + $0x3c4] ss:$12 sps:$4 sm:$0xff]  }
  0x99   :  { %1069 = vmatmul.mubr.bf16.gmra.mrb[16].mxu0 %v14870_v48  ;;  %11113 = vmatprep.mubr.msk.bf16.mxu1 %vm472_vm0, %v14881_v51 }
  0x9a   :  { %11104 = vmatprep.mubr.msk.bf16.mxu0 %vm472_vm0, %v14881_v51  ;;  %1550 = vmatpush1.bf16.msra.mxu0 %v13647_v52  ;;  %v15201_v52 = vld [vmem:[%s21768_s27 + $0x190] ss:$8 sps:$4 sm:$0xff]  }
  0x9b   :  { %1673 = vmatpush1.bf16.msra.mxu1 %v13653_v53  ;;  %1551 = vmatprep.subr.bf16.mxu0 %v13656_v54  ;;  %v15207_v53 = vld [vmem:[%s21768_s27 + $0x1a4] ss:$8 sps:$4 sm:$0xff]   ;;  %v15219_v54 = vld [vmem:[%s21768_s27 + $0x1a0] ss:$8 sps:$4 sm:$0xff]  }
  0x9c   :  { %1674 = vmatprep.subr.bf16.mxu1 %v21411_v0 }
  0x9e   :  { %1552 = vmatpush1.bf16.msra.mxu0 %v13654_v55  ;;  %v15224_v55 = vld [vmem:[%s21768_s27 + $0x1b4] ss:$8 sps:$4 sm:$0xff]  }
  0x9f   :  { %1675 = vmatpush1.bf16.msra.mxu1 %v13657_v57  ;;  %2124 = vmatprep.subr.bf16.mxu0 %v13663_v58  ;;  %v15235_v57 = vld [vmem:[%s21768_s27 + $0x1b0] ss:$8 sps:$4 sm:$0xff]   ;;  %v15240_v58 = vld [vmem:[%s21768_s27 + $0x1c4] ss:$8 sps:$4 sm:$0xff]  }
  0xa0   :  { %1192 = vmatmul.mubr.bf16.gmra.mrb[20].mxu1 %v14906_v56  ;;  %2247 = vmatprep.subr.bf16.mxu1 %v21411_v0 }
  0xa1   :  { %1079 = vmatmul.mubr.bf16.gmra.mrb[20].mxu0 %v14906_v56  ;;  %11114 = vmatprep.mubr.msk.bf16.mxu1 %vm472_vm0, %v14917_v59 }
  0xa2   :  { %11105 = vmatprep.mubr.msk.bf16.mxu0 %vm472_vm0, %v14917_v59 }
  0xa8   :  { %1200 = vmatmul.mubr.bf16.gmra.mrb[24].mxu1 %v14930_v60 }
  0xa9   :  { %1089 = vmatmul.mubr.bf16.gmra.mrb[24].mxu0 %v14930_v60  ;;  %11115 = vmatprep.mubr.msk.bf16.mxu1 %vm472_vm0, %v14935_v61 }
  0xaa   :  { %11106 = vmatprep.mubr.msk.bf16.mxu0 %vm472_vm0, %v14935_v61 }
  0xb0   :  { %1208 = vmatmul.mubr.bf16.gmra.mrb[28].mxu1 %v14946_v62 }
  0xb1   :  { %1099 = vmatmul.mubr.bf16.gmra.mrb[28].mxu0 %v14946_v62  ;;  %11116 = vmatprep.mubr.msk.bf16.mxu1 %vm472_vm0, %v14951_v63 }
  0xb2   :  { %11107 = vmatprep.mubr.msk.bf16.mxu0 %vm472_vm0, %v14951_v63 }
  0xb8   :  { %1216 = vmatmul.mubr.bf16.gmra.mrb[32].mxu1 %v14962_v1 }
  0xb9   :  { %1109 = vmatmul.mubr.bf16.gmra.mrb[32].mxu0 %v14962_v1  ;;  %11214 = vmatprep.mubr.msk.bf16.mxu1 %vm472_vm0, %v14967_v2 }
  0xba   :  { %11205 = vmatprep.mubr.msk.bf16.mxu0 %vm472_vm0, %v14967_v2 }
  0xc0   :  { %1689 = vmatmul.mubr.bf16.vlgmr.msra.gmra.mrb[0].mxu1 %v14978_v3 }
  0xc1   :  { %1566 = vmatmul.mubr.bf16.vlgmr.msra.gmra.mrb[0].mxu0 %v14978_v3  ;;  %2248 = vmatpush1.bf16.msra.mxu1 %v14983_v4 }
  0xc2   :  { %2125 = vmatpush1.bf16.msra.mxu0 %v14988_v5  ;;  %11215 = vmatprep.mubr.msk.bf16.mxu1 %vm472_vm0, %v14993_v6 }
  0xc3   :  { %11206 = vmatprep.mubr.msk.bf16.mxu0 %vm472_vm0, %v14993_v6  ;;  %2126 = vmatprep.subr.bf16.mxu0 %v14998_v7 }
  0xc4   :  { %2249 = vmatprep.subr.bf16.mxu1 %v21411_v0 }
  0xc5   :  { %2250 = vmatpush1.bf16.msra.mxu1 %v15006_v8 }
  0xc6   :  { %2127 = vmatpush1.bf16.msra.mxu0 %v15014_v9  ;;  %2251 = vmatprep.subr.bf16.mxu1 %v21411_v0 }
  0xc7   :  { %2128 = vmatprep.subr.bf16.mxu0 %v15022_v10 }
  0xc8   :  { %1697 = vmatmul.mubr.bf16.gmra.mrb[4].mxu1 %v15027_v11 }
  0xc9   :  { %1576 = vmatmul.mubr.bf16.gmra.mrb[4].mxu0 %v15027_v11  ;;  %11216 = vmatprep.mubr.msk.bf16.mxu1 %vm472_vm0, %v15034_v12 }
  0xca   :  { %11207 = vmatprep.mubr.msk.bf16.mxu0 %vm472_vm0, %v15034_v12  ;;  %2129 = vmatpush1.bf16.msra.mxu0 %v15040_v13 }
  0xcb   :  { %2252 = vmatpush1.bf16.msra.mxu1 %v15047_v14  ;;  %2130 = vmatprep.subr.bf16.mxu0 %v15052_v15 }
  0xcc   :  { %2253 = vmatprep.subr.bf16.mxu1 %v21411_v0 }
  0xce   :  { %2131 = vmatpush1.bf16.msra.mxu0 %v15064_v16  ;;  %v14157_v16 = vld [vmem:[%s21767_s26 + $0xf0] ss:$12 sps:$4 sm:$0xff]  }
  0xcf   :  { %2254 = vmatpush1.bf16.msra.mxu1 %v15071_v17  ;;  %2132 = vmatprep.subr.bf16.mxu0 %v15076_v18  ;;  %v15495_v18 = vld [vmem:[%s21768_s27 + $0x260] ss:$8 sps:$4 sm:$0xff]   ;;  %v14156_v17 = vld [vmem:[%s21767_s26 + $0xf8] ss:$12 sps:$4 sm:$0xff]  }
  0xd0   :  { %1705 = vmatmul.mubr.bf16.gmra.mrb[8].mxu1 %v15081_v19  ;;  %2255 = vmatprep.subr.bf16.mxu1 %v21411_v0 }
  0xd1   :  { %1586 = vmatmul.mubr.bf16.gmra.mrb[8].mxu0 %v15081_v19  ;;  %11217 = vmatprep.mubr.msk.bf16.mxu1 %vm472_vm0, %v15087_v20 }
  0xd2   :  { %11208 = vmatprep.mubr.msk.bf16.mxu0 %vm472_vm0, %v15087_v20  ;;  %2133 = vmatpush1.bf16.msra.mxu0 %v15093_v22  ;;  %v13790_v22 = vld [vmem:[%s21767_s26 + $0x49c] ss:$12 sps:$4 sm:$0xff]  }
  0xd3   :  { %2256 = vmatpush1.bf16.msra.mxu1 %v15100_v23  ;;  %2134 = vmatprep.subr.bf16.mxu0 %v15105_v24  ;;  %v21775_v24 = vmov 0   ;;  %v15409_v23 = vld [vmem:[%s21768_s27 + $0x220] ss:$8 sps:$4 sm:$0xff]  }
  0xd4   :  { %2257 = vmatprep.subr.bf16.mxu1 %v21411_v0 }
  0xd6   :  { %2135 = vmatpush1.bf16.msra.mxu0 %v13693_v25  ;;  %v15251_v25 = vld [vmem:[%s21768_s27 + $0x1c0] ss:$8 sps:$4 sm:$0xff]  }
  0xd7   :  { %2258 = vmatpush1.bf16.msra.mxu1 %v13699_v28  ;;  %2136 = vmatprep.subr.bf16.mxu0 %v13702_v29  ;;  %v15256_v28 = vld [vmem:[%s21768_s27 + $0x1e4] ss:$8 sps:$4 sm:$0xff]   ;;  %v15267_v29 = vld [vmem:[%s21768_s27 + $0x1e0] ss:$8 sps:$4 sm:$0xff]  }
  0xd8   :  { %1713 = vmatmul.mubr.bf16.gmra.mrb[12].mxu1 %v15129_v30  ;;  %2259 = vmatprep.subr.bf16.mxu1 %v21411_v0 }
  0xd9   :  { %1596 = vmatmul.mubr.bf16.gmra.mrb[12].mxu0 %v15129_v30  ;;  %11218 = vmatprep.mubr.msk.bf16.mxu1 %vm472_vm0, %v15135_v32 }
  0xda   :  { %11209 = vmatprep.mubr.msk.bf16.mxu0 %vm472_vm0, %v15135_v32  ;;  %2137 = vmatpush1.bf16.msra.mxu0 %v13700_v33  ;;  %v13731_v33 = vld [vmem:[%s21767_s26 + $0x3c8] ss:$12 sps:$4 sm:$0xff]  }
  0xdb   :  { %2260 = vmatpush1.bf16.msra.mxu1 %v13706_v34  ;;  %2138 = vmatprep.subr.bf16.mxu0 %v13709_v36  ;;  %v13728_v34 = vld [vmem:[%s21767_s26 + $0x3c0] ss:$12 sps:$4 sm:$0xff]   ;;  %v15278_v36 = vld [vmem:[%s21768_s27 + $0x1f4] ss:$8 sps:$4 sm:$0xff]  }
  0xdc   :  { %2261 = vmatprep.subr.bf16.mxu1 %v21411_v0 }
  0xde   :  { %2139 = vmatpush1.bf16.msra.mxu0 %v13707_v37  ;;  %v13737_v37 = vld [vmem:[%s21767_s26 + $0x3dc] ss:$12 sps:$4 sm:$0xff]  }
  0xdf   :  { %2262 = vmatpush1.bf16.msra.mxu1 %v13713_v38  ;;  %2140 = vmatprep.subr.bf16.mxu0 %v13716_v39  ;;  %v13738_v38 = vld [vmem:[%s21767_s26 + $0x3e0] ss:$12 sps:$4 sm:$0xff]   ;;  %v13735_v39 = vld [vmem:[%s21767_s26 + $0x3d8] ss:$12 sps:$4 sm:$0xff]  }
  0xe0   :  { %1721 = vmatmul.mubr.bf16.gmra.mrb[16].mxu1 %v15165_v41  ;;  %2263 = vmatprep.subr.bf16.mxu1 %v21411_v0 }
  0xe1   :  { %1606 = vmatmul.mubr.bf16.gmra.mrb[16].mxu0 %v15165_v41  ;;  %11219 = vmatprep.mubr.msk.bf16.mxu1 %vm472_vm0, %v15171_v43 }
  0xe2   :  { %11210 = vmatprep.mubr.msk.bf16.mxu0 %vm472_vm0, %v15171_v43  ;;  %2141 = vmatpush1.bf16.msra.mxu0 %v13714_v44  ;;  %v13744_v44 = vld [vmem:[%s21767_s26 + $0x3f4] ss:$12 sps:$4 sm:$0xff]  }
  0xe3   :  { %2264 = vmatpush1.bf16.msra.mxu1 %v13720_v45  ;;  %2142 = vmatprep.subr.bf16.mxu0 %v13723_v46  ;;  %v15301_v45 = vld [vmem:[%s21768_s27 + $0x1f0] ss:$8 sps:$4 sm:$0xff]   ;;  %v15307_v46 = vld [vmem:[%s21768_s27 + $0x204] ss:$8 sps:$4 sm:$0xff]  }
  0xe4   :  { %2265 = vmatprep.subr.bf16.mxu1 %v21411_v0 }
  0xe6   :  { %2143 = vmatpush1.bf16.msra.mxu0 %v13721_v47  ;;  %v13742_v47 = vld [vmem:[%s21767_s26 + $0x3f0] ss:$12 sps:$4 sm:$0xff]  }
  0xe7   :  { %2266 = vmatpush1.bf16.msra.mxu1 %v13724_v49  ;;  %2619 = vmatprep.subr.bf16.mxu0 %v13730_v50  ;;  %v13745_v49 = vld [vmem:[%s21767_s26 + $0x3f8] ss:$12 sps:$4 sm:$0xff]  }
  0xe8   :  { %1729 = vmatmul.mubr.bf16.gmra.mrb[20].mxu1 %v15201_v52  ;;  %2742 = vmatprep.subr.bf16.mxu1 %v21411_v0  ;;  %v13750_v50 = vld [vmem:[%s21767_s26 + $0x40c] ss:$12 sps:$4 sm:$0xff]  }
  0xe9   :  { %1616 = vmatmul.mubr.bf16.gmra.mrb[20].mxu0 %v15201_v52  ;;  %11220 = vmatprep.mubr.msk.bf16.mxu1 %vm472_vm0, %v15207_v53 }
  0xea   :  { %11211 = vmatprep.mubr.msk.bf16.mxu0 %vm472_vm0, %v15207_v53 }
  0xf0   :  { %1737 = vmatmul.mubr.bf16.gmra.mrb[24].mxu1 %v15219_v54 }
  0xf1   :  { %1626 = vmatmul.mubr.bf16.gmra.mrb[24].mxu0 %v15219_v54  ;;  %11221 = vmatprep.mubr.msk.bf16.mxu1 %vm472_vm0, %v15224_v55 }
  0xf2   :  { %11212 = vmatprep.mubr.msk.bf16.mxu0 %vm472_vm0, %v15224_v55 }
  0xf8   :  { %1745 = vmatmul.mubr.bf16.gmra.mrb[28].mxu1 %v15235_v57 }
  0xf9   :  { %1636 = vmatmul.mubr.bf16.gmra.mrb[28].mxu0 %v15235_v57  ;;  %11222 = vmatprep.mubr.msk.bf16.mxu1 %vm472_vm0, %v15240_v58 }
  0xfa   :  { %11213 = vmatprep.mubr.msk.bf16.mxu0 %vm472_vm0, %v15240_v58 }
 0x100   :  { %1753 = vmatmul.mubr.bf16.gmra.mrb[32].mxu1 %v15251_v25 }
 0x101   :  { %1646 = vmatmul.mubr.bf16.gmra.mrb[32].mxu0 %v15251_v25  ;;  %11320 = vmatprep.mubr.msk.bf16.mxu1 %vm472_vm0, %v15256_v28 }
 0x102   :  { %11311 = vmatprep.mubr.msk.bf16.mxu0 %vm472_vm0, %v15256_v28 }
 0x108   :  { %2280 = vmatmul.mubr.bf16.vlgmr.msra.gmra.mrb[0].mxu1 %v15267_v29 }
 0x109   :  { %2157 = vmatmul.mubr.bf16.vlgmr.msra.gmra.mrb[0].mxu0 %v15267_v29  ;;  %2743 = vmatpush1.bf16.msra.mxu1 %v13731_v33  ;;  %v13748_v33 = vld [vmem:[%s21767_s26 + $0x408] ss:$12 sps:$4 sm:$0xff]  }
 0x10a   :  { %2620 = vmatpush1.bf16.msra.mxu0 %v13728_v34  ;;  %11321 = vmatprep.mubr.msk.bf16.mxu1 %vm472_vm0, %v15278_v36  ;;  %v13752_v34 = vld [vmem:[%s21767_s26 + $0x410] ss:$12 sps:$4 sm:$0xff]  }
 0x10b   :  { %11312 = vmatprep.mubr.msk.bf16.mxu0 %vm472_vm0, %v15278_v36  ;;  %2621 = vmatprep.subr.bf16.mxu0 %v13737_v37  ;;  %v13755_v37 = vld [vmem:[%s21767_s26 + $0x424] ss:$12 sps:$4 sm:$0xff]  }
 0x10c   :  { %2744 = vmatprep.subr.bf16.mxu1 %v21411_v0 }
 0x10d   :  { %2745 = vmatpush1.bf16.msra.mxu1 %v13738_v38  ;;  %v15337_v38 = vld [vmem:[%s21768_s27 + $0x200] ss:$8 sps:$4 sm:$0xff]  }
 0x10e   :  { %2622 = vmatpush1.bf16.msra.mxu0 %v13735_v39  ;;  %2746 = vmatprep.subr.bf16.mxu1 %v21411_v0  ;;  %v15343_v39 = vld [vmem:[%s21768_s27 + $0x214] ss:$8 sps:$4 sm:$0xff]  }
 0x10f   :  { %2623 = vmatprep.subr.bf16.mxu0 %v13744_v44  ;;  %v13753_v44 = vld [vmem:[%s21767_s26 + $0x420] ss:$12 sps:$4 sm:$0xff]  }
 0x110   :  { %2288 = vmatmul.mubr.bf16.gmra.mrb[4].mxu1 %v15301_v45 }
 0x111   :  { %2167 = vmatmul.mubr.bf16.gmra.mrb[4].mxu0 %v15301_v45  ;;  %11322 = vmatprep.mubr.msk.bf16.mxu1 %vm472_vm0, %v15307_v46 }
 0x112   :  { %11313 = vmatprep.mubr.msk.bf16.mxu0 %vm472_vm0, %v15307_v46  ;;  %2624 = vmatpush1.bf16.msra.mxu0 %v13742_v47  ;;  %v13759_v47 = vld [vmem:[%s21767_s26 + $0x428] ss:$12 sps:$4 sm:$0xff]  }
 0x113   :  { %2747 = vmatpush1.bf16.msra.mxu1 %v13745_v49  ;;  %2625 = vmatprep.subr.bf16.mxu0 %v13750_v50  ;;  %v13762_v49 = vld [vmem:[%s21767_s26 + $0x43c] ss:$12 sps:$4 sm:$0xff]   ;;  %v13760_v50 = vld [vmem:[%s21767_s26 + $0x438] ss:$12 sps:$4 sm:$0xff]  }
 0x114   :  { %2748 = vmatprep.subr.bf16.mxu1 %v21411_v0 }
 0x116   :  { %2626 = vmatpush1.bf16.msra.mxu0 %v13748_v33  ;;  %v13766_v33 = vld [vmem:[%s21767_s26 + $0x440] ss:$12 sps:$4 sm:$0xff]  }
 0x117   :  { %2749 = vmatpush1.bf16.msra.mxu1 %v13752_v34  ;;  %2627 = vmatprep.subr.bf16.mxu0 %v13755_v37  ;;  %v13769_v34 = vld [vmem:[%s21767_s26 + $0x454] ss:$12 sps:$4 sm:$0xff]   ;;  %v15373_v37 = vld [vmem:[%s21768_s27 + $0x210] ss:$8 sps:$4 sm:$0xff]  }
 0x118   :  { %2296 = vmatmul.mubr.bf16.gmra.mrb[8].mxu1 %v15337_v38  ;;  %2750 = vmatprep.subr.bf16.mxu1 %v21411_v0 }
 0x119   :  { %2177 = vmatmul.mubr.bf16.gmra.mrb[8].mxu0 %v15337_v38  ;;  %11323 = vmatprep.mubr.msk.bf16.mxu1 %vm472_vm0, %v15343_v39 }
 0x11a   :  { %11314 = vmatprep.mubr.msk.bf16.mxu0 %vm472_vm0, %v15343_v39  ;;  %2628 = vmatpush1.bf16.msra.mxu0 %v13753_v44  ;;  %v15379_v44 = vld [vmem:[%s21768_s27 + $0x224] ss:$8 sps:$4 sm:$0xff]  }
 0x11b   :  { %2751 = vmatpush1.bf16.msra.mxu1 %v13759_v47  ;;  %2629 = vmatprep.subr.bf16.mxu0 %v13762_v49  ;;  %v13767_v47 = vld [vmem:[%s21767_s26 + $0x450] ss:$12 sps:$4 sm:$0xff]   ;;  %v13773_v49 = vld [vmem:[%s21767_s26 + $0x458] ss:$12 sps:$4 sm:$0xff]  }
 0x11c   :  { %2752 = vmatprep.subr.bf16.mxu1 %v21411_v0  ;;  %v13776_v0 = vld [vmem:[%s21767_s26 + $0x46c] ss:$12 sps:$4 sm:$0xff]  }
 0x11e   :  { %2630 = vmatpush1.bf16.msra.mxu0 %v13760_v50  ;;  %v13774_v50 = vld [vmem:[%s21767_s26 + $0x468] ss:$12 sps:$4 sm:$0xff]  }
 0x11f   :  { %2753 = vmatpush1.bf16.msra.mxu1 %v13766_v33  ;;  %2631 = vmatprep.subr.bf16.mxu0 %v13769_v34  ;;  %v13780_v33 = vld [vmem:[%s21767_s26 + $0x470] ss:$12 sps:$4 sm:$0xff]  }
 0x120   :  { %2304 = vmatmul.mubr.bf16.gmra.mrb[12].mxu1 %v15373_v37  ;;  %2754 = vmatprep.subr.bf16.mxu1 %v21775_v24  ;;  %v13783_v34 = vld [vmem:[%s21767_s26 + $0x484] ss:$12 sps:$4 sm:$0xff]  }
 0x121   :  { %2187 = vmatmul.mubr.bf16.gmra.mrb[12].mxu0 %v15373_v37  ;;  %11324 = vmatprep.mubr.msk.bf16.mxu1 %vm472_vm0, %v15379_v44 }
 0x122   :  { %11315 = vmatprep.mubr.msk.bf16.mxu0 %vm472_vm0, %v15379_v44  ;;  %2632 = vmatpush1.bf16.msra.mxu0 %v13767_v47  ;;  %v15415_v47 = vld [vmem:[%s21768_s27 + $0x234] ss:$8 sps:$4 sm:$0xff]  }
 0x123   :  { %2755 = vmatpush1.bf16.msra.mxu1 %v13773_v49  ;;  %2633 = vmatprep.subr.bf16.mxu0 %v13776_v0  ;;  %v13781_v0 = vld [vmem:[%s21767_s26 + $0x480] ss:$12 sps:$4 sm:$0xff]   ;;  %v13787_v49 = vld [vmem:[%s21767_s26 + $0x488] ss:$12 sps:$4 sm:$0xff]  }
 0x124   :  { %2756 = vmatprep.subr.bf16.mxu1 %v21775_v24 }
 0x126   :  { %2634 = vmatpush1.bf16.msra.mxu0 %v13774_v50  ;;  %v13788_v50 = vld [vmem:[%s21767_s26 + $0x498] ss:$12 sps:$4 sm:$0xff]  }
 0x127   :  { %2757 = vmatpush1.bf16.msra.mxu1 %v13780_v33  ;;  %2635 = vmatprep.subr.bf16.mxu0 %v13783_v34  ;;  %v13791_v33 = vld [vmem:[%s21767_s26 + $0x4a0] ss:$12 sps:$4 sm:$0xff]   ;;  %v15442_v34 = vld [vmem:[%s21768_s27 + $0x230] ss:$8 sps:$4 sm:$0xff]  }
 0x128   :  { %2312 = vmatmul.mubr.bf16.gmra.mrb[16].mxu1 %v15409_v23  ;;  %2758 = vmatprep.subr.bf16.mxu1 %v21775_v24 }
 0x129   :  { %2197 = vmatmul.mubr.bf16.gmra.mrb[16].mxu0 %v15409_v23  ;;  %11325 = vmatprep.mubr.msk.bf16.mxu1 %vm472_vm0, %v15415_v47 }
 0x12a   :  { %11316 = vmatprep.mubr.msk.bf16.mxu0 %vm472_vm0, %v15415_v47  ;;  %2636 = vmatpush1.bf16.msra.mxu0 %v13781_v0  ;;  %v15448_v0 = vld [vmem:[%s21768_s27 + $0x244] ss:$8 sps:$4 sm:$0xff]  }
 0x12b   :  { %2759 = vmatpush1.bf16.msra.mxu1 %v13787_v49  ;;  %2637 = vmatprep.subr.bf16.mxu0 %v13790_v22  ;;  %v14155_v22 = vld [vmem:[%s21767_s26 + $0xf4] ss:$12 sps:$4 sm:$0xff]  }
 0x12c   :  { %2760 = vmatprep.subr.bf16.mxu1 %v21775_v24  ;;  %v15463_v49 = vld [vmem:[%s21768_s27 + $0x240] ss:$8 sps:$4 sm:$0xff]  }
 0x12e   :  { %2638 = vmatpush1.bf16.msra.mxu0 %v13788_v50  ;;  %v15468_v50 = vld [vmem:[%s21768_s27 + $0x254] ss:$8 sps:$4 sm:$0xff]  }
 0x12f   :  { %2761 = vmatpush1.bf16.msra.mxu1 %v13791_v33  ;;  %2901 = vmatprep.subr.bf16.mxu0 %v14155_v22  ;;  %v15479_v33 = vld [vmem:[%s21768_s27 + $0x250] ss:$8 sps:$4 sm:$0xff]   ;;  %v15484_v22 = vld [vmem:[%s21768_s27 + $0x264] ss:$8 sps:$4 sm:$0xff]  }
 0x130   :  { %2320 = vmatmul.mubr.bf16.gmra.mrb[20].mxu1 %v15442_v34  ;;  %3024 = vmatprep.subr.bf16.mxu1 %v21775_v24 }
 0x131   :  { %2207 = vmatmul.mubr.bf16.gmra.mrb[20].mxu0 %v15442_v34  ;;  %11326 = vmatprep.mubr.msk.bf16.mxu1 %vm472_vm0, %v15448_v0 }
 0x132   :  { %11317 = vmatprep.mubr.msk.bf16.mxu0 %vm472_vm0, %v15448_v0 }
 0x138   :  { %2328 = vmatmul.mubr.bf16.gmra.mrb[24].mxu1 %v15463_v49 }
 0x139   :  { %2217 = vmatmul.mubr.bf16.gmra.mrb[24].mxu0 %v15463_v49  ;;  %11327 = vmatprep.mubr.msk.bf16.mxu1 %vm472_vm0, %v15468_v50 }
 0x13a   :  { %11318 = vmatprep.mubr.msk.bf16.mxu0 %vm472_vm0, %v15468_v50 }
 0x140   :  { %2336 = vmatmul.mubr.bf16.gmra.mrb[28].mxu1 %v15479_v33 }
 0x141   :  { %2227 = vmatmul.mubr.bf16.gmra.mrb[28].mxu0 %v15479_v33  ;;  %11328 = vmatprep.mubr.msk.bf16.mxu1 %vm472_vm0, %v15484_v22 }
 0x142   :  { %11319 = vmatprep.mubr.msk.bf16.mxu0 %vm472_vm0, %v15484_v22 }
 0x148   :  { %2344 = vmatmul.mubr.bf16.gmra.mrb[32].mxu1 %v15495_v18 }
 0x149   :  { %2237 = vmatmul.mubr.bf16.gmra.mrb[32].mxu0 %v15495_v18  ;;  %11410 = vmatprep.mubr.msk.bf16.mxu1 %vm472_vm0, %v14747_v21 }
 0x14a   :  { %11401 = vmatprep.mubr.msk.bf16.mxu0 %vm472_vm0, %v14747_v21  ;;  %v14158_v21 = vld [vmem:[%s21767_s26 + $0x10c] ss:$12 sps:$4 sm:$0xff]  }
 0x150   :  { %2775 = vmatmul.mubr.bf16.vlgmr.msra.gmra.mrb[0].mxu1 %v14768_v26 }
 0x151   :  { %2652 = vmatmul.mubr.bf16.vlgmr.msra.gmra.mrb[0].mxu0 %v14768_v26  ;;  %3025 = vmatpush1.bf16.msra.mxu1 %v14156_v17  ;;  %v14159_v26 = vld [vmem:[%s21767_s26 + $0x110] ss:$12 sps:$4 sm:$0xff]   ;;  %v14162_v17 = vld [vmem:[%s21767_s26 + $0x120] ss:$12 sps:$4 sm:$0xff]  }
 0x152   :  { %2902 = vmatpush1.bf16.msra.mxu0 %v14157_v16  ;;  %11411 = vmatprep.mubr.msk.bf16.mxu1 %vm472_vm0, %v14774_v27  ;;  %v14160_v16 = vld [vmem:[%s21767_s26 + $0x108] ss:$12 sps:$4 sm:$0xff]  }
 0x153   :  { %11402 = vmatprep.mubr.msk.bf16.mxu0 %vm472_vm0, %v14774_v27  ;;  %2903 = vmatprep.subr.bf16.mxu0 %v14158_v21  ;;  %v14161_v27 = vld [vmem:[%s21767_s26 + $0x124] ss:$12 sps:$4 sm:$0xff]   ;;  %v14163_v21 = vld [vmem:[%s21767_s26 + $0x128] ss:$12 sps:$4 sm:$0xff]  }
 0x154   :  { %3026 = vmatprep.subr.bf16.mxu1 %v21775_v24 }
 0x155   :  { %3027 = vmatpush1.bf16.msra.mxu1 %v14159_v26  ;;  %v14166_v26 = vld [vmem:[%s21767_s26 + $0x140] ss:$12 sps:$4 sm:$0xff]  }
 0x156   :  { %2904 = vmatpush1.bf16.msra.mxu0 %v14160_v16  ;;  %3028 = vmatprep.subr.bf16.mxu1 %v21775_v24  ;;  %v14167_v16 = vld [vmem:[%s21767_s26 + $0x154] ss:$12 sps:$4 sm:$0xff]  }
 0x157   :  { %2905 = vmatprep.subr.bf16.mxu0 %v14161_v27  ;;  %v14168_v27 = vld [vmem:[%s21767_s26 + $0x150] ss:$12 sps:$4 sm:$0xff]  }
 0x158   :  { %2783 = vmatmul.mubr.bf16.gmra.mrb[4].mxu1 %v14795_v31 }
 0x159   :  { %2662 = vmatmul.mubr.bf16.gmra.mrb[4].mxu0 %v14795_v31  ;;  %11412 = vmatprep.mubr.msk.bf16.mxu1 %vm472_vm0, %v14809_v35  ;;  %v14164_v31 = vld [vmem:[%s21767_s26 + $0x13c] ss:$12 sps:$4 sm:$0xff]  }
 0x15a   :  { %11403 = vmatprep.mubr.msk.bf16.mxu0 %vm472_vm0, %v14809_v35  ;;  %2906 = vmatpush1.bf16.msra.mxu0 %v14162_v17  ;;  %v14165_v35 = vld [vmem:[%s21767_s26 + $0x138] ss:$12 sps:$4 sm:$0xff]  }
 0x15b   :  { %3029 = vmatpush1.bf16.msra.mxu1 %v14163_v21  ;;  %2907 = vmatprep.subr.bf16.mxu0 %v14164_v31  ;;  %v14169_v17 = vld [vmem:[%s21767_s26 + $0x158] ss:$12 sps:$4 sm:$0xff]   ;;  %v14172_v21 = vld [vmem:[%s21767_s26 + $0x170] ss:$12 sps:$4 sm:$0xff]  }
 0x15c   :  { %3030 = vmatprep.subr.bf16.mxu1 %v21775_v24  ;;  %v14173_v31 = vld [vmem:[%s21767_s26 + $0x184] ss:$12 sps:$4 sm:$0xff]  }
 0x15e   :  { %2908 = vmatpush1.bf16.msra.mxu0 %v14165_v35  ;;  %v14174_v35 = vld [vmem:[%s21767_s26 + $0x180] ss:$12 sps:$4 sm:$0xff]  }
 0x15f   :  { %3031 = vmatpush1.bf16.msra.mxu1 %v14166_v26  ;;  %2909 = vmatprep.subr.bf16.mxu0 %v14167_v16  ;;  %v14175_v26 = vld [vmem:[%s21767_s26 + $0x188] ss:$12 sps:$4 sm:$0xff]   ;;  %v14178_v16 = vld [vmem:[%s21767_s26 + $0x1a0] ss:$12 sps:$4 sm:$0xff]  }
 0x160   :  { %2791 = vmatmul.mubr.bf16.gmra.mrb[8].mxu1 %v14834_v40  ;;  %3032 = vmatprep.subr.bf16.mxu1 %v21775_v24 }
 0x161   :  { %2672 = vmatmul.mubr.bf16.gmra.mrb[8].mxu0 %v14834_v40  ;;  %11413 = vmatprep.mubr.msk.bf16.mxu1 %vm472_vm0, %v14842_v42  ;;  %v14170_v40 = vld [vmem:[%s21767_s26 + $0x16c] ss:$12 sps:$4 sm:$0xff]  }
 0x162   :  { %11404 = vmatprep.mubr.msk.bf16.mxu0 %vm472_vm0, %v14842_v42  ;;  %2910 = vmatpush1.bf16.msra.mxu0 %v14168_v27  ;;  %v14171_v42 = vld [vmem:[%s21767_s26 + $0x168] ss:$12 sps:$4 sm:$0xff]  }
 0x163   :  { %3033 = vmatpush1.bf16.msra.mxu1 %v14169_v17  ;;  %2911 = vmatprep.subr.bf16.mxu0 %v14170_v40  ;;  %v14179_v27 = vld [vmem:[%s21767_s26 + $0x1b4] ss:$12 sps:$4 sm:$0xff]   ;;  %v14180_v17 = vld [vmem:[%s21767_s26 + $0x1b0] ss:$12 sps:$4 sm:$0xff]   ;;  %v14181_v40 = vld [vmem:[%s21767_s26 + $0x1b8] ss:$12 sps:$4 sm:$0xff]  }
 0x164   :  { %3034 = vmatprep.subr.bf16.mxu1 %v21775_v24 }
 0x166   :  { %2912 = vmatpush1.bf16.msra.mxu0 %v14171_v42  ;;  %v14184_v42 = vld [vmem:[%s21767_s26 + $0x1d0] ss:$12 sps:$4 sm:$0xff]  }
 0x167   :  { %3035 = vmatpush1.bf16.msra.mxu1 %v14172_v21  ;;  %2913 = vmatprep.subr.bf16.mxu0 %v14173_v31  ;;  %v14185_v21 = vld [vmem:[%s21767_s26 + $0x4] ss:$12 sps:$4 sm:$0xff]  }
 0x168   :  { %2799 = vmatmul.mubr.bf16.gmra.mrb[12].mxu1 %v14870_v48  ;;  %3036 = vmatprep.subr.bf16.mxu1 %v21775_v24  ;;  %v14192_v31 = vld [vmem:[%s21767_s26 + $0x30] ss:$12 sps:$4 sm:$0xff]  }
 0x169   :  { %2682 = vmatmul.mubr.bf16.gmra.mrb[12].mxu0 %v14870_v48  ;;  %11414 = vmatprep.mubr.msk.bf16.mxu1 %vm472_vm0, %v14881_v51  ;;  %v14176_v48 = vld [vmem:[%s21767_s26 + $0x19c] ss:$12 sps:$4 sm:$0xff]  }
 0x16a   :  { %11405 = vmatprep.mubr.msk.bf16.mxu0 %vm472_vm0, %v14881_v51  ;;  %2914 = vmatpush1.bf16.msra.mxu0 %v14174_v35  ;;  %v14177_v51 = vld [vmem:[%s21767_s26 + $0x198] ss:$12 sps:$4 sm:$0xff]  }
 0x16b   :  { %3037 = vmatpush1.bf16.msra.mxu1 %v14175_v26  ;;  %2915 = vmatprep.subr.bf16.mxu0 %v14176_v48  ;;  %v14193_v35 = vld [vmem:[%s21767_s26 + $0x38] ss:$12 sps:$4 sm:$0xff]   ;;  %v14196_v26 = vld [vmem:[%s21767_s26 + $0x50] ss:$12 sps:$4 sm:$0xff]  }
 0x16c   :  { %3038 = vmatprep.subr.bf16.mxu1 %v21775_v24  ;;  %v14197_v48 = vld [vmem:[%s21767_s26 + $0x64] ss:$12 sps:$4 sm:$0xff]  }
 0x16e   :  { %2916 = vmatpush1.bf16.msra.mxu0 %v14177_v51  ;;  %v14198_v51 = vld [vmem:[%s21767_s26 + $0x60] ss:$12 sps:$4 sm:$0xff]  }
 0x16f   :  { %3039 = vmatpush1.bf16.msra.mxu1 %v14178_v16  ;;  %2917 = vmatprep.subr.bf16.mxu0 %v14179_v27  ;;  %v14199_v16 = vld [vmem:[%s21767_s26 + $0x68] ss:$12 sps:$4 sm:$0xff]   ;;  %v14202_v27 = vld [vmem:[%s21767_s26 + $0x80] ss:$12 sps:$4 sm:$0xff]  }
 0x170   :  { %2807 = vmatmul.mubr.bf16.gmra.mrb[16].mxu1 %v14906_v56  ;;  %3040 = vmatprep.subr.bf16.mxu1 %v21775_v24 }
 0x171   :  { %2692 = vmatmul.mubr.bf16.gmra.mrb[16].mxu0 %v14906_v56  ;;  %11415 = vmatprep.mubr.msk.bf16.mxu1 %vm472_vm0, %v14917_v59  ;;  %v14182_v56 = vld [vmem:[%s21767_s26 + $0x1cc] ss:$12 sps:$4 sm:$0xff]  }
 0x172   :  { %11406 = vmatprep.mubr.msk.bf16.mxu0 %vm472_vm0, %v14917_v59  ;;  %2918 = vmatpush1.bf16.msra.mxu0 %v14180_v17  ;;  %v14183_v59 = vld [vmem:[%s21767_s26 + $0x1c8] ss:$12 sps:$4 sm:$0xff]  }
 0x173   :  { %3041 = vmatpush1.bf16.msra.mxu1 %v14181_v40  ;;  %2919 = vmatprep.subr.bf16.mxu0 %v14182_v56  ;;  %v14203_v17 = vld [vmem:[%s21767_s26 + $0x94] ss:$12 sps:$4 sm:$0xff]   ;;  %v14204_v40 = vld [vmem:[%s21767_s26 + $0x90] ss:$12 sps:$4 sm:$0xff]   ;;  %v14205_v56 = vld [vmem:[%s21767_s26 + $0x98] ss:$12 sps:$4 sm:$0xff]  }
 0x174   :  { %3042 = vmatprep.subr.bf16.mxu1 %v21775_v24 }
 0x176   :  { %2920 = vmatpush1.bf16.msra.mxu0 %v14183_v59  ;;  %v14208_v59 = vld [vmem:[%s21767_s26 + $0xb0] ss:$12 sps:$4 sm:$0xff]  }
 0x177   :  { %3043 = vmatpush1.bf16.msra.mxu1 %v14184_v42  ;;  %3129 = vmatprep.subr.bf16.mxu0 %v14185_v21  ;;  %v14209_v42 = vld [vmem:[%s21767_s26 + $0xc4] ss:$12 sps:$4 sm:$0xff]   ;;  %v14210_v21 = vld [vmem:[%s21767_s26 + $0xc0] ss:$12 sps:$4 sm:$0xff]  }
 0x178   :  { %2815 = vmatmul.mubr.bf16.gmra.mrb[20].mxu1 %v14930_v60  ;;  %3252 = vmatprep.subr.bf16.mxu1 %v21775_v24 }
 0x179   :  { %2702 = vmatmul.mubr.bf16.gmra.mrb[20].mxu0 %v14930_v60  ;;  %11416 = vmatprep.mubr.msk.bf16.mxu1 %vm472_vm0, %v14935_v61  ;;  %v15648_v60 = vld [vmem:[%s21768_s27 + $0x94] ss:$8 sps:$4 sm:$0xff]  }
 0x17a   :  { %11407 = vmatprep.mubr.msk.bf16.mxu0 %vm472_vm0, %v14935_v61  ;;  %v15659_v61 = vld [vmem:[%s21768_s27 + $0x90] ss:$8 sps:$4 sm:$0xff]  }
 0x180   :  { %2823 = vmatmul.mubr.bf16.gmra.mrb[24].mxu1 %v14946_v62 }
 0x181   :  { %2712 = vmatmul.mubr.bf16.gmra.mrb[24].mxu0 %v14946_v62  ;;  %11417 = vmatprep.mubr.msk.bf16.mxu1 %vm472_vm0, %v14951_v63  ;;  %v14186_v62 = vld [vmem:[%s21767_s26 + $0x8] ss:$12 sps:$4 sm:$0xff]  }
 0x182   :  { %11408 = vmatprep.mubr.msk.bf16.mxu0 %vm472_vm0, %v14951_v63  ;;  %v14187_v63 = vld [vmem:[%s21767_s26] ss:$12 sps:$4 sm:$0xff]  }
 0x188   :  { %2831 = vmatmul.mubr.bf16.gmra.mrb[28].mxu1 %v14962_v1 }
 0x189   :  { %2722 = vmatmul.mubr.bf16.gmra.mrb[28].mxu0 %v14962_v1  ;;  %11418 = vmatprep.mubr.msk.bf16.mxu1 %vm472_vm0, %v15648_v60  ;;  %v14188_v1 = vld [vmem:[%s21767_s26 + $0x1c] ss:$12 sps:$4 sm:$0xff]  }
 0x18a   :  { %11409 = vmatprep.mubr.msk.bf16.mxu0 %vm472_vm0, %v15648_v60 }
 0x190   :  { %2839 = vmatmul.mubr.bf16.gmra.mrb[32].mxu1 %v15659_v61 }
 0x191   :  { %2732 = vmatmul.mubr.bf16.gmra.mrb[32].mxu0 %v15659_v61  ;;  %11428 = vmatprep.mubr.msk.bf16.mxu1 %vm472_vm0, %v15256_v28 }
 0x192   :  { %11419 = vmatprep.mubr.msk.bf16.mxu0 %vm472_vm0, %v15256_v28  ;;  %v14189_v28 = vld [vmem:[%s21767_s26 + $0x20] ss:$12 sps:$4 sm:$0xff]  }
 0x198   :  { %3057 = vmatmul.mubr.bf16.vlgmr.msra.gmra.mrb[36].mxu1 %v15267_v29 }
 0x199   :  { %2934 = vmatmul.mubr.bf16.vlgmr.msra.gmra.mrb[36].mxu0 %v15267_v29  ;;  %3253 = vmatpush1.bf16.msra.mxu1 %v14186_v62  ;;  %v14190_v29 = vld [vmem:[%s21767_s26 + $0x18] ss:$12 sps:$4 sm:$0xff]   ;;  %v14211_v62 = vld [vmem:[%s21767_s26 + $0xc8] ss:$12 sps:$4 sm:$0xff]  }
 0x19a   :  { %3130 = vmatpush1.bf16.msra.mxu0 %v14187_v63  ;;  %11429 = vmatprep.mubr.msk.bf16.mxu1 %vm472_vm0, %v15278_v36  ;;  %v14214_v63 = vld [vmem:[%s21767_s26 + $0xe0] ss:$12 sps:$4 sm:$0xff]  }
 0x19b   :  { %11420 = vmatprep.mubr.msk.bf16.mxu0 %vm472_vm0, %v15278_v36  ;;  %3131 = vmatprep.subr.bf16.mxu0 %v14188_v1  ;;  %v14191_v36 = vld [vmem:[%s21767_s26 + $0x34] ss:$12 sps:$4 sm:$0xff]   ;;  %v14215_v1 = vld [vmem:[%s21767_s26 + $0x1e4] ss:$12 sps:$4 sm:$0xff]  }
 0x19c   :  { %3254 = vmatprep.subr.bf16.mxu1 %v21775_v24 }
 0x19d   :  { %3255 = vmatpush1.bf16.msra.mxu1 %v14189_v28  ;;  %v14228_v28 = vld [vmem:[%s21767_s26 + $0x240] ss:$12 sps:$4 sm:$0xff]  }
 0x19e   :  { %3132 = vmatpush1.bf16.msra.mxu0 %v14190_v29  ;;  %3256 = vmatprep.subr.bf16.mxu1 %v21775_v24  ;;  %v14229_v29 = vld [vmem:[%s21767_s26 + $0x248] ss:$12 sps:$4 sm:$0xff]  }
 0x19f   :  { %3133 = vmatprep.subr.bf16.mxu0 %v14191_v36  ;;  %v14232_v36 = vld [vmem:[%s21767_s26 + $0x260] ss:$12 sps:$4 sm:$0xff]  }
 0x1a0   :  { %3065 = vmatmul.mubr.bf16.gmra.mrb[40].mxu1 %v15301_v45 }
 0x1a1   :  { %2944 = vmatmul.mubr.bf16.gmra.mrb[40].mxu0 %v15301_v45  ;;  %11430 = vmatprep.mubr.msk.bf16.mxu1 %vm472_vm0, %v15307_v46  ;;  %v14194_v45 = vld [vmem:[%s21767_s26 + $0x4c] ss:$12 sps:$4 sm:$0xff]  }
 0x1a2   :  { %11421 = vmatprep.mubr.msk.bf16.mxu0 %vm472_vm0, %v15307_v46  ;;  %3134 = vmatpush1.bf16.msra.mxu0 %v14192_v31  ;;  %v14195_v46 = vld [vmem:[%s21767_s26 + $0x48] ss:$12 sps:$4 sm:$0xff]  }
 0x1a3   :  { %3257 = vmatpush1.bf16.msra.mxu1 %v14193_v35  ;;  %3135 = vmatprep.subr.bf16.mxu0 %v14194_v45  ;;  %v14233_v31 = vld [vmem:[%s21767_s26 + $0x274] ss:$12 sps:$4 sm:$0xff]   ;;  %v14234_v35 = vld [vmem:[%s21767_s26 + $0x270] ss:$12 sps:$4 sm:$0xff]   ;;  %v14235_v45 = vld [vmem:[%s21767_s26 + $0x278] ss:$12 sps:$4 sm:$0xff]  }
 0x1a4   :  { %3258 = vmatprep.subr.bf16.mxu1 %v21775_v24 }
 0x1a6   :  { %3136 = vmatpush1.bf16.msra.mxu0 %v14195_v46  ;;  %v14238_v46 = vld [vmem:[%s21767_s26 + $0x290] ss:$12 sps:$4 sm:$0xff]  }
 0x1a7   :  { %3259 = vmatpush1.bf16.msra.mxu1 %v14196_v26  ;;  %3137 = vmatprep.subr.bf16.mxu0 %v14197_v48  ;;  %v14239_v26 = vld [vmem:[%s21767_s26 + $0x2a4] ss:$12 sps:$4 sm:$0xff]   ;;  %v14240_v48 = vld [vmem:[%s21767_s26 + $0x2a0] ss:$12 sps:$4 sm:$0xff]  }
 0x1a8   :  { %3073 = vmatmul.mubr.bf16.gmra.mrb[44].mxu1 %v15337_v38  ;;  %3260 = vmatprep.subr.bf16.mxu1 %v21775_v24 }
 0x1a9   :  { %2954 = vmatmul.mubr.bf16.gmra.mrb[44].mxu0 %v15337_v38  ;;  %11431 = vmatprep.mubr.msk.bf16.mxu1 %vm472_vm0, %v15343_v39  ;;  %v14200_v38 = vld [vmem:[%s21767_s26 + $0x7c] ss:$12 sps:$4 sm:$0xff]  }
 0x1aa   :  { %11422 = vmatprep.mubr.msk.bf16.mxu0 %vm472_vm0, %v15343_v39  ;;  %3138 = vmatpush1.bf16.msra.mxu0 %v14198_v51  ;;  %v14201_v39 = vld [vmem:[%s21767_s26 + $0x78] ss:$12 sps:$4 sm:$0xff]   ;;  %v14241_v51 = vld [vmem:[%s21767_s26 + $0x2a8] ss:$12 sps:$4 sm:$0xff]  }
 0x1ab   :  { %3261 = vmatpush1.bf16.msra.mxu1 %v14199_v16  ;;  %3139 = vmatprep.subr.bf16.mxu0 %v14200_v38  ;;  %v14244_v16 = vld [vmem:[%s21767_s26 + $0x2c0] ss:$12 sps:$4 sm:$0xff]  }
 0x1ac   :  { %3262 = vmatprep.subr.bf16.mxu1 %v21775_v24  ;;  %v14245_v38 = vld [vmem:[%s21767_s26 + $0x2d4] ss:$12 sps:$4 sm:$0xff]  }
 0x1ae   :  { %3140 = vmatpush1.bf16.msra.mxu0 %v14201_v39 }
 0x1af   :  { %3263 = vmatpush1.bf16.msra.mxu1 %v14202_v27  ;;  %3141 = vmatprep.subr.bf16.mxu0 %v14203_v17 }
 0x1b0   :  { %3081 = vmatmul.mubr.bf16.gmra.mrb[48].mxu1 %v15373_v37  ;;  %3264 = vmatprep.subr.bf16.mxu1 %v21775_v24 }
 0x1b1   :  { %2964 = vmatmul.mubr.bf16.gmra.mrb[48].mxu0 %v15373_v37  ;;  %11432 = vmatprep.mubr.msk.bf16.mxu1 %vm472_vm0, %v15379_v44  ;;  %v14206_v37 = vld [vmem:[%s21767_s26 + $0xac] ss:$12 sps:$4 sm:$0xff]  }
 0x1b2   :  { %11423 = vmatprep.mubr.msk.bf16.mxu0 %vm472_vm0, %v15379_v44  ;;  %3142 = vmatpush1.bf16.msra.mxu0 %v14204_v40  ;;  %v14207_v44 = vld [vmem:[%s21767_s26 + $0xa8] ss:$12 sps:$4 sm:$0xff]  }
 0x1b3   :  { %3265 = vmatpush1.bf16.msra.mxu1 %v14205_v56  ;;  %3143 = vmatprep.subr.bf16.mxu0 %v14206_v37 }
 0x1b4   :  { %3266 = vmatprep.subr.bf16.mxu1 %v21775_v24 }
 0x1b6   :  { %3144 = vmatpush1.bf16.msra.mxu0 %v14207_v44 }
 0x1b7   :  { %3267 = vmatpush1.bf16.msra.mxu1 %v14208_v59  ;;  %3145 = vmatprep.subr.bf16.mxu0 %v14209_v42  ;;  %v14247_v59 = vld [vmem:[%s21768_s27 + $0x10] ss:$8 sps:$4 sm:$0xff]   ;;  %v14248_v42 = vld [vmem:[%s21768_s27 + $0x24] ss:$8 sps:$4 sm:$0xff]  }
 0x1b8   :  { %3089 = vmatmul.mubr.bf16.gmra.mrb[52].mxu1 %v15409_v23  ;;  %3268 = vmatprep.subr.bf16.mxu1 %v21775_v24 }
 0x1b9   :  { %2974 = vmatmul.mubr.bf16.gmra.mrb[52].mxu0 %v15409_v23  ;;  %11433 = vmatprep.mubr.msk.bf16.mxu1 %vm472_vm0, %v15415_v47  ;;  %v14212_v23 = vld [vmem:[%s21767_s26 + $0xdc] ss:$12 sps:$4 sm:$0xff]  }
 0x1ba   :  { %11424 = vmatprep.mubr.msk.bf16.mxu0 %vm472_vm0, %v15415_v47  ;;  %3146 = vmatpush1.bf16.msra.mxu0 %v14210_v21  ;;  %v14213_v47 = vld [vmem:[%s21767_s26 + $0xd8] ss:$12 sps:$4 sm:$0xff]  }
 0x1bb   :  { %3269 = vmatpush1.bf16.msra.mxu1 %v14211_v62  ;;  %3147 = vmatprep.subr.bf16.mxu0 %v14212_v23 }
 0x1bc   :  { %3270 = vmatprep.subr.bf16.mxu1 %v21775_v24 }
 0x1be   :  { %3148 = vmatpush1.bf16.msra.mxu0 %v14213_v47 }
 0x1bf   :  { %3271 = vmatpush1.bf16.msra.mxu1 %v14214_v63  ;;  %3357 = vmatprep.subr.bf16.mxu0 %v14215_v1 }
 0x1c0   :  { %3097 = vmatmul.mubr.bf16.gmra.mrb[56].mxu1 %v15442_v34  ;;  %3480 = vmatprep.subr.bf16.mxu1 %v21775_v24 }
 0x1c1   :  { %2984 = vmatmul.mubr.bf16.gmra.mrb[56].mxu0 %v15442_v34  ;;  %11434 = vmatprep.mubr.msk.bf16.mxu1 %vm472_vm0, %v15448_v0  ;;  %v14216_v34 = vld [vmem:[%s21767_s26 + $0x1e8] ss:$12 sps:$4 sm:$0xff]  }
 0x1c2   :  { %11425 = vmatprep.mubr.msk.bf16.mxu0 %vm472_vm0, %v15448_v0  ;;  %v14217_v0 = vld [vmem:[%s21767_s26 + $0x1e0] ss:$12 sps:$4 sm:$0xff]  }
 0x1c8   :  { %3105 = vmatmul.mubr.bf16.gmra.mrb[60].mxu1 %v15463_v49 }
 0x1c9   :  { %2994 = vmatmul.mubr.bf16.gmra.mrb[60].mxu0 %v15463_v49  ;;  %11435 = vmatprep.mubr.msk.bf16.mxu1 %vm472_vm0, %v15468_v50  ;;  %v14222_v49 = vld [vmem:[%s21767_s26 + $0x210] ss:$12 sps:$4 sm:$0xff]  }
 0x1ca   :  { %11426 = vmatprep.mubr.msk.bf16.mxu0 %vm472_vm0, %v15468_v50  ;;  %v14223_v50 = vld [vmem:[%s21767_s26 + $0x218] ss:$12 sps:$4 sm:$0xff]  }
 0x1d0   :  { %3113 = vmatmul.mubr.bf16.gmra.mrb[64].mxu1 %v15479_v33 }
 0x1d1   :  { %3004 = vmatmul.mubr.bf16.gmra.mrb[64].mxu0 %v15479_v33  ;;  %11436 = vmatprep.mubr.msk.bf16.mxu1 %vm472_vm0, %v15484_v22  ;;  %v14226_v33 = vld [vmem:[%s21767_s26 + $0x230] ss:$12 sps:$4 sm:$0xff]  }
 0x1d2   :  { %11427 = vmatprep.mubr.msk.bf16.mxu0 %vm472_vm0, %v15484_v22  ;;  %v14227_v22 = vld [vmem:[%s21767_s26 + $0x244] ss:$12 sps:$4 sm:$0xff]  }
 0x1d8   :  { %3121 = vmatmul.mubr.bf16.gmra.mrb[68].mxu1 %v15495_v18 }
 0x1d9   :  { %3014 = vmatmul.mubr.bf16.gmra.mrb[68].mxu0 %v15495_v18  ;;  %11446 = vmatprep.mubr.msk.bf16.mxu1 %vm472_vm0, %v14967_v2  ;;  %v14220_v18 = vld [vmem:[%s21767_s26 + $0x1f8] ss:$12 sps:$4 sm:$0xff]  }
 0x1da   :  { %11437 = vmatprep.mubr.msk.bf16.mxu0 %vm472_vm0, %v14967_v2  ;;  %v14218_v2 = vld [vmem:[%s21767_s26 + $0x1fc] ss:$12 sps:$4 sm:$0xff]  }
 0x1e0   :  { %3285 = vmatmul.mubr.bf16.vlgmr.msra.gmra.mrb[36].mxu1 %v14978_v3 }
 0x1e1   :  { %3162 = vmatmul.mubr.bf16.vlgmr.msra.gmra.mrb[36].mxu0 %v14978_v3  ;;  %3481 = vmatpush1.bf16.msra.mxu1 %v14216_v34  ;;  %v14219_v3 = vld [vmem:[%s21767_s26 + $0x200] ss:$12 sps:$4 sm:$0xff]  }
 0x1e2   :  { %3358 = vmatpush1.bf16.msra.mxu0 %v14217_v0  ;;  %11447 = vmatprep.mubr.msk.bf16.mxu1 %vm472_vm0, %v14993_v6 }
 0x1e3   :  { %11438 = vmatprep.mubr.msk.bf16.mxu0 %vm472_vm0, %v14993_v6  ;;  %3359 = vmatprep.subr.bf16.mxu0 %v14218_v2  ;;  %v14221_v6 = vld [vmem:[%s21767_s26 + $0x214] ss:$12 sps:$4 sm:$0xff]  }
 0x1e4   :  { %3482 = vmatprep.subr.bf16.mxu1 %v21775_v24 }
 0x1e5   :  { %3483 = vmatpush1.bf16.msra.mxu1 %v14219_v3 }
 0x1e6   :  { %3360 = vmatpush1.bf16.msra.mxu0 %v14220_v18  ;;  %3484 = vmatprep.subr.bf16.mxu1 %v21775_v24 }
 0x1e7   :  { %3361 = vmatprep.subr.bf16.mxu0 %v14221_v6 }
 0x1e8   :  { %3293 = vmatmul.mubr.bf16.gmra.mrb[40].mxu1 %v15027_v11 }
 0x1e9   :  { %3172 = vmatmul.mubr.bf16.gmra.mrb[40].mxu0 %v15027_v11  ;;  %11448 = vmatprep.mubr.msk.bf16.mxu1 %vm472_vm0, %v15034_v12  ;;  %v14224_v11 = vld [vmem:[%s21767_s26 + $0x22c] ss:$12 sps:$4 sm:$0xff]  }
 0x1ea   :  { %11439 = vmatprep.mubr.msk.bf16.mxu0 %vm472_vm0, %v15034_v12  ;;  %3362 = vmatpush1.bf16.msra.mxu0 %v14222_v49  ;;  %v14225_v12 = vld [vmem:[%s21767_s26 + $0x228] ss:$12 sps:$4 sm:$0xff]  }
 0x1eb   :  { %3485 = vmatpush1.bf16.msra.mxu1 %v14223_v50  ;;  %3363 = vmatprep.subr.bf16.mxu0 %v14224_v11  ;;  %v14249_v49 = vld [vmem:[%s21768_s27 + $0x20] ss:$8 sps:$4 sm:$0xff]  }
 0x1ec   :  { %3486 = vmatprep.subr.bf16.mxu1 %v21775_v24 }
 0x1ee   :  { %3364 = vmatpush1.bf16.msra.mxu0 %v14225_v12 }
 0x1ef   :  { %3487 = vmatpush1.bf16.msra.mxu1 %v14226_v33  ;;  %3365 = vmatprep.subr.bf16.mxu0 %v14227_v22 }
 0x1f0   :  { %3301 = vmatmul.mubr.bf16.gmra.mrb[44].mxu1 %v15081_v19  ;;  %3488 = vmatprep.subr.bf16.mxu1 %v21775_v24 }
 0x1f1   :  { %3182 = vmatmul.mubr.bf16.gmra.mrb[44].mxu0 %v15081_v19  ;;  %11449 = vmatprep.mubr.msk.bf16.mxu1 %vm472_vm0, %v15087_v20  ;;  %v14230_v19 = vld [vmem:[%s21767_s26 + $0x25c] ss:$12 sps:$4 sm:$0xff]  }
 0x1f2   :  { %11440 = vmatprep.mubr.msk.bf16.mxu0 %vm472_vm0, %v15087_v20  ;;  %3366 = vmatpush1.bf16.msra.mxu0 %v14228_v28  ;;  %v14231_v20 = vld [vmem:[%s21767_s26 + $0x258] ss:$12 sps:$4 sm:$0xff]  }
 0x1f3   :  { %3489 = vmatpush1.bf16.msra.mxu1 %v14229_v29  ;;  %3367 = vmatprep.subr.bf16.mxu0 %v14230_v19 }
 0x1f4   :  { %3490 = vmatprep.subr.bf16.mxu1 %v21775_v24 }
 0x1f6   :  { %3368 = vmatpush1.bf16.msra.mxu0 %v14231_v20  ;;  %v21793_v20 = vld [vmem:[#allocation2_spill] sm:$0xff] }
 0x1f7   :  { %3491 = vmatpush1.bf16.msra.mxu1 %v14232_v36  ;;  %3369 = vmatprep.subr.bf16.mxu0 %v14233_v31 }
 0x1f8   :  { %3309 = vmatmul.mubr.bf16.gmra.mrb[48].mxu1 %v15129_v30  ;;  %3492 = vmatprep.subr.bf16.mxu1 %v21775_v24 }
 0x1f9   :  { %3192 = vmatmul.mubr.bf16.gmra.mrb[48].mxu0 %v15129_v30  ;;  %11450 = vmatprep.mubr.msk.bf16.mxu1 %vm472_vm0, %v15135_v32  ;;  %v14236_v30 = vld [vmem:[%s21767_s26 + $0x28c] ss:$12 sps:$4 sm:$0xff]  }
 0x1fa   :  { %11441 = vmatprep.mubr.msk.bf16.mxu0 %vm472_vm0, %v15135_v32  ;;  %3370 = vmatpush1.bf16.msra.mxu0 %v14234_v35  ;;  %v14237_v32 = vld [vmem:[%s21767_s26 + $0x288] ss:$12 sps:$4 sm:$0xff]  }
 0x1fb   :  { %3493 = vmatpush1.bf16.msra.mxu1 %v14235_v45  ;;  %3371 = vmatprep.subr.bf16.mxu0 %v14236_v30  ;;  %v21795_v45 = vld [vmem:[#allocation3_spill] sm:$0xff]  ;;  %v21796_v30 = vld [vmem:[#allocation4_spill] sm:$0xff] }
 0x1fc   :  { %3494 = vmatprep.subr.bf16.mxu1 %v21775_v24 }
 0x1fe   :  { %3372 = vmatpush1.bf16.msra.mxu0 %v14237_v32 }
 0x1ff   :  { %3495 = vmatpush1.bf16.msra.mxu1 %v14238_v46  ;;  %3373 = vmatprep.subr.bf16.mxu0 %v14239_v26  ;;  %v14251_v46 = vld [vmem:[%s21768_s27 + $0x30] ss:$8 sps:$4 sm:$0xff]   ;;  %v14252_v26 = vld [vmem:[%s21768_s27 + $0x44] ss:$8 sps:$4 sm:$0xff]  }
 0x200   :  { %3317 = vmatmul.mubr.bf16.gmra.mrb[52].mxu1 %v15165_v41  ;;  %3496 = vmatprep.subr.bf16.mxu1 %v21775_v24 }
 0x201   :  { %3202 = vmatmul.mubr.bf16.gmra.mrb[52].mxu0 %v15165_v41  ;;  %11451 = vmatprep.mubr.msk.bf16.mxu1 %vm472_vm0, %v15171_v43  ;;  %v14242_v41 = vld [vmem:[%s21767_s26 + $0x2bc] ss:$12 sps:$4 sm:$0xff]  }
 0x202   :  { %11442 = vmatprep.mubr.msk.bf16.mxu0 %vm472_vm0, %v15171_v43  ;;  %3374 = vmatpush1.bf16.msra.mxu0 %v14240_v48  ;;  %v14243_v43 = vld [vmem:[%s21767_s26 + $0x2b8] ss:$12 sps:$4 sm:$0xff]  }
 0x203   :  { %3497 = vmatpush1.bf16.msra.mxu1 %v14241_v51  ;;  %3375 = vmatprep.subr.bf16.mxu0 %v14242_v41  ;;  %v21797_v48 = vld [vmem:[#allocation5_spill] sm:$0xff]  ;;  %v21799_v41 = vld [vmem:[#allocation6_spill] sm:$0xff] }
 0x204   :  { %3498 = vmatprep.subr.bf16.mxu1 %v21775_v24 }
 0x206   :  { %3376 = vmatpush1.bf16.msra.mxu0 %v14243_v43  ;;  %v21800_v43 = vld [vmem:[#allocation7_spill] sm:$0xff] }
 0x207   :  { %3499 = vmatpush1.bf16.msra.mxu1 %v14244_v16  ;;  %3651 = vmatprep.subr.bf16.mxu0 %v14245_v38 }
 0x208   :  { %3325 = vmatmul.mubr.bf16.gmra.mrb[56].mxu1 %v15201_v52  ;;  %3774 = vmatprep.subr.bf16.mxu1 %v21775_v24 }
 0x209   :  { %3212 = vmatmul.mubr.bf16.gmra.mrb[56].mxu0 %v15201_v52  ;;  %11452 = vmatprep.mubr.msk.bf16.mxu1 %vm472_vm0, %v15207_v53  ;;  %v14246_v52 = vld [vmem:[%s21768_s27 + $0x14] ss:$8 sps:$4 sm:$0xff]  }
 0x20a   :  { %11443 = vmatprep.mubr.msk.bf16.mxu0 %vm472_vm0, %v15207_v53 }
 0x210   :  { %3333 = vmatmul.mubr.bf16.gmra.mrb[60].mxu1 %v15219_v54 }
 0x211   :  { %3222 = vmatmul.mubr.bf16.gmra.mrb[60].mxu0 %v15219_v54  ;;  %11453 = vmatprep.mubr.msk.bf16.mxu1 %vm472_vm0, %v15224_v55 }
 0x212   :  { %11444 = vmatprep.mubr.msk.bf16.mxu0 %vm472_vm0, %v15224_v55 }
 0x218   :  { %3341 = vmatmul.mubr.bf16.gmra.mrb[64].mxu1 %v15235_v57 }
 0x219   :  { %3232 = vmatmul.mubr.bf16.gmra.mrb[64].mxu0 %v15235_v57  ;;  %11454 = vmatprep.mubr.msk.bf16.mxu1 %vm472_vm0, %v15240_v58 }
 0x21a   :  { %11445 = vmatprep.mubr.msk.bf16.mxu0 %vm472_vm0, %v15240_v58 }
 0x220   :  { %3349 = vmatmul.mubr.bf16.gmra.mrb[68].mxu1 %v15251_v25 }
 0x221   :  { %3242 = vmatmul.mubr.bf16.gmra.mrb[68].mxu0 %v15251_v25  ;;  %11464 = vmatprep.mubr.msk.bf16.mxu1 %vm472_vm0, %v14246_v52 }
 0x222   :  { %11455 = vmatprep.mubr.msk.bf16.mxu0 %vm472_vm0, %v14246_v52 }
 0x223   :  { %v15976_v53 = vpop.f32.mrb[0].mxu1 }
 0x224   :  { %21776 = vst [vmem:[#allocation8_spill] sm:$0xff] %v15976_v53  ;;  %v15978_v54 = vpop.f32.mrb[0].mxu0  ;;  %v2778_v55 = vpop.f32.mrb[1].mxu1  ;;  %v4315_v25 = vsel %vm472_vm0, %v15976_v53, 0.0 }
 0x225   :  { %21777 = vst [vmem:[#allocation9_spill] sm:$0xff] %v15978_v54  ;;  %v15980_v57 = vpop.f32.mrb[1].mxu0  ;;  %v15982_v58 = vpop.f32.mrb[2].mxu1 }
 0x226   :  { %21778 = vst [vmem:[#allocation10_spill] sm:$0xff] %v15980_v57  ;;  %21779 = vst [vmem:[#allocation11_spill] sm:$0xff] %v15982_v58  ;;  %v4316_v39 = vsel %vm472_vm0, %v15982_v58, 0.0  ;;  %v15988_v27 = vpop.f32.mrb[2].mxu0  ;;  %v2781_v17 = vpop.f32.mrb[3].mxu1 }
 0x227   :  { %21780 = vst [vmem:[#allocation12_spill] sm:$0xff] %v15988_v27  ;;  %v4317_v40 = vadd.f32 %v4316_v39, %v4315_v25  ;;  %v4269_v56 = vadd.f32 %v15988_v27, %v15978_v54  ;;  %v15992_v37 = vpop.f32.mrb[3].mxu0 }
 0x228   :  { %21781 = vst [vmem:[#allocation13_spill] sm:$0xff] %v15992_v37  ;;  %v4292_v44 = vadd.f32 %v15992_v37, %v15980_v57  ;;  %3513 = vmatmul.mubr.bf16.vlgmr.msra.gmra.mrb[36].mxu1 %v14247_v59 }
 0x229   :  { %3390 = vmatmul.mubr.bf16.vlgmr.msra.gmra.mrb[36].mxu0 %v14247_v59  ;;  %3775 = vmatpush1.bf16.msra.mxu1 %v14983_v4 }
 0x22a   :  { %3652 = vmatpush1.bf16.msra.mxu0 %v14988_v5  ;;  %11465 = vmatprep.mubr.msk.bf16.mxu1 %vm472_vm0, %v14248_v42 }
 0x22b   :  { %v16005_v21 = vpop.f32.mrb[4].mxu1  ;;  %11456 = vmatprep.mubr.msk.bf16.mxu0 %vm472_vm0, %v14248_v42  ;;  %3653 = vmatprep.subr.bf16.mxu0 %v14998_v7  ;;  %v14253_v42 = vld [vmem:[%s21767_s26 + $0x348] ss:$12 sps:$4 sm:$0xff]  }
 0x22c   :  { %21782 = vst [vmem:[#allocation14_spill] sm:$0xff] %v16005_v21  ;;  %v4318_v62 = vsel %vm472_vm0, %v16005_v21, 0.0  ;;  %v16011_v23 = vpop.f32.mrb[4].mxu0  ;;  %v2786_v4 = vpop.f32.mrb[5].mxu1  ;;  %3776 = vmatprep.subr.bf16.mxu1 %v21775_v24  ;;  %v21462_v21 = vmov 0.0  }
 0x22d   :  { %21783 = vst [vmem:[#allocation15_spill] sm:$0xff] %v16011_v23  ;;  %v4319_v5 = vadd.f32 %v4318_v62, %v4317_v40  ;;  %v4270_v47 = vadd.f32 %v4269_v56, %v16011_v23  ;;  %v16015_v63 = vpop.f32.mrb[5].mxu0  ;;  %v16017_v1 = vpop.f32.mrb[6].mxu1  ;;  %3777 = vmatpush1.bf16.msra.mxu1 %v15006_v8 }
 0x22e   :  { %21784 = vst [vmem:[#allocation16_spill] sm:$0xff] %v16015_v63  ;;  %21785 = vst [vmem:[#allocation17_spill] sm:$0xff] %v16017_v1  ;;  %v4293_v34 = vadd.f32 %v4292_v44, %v16015_v63  ;;  %v4320_v7 = vsel %vm472_vm0, %v16017_v1, 0.0  ;;  %v16023_v0 = vpop.f32.mrb[6].mxu0  ;;  %v2789_v2 = vpop.f32.mrb[7].mxu1  ;;  %3654 = vmatpush1.bf16.msra.mxu0 %v15014_v9  ;;  %3778 = vmatprep.subr.bf16.mxu1 %v21775_v24  ;;  %v4241_v1 = vld [vmem:[%s21836_s0 + $0x70] sm:$0xff] }
 0x22f   :  { %21786 = vst [vmem:[#allocation18_spill] sm:$0xff] %v16023_v0  ;;  %v4321_v3 = vadd.f32 %v4320_v7, %v4319_v5  ;;  %v4271_v18 = vadd.f32 %v4270_v47, %v16023_v0  ;;  %v16028_v6 = vpop.f32.mrb[7].mxu0  ;;  %3655 = vmatprep.subr.bf16.mxu0 %v15022_v10  ;;  %v14250_v9 = vld [vmem:[%s21768_s27 + $0x34] ss:$8 sps:$4 sm:$0xff]   ;;  %v14256_v2 = vld [vmem:[%s21768_s27 + $0x40] ss:$8 sps:$4 sm:$0xff]  }
 0x230   :  { %21787 = vst [vmem:[#allocation19_spill] sm:$0xff] %v16028_v6  ;;  %v4294_v8 = vadd.f32 %v4293_v34, %v16028_v6  ;;  %3521 = vmatmul.mubr.bf16.gmra.mrb[40].mxu1 %v14249_v49  ;;  %v14254_v47 = vld [vmem:[%s21767_s26 + $0x350] ss:$12 sps:$4 sm:$0xff]  }
 0x231   :  { %3400 = vmatmul.mubr.bf16.gmra.mrb[40].mxu0 %v14249_v49  ;;  %11466 = vmatprep.mubr.msk.bf16.mxu1 %vm472_vm0, %v14250_v9  ;;  %v14255_v34 = vld [vmem:[%s21767_s26 + $0x364] ss:$12 sps:$4 sm:$0xff]   ;;  %v14259_v49 = vld [vmem:[%s21767_s26 + $0x368] ss:$12 sps:$4 sm:$0xff]  }
 0x232   :  { %11457 = vmatprep.mubr.msk.bf16.mxu0 %vm472_vm0, %v14250_v9  ;;  %3656 = vmatpush1.bf16.msra.mxu0 %v15040_v13  ;;  %v14260_v9 = vld [vmem:[%s21767_s26 + $0x37c] ss:$12 sps:$4 sm:$0xff]  }
 0x233   :  { %v16041_v50 = vpop.f32.mrb[8].mxu1  ;;  %3779 = vmatpush1.bf16.msra.mxu1 %v15047_v14  ;;  %3657 = vmatprep.subr.bf16.mxu0 %v15052_v15 }
 0x234   :  { %21788 = vst [vmem:[#allocation20_spill] sm:$0xff] %v16041_v50  ;;  %v4322_v10 = vsel %vm472_vm0, %v16041_v50, 0.0  ;;  %v16047_v11 = vpop.f32.mrb[8].mxu0  ;;  %v2794_v12 = vpop.f32.mrb[9].mxu1  ;;  %3780 = vmatprep.subr.bf16.mxu1 %v21775_v24  ;;  %v4257_v50 = vld [vmem:[%s21836_s0 + $0xf0] sm:$0xff] }
 0x235   :  { %21789 = vst [vmem:[#allocation21_spill] sm:$0xff] %v16047_v11  ;;  %v4323_v33 = vadd.f32 %v4322_v10, %v4321_v3  ;;  %v4272_v22 = vadd.f32 %v4271_v18, %v16047_v11  ;;  %v16051_v28 = vpop.f32.mrb[9].mxu0  ;;  %v16053_v13 = vpop.f32.mrb[10].mxu1  ;;  %v14257_v3 = vld [vmem:[%s21768_s27 + $0x54] ss:$8 sps:$4 sm:$0xff]  }
 0x236   :  { %21790 = vst [vmem:[#allocation22_spill] sm:$0xff] %v16051_v28  ;;  %21791 = vst [vmem:[#allocation23_spill] sm:$0xff] %v16053_v13  ;;  %v4295_v29 = vadd.f32 %v4294_v8, %v16051_v28  ;;  %v4324_v14 = vsel %vm472_vm0, %v16053_v13, 0.0  ;;  %v16058_v15 = vpop.f32.mrb[10].mxu0  ;;  %v2797_v19 = vpop.f32.mrb[11].mxu1  ;;  %3658 = vmatpush1.bf16.msra.mxu0 %v21793_v20  ;;  %v4239_v13 = vld [vmem:[%s21836_s0 + $0x60] sm:$0xff] }
 0x237   :  { %21792 = vst [vmem:[#allocation24_spill] sm:$0xff] %v16058_v15  ;;  %v4325_v36 = vadd.f32 %v4324_v14, %v4323_v33  ;;  %v4273_v31 = vadd.f32 %v4272_v22, %v16058_v15  ;;  %v16062_v35 = vpop.f32.mrb[11].mxu0  ;;  %3781 = vmatpush1.bf16.msra.mxu1 %v21795_v45  ;;  %3659 = vmatprep.subr.bf16.mxu0 %v21796_v30  ;;  %v14258_v18 = vld [vmem:[%s21767_s26 + $0x360] ss:$12 sps:$4 sm:$0xff]   ;;  %v14261_v30 = vld [vmem:[%s21767_s26 + $0x378] ss:$12 sps:$4 sm:$0xff]  }
 0x238   :  { %21794 = vst [vmem:[#allocation2_spill] sm:$0xff] %v16062_v35  ;;  %v4296_v32 = vadd.f32 %v4295_v29, %v16062_v35  ;;  %3529 = vmatmul.mubr.bf16.gmra.mrb[44].mxu1 %v14251_v46  ;;  %3782 = vmatprep.subr.bf16.mxu1 %v21775_v24 }
 0x239   :  { %3410 = vmatmul.mubr.bf16.gmra.mrb[44].mxu0 %v14251_v46  ;;  %11467 = vmatprep.mubr.msk.bf16.mxu1 %vm472_vm0, %v14252_v26 }
 0x23a   :  { %11458 = vmatprep.mubr.msk.bf16.mxu0 %vm472_vm0, %v14252_v26  ;;  %3660 = vmatpush1.bf16.msra.mxu0 %v21797_v48  ;;  %v14262_v48 = vld [vmem:[%s21767_s26 + $0x380] ss:$12 sps:$4 sm:$0xff]  }
 0x23b   :  { %v16077_v51 = vpop.f32.mrb[12].mxu1  ;;  %3783 = vmatpush1.bf16.msra.mxu1 %v21799_v41  ;;  %3661 = vmatprep.subr.bf16.mxu0 %v21800_v43  ;;  %v14263_v41 = vld [vmem:[%s21767_s26 + $0x394] ss:$12 sps:$4 sm:$0xff]  }
 0x23c   :  { %21798 = vst [vmem:[#allocation3_spill] sm:$0xff] %v16077_v51  ;;  %v4326_v16 = vsel %vm472_vm0, %v16077_v51, 0.0  ;;  %v16083_v38 = vpop.f32.mrb[12].mxu0  ;;  %v2802_v52 = vpop.f32.mrb[13].mxu1  ;;  %3784 = vmatprep.subr.bf16.mxu1 %v21775_v24 }
 0x23d   :  { %21801 = vst [vmem:[#allocation4_spill] sm:$0xff] %v16083_v38  ;;  %v4327_v55 = vadd.f32 %v4326_v16, %v4325_v36  ;;  %v4274_v25 = vadd.f32 %v4273_v31, %v16083_v38  ;;  %v16087_v39 = vpop.f32.mrb[13].mxu0  ;;  %v16089_v17 = vpop.f32.mrb[14].mxu1  ;;  %v14264_v16 = vld [vmem:[%s21768_s27 + $0x50] ss:$8 sps:$4 sm:$0xff]  }
 0x23e   :  { %21802 = vst [vmem:[#allocation5_spill] sm:$0xff] %v16087_v39  ;;  %21803 = vst [vmem:[#allocation6_spill] sm:$0xff] %v16089_v17  ;;  %v4297_v40 = vadd.f32 %v4296_v32, %v16087_v39  ;;  %v4328_v56 = vsel %vm472_vm0, %v16089_v17, 0.0  ;;  %v16094_v44 = vpop.f32.mrb[14].mxu0  ;;  %v2805_v59 = vpop.f32.mrb[15].mxu1  ;;  %3662 = vmatpush1.bf16.msra.mxu0 %v14253_v42 }
 0x23f   :  { %21804 = vst [vmem:[#allocation7_spill] sm:$0xff] %v16094_v44  ;;  %v4329_v62 = vadd.f32 %v4328_v56, %v4327_v55  ;;  %v4275_v4 = vadd.f32 %v4274_v25, %v16094_v44  ;;  %v16100_v5 = vpop.f32.mrb[15].mxu0  ;;  %3785 = vmatpush1.bf16.msra.mxu1 %v14254_v47  ;;  %3663 = vmatprep.subr.bf16.mxu0 %v14255_v34  ;;  %v14265_v52 = vld [vmem:[%s21768_s27 + $0x64] ss:$8 sps:$4 sm:$0xff]   ;;  %v14266_v55 = vld [vmem:[%s21767_s26 + $0x390] ss:$12 sps:$4 sm:$0xff]  }
 0x240   :  { %21805 = vst [vmem:[#allocation25_spill] sm:$0xff] %v16100_v5  ;;  %v4298_v7 = vadd.f32 %v4297_v40, %v16100_v5  ;;  %3537 = vmatmul.mubr.bf16.gmra.mrb[48].mxu1 %v14256_v2  ;;  %3786 = vmatprep.subr.bf16.mxu1 %v21775_v24  ;;  %v14267_v40 = vld [vmem:[%s21767_s26 + $0x398] ss:$12 sps:$4 sm:$0xff]  }
 0x241   :  { %3420 = vmatmul.mubr.bf16.gmra.mrb[48].mxu0 %v14256_v2  ;;  %11468 = vmatprep.mubr.msk.bf16.mxu1 %vm472_vm0, %v14257_v3  ;;  %v14268_v56 = vld [vmem:[%s21767_s26 + $0x3ac] ss:$12 sps:$4 sm:$0xff]  }
 0x242   :  { %11459 = vmatprep.mubr.msk.bf16.mxu0 %vm472_vm0, %v14257_v3  ;;  %3664 = vmatpush1.bf16.msra.mxu0 %v14258_v18 }
 0x243   :  { %v16121_v8 = vpop.f32.mrb[16].mxu1  ;;  %3787 = vmatpush1.bf16.msra.mxu1 %v14259_v49  ;;  %3665 = vmatprep.subr.bf16.mxu0 %v14260_v9  ;;  %v14269_v9 = vld [vmem:[%s21767_s26 + $0x3a8] ss:$12 sps:$4 sm:$0xff]  }
 0x244   :  { %21806 = vst [vmem:[#allocation26_spill] sm:$0xff] %v16121_v8  ;;  %v4330_v10 = vsel %vm472_vm0, %v16121_v8, 0.0  ;;  %v16131_v12 = vpop.f32.mrb[16].mxu0  ;;  %v2810_v33 = vpop.f32.mrb[17].mxu1  ;;  %3788 = vmatprep.subr.bf16.mxu1 %v21775_v24 }
 0x245   :  { %21807 = vst [vmem:[#allocation27_spill] sm:$0xff] %v16131_v12  ;;  %v4331_v22 = vadd.f32 %v4330_v10, %v4329_v62  ;;  %v4276_v29 = vadd.f32 %v4275_v4, %v16131_v12  ;;  %v16135_v14 = vpop.f32.mrb[17].mxu0  ;;  %v16137_v19 = vpop.f32.mrb[18].mxu1 }
 0x246   :  { %21808 = vst [vmem:[#allocation28_spill] sm:$0xff] %v16135_v14  ;;  %21809 = vst [vmem:[#allocation29_spill] sm:$0xff] %v16137_v19  ;;  %v4299_v20 = vadd.f32 %v4298_v7, %v16135_v14  ;;  %v4332_v36 = vsel %vm472_vm0, %v16137_v19, 0.0  ;;  %v16142_v31 = vpop.f32.mrb[18].mxu0  ;;  %v2813_v45 = vpop.f32.mrb[19].mxu1  ;;  %3666 = vmatpush1.bf16.msra.mxu0 %v14261_v30  ;;  %v4262_v19 = vld [vmem:[%s21836_s0 + $0x118] sm:$0xff] }
 0x247   :  { %21810 = vst [vmem:[#allocation30_spill] sm:$0xff] %v16142_v31  ;;  %v4333_v32 = vadd.f32 %v4332_v36, %v4331_v22  ;;  %v4277_v46 = vadd.f32 %v4276_v29, %v16142_v31  ;;  %v16148_v26 = vpop.f32.mrb[19].mxu0  ;;  %3789 = vmatpush1.bf16.msra.mxu1 %v14262_v48  ;;  %3667 = vmatprep.subr.bf16.mxu0 %v14263_v41  ;;  %v14270_v29 = vld [vmem:[%s21767_s26 + $0x3b0] ss:$12 sps:$4 sm:$0xff]   ;;  %v14272_v45 = vld [vmem:[%s21768_s27 + $0x60] ss:$8 sps:$4 sm:$0xff]  }
 0x248   :  { %21811 = vst [vmem:[#allocation31_spill] sm:$0xff] %v16148_v26  ;;  %v4300_v43 = vadd.f32 %v4299_v20, %v16148_v26  ;;  %3545 = vmatmul.mubr.bf16.gmra.mrb[52].mxu1 %v14264_v16  ;;  %3790 = vmatprep.subr.bf16.mxu1 %v21775_v24  ;;  %v14271_v20 = vld [vmem:[%s21767_s26 + $0x3c4] ss:$12 sps:$4 sm:$0xff]   ;;  %v14273_v30 = vld [vmem:[%s21768_s27 + $0x74] ss:$8 sps:$4 sm:$0xff]  }
 0x249   :  { %3430 = vmatmul.mubr.bf16.gmra.mrb[52].mxu0 %v14264_v16  ;;  %11469 = vmatprep.mubr.msk.bf16.mxu1 %vm472_vm0, %v14265_v52 }
 0x24a   :  { %11460 = vmatprep.mubr.msk.bf16.mxu0 %vm472_vm0, %v14265_v52  ;;  %3668 = vmatpush1.bf16.msra.mxu0 %v14266_v55 }
 0x24b   :  { %v16169_v25 = vpop.f32.mrb[20].mxu1  ;;  %3791 = vmatpush1.bf16.msra.mxu1 %v14267_v40  ;;  %3669 = vmatprep.subr.bf16.mxu0 %v14268_v56 }
 0x24c   :  { %21812 = vst [vmem:[#allocation32_spill] sm:$0xff] %v16169_v25  ;;  %v4334_v59 = vsel %vm472_vm0, %v16169_v25, 0.0  ;;  %v16179_v42 = vpop.f32.mrb[20].mxu0  ;;  %v2818_v62 = vpop.f32.mrb[21].mxu1  ;;  %3792 = vmatprep.subr.bf16.mxu1 %v21775_v24 }
 0x24d   :  { %21813 = vst [vmem:[#allocation33_spill] sm:$0xff] %v16179_v42  ;;  %v4335_v4 = vadd.f32 %v4334_v59, %v4333_v32  ;;  %v4278_v47 = vadd.f32 %v4277_v46, %v16179_v42  ;;  %v16183_v34 = vpop.f32.mrb[21].mxu0  ;;  %v16185_v7 = vpop.f32.mrb[22].mxu1 }
 0x24e   :  { %21814 = vst [vmem:[#allocation34_spill] sm:$0xff] %v16183_v34  ;;  %21815 = vst [vmem:[#allocation35_spill] sm:$0xff] %v16185_v7  ;;  %v4301_v2 = vadd.f32 %v4300_v43, %v16183_v34  ;;  %v4336_v3 = vsel %vm472_vm0, %v16185_v7, 0.0  ;;  %v16190_v18 = vpop.f32.mrb[22].mxu0  ;;  %v2821_v49 = vpop.f32.mrb[23].mxu1  ;;  %3670 = vmatpush1.bf16.msra.mxu0 %v14269_v9  ;;  %v4251_v7 = vld [vmem:[%s21836_s0 + $0xc0] sm:$0xff] }
 0x24f   :  { %21816 = vst [vmem:[#allocation36_spill] sm:$0xff] %v16190_v18  ;;  %v4337_v10 = vadd.f32 %v4336_v3, %v4335_v4  ;;  %v4279_v33 = vadd.f32 %v4278_v47, %v16190_v18  ;;  %v16196_v22 = vpop.f32.mrb[23].mxu0  ;;  %3793 = vmatpush1.bf16.msra.mxu1 %v14270_v29  ;;  %3945 = vmatprep.subr.bf16.mxu0 %v14271_v20  ;;  %v14274_v49 = vld [vmem:[%s21768_s27 + $0x70] ss:$8 sps:$4 sm:$0xff]   ;;  %v14275_v9 = vld [vmem:[%s21768_s27 + $0x84] ss:$8 sps:$4 sm:$0xff]  }
 0x250   :  { %21817 = vst [vmem:[#allocation37_spill] sm:$0xff] %v16196_v22  ;;  %v4302_v36 = vadd.f32 %v4301_v2, %v16196_v22  ;;  %3553 = vmatmul.mubr.bf16.gmra.mrb[56].mxu1 %v14272_v45  ;;  %4068 = vmatprep.subr.bf16.mxu1 %v21775_v24 }
 0x251   :  { %3440 = vmatmul.mubr.bf16.gmra.mrb[56].mxu0 %v14272_v45  ;;  %11470 = vmatprep.mubr.msk.bf16.mxu1 %vm472_vm0, %v14273_v30 }
 0x252   :  { %11461 = vmatprep.mubr.msk.bf16.mxu0 %vm472_vm0, %v14273_v30 }
 0x253   :  { %v16214_v32 = vpop.f32.mrb[24].mxu1 }
 0x254   :  { %21818 = vst [vmem:[#allocation38_spill] sm:$0xff] %v16214_v32  ;;  %v4338_v46 = vsel %vm472_vm0, %v16214_v32, 0.0  ;;  %v16218_v48 = vpop.f32.mrb[24].mxu0  ;;  %v2826_v41 = vpop.f32.mrb[25].mxu1  ;;  %v4250_v32 = vld [vmem:[%s21836_s0 + $0xb8] sm:$0xff] }
 0x255   :  { %21819 = vst [vmem:[#allocation39_spill] sm:$0xff] %v16218_v48  ;;  %v4339_v43 = vadd.f32 %v4338_v46, %v4337_v10  ;;  %v4280_v16 = vadd.f32 %v4279_v33, %v16218_v48  ;;  %v16221_v52 = vpop.f32.mrb[25].mxu0  ;;  %v16223_v55 = vpop.f32.mrb[26].mxu1 }
 0x256   :  { %21820 = vst [vmem:[#allocation40_spill] sm:$0xff] %v16221_v52  ;;  %21821 = vst [vmem:[#allocation41_spill] sm:$0xff] %v16223_v55  ;;  %v4303_v40 = vadd.f32 %v4302_v36, %v16221_v52  ;;  %v4340_v56 = vsel %vm472_vm0, %v16223_v55, 0.0  ;;  %v16228_v59 = vpop.f32.mrb[26].mxu0  ;;  %v2829_v62 = vpop.f32.mrb[27].mxu1  ;;  %v4249_v55 = vld [vmem:[%s21836_s0 + $0xb0] sm:$0xff] }
 0x257   :  { %21822 = vst [vmem:[#allocation42_spill] sm:$0xff] %v16228_v59  ;;  %v4341_v4 = vadd.f32 %v4340_v56, %v4339_v43  ;;  %v4281_v47 = vadd.f32 %v4280_v16, %v16228_v59  ;;  %v16231_v2 = vpop.f32.mrb[27].mxu0 }
 0x258   :  { %21823 = vst [vmem:[#allocation43_spill] sm:$0xff] %v16231_v2  ;;  %v4304_v3 = vadd.f32 %v4303_v40, %v16231_v2  ;;  %3561 = vmatmul.mubr.bf16.gmra.mrb[60].mxu1 %v14274_v49 }
 0x259   :  { %3450 = vmatmul.mubr.bf16.gmra.mrb[60].mxu0 %v14274_v49  ;;  %11471 = vmatprep.mubr.msk.bf16.mxu1 %vm472_vm0, %v14275_v9 }
 0x25a   :  { %11462 = vmatprep.mubr.msk.bf16.mxu0 %vm472_vm0, %v14275_v9 }
 0x25b   :  { %v16242_v10 = vpop.f32.mrb[28].mxu1 }
 0x25c   :  { %21824 = vst [vmem:[#allocation44_spill] sm:$0xff] %v16242_v10  ;;  %v4342_v33 = vsel %vm472_vm0, %v16242_v10, 0.0  ;;  %v16246_v29 = vpop.f32.mrb[28].mxu0  ;;  %v2834_v20 = vpop.f32.mrb[29].mxu1 }
 0x25d   :  { %21825 = vst [vmem:[#allocation45_spill] sm:$0xff] %v16246_v29  ;;  %v4343_v36 = vadd.f32 %v4342_v33, %v4341_v4  ;;  %v4282_v45 = vadd.f32 %v4281_v47, %v16246_v29  ;;  %v16249_v30 = vpop.f32.mrb[29].mxu0  ;;  %v16251_v46 = vpop.f32.mrb[30].mxu1  ;;  %v14276_v47 = vld [vmem:[%s21768_s27 + $0x80] ss:$8 sps:$4 sm:$0xff]  }
 0x25e   :  { %21826 = vst [vmem:[#allocation46_spill] sm:$0xff] %v16249_v30  ;;  %21827 = vst [vmem:[#allocation47_spill] sm:$0xff] %v16251_v46  ;;  %v4305_v41 = vadd.f32 %v4304_v3, %v16249_v30  ;;  %v4344_v43 = vsel %vm472_vm0, %v16251_v46, 0.0  ;;  %v16256_v16 = vpop.f32.mrb[30].mxu0  ;;  %v2837_v40 = vpop.f32.mrb[31].mxu1 }
 0x25f   :  { %21828 = vst [vmem:[#allocation48_spill] sm:$0xff] %v16256_v16  ;;  %v4345_v56 = vadd.f32 %v4344_v43, %v4343_v36  ;;  %v4283_v62 = vadd.f32 %v4282_v45, %v16256_v16  ;;  %v16259_v49 = vpop.f32.mrb[31].mxu0 }
 0x260   :  { %21829 = vst [vmem:[#allocation49_spill] sm:$0xff] %v16259_v49  ;;  %v4306_v4 = vadd.f32 %v4305_v41, %v16259_v49  ;;  %3569 = vmatmul.mubr.bf16.gmra.mrb[64].mxu1 %v14276_v47 }
 0x261   :  { %3460 = vmatmul.mubr.bf16.gmra.mrb[64].mxu0 %v14276_v47  ;;  %11472 = vmatprep.mubr.msk.bf16.mxu1 %vm472_vm0, %v15648_v60 }
 0x262   :  { %11463 = vmatprep.mubr.msk.bf16.mxu0 %vm472_vm0, %v15648_v60 }
 0x263   :  { %v16269_v3 = vpop.f32.mrb[32].mxu1 }
 0x264   :  { %21830 = vst [vmem:[#allocation50_spill] sm:$0xff] %v16269_v3  ;;  %v4346_v9 = vsel %vm472_vm0, %v16269_v3, 0.0  ;;  %v16273_v33 = vpop.f32.mrb[32].mxu0  ;;  %v2842_v20 = vpop.f32.mrb[33].mxu1 }
 0x265   :  { %21831 = vst [vmem:[#allocation51_spill] sm:$0xff] %v16273_v33  ;;  %v4347_v36 = vadd.f32 %v4346_v9, %v4345_v56  ;;  %v4284_v45 = vadd.f32 %v4283_v62, %v16273_v33  ;;  %v16276_v41 = vpop.f32.mrb[33].mxu0  ;;  %v16278_v43 = vpop.f32.mrb[34].mxu1  ;;  %v14279_v9 = vld [vmem:[%s21767_s26 + $0x3c8] ss:$12 sps:$4 sm:$0xff]  }
 0x266   :  { %21832 = vst [vmem:[#allocation52_spill] sm:$0xff] %v16276_v41  ;;  %21833 = vst [vmem:[#allocation53_spill] sm:$0xff] %v16278_v43  ;;  %v4307_v40 = vadd.f32 %v4306_v4, %v16276_v41  ;;  %v4348_v60 = vsel %vm472_vm0, %v16278_v43, 0.0  ;;  %v16283_v47 = vpop.f32.mrb[34].mxu0  ;;  %v2845_v46 = vpop.f32.mrb[35].mxu1 }
 0x267   :  { %21834 = vst [vmem:[#allocation54_spill] sm:$0xff] %v16283_v47  ;;  %v16285_v10 = vadd.f32 %v4348_v60, %v4347_v36  ;;  %v16288_v3 = vadd.f32 %v4284_v45, %v16283_v47  ;;  %v16290_v56 = vpop.f32.mrb[35].mxu0  ;;  %v14277_v4 = vld [vmem:[%s21768_s27 + $0xb4] ss:$8 sps:$4 sm:$0xff]   ;;  %v14278_v46 = vld [vmem:[%s21768_s27 + $0xb0] ss:$8 sps:$4 sm:$0xff]  }
 0x268   :  { %21835 = vst [vmem:[#allocation55_spill] sm:$0xff] %v16290_v56  ;;  %v16293_v62 = vadd.f32 %v4307_v40, %v16290_v56  ;;  %3577 = vmatmul.mubr.bf16.gmra.mrb[68].mxu1 %v15659_v61  ;;  %v14281_v20 = vld [vmem:[%s21768_s27 + $0xc4] ss:$8 sps:$4 sm:$0xff]   ;;  %v14282_v36 = vld [vmem:[%s21767_s26 + $0x3dc] ss:$12 sps:$4 sm:$0xff]  }
 0x269   :  { %3470 = vmatmul.mubr.bf16.gmra.mrb[68].mxu0 %v15659_v61  ;;  %11484 = vmatprep.mubr.msk.bf16.mxu1 %vm472_vm0, %v14277_v4  ;;  %v14280_v61 = vld [vmem:[%s21767_s26 + $0x3c0] ss:$12 sps:$4 sm:$0xff]   ;;  %v14284_v40 = vld [vmem:[%s21767_s26 + $0x3d8] ss:$12 sps:$4 sm:$0xff]  }
 0x26a   :  { %11475 = vmatprep.mubr.msk.bf16.mxu0 %vm472_vm0, %v14277_v4  ;;  %v14283_v45 = vld [vmem:[%s21767_s26 + $0x3e0] ss:$12 sps:$4 sm:$0xff]  }
 0x26b   :  { %v14285_v60 = vld [vmem:[%s21767_s26 + $0x3f4] ss:$12 sps:$4 sm:$0xff]  }
 0x26c   :  { %v14286_v4 = vld [vmem:[%s21768_s27 + $0xc0] ss:$8 sps:$4 sm:$0xff]  }
 0x270   :  { %3807 = vmatmul.mubr.bf16.vlgmr.msra.gmra.mrb[36].mxu1 %v14278_v46 }
 0x271   :  { %3684 = vmatmul.mubr.bf16.vlgmr.msra.gmra.mrb[36].mxu0 %v14278_v46  ;;  %4069 = vmatpush1.bf16.msra.mxu1 %v14279_v9  ;;  %v14287_v46 = vld [vmem:[%s21768_s27 + $0xd4] ss:$8 sps:$4 sm:$0xff]  }
 0x272   :  { %3946 = vmatpush1.bf16.msra.mxu0 %v14280_v61  ;;  %11485 = vmatprep.mubr.msk.bf16.mxu1 %vm472_vm0, %v14281_v20  ;;  %v14288_v9 = vld [vmem:[%s21767_s26 + $0x3f0] ss:$12 sps:$4 sm:$0xff]   ;;  %v14289_v61 = vld [vmem:[%s21767_s26 + $0x3f8] ss:$12 sps:$4 sm:$0xff]  }
 0x273   :  { %11476 = vmatprep.mubr.msk.bf16.mxu0 %vm472_vm0, %v14281_v20  ;;  %3947 = vmatprep.subr.bf16.mxu0 %v14282_v36  ;;  %v14290_v20 = vld [vmem:[%s21767_s26 + $0x40c] ss:$12 sps:$4 sm:$0xff]   ;;  %v14291_v36 = vld [vmem:[%s21767_s26 + $0x408] ss:$12 sps:$4 sm:$0xff]  }
 0x274   :  { %4070 = vmatprep.subr.bf16.mxu1 %v21775_v24 }
 0x275   :  { %4071 = vmatpush1.bf16.msra.mxu1 %v14283_v45  ;;  %v14292_v45 = vld [vmem:[%s21767_s26 + $0x410] ss:$12 sps:$4 sm:$0xff]  }
 0x276   :  { %3948 = vmatpush1.bf16.msra.mxu0 %v14284_v40  ;;  %4072 = vmatprep.subr.bf16.mxu1 %v21775_v24  ;;  %v14293_v40 = vld [vmem:[%s21767_s26 + $0x424] ss:$12 sps:$4 sm:$0xff]  }
 0x277   :  { %3949 = vmatprep.subr.bf16.mxu0 %v14285_v60  ;;  %v14294_v60 = vld [vmem:[%s21768_s27 + $0xd0] ss:$8 sps:$4 sm:$0xff]  }
 0x278   :  { %3815 = vmatmul.mubr.bf16.gmra.mrb[40].mxu1 %v14286_v4 }
 0x279   :  { %3694 = vmatmul.mubr.bf16.gmra.mrb[40].mxu0 %v14286_v4  ;;  %11486 = vmatprep.mubr.msk.bf16.mxu1 %vm472_vm0, %v14287_v46  ;;  %v14295_v4 = vld [vmem:[%s21768_s27 + $0xe4] ss:$8 sps:$4 sm:$0xff]  }
 0x27a   :  { %11477 = vmatprep.mubr.msk.bf16.mxu0 %vm472_vm0, %v14287_v46  ;;  %3950 = vmatpush1.bf16.msra.mxu0 %v14288_v9  ;;  %v14296_v46 = vld [vmem:[%s21767_s26 + $0x420] ss:$12 sps:$4 sm:$0xff]   ;;  %v14297_v9 = vld [vmem:[%s21767_s26 + $0x428] ss:$12 sps:$4 sm:$0xff]  }
 0x27b   :  { %4073 = vmatpush1.bf16.msra.mxu1 %v14289_v61  ;;  %3951 = vmatprep.subr.bf16.mxu0 %v14290_v20  ;;  %v14298_v61 = vld [vmem:[%s21767_s26 + $0x43c] ss:$12 sps:$4 sm:$0xff]   ;;  %v14299_v20 = vld [vmem:[%s21767_s26 + $0x438] ss:$12 sps:$4 sm:$0xff]  }
 0x27c   :  { %4074 = vmatprep.subr.bf16.mxu1 %v21775_v24 }
 0x27e   :  { %3952 = vmatpush1.bf16.msra.mxu0 %v14291_v36  ;;  %v14300_v36 = vld [vmem:[%s21767_s26 + $0x440] ss:$12 sps:$4 sm:$0xff]  }
 0x27f   :  { %4075 = vmatpush1.bf16.msra.mxu1 %v14292_v45  ;;  %3953 = vmatprep.subr.bf16.mxu0 %v14293_v40  ;;  %v14301_v45 = vld [vmem:[%s21767_s26 + $0x454] ss:$12 sps:$4 sm:$0xff]  }
 0x280   :  { %3823 = vmatmul.mubr.bf16.gmra.mrb[44].mxu1 %v14294_v60  ;;  %4076 = vmatprep.subr.bf16.mxu1 %v21775_v24  ;;  %v14302_v40 = vld [vmem:[%s21768_s27 + $0xe0] ss:$8 sps:$4 sm:$0xff]  }
 0x281   :  { %3704 = vmatmul.mubr.bf16.gmra.mrb[44].mxu0 %v14294_v60  ;;  %11487 = vmatprep.mubr.msk.bf16.mxu1 %vm472_vm0, %v14295_v4  ;;  %v14303_v60 = vld [vmem:[%s21768_s27 + $0xf4] ss:$8 sps:$4 sm:$0xff]  }
 0x282   :  { %11478 = vmatprep.mubr.msk.bf16.mxu0 %vm472_vm0, %v14295_v4  ;;  %3954 = vmatpush1.bf16.msra.mxu0 %v14296_v46  ;;  %v14304_v4 = vld [vmem:[%s21767_s26 + $0x450] ss:$12 sps:$4 sm:$0xff]   ;;  %v14305_v46 = vld [vmem:[%s21767_s26 + $0x458] ss:$12 sps:$4 sm:$0xff]  }
 0x283   :  { %4077 = vmatpush1.bf16.msra.mxu1 %v14297_v9  ;;  %3955 = vmatprep.subr.bf16.mxu0 %v14298_v61  ;;  %v14306_v9 = vld [vmem:[%s21767_s26 + $0x46c] ss:$12 sps:$4 sm:$0xff]   ;;  %v14307_v61 = vld [vmem:[%s21767_s26 + $0x468] ss:$12 sps:$4 sm:$0xff]  }
 0x284   :  { %4078 = vmatprep.subr.bf16.mxu1 %v21775_v24 }
 0x286   :  { %3956 = vmatpush1.bf16.msra.mxu0 %v14299_v20  ;;  %v14308_v20 = vld [vmem:[%s21767_s26 + $0x470] ss:$12 sps:$4 sm:$0xff]  }
 0x287   :  { %4079 = vmatpush1.bf16.msra.mxu1 %v14300_v36  ;;  %3957 = vmatprep.subr.bf16.mxu0 %v14301_v45  ;;  %v14309_v36 = vld [vmem:[%s21767_s26 + $0x484] ss:$12 sps:$4 sm:$0xff]  }
 0x288   :  { %3831 = vmatmul.mubr.bf16.gmra.mrb[48].mxu1 %v14302_v40  ;;  %4080 = vmatprep.subr.bf16.mxu1 %v21775_v24  ;;  %v14310_v45 = vld [vmem:[%s21768_s27 + $0xf0] ss:$8 sps:$4 sm:$0xff]  }
 0x289   :  { %3714 = vmatmul.mubr.bf16.gmra.mrb[48].mxu0 %v14302_v40  ;;  %11488 = vmatprep.mubr.msk.bf16.mxu1 %vm472_vm0, %v14303_v60  ;;  %v14311_v40 = vld [vmem:[%s21768_s27 + $0x104] ss:$8 sps:$4 sm:$0xff]  }
 0x28a   :  { %11479 = vmatprep.mubr.msk.bf16.mxu0 %vm472_vm0, %v14303_v60  ;;  %3958 = vmatpush1.bf16.msra.mxu0 %v14304_v4  ;;  %v14312_v60 = vld [vmem:[%s21767_s26 + $0x480] ss:$12 sps:$4 sm:$0xff]   ;;  %v14313_v4 = vld [vmem:[%s21767_s26 + $0x488] ss:$12 sps:$4 sm:$0xff]  }
 0x28b   :  { %4081 = vmatpush1.bf16.msra.mxu1 %v14305_v46  ;;  %3959 = vmatprep.subr.bf16.mxu0 %v14306_v9  ;;  %v14314_v46 = vld [vmem:[%s21767_s26 + $0x49c] ss:$12 sps:$4 sm:$0xff]   ;;  %v14315_v9 = vld [vmem:[%s21767_s26 + $0x498] ss:$12 sps:$4 sm:$0xff]  }
 0x28c   :  { %4082 = vmatprep.subr.bf16.mxu1 %v21775_v24 }
 0x28e   :  { %3960 = vmatpush1.bf16.msra.mxu0 %v14307_v61  ;;  %v14316_v61 = vld [vmem:[%s21767_s26 + $0x4a0] ss:$12 sps:$4 sm:$0xff]  }
 0x28f   :  { %4083 = vmatpush1.bf16.msra.mxu1 %v14308_v20  ;;  %3961 = vmatprep.subr.bf16.mxu0 %v14309_v36  ;;  %v14317_v20 = vld [vmem:[%s21768_s27 + $0x100] ss:$8 sps:$4 sm:$0xff]   ;;  %v14318_v36 = vld [vmem:[%s21768_s27 + $0x114] ss:$8 sps:$4 sm:$0xff]  }
 0x290   :  { %3839 = vmatmul.mubr.bf16.gmra.mrb[52].mxu1 %v14310_v45  ;;  %4084 = vmatprep.subr.bf16.mxu1 %v21775_v24 }
 0x291   :  { %3724 = vmatmul.mubr.bf16.gmra.mrb[52].mxu0 %v14310_v45  ;;  %11489 = vmatprep.mubr.msk.bf16.mxu1 %vm472_vm0, %v14311_v40  ;;  %v14319_v45 = vld [vmem:[%s21768_s27 + $0x110] ss:$8 sps:$4 sm:$0xff]  }
 0x292   :  { %11480 = vmatprep.mubr.msk.bf16.mxu0 %vm472_vm0, %v14311_v40  ;;  %3962 = vmatpush1.bf16.msra.mxu0 %v14312_v60  ;;  %v14320_v40 = vld [vmem:[%s21768_s27 + $0x124] ss:$8 sps:$4 sm:$0xff]   ;;  %v13795_v60 = vld [vmem:[%s21768_s27 + $0x134] ss:$8 sps:$4 sm:$0xff]  }
 0x293   :  { %4085 = vmatpush1.bf16.msra.mxu1 %v14313_v4  ;;  %3963 = vmatprep.subr.bf16.mxu0 %v14314_v46  ;;  %v14321_v4 = vld [vmem:[%s21768_s27 + $0x120] ss:$8 sps:$4 sm:$0xff]   ;;  %v13797_v46 = vld [vmem:[%s21768_s27 + $0x130] ss:$8 sps:$4 sm:$0xff]  }
 0x294   :  { %4086 = vmatprep.subr.bf16.mxu1 %v21775_v24 }
 0x296   :  { %3964 = vmatpush1.bf16.msra.mxu0 %v14315_v9  ;;  %v14322_v9 = vld [vmem:[%s21768_s27 + $0x154] ss:$8 sps:$4 sm:$0xff]  }
 0x297   :  { %4087 = vmatpush1.bf16.msra.mxu1 %v14316_v61  ;;  %v14323_v61 = vld [vmem:[%s21768_s27 + $0x150] ss:$8 sps:$4 sm:$0xff]  }
 0x298   :  { %3847 = vmatmul.mubr.bf16.gmra.mrb[56].mxu1 %v14317_v20 }
 0x299   :  { %3734 = vmatmul.mubr.bf16.gmra.mrb[56].mxu0 %v14317_v20  ;;  %11490 = vmatprep.mubr.msk.bf16.mxu1 %vm472_vm0, %v14318_v36  ;;  %v14324_v20 = vld [vmem:[%s21768_s27 + $0x164] ss:$8 sps:$4 sm:$0xff]  }
 0x29a   :  { %11481 = vmatprep.mubr.msk.bf16.mxu0 %vm472_vm0, %v14318_v36  ;;  %v14325_v36 = vld [vmem:[%s21768_s27 + $0x160] ss:$8 sps:$4 sm:$0xff]  }
 0x2a0   :  { %3855 = vmatmul.mubr.bf16.gmra.mrb[60].mxu1 %v14319_v45 }
 0x2a1   :  { %3744 = vmatmul.mubr.bf16.gmra.mrb[60].mxu0 %v14319_v45  ;;  %11491 = vmatprep.mubr.msk.bf16.mxu1 %vm472_vm0, %v14320_v40  ;;  %v14326_v45 = vld [vmem:[%s21768_s27 + $0x174] ss:$8 sps:$4 sm:$0xff]  }
 0x2a2   :  { %11482 = vmatprep.mubr.msk.bf16.mxu0 %vm472_vm0, %v14320_v40  ;;  %v14327_v40 = vld [vmem:[%s21768_s27 + $0x170] ss:$8 sps:$4 sm:$0xff]  }
 0x2a8   :  { %3863 = vmatmul.mubr.bf16.gmra.mrb[64].mxu1 %v14321_v4 }
 0x2a9   :  { %3754 = vmatmul.mubr.bf16.gmra.mrb[64].mxu0 %v14321_v4  ;;  %11492 = vmatprep.mubr.msk.bf16.mxu1 %vm472_vm0, %v13795_v60  ;;  %v14329_v4 = vld [vmem:[%s21768_s27 + $0x180] ss:$8 sps:$4 sm:$0xff]  }
 0x2aa   :  { %11483 = vmatprep.mubr.msk.bf16.mxu0 %vm472_vm0, %v13795_v60  ;;  %v14328_v60 = vld [vmem:[%s21768_s27 + $0x184] ss:$8 sps:$4 sm:$0xff]  }
 0x2b0   :  { %3871 = vmatmul.mubr.bf16.gmra.mrb[68].mxu1 %v13797_v46 }
 0x2b1   :  { %3764 = vmatmul.mubr.bf16.gmra.mrb[68].mxu0 %v13797_v46  ;;  %11504 = vmatprep.mubr.msk.bf16.mxu1 %vm472_vm0, %v14322_v9  ;;  %v14330_v46 = vld [vmem:[%s21768_s27 + $0x194] ss:$8 sps:$4 sm:$0xff]  }
 0x2b2   :  { %11495 = vmatprep.mubr.msk.bf16.mxu0 %vm472_vm0, %v14322_v9  ;;  %v14331_v9 = vld [vmem:[%s21768_s27 + $0x190] ss:$8 sps:$4 sm:$0xff]  }
 0x2b8   :  { %4101 = vmatmul.mubr.bf16.vlgmr.msra.gmra.mrb[36].mxu1 %v14323_v61 }
 0x2b9   :  { %3978 = vmatmul.mubr.bf16.vlgmr.msra.gmra.mrb[36].mxu0 %v14323_v61  ;;  %11505 = vmatprep.mubr.msk.bf16.mxu1 %vm472_vm0, %v14324_v20  ;;  %v14332_v61 = vld [vmem:[%s21768_s27 + $0x1a4] ss:$8 sps:$4 sm:$0xff]  }
 0x2ba   :  { %11496 = vmatprep.mubr.msk.bf16.mxu0 %vm472_vm0, %v14324_v20  ;;  %v14333_v20 = vld [vmem:[%s21768_s27 + $0x1a0] ss:$8 sps:$4 sm:$0xff]  }
 0x2c0   :  { %4109 = vmatmul.mubr.bf16.gmra.mrb[40].mxu1 %v14325_v36 }
 0x2c1   :  { %3988 = vmatmul.mubr.bf16.gmra.mrb[40].mxu0 %v14325_v36  ;;  %11506 = vmatprep.mubr.msk.bf16.mxu1 %vm472_vm0, %v14326_v45  ;;  %v14334_v36 = vld [vmem:[%s21768_s27 + $0x1b4] ss:$8 sps:$4 sm:$0xff]  }
 0x2c2   :  { %11497 = vmatprep.mubr.msk.bf16.mxu0 %vm472_vm0, %v14326_v45  ;;  %v14335_v45 = vld [vmem:[%s21768_s27 + $0x1b0] ss:$8 sps:$4 sm:$0xff]  }
 0x2c8   :  { %4117 = vmatmul.mubr.bf16.gmra.mrb[44].mxu1 %v14327_v40 }
 0x2c9   :  { %3998 = vmatmul.mubr.bf16.gmra.mrb[44].mxu0 %v14327_v40  ;;  %11507 = vmatprep.mubr.msk.bf16.mxu1 %vm472_vm0, %v14328_v60  ;;  %v14336_v40 = vld [vmem:[%s21768_s27 + $0x1c4] ss:$8 sps:$4 sm:$0xff]  }
 0x2ca   :  { %11498 = vmatprep.mubr.msk.bf16.mxu0 %vm472_vm0, %v14328_v60  ;;  %v13798_v60 = vld [vmem:[%s21768_s27 + $0x1d4] ss:$8 sps:$4 sm:$0xff]  }
 0x2d0   :  { %4125 = vmatmul.mubr.bf16.gmra.mrb[48].mxu1 %v14329_v4 }
 0x2d1   :  { %4008 = vmatmul.mubr.bf16.gmra.mrb[48].mxu0 %v14329_v4  ;;  %11508 = vmatprep.mubr.msk.bf16.mxu1 %vm472_vm0, %v14330_v46  ;;  %v14337_v4 = vld [vmem:[%s21768_s27 + $0x1c0] ss:$8 sps:$4 sm:$0xff]  }
 0x2d2   :  { %11499 = vmatprep.mubr.msk.bf16.mxu0 %vm472_vm0, %v14330_v46  ;;  %v13800_v46 = vld [vmem:[%s21768_s27 + $0x1d0] ss:$8 sps:$4 sm:$0xff]  }
 0x2d8   :  { %4133 = vmatmul.mubr.bf16.gmra.mrb[52].mxu1 %v14331_v9 }
 0x2d9   :  { %4018 = vmatmul.mubr.bf16.gmra.mrb[52].mxu0 %v14331_v9  ;;  %11509 = vmatprep.mubr.msk.bf16.mxu1 %vm472_vm0, %v14332_v61  ;;  %v4243_v9 = vld [vmem:[%s21836_s0 + $0x80] sm:$0xff] }
 0x2da   :  { %11500 = vmatprep.mubr.msk.bf16.mxu0 %vm472_vm0, %v14332_v61  ;;  %v4244_v61 = vld [vmem:[%s21836_s0 + $0x88] sm:$0xff] }
 0x2e0   :  { %4141 = vmatmul.mubr.bf16.gmra.mrb[56].mxu1 %v14333_v20 }
 0x2e1   :  { %4028 = vmatmul.mubr.bf16.gmra.mrb[56].mxu0 %v14333_v20  ;;  %11510 = vmatprep.mubr.msk.bf16.mxu1 %vm472_vm0, %v14334_v36  ;;  %v4227_v20 = vld [vmem:[%s21836_s0] sm:$0xff] }
 0x2e2   :  { %11501 = vmatprep.mubr.msk.bf16.mxu0 %vm472_vm0, %v14334_v36  ;;  %v16546_v36 = vpack.c.bf16 %v4244_v61, %v4243_v9  ;;  %v4245_v61 = vld [vmem:[%s21836_s0 + $0x90] sm:$0xff] }
 0x2e4   :  { %12372 = vmatprep.subr.bf16.mxu0 %v16546_v36 }
 0x2e8   :  { %4149 = vmatmul.mubr.bf16.gmra.mrb[60].mxu1 %v14335_v45 }
 0x2e9   :  { %4038 = vmatmul.mubr.bf16.gmra.mrb[60].mxu0 %v14335_v45  ;;  %11511 = vmatprep.mubr.msk.bf16.mxu1 %vm472_vm0, %v14336_v40  ;;  %v4228_v45 = vld [vmem:[%s21836_s0 + $0x8] sm:$0xff] }
 0x2ea   :  { %11502 = vmatprep.mubr.msk.bf16.mxu0 %vm472_vm0, %v14336_v40  ;;  %v16551_v40 = vpack.c.bf16 %v4228_v45, %v4227_v20  ;;  %v4246_v20 = vld [vmem:[%s21836_s0 + $0x98] sm:$0xff] }
 0x2eb   :  { %v16570_v45 = vpack.c.bf16 %v4246_v20, %v4245_v61  ;;  %v4247_v61 = vld [vmem:[%s21836_s0 + $0xa0] sm:$0xff]  ;;  %v4248_v20 = vld [vmem:[%s21836_s0 + $0xa8] sm:$0xff] }
 0x2ec   :  { %12374 = vmatpush3.bf16.msra.mxu0 %v16551_v40  ;;  %v16593_v43 = vpack.c.bf16 %v4248_v20, %v4247_v61  ;;  %v16608_v61 = vpack.c.bf16 %v4250_v32, %v4249_v55  ;;  %v4233_v20 = vld [vmem:[%s21836_s0 + $0x30] sm:$0xff]  ;;  %v4252_v32 = vld [vmem:[%s21836_s0 + $0xc8] sm:$0xff]  ;;  %v4235_v55 = vld [vmem:[%s21836_s0 + $0x40] sm:$0xff] }
 0x2ed   :  { %12376 = vmatprep.subr.bf16.mxu0 %v16570_v45  ;;  %v16629_v25 = vpack.c.bf16 %v4252_v32, %v4251_v7  ;;  %v4253_v7 = vld [vmem:[%s21836_s0 + $0xd0] sm:$0xff]  ;;  %v4254_v32 = vld [vmem:[%s21836_s0 + $0xd8] sm:$0xff] }
 0x2ee   :  { %v16653_v51 = vpack.c.bf16 %v4254_v32, %v4253_v7  ;;  %v4256_v7 = vld [vmem:[%s21836_s0 + $0xe8] sm:$0xff] }
 0x2f0   :  { %4157 = vmatmul.mubr.bf16.gmra.mrb[64].mxu1 %v14337_v4 }
 0x2f1   :  { %4048 = vmatmul.mubr.bf16.gmra.mrb[64].mxu0 %v14337_v4  ;;  %11512 = vmatprep.mubr.msk.bf16.mxu1 %vm472_vm0, %v13798_v60  ;;  %v4259_v4 = vld [vmem:[%s21836_s0 + $0x100] sm:$0xff] }
 0x2f2   :  { %11503 = vmatprep.mubr.msk.bf16.mxu0 %vm472_vm0, %v13798_v60  ;;  %v21426_v60 = vmov 0.0|0.0  }
 0x2f3   :  { %12403 = vmatprep.subr.bf16.mxu1 %v21426_v60 }
 0x2f8   :  { %4165 = vmatmul.mubr.bf16.gmra.mrb[68].mxu1 %v13800_v46 }
 0x2f9   :  { %4058 = vmatmul.mubr.bf16.gmra.mrb[68].mxu0 %v13800_v46  ;;  %v4260_v46 = vld [vmem:[%s21836_s0 + $0x108] sm:$0xff]  ;;  %12241 = vmatprep.mubr.msk.f32.mxu1 %vm14340_vm1, %v21462_v21 }
 0x2fa   :  { %v16562_v9 = vpack.c.bf16 %v4260_v46, %v4259_v4  ;;  %v4229_v4 = vld [vmem:[%s21836_s0 + $0x10] sm:$0xff]  ;;  %v4230_v46 = vld [vmem:[%s21836_s0 + $0x18] sm:$0xff] }
 0x2fb   :  { %v16581_v24 = vpack.c.bf16 %v4230_v46, %v4229_v4  ;;  %v4232_v4 = vld [vmem:[%s21836_s0 + $0x28] sm:$0xff] }
 0x2fc   :  { %12405 = vmatpush3.bf16.msra.mxu1 %v16562_v9 }
 0x2fd   :  { %12406 = vmatprep.subr.bf16.mxu1 %v21426_v60  ;;  %12378 = vmatpush3.bf16.msra.mxu0 %v16581_v24  ;;  %v4231_v60 = vld [vmem:[%s21836_s0 + $0x20] sm:$0xff] }
 0x2fe   :  { %v16598_v46 = vpack.c.bf16 %v4232_v4, %v4231_v60  ;;  %12380 = vmatprep.subr.bf16.mxu0 %v16593_v43  ;;  %v4234_v60 = vld [vmem:[%s21836_s0 + $0x38] sm:$0xff] }
 0x2ff   :  { %v16617_v4 = vpack.c.bf16 %v4234_v60, %v4233_v20  ;;  %v4236_v20 = vld [vmem:[%s21836_s0 + $0x48] sm:$0xff]  ;;  %v4261_v60 = vld [vmem:[%s21836_s0 + $0x110] sm:$0xff] }
 0x300   :  { %v16640_v8 = vpack.c.bf16 %v4236_v20, %v4235_v55  ;;  %v16642_v17 = vpack.c.bf16 %v4262_v19, %v4261_v60  ;;  %v4237_v19 = vld [vmem:[%s21836_s0 + $0x50] sm:$0xff]  ;;  %v4238_v55 = vld [vmem:[%s21836_s0 + $0x58] sm:$0xff]  ;;  %v4255_v60 = vld [vmem:[%s21836_s0 + $0xe0] sm:$0xff] }
 0x301   :  { %12382 = vmatpush3.bf16.msra.mxu0 %v16598_v46  ;;  %v16661_v20 = vpack.c.bf16 %v4238_v55, %v4237_v19  ;;  %v16671_v32 = vpack.c.bf16 %v4256_v7, %v4255_v60  ;;  %v4240_v19 = vld [vmem:[%s21836_s0 + $0x68] sm:$0xff]  ;;  %v4258_v60 = vld [vmem:[%s21836_s0 + $0xf8] sm:$0xff] }
 0x302   :  { %12384 = vmatprep.subr.bf16.mxu0 %v16608_v61  ;;  %12408 = vmatpush3.bf16.msra.mxu1 %v16642_v17  ;;  %v16679_v55 = vpack.c.bf16 %v4240_v19, %v4239_v13  ;;  %v16689_v7 = vpack.c.bf16 %v4258_v60, %v4257_v50  ;;  %v4242_v13 = vld [vmem:[%s21836_s0 + $0x78] sm:$0xff]  ;;  %s22129_s0 = sld [smem:[#allocation170_spill]] }
 0x303   :  { %v16697_v19 = vpack.c.bf16 %v4242_v13, %v4241_v1 }
 0x305   :  { %12386 = vmatpush3.bf16.msra.mxu0 %v16617_v4 }
 0x306   :  { %12388 = vmatprep.subr.bf16.mxu0 %v16629_v25 }
 0x309   :  { %12390 = vmatpush3.bf16.msra.mxu0 %v16640_v8 }
 0x30a   :  { %12392 = vmatprep.subr.bf16.mxu0 %v16653_v51 }
 0x30d   :  { %12394 = vmatpush3.bf16.msra.mxu0 %v16661_v20 }
 0x30e   :  { %12396 = vmatprep.subr.bf16.mxu0 %v16671_v32 }
 0x311   :  { %12398 = vmatpush3.bf16.msra.mxu0 %v16679_v55 }
 0x312   :  { %12400 = vmatprep.subr.bf16.mxu0 %v16689_v7 }
 0x315   :  { %12402 = vmatpush3.bf16.msra.mxu0 %v16697_v19 }
 0x316   :  { %12417 = vmatprep.subr.bf16.mxu0 %v16546_v36 }
 0x38b   :  { %v16704_v50 = vpop.f32.mrb[36].mxu1 }
 0x38c   :  { %21837 = vst [vmem:[#allocation56_spill] sm:$0xff] %v16704_v50  ;;  %v16706_v60 = vpop.f32.mrb[36].mxu0  ;;  %v4104_v58 = vpop.f32.mrb[37].mxu1  ;;  %v4402_v13 = vsel %vm472_vm0, %v16704_v50, 0.0 }
 0x38d   :  { %21838 = vst [vmem:[#allocation57_spill] sm:$0xff] %v16706_v60  ;;  %v16708_v53 = vpop.f32.mrb[37].mxu0  ;;  %v16710_v1 = vpop.f32.mrb[38].mxu1 }
 0x38e   :  { %21839 = vst [vmem:[#allocation58_spill] sm:$0xff] %v16708_v53  ;;  %21840 = vst [vmem:[#allocation59_spill] sm:$0xff] %v16710_v1  ;;  %v4403_v56 = vsel %vm472_vm0, %v16710_v1, 0.0  ;;  %v16716_v41 = vpop.f32.mrb[38].mxu0  ;;  %v4107_v21 = vpop.f32.mrb[39].mxu1 }
 0x38f   :  { %21841 = vst [vmem:[#allocation60_spill] sm:$0xff] %v16716_v41  ;;  %v4404_v49 = vadd.f32 %v4403_v56, %v4402_v13  ;;  %v4356_v36 = vadd.f32 %v16716_v41, %v16706_v60  ;;  %v16720_v30 = vpop.f32.mrb[39].mxu0 }
 0x390   :  { %21842 = vst [vmem:[#allocation61_spill] sm:$0xff] %v16720_v30  ;;  %v4379_v58 = vadd.f32 %v16720_v30, %v16708_v53 }
 0x393   :  { %v16724_v2 = vpop.f32.mrb[40].mxu1 }
 0x394   :  { %21843 = vst [vmem:[#allocation62_spill] sm:$0xff] %v16724_v2  ;;  %v4405_v50 = vsel %vm472_vm0, %v16724_v2, 0.0  ;;  %v16728_v52 = vpop.f32.mrb[40].mxu0  ;;  %v4112_v1 = vpop.f32.mrb[41].mxu1 }
 0x395   :  { %21844 = vst [vmem:[#allocation63_spill] sm:$0xff] %v16728_v52  ;;  %v4406_v22 = vadd.f32 %v4405_v50, %v4404_v49  ;;  %v4357_v21 = vadd.f32 %v4356_v36, %v16728_v52  ;;  %v16731_v56 = vpop.f32.mrb[41].mxu0  ;;  %v16733_v13 = vpop.f32.mrb[42].mxu1 }
 0x396   :  { %21845 = vst [vmem:[#allocation64_spill] sm:$0xff] %v16731_v56  ;;  %21846 = vst [vmem:[#allocation65_spill] sm:$0xff] %v16733_v13  ;;  %v4380_v34 = vadd.f32 %v4379_v58, %v16731_v56  ;;  %v4407_v30 = vsel %vm472_vm0, %v16733_v13, 0.0  ;;  %v16738_v53 = vpop.f32.mrb[42].mxu0  ;;  %v4115_v26 = vpop.f32.mrb[43].mxu1 }
 0x397   :  { %21847 = vst [vmem:[#allocation66_spill] sm:$0xff] %v16738_v53  ;;  %v4408_v14 = vadd.f32 %v4407_v30, %v4406_v22  ;;  %v4358_v2 = vadd.f32 %v4357_v21, %v16738_v53  ;;  %v16741_v5 = vpop.f32.mrb[43].mxu0 }
 0x398   :  { %21848 = vst [vmem:[#allocation67_spill] sm:$0xff] %v16741_v5  ;;  %v4381_v49 = vadd.f32 %v4380_v34, %v16741_v5 }
 0x39b   :  { %v16744_v50 = vpop.f32.mrb[44].mxu1 }
 0x39c   :  { %21849 = vst [vmem:[#allocation68_spill] sm:$0xff] %v16744_v50  ;;  %v4409_v1 = vsel %vm472_vm0, %v16744_v50, 0.0  ;;  %v16748_v36 = vpop.f32.mrb[44].mxu0  ;;  %v4120_v58 = vpop.f32.mrb[45].mxu1 }
 0x39d   :  { %21850 = vst [vmem:[#allocation69_spill] sm:$0xff] %v16748_v36  ;;  %v4410_v56 = vadd.f32 %v4409_v1, %v4408_v14  ;;  %v4359_v13 = vadd.f32 %v4358_v2, %v16748_v36  ;;  %v16751_v39 = vpop.f32.mrb[45].mxu0  ;;  %v16753_v26 = vpop.f32.mrb[46].mxu1 }
 0x39e   :  { %21851 = vst [vmem:[#allocation70_spill] sm:$0xff] %v16751_v39  ;;  %21852 = vst [vmem:[#allocation71_spill] sm:$0xff] %v16753_v26  ;;  %v4382_v22 = vadd.f32 %v4381_v49, %v16751_v39  ;;  %v4411_v34 = vsel %vm472_vm0, %v16753_v26, 0.0  ;;  %v16758_v30 = vpop.f32.mrb[46].mxu0  ;;  %v4123_v21 = vpop.f32.mrb[47].mxu1 }
 0x39f   :  { %21853 = vst [vmem:[#allocation72_spill] sm:$0xff] %v16758_v30  ;;  %v4412_v5 = vadd.f32 %v4411_v34, %v4410_v56  ;;  %v4360_v50 = vadd.f32 %v4359_v13, %v16758_v30  ;;  %v16761_v35 = vpop.f32.mrb[47].mxu0 }
 0x3a0   :  { %21854 = vst [vmem:[#allocation73_spill] sm:$0xff] %v16761_v35  ;;  %v4383_v14 = vadd.f32 %v4382_v22, %v16761_v35 }
 0x3a3   :  { %v16764_v2 = vpop.f32.mrb[48].mxu1 }
 0x3a4   :  { %21855 = vst [vmem:[#allocation74_spill] sm:$0xff] %v16764_v2  ;;  %v4413_v1 = vsel %vm472_vm0, %v16764_v2, 0.0  ;;  %v16768_v58 = vpop.f32.mrb[48].mxu0  ;;  %v4128_v49 = vpop.f32.mrb[49].mxu1 }
 0x3a5   :  { %21856 = vst [vmem:[#allocation75_spill] sm:$0xff] %v16768_v58  ;;  %v4414_v39 = vadd.f32 %v4413_v1, %v4412_v5  ;;  %v4361_v26 = vadd.f32 %v4360_v50, %v16768_v58  ;;  %v16771_v28 = vpop.f32.mrb[49].mxu0  ;;  %v16773_v56 = vpop.f32.mrb[50].mxu1 }
 0x3a6   :  { %21857 = vst [vmem:[#allocation76_spill] sm:$0xff] %v16771_v28  ;;  %21858 = vst [vmem:[#allocation77_spill] sm:$0xff] %v16773_v56  ;;  %v4384_v13 = vadd.f32 %v4383_v14, %v16771_v28  ;;  %v4415_v22 = vsel %vm472_vm0, %v16773_v56, 0.0  ;;  %v16778_v34 = vpop.f32.mrb[50].mxu0  ;;  %v4131_v21 = vpop.f32.mrb[51].mxu1 }
 0x3a7   :  { %21859 = vst [vmem:[#allocation78_spill] sm:$0xff] %v16778_v34  ;;  %v4416_v35 = vadd.f32 %v4415_v22, %v4414_v39  ;;  %v4362_v2 = vadd.f32 %v4361_v26, %v16778_v34  ;;  %v16781_v6 = vpop.f32.mrb[51].mxu0 }
 0x3a8   :  { %21860 = vst [vmem:[#allocation79_spill] sm:$0xff] %v16781_v6  ;;  %v4385_v5 = vadd.f32 %v4384_v13, %v16781_v6 }
 0x3ab   :  { %v16784_v50 = vpop.f32.mrb[52].mxu1 }
 0x3ac   :  { %21861 = vst [vmem:[#allocation80_spill] sm:$0xff] %v16784_v50  ;;  %v4417_v1 = vsel %vm472_vm0, %v16784_v50, 0.0  ;;  %v16788_v49 = vpop.f32.mrb[52].mxu0  ;;  %v4136_v14 = vpop.f32.mrb[53].mxu1 }
 0x3ad   :  { %21862 = vst [vmem:[#allocation81_spill] sm:$0xff] %v16788_v49  ;;  %v4418_v28 = vadd.f32 %v4417_v1, %v4416_v35  ;;  %v4363_v56 = vadd.f32 %v4362_v2, %v16788_v49  ;;  %v16791_v63 = vpop.f32.mrb[53].mxu0  ;;  %v16793_v39 = vpop.f32.mrb[54].mxu1 }
 0x3ae   :  { %21863 = vst [vmem:[#allocation82_spill] sm:$0xff] %v16791_v63  ;;  %21864 = vst [vmem:[#allocation83_spill] sm:$0xff] %v16793_v39  ;;  %v4386_v26 = vadd.f32 %v4385_v5, %v16791_v63  ;;  %v4419_v13 = vsel %vm472_vm0, %v16793_v39, 0.0  ;;  %v16798_v22 = vpop.f32.mrb[54].mxu0  ;;  %v4139_v21 = vpop.f32.mrb[55].mxu1 }
 0x3af   :  { %21865 = vst [vmem:[#allocation84_spill] sm:$0xff] %v16798_v22  ;;  %v4420_v6 = vadd.f32 %v4419_v13, %v4418_v28  ;;  %v4364_v50 = vadd.f32 %v4363_v56, %v16798_v22  ;;  %v16801_v37 = vpop.f32.mrb[55].mxu0 }
 0x3b0   :  { %21866 = vst [vmem:[#allocation85_spill] sm:$0xff] %v16801_v37  ;;  %v4387_v35 = vadd.f32 %v4386_v26, %v16801_v37 }
 0x3b3   :  { %v16804_v2 = vpop.f32.mrb[56].mxu1 }
 0x3b4   :  { %21867 = vst [vmem:[#allocation86_spill] sm:$0xff] %v16804_v2  ;;  %v4421_v1 = vsel %vm472_vm0, %v16804_v2, 0.0  ;;  %v16808_v14 = vpop.f32.mrb[56].mxu0  ;;  %v4144_v5 = vpop.f32.mrb[57].mxu1 }
 0x3b5   :  { %21868 = vst [vmem:[#allocation87_spill] sm:$0xff] %v16808_v14  ;;  %v4422_v63 = vadd.f32 %v4421_v1, %v4420_v6  ;;  %v4365_v39 = vadd.f32 %v4364_v50, %v16808_v14  ;;  %v16811_v57 = vpop.f32.mrb[57].mxu0  ;;  %v16813_v28 = vpop.f32.mrb[58].mxu1 }
 0x3b6   :  { %21869 = vst [vmem:[#allocation88_spill] sm:$0xff] %v16811_v57  ;;  %21870 = vst [vmem:[#allocation89_spill] sm:$0xff] %v16813_v28  ;;  %v4388_v56 = vadd.f32 %v4387_v35, %v16811_v57  ;;  %v4423_v26 = vsel %vm472_vm0, %v16813_v28, 0.0  ;;  %v16818_v13 = vpop.f32.mrb[58].mxu0  ;;  %v4147_v21 = vpop.f32.mrb[59].mxu1 }
 0x3b7   :  { %21871 = vst [vmem:[#allocation90_spill] sm:$0xff] %v16818_v13  ;;  %v4424_v37 = vadd.f32 %v4423_v26, %v4422_v63  ;;  %v4366_v2 = vadd.f32 %v4365_v39, %v16818_v13  ;;  %v16821_v22 = vpop.f32.mrb[59].mxu0 }
 0x3b8   :  { %21872 = vst [vmem:[#allocation91_spill] sm:$0xff] %v16821_v22  ;;  %v4389_v6 = vadd.f32 %v4388_v56, %v16821_v22 }
 0x3bb   :  { %v16824_v50 = vpop.f32.mrb[60].mxu1 }
 0x3bc   :  { %21873 = vst [vmem:[#allocation92_spill] sm:$0xff] %v16824_v50  ;;  %v4425_v1 = vsel %vm472_vm0, %v16824_v50, 0.0  ;;  %v16828_v5 = vpop.f32.mrb[60].mxu0  ;;  %v4152_v35 = vpop.f32.mrb[61].mxu1 }
 0x3bd   :  { %21874 = vst [vmem:[#allocation93_spill] sm:$0xff] %v16828_v5  ;;  %v4426_v57 = vadd.f32 %v4425_v1, %v4424_v37  ;;  %v4367_v28 = vadd.f32 %v4366_v2, %v16828_v5  ;;  %v16831_v14 = vpop.f32.mrb[61].mxu0  ;;  %v16833_v63 = vpop.f32.mrb[62].mxu1 }
 0x3be   :  { %21875 = vst [vmem:[#allocation94_spill] sm:$0xff] %v16831_v14  ;;  %21876 = vst [vmem:[#allocation95_spill] sm:$0xff] %v16833_v63  ;;  %v4390_v39 = vadd.f32 %v4389_v6, %v16831_v14  ;;  %v4427_v56 = vsel %vm472_vm0, %v16833_v63, 0.0  ;;  %v16838_v26 = vpop.f32.mrb[62].mxu0  ;;  %v4155_v21 = vpop.f32.mrb[63].mxu1 }
 0x3bf   :  { %21877 = vst [vmem:[#allocation96_spill] sm:$0xff] %v16838_v26  ;;  %v4428_v22 = vadd.f32 %v4427_v56, %v4426_v57  ;;  %v4368_v50 = vadd.f32 %v4367_v28, %v16838_v26  ;;  %v16841_v13 = vpop.f32.mrb[63].mxu0 }
 0x3c0   :  { %21878 = vst [vmem:[#allocation97_spill] sm:$0xff] %v16841_v13  ;;  %v4391_v37 = vadd.f32 %v4390_v39, %v16841_v13  ;;  %v4286_v13 = vrot.slane %v16288_v3, 4 }
 0x3c3   :  { %v16844_v2 = vpop.f32.mrb[64].mxu1 }
 0x3c4   :  { %21879 = vst [vmem:[#allocation98_spill] sm:$0xff] %v16844_v2  ;;  %v4429_v1 = vsel %vm472_vm0, %v16844_v2, 0.0  ;;  %v16848_v35 = vpop.f32.mrb[64].mxu0  ;;  %v4160_v6 = vpop.f32.mrb[65].mxu1  ;;  %v4350_v2 = vrot.slane %v16285_v10, 4 }
 0x3c5   :  { %21880 = vst [vmem:[#allocation99_spill] sm:$0xff] %v16848_v35  ;;  %v4430_v14 = vadd.f32 %v4429_v1, %v4428_v22  ;;  %v4369_v63 = vadd.f32 %v4368_v50, %v16848_v35  ;;  %v16851_v5 = vpop.f32.mrb[65].mxu0  ;;  %v16853_v57 = vpop.f32.mrb[66].mxu1  ;;  %v4309_v1 = vrot.slane %v16293_v62, 4 }
 0x3c6   :  { %21881 = vst [vmem:[#allocation100_spill] sm:$0xff] %v16851_v5  ;;  %21882 = vst [vmem:[#allocation101_spill] sm:$0xff] %v16853_v57  ;;  %v4392_v28 = vadd.f32 %v4391_v37, %v16851_v5  ;;  %v4431_v39 = vsel %vm472_vm0, %v16853_v57, 0.0  ;;  %v16858_v56 = vpop.f32.mrb[66].mxu0  ;;  %v4163_v21 = vpop.f32.mrb[67].mxu1  ;;  %v4351_v37 = vadd.f32 %v4350_v2, %v16285_v10  ;;  %v4287_v57 = vadd.f32 %v4286_v13, %v16288_v3 }
 0x3c7   :  { %21883 = vst [vmem:[#allocation102_spill] sm:$0xff] %v16858_v56  ;;  %v4432_v6 = vadd.f32 %v4431_v39, %v4430_v14  ;;  %v4370_v22 = vadd.f32 %v4369_v63, %v16858_v56  ;;  %v16863_v50 = vpop.f32.mrb[67].mxu0  ;;  %v4310_v21 = vadd.f32 %v4309_v1, %v16293_v62 }
 0x3c8   :  { %21884 = vst [vmem:[#allocation103_spill] sm:$0xff] %v16863_v50  ;;  %v4393_v35 = vadd.f32 %v4392_v28, %v16863_v50  ;;  %v4352_v2 = vrot.slane %v4351_v37, 2  ;;  %v4288_v1 = vrot.slane %v4287_v57, 2 }
 0x3cb   :  { %v16869_v5 = vpop.f32.mrb[68].mxu1 }
 0x3cc   :  { %21885 = vst [vmem:[#allocation104_spill] sm:$0xff] %v16869_v5  ;;  %v4433_v26 = vsel %vm472_vm0, %v16869_v5, 0.0  ;;  %v16874_v14 = vpop.f32.mrb[68].mxu0  ;;  %v4168_v63 = vpop.f32.mrb[69].mxu1 }
 0x3cd   :  { %21886 = vst [vmem:[#allocation105_spill] sm:$0xff] %v16874_v14  ;;  %v4434_v39 = vadd.f32 %v4433_v26, %v4432_v6  ;;  %v4371_v56 = vadd.f32 %v4370_v22, %v16874_v14  ;;  %v16877_v49 = vpop.f32.mrb[69].mxu0  ;;  %v16879_v28 = vpop.f32.mrb[70].mxu1  ;;  %v4311_v6 = vrot.slane %v4310_v21, 2 }
 0x3ce   :  { %21887 = vst [vmem:[#allocation106_spill] sm:$0xff] %v16877_v49  ;;  %21888 = vst [vmem:[#allocation107_spill] sm:$0xff] %v16879_v28  ;;  %v4394_v10 = vadd.f32 %v4393_v35, %v16877_v49  ;;  %v4435_v3 = vsel %vm472_vm0, %v16879_v28, 0.0  ;;  %v16884_v13 = vpop.f32.mrb[70].mxu0  ;;  %v4171_v62 = vpop.f32.mrb[71].mxu1  ;;  %v4353_v35 = vadd.f32 %v4352_v2, %v4351_v37  ;;  %v4289_v49 = vadd.f32 %v4288_v1, %v4287_v57 }
 0x3cf   :  { %21889 = vst [vmem:[#allocation108_spill] sm:$0xff] %v16884_v13  ;;  %v4436_v5 = vadd.f32 %v4435_v3, %v4434_v39  ;;  %v4372_v63 = vadd.f32 %v4371_v56, %v16884_v13  ;;  %v16887_v26 = vpop.f32.mrb[71].mxu0  ;;  %v4312_v30 = vadd.f32 %v4311_v6, %v4310_v21  ;;  %v21891_v2 = vmov 0.0  }
 0x3d0   :  { %21890 = vst [vmem:[#allocation109_spill] sm:$0xff] %v16887_v26  ;;  %v4395_v22 = vadd.f32 %v4394_v10, %v16887_v26  ;;  %v4354_v39 = vrot.slane %v4353_v35, 1  ;;  %v4290_v3 = vrot.slane %v4289_v49, 1 }
 0x3d1   :  { %v4437_v50 = vrot.slane %v4436_v5, 4  ;;  %v4373_v14 = vrot.slane %v4372_v63, 4  ;;  %v4313_v60 = vrot.slane %v4312_v30, 1 }
 0x3d2   :  { %v4396_v34 = vrot.slane %v4395_v22, 4  ;;  %v4355_v33 = vadd.f32 %v4354_v39, %v4353_v35  ;;  %v4291_v16 = vadd.f32 %v4290_v3, %v4289_v49 }
 0x3d3   :  { %v4438_v58 = vadd.f32 %v4437_v50, %v4436_v5  ;;  %v4374_v28 = vadd.f32 %v4373_v14, %v4372_v63  ;;  %v4314_v5 = vadd.f32 %v4313_v60, %v4312_v30 }
 0x3d4   :  { %v4397_v36 = vadd.f32 %v4396_v34, %v4395_v22 }
 0x3d5   :  { %v4439_v62 = vrot.slane %v4438_v58, 2  ;;  %v4375_v53 = vrot.slane %v4374_v28, 2 }
 0x3d6   :  { %v4398_v52 = vrot.slane %v4397_v36, 2 }
 0x3d7   :  { %v4440_v56 = vadd.f32 %v4439_v62, %v4438_v58  ;;  %v4376_v13 = vadd.f32 %v4375_v53, %v4374_v28  ;;  %v4264_v53 = vld [vmem:[%s21893_s4 + $0x8] sm:$0xff] }
 0x3d8   :  { %v4399_v41 = vadd.f32 %v4398_v52, %v4397_v36  ;;  %v4266_v52 = vld [vmem:[%s21893_s4 + $0x18] sm:$0xff] }
 0x3d9   :  { %v4441_v47 = vrot.slane %v4440_v56, 1  ;;  %v4377_v10 = vrot.slane %v4376_v13, 1 }
 0x3da   :  { %v4400_v26 = vrot.slane %v4399_v41, 1 }
 0x3db   :  { %v4442_v37 = vadd.f32 %v4441_v47, %v4440_v56  ;;  %v4378_v57 = vadd.f32 %v4377_v10, %v4376_v13 }
 0x3dc   :  { %v4401_v50 = vadd.f32 %v4400_v26, %v4399_v41 }
 0x3dd   :  { %v4445_v21 = vadd.f32 %v4442_v37, %v4355_v33  ;;  %v4443_v34 = vadd.f32 %v4378_v57, %v4291_v16  ;;  %v21899_v37 = vld [vmem:[#allocation48_spill] sm:$0xff] }
 0x3de   :  { %v4444_v14 = vadd.f32 %v4401_v50, %v4314_v5  ;;  %v21900_v5 = vld [vmem:[#allocation51_spill] sm:$0xff] }
 0x3df   :  { %12242 = vmatmul.mubr.msk.f32.vlgmr.msra.gmra.mrb[72].mxu1 %vm472_vm0, %v4445_v21  ;;  %v21901_v21 = vld [vmem:[#allocation54_spill] sm:$0xff] }
 0x3e0   :  { %4513 = vmatprep.mubr.f32.mxu0 %v4444_v14  ;;  %4658 = vmatprep.mubr.f32.mxu1 %v21891_v2  ;;  %v21902_v14 = vld [vmem:[#allocation57_spill] sm:$0xff] }
 0x3e1   :  { %4514 = vmatmul.mubr.f32.vlgmr.msra.gmra.mrb[72].mxu0 %v4443_v34 }
 0x3e2   :  { %12419 = vmatpush3.bf16.msra.mxu0 %v16551_v40 }
 0x3e3   :  { %12421 = vmatprep.subr.bf16.mxu0 %v16570_v45  ;;  %v4265_v45 = vld [vmem:[%s21893_s4 + $0x10] sm:$0xff] }
 0x3e6   :  { %12423 = vmatpush3.bf16.msra.mxu0 %v16581_v24  ;;  %v21892_v24 = vmov 0.0|0.0  }
 0x3e7   :  { %12425 = vmatprep.subr.bf16.mxu0 %v16593_v43 }
 0x3ea   :  { %12427 = vmatpush3.bf16.msra.mxu0 %v16598_v46  ;;  %v4268_v46 = vld [vmem:[%s21893_s4 + $0x28] sm:$0xff] }
 0x3eb   :  { %12429 = vmatprep.subr.bf16.mxu0 %v16608_v61 }
 0x3ee   :  { %12431 = vmatpush3.bf16.msra.mxu0 %v16617_v4  ;;  %v16933_v4 = vpack.c.bf16 %v4268_v46, %v4265_v45  ;;  %v21907_v45 = vld [vmem:[#allocation72_spill] sm:$0xff] }
 0x3ef   :  { %12433 = vmatprep.subr.bf16.mxu0 %v16629_v25  ;;  %v4263_v25 = vld [vmem:[%s21893_s4] sm:$0xff] }
 0x3f0   :  { %v16922_v16 = vpack.c.bf16 %v4266_v52, %v4263_v25  ;;  %21896 = vst [vmem:[#allocation112_spill] sm:$0xff] %v16933_v4  ;;  %v21904_v52 = vld [vmem:[#allocation63_spill] sm:$0xff] }
 0x3f2   :  { %12435 = vmatpush3.bf16.msra.mxu0 %v16640_v8  ;;  %21895 = vst [vmem:[#allocation111_spill] sm:$0xff] %v16922_v16 }
 0x3f3   :  { %12437 = vmatprep.subr.bf16.mxu0 %v16653_v51  ;;  %v4267_v51 = vld [vmem:[%s21893_s4 + $0x20] sm:$0xff] }
 0x3f4   :  { %v16914_v8 = vpack.c.bf16 %v4267_v51, %v4264_v53  ;;  %v21903_v51 = vld [vmem:[#allocation60_spill] sm:$0xff] }
 0x3f6   :  { %12439 = vmatpush3.bf16.msra.mxu0 %v16661_v20  ;;  %21894 = vst [vmem:[#allocation110_spill] sm:$0xff] %v16914_v8  ;;  %12410 = vmatprep.subr.bf16.mxu1 %v16914_v8 }
 0x3f7   :  { %12441 = vmatprep.subr.bf16.mxu0 %v16671_v32  ;;  %12412 = vmatpush1.bf16.msra.mxu1 %v16922_v16  ;;  %v4735_v32 = vlaneseq  ;;  %v21942_v16 = vld [vmem:[#allocation58_spill] sm:$0xff] }
 0x3f8   :  { %12413 = vmatprep.subr.bf16.mxu1 %v21892_v24 }
 0x3fa   :  { %12443 = vmatpush3.bf16.msra.mxu0 %v16679_v55  ;;  %v4736_v55 = vshrl.u32 %v4735_v32, 7 }
 0x3fb   :  { %12445 = vmatprep.subr.bf16.mxu0 %v16689_v7 }
 0x3fc   :  { %v16951_v7 = vsub.s32 0, %v4736_v55  ;;  %v21909_v55 = vld [vmem:[#allocation78_spill] sm:$0xff] }
 0x3fe   :  { %12447 = vmatpush3.bf16.msra.mxu0 %v16697_v19  ;;  %21898 = vst [vmem:[#allocation114_spill] sm:$0xff] %v16951_v7 }
 0x3ff   :  { %12468 = vmatprep.subr.bf16.mxu0 %v21892_v24 }
 0x4b2   :  { %v4585_v33 = vpop.f32.mrb[72].mxu1 }
 0x4b3   :  { %v12243_v41 = vpop.f32.mrb[73].mxu1 }
 0x4b4   :  { %v12133_v43 = vpop.f32.mrb[72].mxu0  ;;  %v21905_v41 = vld [vmem:[#allocation66_spill] sm:$0xff] }
 0x4b5   :  { %v12134_v47 = vpop.f32.mrb[73].mxu0 }
 0x4b6   :  { %v12135_v40 = vadd.f32 %v12134_v47, %v12133_v43  ;;  %v21906_v47 = vld [vmem:[#allocation69_spill] sm:$0xff] }
 0x4b8   :  { %v4586_v61 = vadd.f32 %v12135_v40, %v4585_v33 }
 0x4ba   :  { %v16935_v20 = vmul.f32 0.0015432099, %v4586_v61  ;;  %v21908_v61 = vld [vmem:[#allocation75_spill] sm:$0xff] }
 0x4bc   :  { %21897 = vst [vmem:[#allocation113_spill] sm:$0xff] %v16935_v20  ;;  %11514 = vmatmul.mubr.msk.f32.vlgmr.msra.gmra.mrb[74].mxu1 %vm4590_vm2, %v16935_v20 }
 0x4bd   :  { %12415 = vmatpush3.bf16.msra.mxu1 %v16933_v4  ;;  %12248 = vmatprep.mubr.msk.f32.mxu1 %vm14340_vm1, %v21891_v2  ;;  %v21936_v4 = vld [vmem:[#allocation49_spill] sm:$0xff] }
 0x4be   :  { %12448 = vmatprep.subr.bf16.mxu1 %v21892_v24 }
 0x4c0   :  { %12249 = vmatmul.mubr.msk.f32.vlgmr.msra.gmra.mrb[76].mxu1 %vm4590_vm2, %v16935_v20  ;;  %v21938_v20 = vld [vmem:[#allocation52_spill] sm:$0xff] }
 0x4c1   :  { %12450 = vmatpush3.bf16.msra.mxu1 %v16562_v9  ;;  %12259 = vmatprep.mubr.msk.f32.mxu1 %vm14340_vm1, %v21891_v2 }
 0x4c2   :  { %12451 = vmatprep.subr.bf16.mxu1 %v21892_v24  ;;  %v21940_v24 = vld [vmem:[#allocation55_spill] sm:$0xff] }
 0x4c5   :  { %12453 = vmatpush3.bf16.msra.mxu1 %v16642_v17 }
 0x4c6   :  { %12455 = vmatprep.subr.bf16.mxu1 %v16914_v8  ;;  %v21934_v8 = vld [vmem:[#allocation46_spill] sm:$0xff] }
 0x58f   :  { %v4660_v19 = vpop.f32.mrb[74].mxu1 }
 0x590   :  { %v4738_v60 = vrot.slane %v4660_v19, %v16951_v7  ;;  %v4662_v36 = vpop.f32.mrb[75].mxu1 }
 0x591   :  { %v16955_v30 = vrot.slane %v4662_v36, %v16951_v7  ;;  %v21910_v36 = vld [vmem:[#allocation81_spill] sm:$0xff] }
 0x592   :  { %v4747_v9 = vsub.f32 %v15978_v54, %v4738_v60  ;;  %v4750_v58 = vsub.f32 %v15988_v27, %v4738_v60  ;;  %v16960_v49 = vsub.f32 %v16011_v23, %v4738_v60  ;;  %v16963_v17 = vsub.f32 %v16023_v0, %v4738_v60  ;;  %v21930_v0 = vld [vmem:[#allocation34_spill] sm:$0xff]  ;;  %v21931_v23 = vld [vmem:[#allocation37_spill] sm:$0xff]  ;;  %v21932_v27 = vld [vmem:[#allocation40_spill] sm:$0xff] }
 0x593   :  { %v16966_v28 = vsub.f32 %v16047_v11, %v4738_v60  ;;  %v16969_v13 = vsub.f32 %v16058_v15, %v4738_v60  ;;  %v16972_v1 = vsub.f32 %v16083_v38, %v4738_v60  ;;  %v16975_v63 = vsub.f32 %v16094_v44, %v4738_v60  ;;  %v16977_v26 = vpop.f32.mrb[76].mxu1  ;;  %v21926_v44 = vld [vmem:[#allocation5_spill] sm:$0xff]  ;;  %v21928_v15 = vld [vmem:[#allocation28_spill] sm:$0xff]  ;;  %v21929_v11 = vld [vmem:[#allocation31_spill] sm:$0xff] }
 0x594   :  { %v16980_v6 = vsub.f32 %v16131_v12, %v4738_v60  ;;  %v16983_v22 = vsub.f32 %v16142_v31, %v4738_v60  ;;  %v16986_v35 = vsub.f32 %v16179_v42, %v4738_v60  ;;  %v16989_v62 = vsub.f32 %v16190_v18, %v4738_v60  ;;  %v12250_v39 = vpop.f32.mrb[77].mxu1  ;;  %v21927_v38 = vld [vmem:[#allocation25_spill] sm:$0xff]  ;;  %v21933_v54 = vld [vmem:[#allocation43_spill] sm:$0xff] }
 0x595   :  { %v16992_v3 = vsub.f32 %v16218_v48, %v4738_v60  ;;  %v16995_v56 = vsub.f32 %v16228_v59, %v4738_v60  ;;  %v16998_v10 = vsub.f32 %v16246_v29, %v4738_v60  ;;  %v17001_v57 = vsub.f32 %v21899_v37, %v4738_v60 }
 0x596   :  { %v17004_v50 = vsub.f32 %v21900_v5, %v4738_v60  ;;  %v17007_v34 = vsub.f32 %v21901_v21, %v4738_v60  ;;  %v17010_v53 = vsub.f32 %v21902_v14, %v4738_v60  ;;  %v17013_v25 = vsub.f32 %v21903_v51, %v4738_v60 }
 0x597   :  { %v17016_v33 = vsub.f32 %v21904_v52, %v4738_v60  ;;  %v17019_v43 = vsub.f32 %v21905_v41, %v4738_v60  ;;  %v17022_v40 = vsub.f32 %v21906_v47, %v4738_v60  ;;  %v17025_v46 = vsub.f32 %v21907_v45, %v4738_v60  ;;  %v21911_v52 = vld [vmem:[#allocation84_spill] sm:$0xff]  ;;  %v21912_v41 = vld [vmem:[#allocation87_spill] sm:$0xff]  ;;  %v21913_v47 = vld [vmem:[#allocation90_spill] sm:$0xff] }
 0x598   :  { %v17028_v32 = vsub.f32 %v21908_v61, %v4738_v60  ;;  %v17031_v19 = vsub.f32 %v21909_v55, %v4738_v60  ;;  %v17034_v39 = vsub.f32 %v21910_v36, %v4738_v60  ;;  %v17037_v51 = vsub.f32 %v21911_v52, %v4738_v60  ;;  %v21914_v45 = vld [vmem:[#allocation93_spill] sm:$0xff]  ;;  %v21915_v61 = vld [vmem:[#allocation96_spill] sm:$0xff]  ;;  %v21916_v55 = vld [vmem:[#allocation99_spill] sm:$0xff] }
 0x599   :  { %v17040_v14 = vsub.f32 %v21912_v41, %v4738_v60  ;;  %v17043_v21 = vsub.f32 %v21913_v47, %v4738_v60  ;;  %v17046_v5 = vsub.f32 %v21914_v45, %v4738_v60  ;;  %v17049_v37 = vsub.f32 %v21915_v61, %v4738_v60  ;;  %v21917_v36 = vld [vmem:[#allocation102_spill] sm:$0xff]  ;;  %v21918_v52 = vld [vmem:[#allocation105_spill] sm:$0xff]  ;;  %v21919_v41 = vld [vmem:[#allocation108_spill] sm:$0xff] }
 0x59a   :  { %v17052_v29 = vsub.f32 %v21916_v55, %v4738_v60  ;;  %v17055_v59 = vsub.f32 %v21917_v36, %v4738_v60  ;;  %v17058_v48 = vsub.f32 %v21918_v52, %v4738_v60  ;;  %v17061_v18 = vsub.f32 %v21919_v41, %v4738_v60  ;;  %v21920_v47 = vld [vmem:[#allocation10_spill] sm:$0xff]  ;;  %v21921_v45 = vld [vmem:[#allocation13_spill] sm:$0xff]  ;;  %v21922_v55 = vld [vmem:[#allocation16_spill] sm:$0xff] }
 0x59b   :  { %v17065_v42 = vsub.f32 %v21920_v47, %v16955_v30  ;;  %v17069_v61 = vsub.f32 %v21921_v45, %v16955_v30  ;;  %v17073_v31 = vsub.f32 %v21922_v55, %v16955_v30  ;;  %v21923_v36 = vld [vmem:[#allocation19_spill] sm:$0xff]  ;;  %v21924_v52 = vld [vmem:[#allocation22_spill] sm:$0xff]  ;;  %v17089_v45 = vsub.f32 %v21926_v44, %v16955_v30 }
 0x59c   :  { %v17077_v12 = vsub.f32 %v21923_v36, %v16955_v30  ;;  %v17081_v60 = vsub.f32 %v21924_v52, %v16955_v30  ;;  %v21925_v41 = vld [vmem:[#allocation2_spill] sm:$0xff]  ;;  %v17093_v55 = vsub.f32 %v21927_v38, %v16955_v30  ;;  %v17097_v36 = vsub.f32 %v21928_v15, %v16955_v30 }
 0x59d   :  { %v17085_v47 = vsub.f32 %v21925_v41, %v16955_v30  ;;  %v17101_v52 = vsub.f32 %v21929_v11, %v16955_v30  ;;  %v17105_v41 = vsub.f32 %v21930_v0, %v16955_v30  ;;  %v17109_v44 = vsub.f32 %v21931_v23, %v16955_v30 }
 0x59e   :  { %v17113_v38 = vsub.f32 %v21932_v27, %v16955_v30  ;;  %v17117_v15 = vsub.f32 %v21933_v54, %v16955_v30  ;;  %v17121_v11 = vsub.f32 %v21934_v8, %v16955_v30  ;;  %v17125_v0 = vsub.f32 %v21936_v4, %v16955_v30 }
 0x59f   :  { %v17129_v23 = vsub.f32 %v21938_v20, %v16955_v30  ;;  %v17133_v27 = vsub.f32 %v21940_v24, %v16955_v30  ;;  %v17135_v2 = vmul.f32 %v4747_v9, %v4747_v9  ;;  %v17137_v54 = vmul.f32 %v4750_v58, %v4750_v58  ;;  %v21950_v9 = vld [vmem:[#allocation70_spill] sm:$0xff] }
 0x5a0   :  { %21935 = vst [vmem:[#allocation105_spill] sm:$0xff] %v17121_v11  ;;  %21937 = vst [vmem:[#allocation108_spill] sm:$0xff] %v17125_v0  ;;  %v17141_v8 = vsub.f32 %v21942_v16, %v16955_v30  ;;  %v21944_v11 = vld [vmem:[#allocation61_spill] sm:$0xff]  ;;  %v21946_v0 = vld [vmem:[#allocation64_spill] sm:$0xff]  ;;  %v17157_v58 = vsub.f32 %v21950_v9, %v16955_v30 }
 0x5a1   :  { %21939 = vst [vmem:[#allocation115_spill] sm:$0xff] %v17129_v23  ;;  %21941 = vst [vmem:[#allocation116_spill] sm:$0xff] %v17133_v27  ;;  %v17145_v4 = vsub.f32 %v21944_v11, %v16955_v30  ;;  %v17149_v20 = vsub.f32 %v21946_v0, %v16955_v30  ;;  %v21948_v23 = vld [vmem:[#allocation67_spill] sm:$0xff]  ;;  %v21952_v27 = vld [vmem:[#allocation73_spill] sm:$0xff] }
 0x5a2   :  { %21943 = vst [vmem:[#allocation117_spill] sm:$0xff] %v17141_v8  ;;  %v17153_v24 = vsub.f32 %v21948_v23, %v16955_v30  ;;  %21951 = vst [vmem:[#allocation121_spill] sm:$0xff] %v17157_v58  ;;  %v17161_v16 = vsub.f32 %v21952_v27, %v16955_v30  ;;  %v21954_v8 = vld [vmem:[#allocation76_spill] sm:$0xff] }
 0x5a3   :  { %21945 = vst [vmem:[#allocation118_spill] sm:$0xff] %v17145_v4  ;;  %21947 = vst [vmem:[#allocation119_spill] sm:$0xff] %v17149_v20  ;;  %v17165_v11 = vsub.f32 %v21954_v8, %v16955_v30  ;;  %v21956_v4 = vld [vmem:[#allocation79_spill] sm:$0xff]  ;;  %v21958_v20 = vld [vmem:[#allocation82_spill] sm:$0xff] }
 0x5a4   :  { %21949 = vst [vmem:[#allocation120_spill] sm:$0xff] %v17153_v24  ;;  %21953 = vst [vmem:[#allocation122_spill] sm:$0xff] %v17161_v16  ;;  %v17169_v0 = vsub.f32 %v21956_v4, %v16955_v30  ;;  %v17173_v23 = vsub.f32 %v21958_v20, %v16955_v30  ;;  %v21960_v24 = vld [vmem:[#allocation85_spill] sm:$0xff]  ;;  %v21962_v58 = vld [vmem:[#allocation88_spill] sm:$0xff] }
 0x5a5   :  { %21955 = vst [vmem:[#allocation123_spill] sm:$0xff] %v17165_v11  ;;  %v17177_v9 = vsub.f32 %v21960_v24, %v16955_v30  ;;  %v17181_v27 = vsub.f32 %v21962_v58, %v16955_v30  ;;  %v21963_v16 = vld [vmem:[#allocation91_spill] sm:$0xff]  ;;  %v21964_v11 = vld [vmem:[#allocation94_spill] sm:$0xff] }
 0x5a6   :  { %21957 = vst [vmem:[#allocation124_spill] sm:$0xff] %v17169_v0  ;;  %21959 = vst [vmem:[#allocation125_spill] sm:$0xff] %v17173_v23  ;;  %v17185_v8 = vsub.f32 %v21963_v16, %v16955_v30  ;;  %v17189_v4 = vsub.f32 %v21964_v11, %v16955_v30  ;;  %v21966_v0 = vld [vmem:[#allocation97_spill] sm:$0xff]  ;;  %v21968_v23 = vld [vmem:[#allocation100_spill] sm:$0xff]  ;;  %v17205_v16 = vmul.f32 %v16960_v49, %v16960_v49 }
 0x5a7   :  { %21961 = vst [vmem:[#allocation126_spill] sm:$0xff] %v17177_v9  ;;  %v17193_v20 = vsub.f32 %v21966_v0, %v16955_v30  ;;  %v17197_v24 = vsub.f32 %v21968_v23, %v16955_v30  ;;  %v21969_v9 = vld [vmem:[#allocation103_spill] sm:$0xff]  ;;  %v17209_v11 = vmul.f32 %v16963_v17, %v16963_v17  ;;  %v17225_v49 = vmul.f32 %v16969_v13, %v16969_v13 }
 0x5a8   :  { %21965 = vst [vmem:[#allocation127_spill] sm:$0xff] %v17189_v4  ;;  %v17201_v58 = vsub.f32 %v21969_v9, %v16955_v30  ;;  %v21970_v4 = vld [vmem:[#allocation106_spill] sm:$0xff]  ;;  %v17221_v9 = vmul.f32 %v16966_v28, %v16966_v28  ;;  %v17229_v17 = vmul.f32 %v16972_v1, %v16972_v1  ;;  %v17245_v28 = vmul.f32 %v16986_v35, %v16986_v35 }
 0x5a9   :  { %21967 = vst [vmem:[#allocation128_spill] sm:$0xff] %v17193_v20  ;;  %v17213_v0 = vsub.f32 %v21970_v4, %v16955_v30  ;;  %v21971_v20 = vld [vmem:[#allocation109_spill] sm:$0xff]  ;;  %21974 = vst [vmem:[#allocation129_spill] sm:$0xff] %v17225_v49  ;;  %v17233_v4 = vmul.f32 %v16975_v63, %v16975_v63  ;;  %v17249_v13 = vmul.f32 %v16989_v62, %v16989_v62 }
 0x5aa   :  { %v17217_v23 = vsub.f32 %v21971_v20, %v16955_v30  ;;  %21973 = vst [vmem:[#allocation109_spill] sm:$0xff] %v17221_v9  ;;  %21975 = vst [vmem:[#allocation130_spill] sm:$0xff] %v17229_v17  ;;  %v17237_v20 = vmul.f32 %v16980_v6, %v16980_v6  ;;  %v17241_v30 = vmul.f32 %v16983_v22, %v16983_v22 }
 0x5ab   :  { %21976 = vst [vmem:[#allocation131_spill] sm:$0xff] %v17233_v4  ;;  %21979 = vst [vmem:[#allocation134_spill] sm:$0xff] %v17245_v28  ;;  %v17253_v1 = vmul.f32 %v16992_v3, %v16992_v3  ;;  %v17257_v63 = vmul.f32 %v16995_v56, %v16995_v56  ;;  %v17261_v6 = vmul.f32 %v16998_v10, %v16998_v10 }
 0x5ac   :  { %21972 = vst [vmem:[#allocation106_spill] sm:$0xff] %v17217_v23  ;;  %21977 = vst [vmem:[#allocation132_spill] sm:$0xff] %v17237_v20  ;;  %v17265_v22 = vmul.f32 %v17001_v57, %v17001_v57  ;;  %v17269_v35 = vmul.f32 %v17004_v50, %v17004_v50  ;;  %v17273_v62 = vmul.f32 %v17007_v34, %v17007_v34 }
 0x5ad   :  { %21978 = vst [vmem:[#allocation133_spill] sm:$0xff] %v17241_v30  ;;  %21980 = vst [vmem:[#allocation135_spill] sm:$0xff] %v17249_v13  ;;  %v17277_v3 = vmul.f32 %v17010_v53, %v17010_v53  ;;  %v17281_v56 = vmul.f32 %v17013_v25, %v17013_v25  ;;  %v17285_v10 = vmul.f32 %v17016_v33, %v17016_v33 }
 0x5ae   :  { %21981 = vst [vmem:[#allocation136_spill] sm:$0xff] %v17253_v1  ;;  %21982 = vst [vmem:[#allocation137_spill] sm:$0xff] %v17257_v63  ;;  %v17289_v57 = vmul.f32 %v17019_v43, %v17019_v43  ;;  %v17293_v50 = vmul.f32 %v17022_v40, %v17022_v40  ;;  %v4746_v34 = vrot.slane %v16977_v26, %v16951_v7  ;;  %v21993_v40 = vld [vmem:[#allocation8_spill] sm:$0xff]  ;;  %v21994_v26 = vld [vmem:[#allocation11_spill] sm:$0xff] }
 0x5af   :  { %21983 = vst [vmem:[#allocation138_spill] sm:$0xff] %v17261_v6  ;;  %21984 = vst [vmem:[#allocation139_spill] sm:$0xff] %v17265_v22  ;;  %v17299_v53 = vmul.f32 %v17025_v46, %v17025_v46  ;;  %v17303_v25 = vmul.f32 %v17028_v32, %v17028_v32  ;;  %v17307_v33 = vmul.f32 %v17031_v19, %v17031_v19  ;;  %v21995_v46 = vld [vmem:[#allocation14_spill] sm:$0xff]  ;;  %v21997_v22 = vld [vmem:[#allocation20_spill] sm:$0xff] }
 0x5b0   :  { %21985 = vst [vmem:[#allocation140_spill] sm:$0xff] %v17269_v35  ;;  %21986 = vst [vmem:[#allocation141_spill] sm:$0xff] %v17273_v62  ;;  %v17311_v43 = vmul.f32 %v17034_v39, %v17034_v39  ;;  %v17314_v23 = vsub.f32 %v21993_v40, %v4746_v34  ;;  %v17317_v7 = vsub.f32 %v21994_v26, %v4746_v34  ;;  %v21996_v35 = vld [vmem:[#allocation17_spill] sm:$0xff]  ;;  %v21998_v19 = vld [vmem:[#allocation23_spill] sm:$0xff] }
 0x5b1   :  { %21987 = vst [vmem:[#allocation142_spill] sm:$0xff] %v17289_v57  ;;  %21988 = vst [vmem:[#allocation143_spill] sm:$0xff] %v17293_v50  ;;  %v17320_v62 = vsub.f32 %v21995_v46, %v4746_v34  ;;  %v17323_v32 = vsub.f32 %v21996_v35, %v4746_v34  ;;  %v17326_v6 = vsub.f32 %v21997_v22, %v4746_v34  ;;  %v21999_v39 = vld [vmem:[#allocation3_spill] sm:$0xff]  ;;  %v22000_v40 = vld [vmem:[#allocation6_spill] sm:$0xff] }
 0x5b2   :  { %21989 = vst [vmem:[#allocation144_spill] sm:$0xff] %v17299_v53  ;;  %21990 = vst [vmem:[#allocation145_spill] sm:$0xff] %v17303_v25  ;;  %v17329_v63 = vsub.f32 %v21998_v19, %v4746_v34  ;;  %v17335_v1 = vsub.f32 %v22000_v40, %v4746_v34  ;;  %v22001_v26 = vld [vmem:[#allocation26_spill] sm:$0xff]  ;;  %v22002_v46 = vld [vmem:[#allocation29_spill] sm:$0xff] }
 0x5b3   :  { %21991 = vst [vmem:[#allocation146_spill] sm:$0xff] %v17307_v33  ;;  %21992 = vst [vmem:[#allocation147_spill] sm:$0xff] %v17311_v43  ;;  %v17332_v43 = vsub.f32 %v21999_v39, %v4746_v34  ;;  %v17338_v33 = vsub.f32 %v22001_v26, %v4746_v34  ;;  %v17341_v13 = vsub.f32 %v22002_v46, %v4746_v34  ;;  %v22003_v35 = vld [vmem:[#allocation32_spill] sm:$0xff]  ;;  %v22004_v22 = vld [vmem:[#allocation35_spill] sm:$0xff] }
 0x5b4   :  { %v17344_v25 = vsub.f32 %v22003_v35, %v4746_v34  ;;  %v17347_v28 = vsub.f32 %v22004_v22, %v4746_v34  ;;  %v22005_v19 = vld [vmem:[#allocation38_spill] sm:$0xff]  ;;  %v22006_v39 = vld [vmem:[#allocation41_spill] sm:$0xff]  ;;  %v22007_v40 = vld [vmem:[#allocation44_spill] sm:$0xff]  ;;  %v17363_v46 = vmul.f32 %v17037_v51, %v17037_v51  ;;  %v17367_v22 = vmul.f32 %v17040_v14, %v17040_v14 }
 0x5b5   :  { %v17350_v53 = vsub.f32 %v22005_v19, %v4746_v34  ;;  %v17353_v30 = vsub.f32 %v22006_v39, %v4746_v34  ;;  %v17356_v50 = vsub.f32 %v22007_v40, %v4746_v34  ;;  %v22008_v26 = vld [vmem:[#allocation47_spill] sm:$0xff]  ;;  %v22011_v35 = vld [vmem:[#allocation50_spill] sm:$0xff]  ;;  %v22012_v57 = vld [vmem:[#allocation53_spill] sm:$0xff]  ;;  %v17377_v40 = vmul.f32 %v17043_v21, %v17043_v21 }
 0x5b6   :  { %v17359_v20 = vsub.f32 %v22008_v26, %v4746_v34  ;;  %22009 = vst [vmem:[#allocation148_spill] sm:$0xff] %v17363_v46  ;;  %22010 = vst [vmem:[#allocation149_spill] sm:$0xff] %v17367_v22  ;;  %v17370_v19 = vsub.f32 %v22011_v35, %v4746_v34  ;;  %v17373_v39 = vsub.f32 %v22012_v57, %v4746_v34  ;;  %v22026_v22 = vld [vmem:[#allocation74_spill] sm:$0xff] }
 0x5b7   :  { %22013 = vst [vmem:[#allocation150_spill] sm:$0xff] %v17377_v40  ;;  %v17381_v26 = vmul.f32 %v17046_v5, %v17046_v5  ;;  %v17385_v51 = vmul.f32 %v17049_v37, %v17049_v37  ;;  %v17389_v14 = vmul.f32 %v17052_v29, %v17052_v29  ;;  %v17393_v57 = vmul.f32 %v17055_v59, %v17055_v59  ;;  %v22025_v40 = vld [vmem:[#allocation71_spill] sm:$0xff] }
 0x5b8   :  { %v17397_v21 = vmul.f32 %v17058_v48, %v17058_v48  ;;  %v17401_v5 = vmul.f32 %v17061_v18, %v17061_v18  ;;  %v4802_v37 = vmul.f32 %v17065_v42, %v17065_v42  ;;  %v4805_v35 = vmul.f32 %v17069_v61, %v17069_v61  ;;  %v22022_v48 = vld [vmem:[#allocation62_spill] sm:$0xff]  ;;  %v22023_v18 = vld [vmem:[#allocation65_spill] sm:$0xff] }
 0x5b9   :  { %22014 = vst [vmem:[#allocation151_spill] sm:$0xff] %v17381_v26  ;;  %22015 = vst [vmem:[#allocation152_spill] sm:$0xff] %v17385_v51  ;;  %v4855_v29 = vadd.f32 %v17137_v54, %v17135_v2  ;;  %v22024_v26 = vld [vmem:[#allocation68_spill] sm:$0xff]  ;;  %v17425_v61 = vsub.f32 %v22025_v40, %v4746_v34  ;;  %v17428_v54 = vsub.f32 %v22026_v22, %v4746_v34  ;;  %v22028_v2 = vld [vmem:[#allocation77_spill] sm:$0xff] }
 0x5ba   :  { %22016 = vst [vmem:[#allocation153_spill] sm:$0xff] %v17389_v14  ;;  %22017 = vst [vmem:[#allocation154_spill] sm:$0xff] %v17393_v57  ;;  %v22020_v14 = vld [vmem:[#allocation56_spill] sm:$0xff]  ;;  %v22021_v57 = vld [vmem:[#allocation59_spill] sm:$0xff]  ;;  %v17422_v42 = vsub.f32 %v22024_v26, %v4746_v34 }
 0x5bb   :  { %22018 = vst [vmem:[#allocation155_spill] sm:$0xff] %v17397_v21  ;;  %22019 = vst [vmem:[#allocation156_spill] sm:$0xff] %v17401_v5  ;;  %v17410_v59 = vsub.f32 %v22020_v14, %v4746_v34  ;;  %v17413_v51 = vsub.f32 %v22021_v57, %v4746_v34  ;;  %v17416_v21 = vsub.f32 %v22022_v48, %v4746_v34  ;;  %v22030_v57 = vld [vmem:[#allocation80_spill] sm:$0xff]  ;;  %v22032_v48 = vld [vmem:[#allocation83_spill] sm:$0xff] }
 0x5bc   :  { %v17419_v5 = vsub.f32 %v22023_v18, %v4746_v34  ;;  %22027 = vst [vmem:[#allocation157_spill] sm:$0xff] %v17428_v54  ;;  %v17431_v14 = vsub.f32 %v22028_v2, %v4746_v34  ;;  %v17434_v46 = vsub.f32 %v22030_v57, %v4746_v34  ;;  %v17437_v4 = vsub.f32 %v22032_v48, %v4746_v34  ;;  %v22034_v18 = vld [vmem:[#allocation86_spill] sm:$0xff]  ;;  %v22036_v26 = vld [vmem:[#allocation89_spill] sm:$0xff]  ;;  %v22037_v40 = vld [vmem:[#allocation92_spill] sm:$0xff] }
 0x5bd   :  { %v17440_v17 = vsub.f32 %v22034_v18, %v4746_v34  ;;  %v17443_v49 = vsub.f32 %v22036_v26, %v4746_v34  ;;  %v17446_v9 = vsub.f32 %v22037_v40, %v4746_v34  ;;  %v22038_v22 = vld [vmem:[#allocation95_spill] sm:$0xff]  ;;  %v22039_v2 = vld [vmem:[#allocation98_spill] sm:$0xff]  ;;  %v22040_v57 = vld [vmem:[#allocation101_spill] sm:$0xff]  ;;  %v4808_v26 = vmul.f32 %v17073_v31, %v17073_v31 }
 0x5be   :  { %22029 = vst [vmem:[#allocation158_spill] sm:$0xff] %v17431_v14  ;;  %22031 = vst [vmem:[#allocation159_spill] sm:$0xff] %v17434_v46  ;;  %v17449_v54 = vsub.f32 %v22038_v22, %v4746_v34  ;;  %v17452_v14 = vsub.f32 %v22039_v2, %v4746_v34  ;;  %v17455_v46 = vsub.f32 %v22040_v57, %v4746_v34  ;;  %v22041_v48 = vld [vmem:[#allocation104_spill] sm:$0xff]  ;;  %v22043_v18 = vld [vmem:[#allocation107_spill] sm:$0xff] }
 0x5bf   :  { %22033 = vst [vmem:[#allocation160_spill] sm:$0xff] %v17437_v4  ;;  %22035 = vst [vmem:[#allocation161_spill] sm:$0xff] %v17440_v17  ;;  %v17458_v4 = vsub.f32 %v22041_v48, %v4746_v34  ;;  %v17461_v17 = vsub.f32 %v22043_v18, %v4746_v34  ;;  %v17467_v40 = vmul.f32 %v17077_v12, %v17077_v12  ;;  %v22051_v18 = vld [vmem:[#allocation108_spill] sm:$0xff]  ;;  %v22053_v22 = vld [vmem:[#allocation115_spill] sm:$0xff] }
 0x5c0   :  { %v17471_v2 = vmul.f32 %v17081_v60, %v17081_v60  ;;  %v17475_v57 = vmul.f32 %v17085_v47, %v17085_v47  ;;  %v17479_v48 = vmul.f32 %v17089_v45, %v17089_v45  ;;  %v17483_v34 = vmul.f32 %v17093_v55, %v17093_v55  ;;  %v22049_v60 = vld [vmem:[#allocation105_spill] sm:$0xff] }
 0x5c1   :  { %22042 = vst [vmem:[#allocation104_spill] sm:$0xff] %v17458_v4  ;;  %22044 = vst [vmem:[#allocation107_spill] sm:$0xff] %v17461_v17  ;;  %v17487_v12 = vmul.f32 %v17097_v36, %v17097_v36  ;;  %v17491_v31 = vmul.f32 %v17101_v52, %v17101_v52  ;;  %v17495_v47 = vmul.f32 %v17105_v41, %v17105_v41  ;;  %v22055_v17 = vld [vmem:[#allocation116_spill] sm:$0xff]  ;;  %v22057_v4 = vld [vmem:[#allocation117_spill] sm:$0xff] }
 0x5c2   :  { %v17499_v45 = vmul.f32 %v17109_v44, %v17109_v44  ;;  %v17503_v55 = vmul.f32 %v17113_v38, %v17113_v38  ;;  %v17507_v36 = vmul.f32 %v17117_v15, %v17117_v15  ;;  %v17511_v52 = vmul.f32 %v22049_v60, %v22049_v60  ;;  %v22059_v60 = vld [vmem:[#allocation119_spill] sm:$0xff] }
 0x5c3   :  { %22045 = vst [vmem:[#allocation162_spill] sm:$0xff] %v17495_v47  ;;  %v17515_v41 = vmul.f32 %v22051_v18, %v22051_v18  ;;  %v17519_v44 = vmul.f32 %v22053_v22, %v22053_v22  ;;  %v17523_v38 = vmul.f32 %v22055_v17, %v22055_v17  ;;  %v4997_v15 = vmul.f32 %v22057_v4, %v22057_v4 }
 0x5c4   :  { %22046 = vst [vmem:[#allocation163_spill] sm:$0xff] %v17499_v45  ;;  %22047 = vst [vmem:[#allocation164_spill] sm:$0xff] %v17503_v55  ;;  %v5050_v18 = vadd.f32 %v17281_v56, %v17277_v3  ;;  %v22067_v3 = vld [vmem:[#allocation125_spill] sm:$0xff] }
 0x5c5   :  { %22048 = vst [vmem:[#allocation165_spill] sm:$0xff] %v17507_v36  ;;  %22050 = vst [vmem:[#allocation105_spill] sm:$0xff] %v17511_v52  ;;  %v22058_v36 = vld [vmem:[#allocation118_spill] sm:$0xff]  ;;  %v17531_v52 = vmul.f32 %v22059_v60, %v22059_v60  ;;  %v22065_v60 = vld [vmem:[#allocation124_spill] sm:$0xff]  ;;  %v17557_v56 = vmul.f32 %v22067_v3, %v22067_v3 }
 0x5c6   :  { %22052 = vst [vmem:[#allocation108_spill] sm:$0xff] %v17515_v41  ;;  %22054 = vst [vmem:[#allocation115_spill] sm:$0xff] %v17519_v44  ;;  %v5000_v55 = vmul.f32 %v22058_v36, %v22058_v36  ;;  %v22060_v41 = vld [vmem:[#allocation120_spill] sm:$0xff]  ;;  %v22061_v44 = vld [vmem:[#allocation121_spill] sm:$0xff]  ;;  %v17553_v47 = vmul.f32 %v22065_v60, %v22065_v60 }
 0x5c7   :  { %22056 = vst [vmem:[#allocation116_spill] sm:$0xff] %v17523_v38  ;;  %v17537_v22 = vmul.f32 %v22060_v41, %v22060_v41  ;;  %v17541_v17 = vmul.f32 %v22061_v44, %v22061_v44  ;;  %v22062_v38 = vld [vmem:[#allocation122_spill] sm:$0xff]  ;;  %v22063_v36 = vld [vmem:[#allocation123_spill] sm:$0xff] }
 0x5c8   :  { %v17545_v4 = vmul.f32 %v22062_v38, %v22062_v38  ;;  %v17549_v45 = vmul.f32 %v22063_v36, %v22063_v36  ;;  %22066 = vst [vmem:[#allocation118_spill] sm:$0xff] %v17553_v47  ;;  %v22068_v41 = vld [vmem:[#allocation126_spill] sm:$0xff]  ;;  %v17565_v38 = vmul.f32 %v17181_v27, %v17181_v27  ;;  %v17569_v36 = vmul.f32 %v17185_v8, %v17185_v8  ;;  %v22071_v47 = vld [vmem:[#allocation128_spill] sm:$0xff] }
 0x5c9   :  { %v17561_v44 = vmul.f32 %v22068_v41, %v22068_v41  ;;  %v17577_v3 = vmul.f32 %v22071_v47, %v22071_v47  ;;  %v17581_v41 = vmul.f32 %v17197_v24, %v17197_v24  ;;  %v17585_v27 = vmul.f32 %v17201_v58, %v17201_v58 }
 0x5ca   :  { %22064 = vst [vmem:[#allocation117_spill] sm:$0xff] %v17549_v45  ;;  %v22069_v45 = vld [vmem:[#allocation127_spill] sm:$0xff]  ;;  %v17589_v8 = vmul.f32 %v17213_v0, %v17213_v0  ;;  %v4809_v47 = vmul.f32 %v17320_v62, %v17320_v62  ;;  %v4812_v24 = vmul.f32 %v17323_v32, %v17323_v32  ;;  %v4878_v58 = vadd.f32 %v4805_v35, %v4802_v37 }
 0x5cb   :  { %v17573_v60 = vmul.f32 %v22069_v45, %v22069_v45  ;;  %22072 = vst [vmem:[#allocation120_spill] sm:$0xff] %v17581_v41  ;;  %22073 = vst [vmem:[#allocation121_spill] sm:$0xff] %v17585_v27  ;;  %v4803_v45 = vmul.f32 %v17314_v23, %v17314_v23  ;;  %v4856_v41 = vadd.f32 %v4855_v29, %v17205_v16 }
 0x5cc   :  { %22074 = vst [vmem:[#allocation122_spill] sm:$0xff] %v17589_v8  ;;  %v4815_v27 = vmul.f32 %v17326_v6, %v17326_v6  ;;  %v4818_v0 = vmul.f32 %v17329_v63, %v17329_v63  ;;  %v4821_v23 = vmul.f32 %v17332_v43, %v17332_v43  ;;  %v17612_v62 = vmul.f32 %v17338_v33, %v17338_v33 }
 0x5cd   :  { %22070 = vst [vmem:[#allocation119_spill] sm:$0xff] %v17573_v60  ;;  %v4806_v60 = vmul.f32 %v17317_v7, %v17317_v7  ;;  %v17608_v7 = vmul.f32 %v17335_v1, %v17335_v1  ;;  %v17616_v16 = vmul.f32 %v17341_v13, %v17341_v13  ;;  %v17620_v6 = vmul.f32 %v17344_v25, %v17344_v25 }
 0x5ce   :  { %v17624_v63 = vmul.f32 %v17347_v28, %v17347_v28  ;;  %v17628_v1 = vmul.f32 %v17350_v53, %v17350_v53  ;;  %v17632_v35 = vmul.f32 %v17353_v30, %v17353_v30  ;;  %v17636_v13 = vmul.f32 %v17356_v50, %v17356_v50 }
 0x5cf   :  { %v17640_v25 = vmul.f32 %v17359_v20, %v17359_v20  ;;  %v17644_v28 = vmul.f32 %v17370_v19, %v17370_v19  ;;  %v17648_v53 = vmul.f32 %v17373_v39, %v17373_v39  ;;  %v4998_v30 = vmul.f32 %v17410_v59, %v17410_v59 }
 0x5d0   :  { %v5001_v33 = vmul.f32 %v17413_v51, %v17413_v51  ;;  %v5004_v50 = vmul.f32 %v17416_v21, %v17416_v21  ;;  %v5051_v20 = vadd.f32 %v5050_v18, %v17285_v10  ;;  %v5073_v43 = vadd.f32 %v5000_v55, %v4997_v15  ;;  %v22075_v21 = vld [vmem:[#allocation109_spill] sm:$0xff]  ;;  %v22077_v15 = vld [vmem:[#allocation158_spill] sm:$0xff] }
 0x5d1   :  { %v4857_v32 = vadd.f32 %v4856_v41, %v17209_v11  ;;  %v5007_v19 = vmul.f32 %v17419_v5, %v17419_v5  ;;  %v4879_v37 = vadd.f32 %v4878_v58, %v4808_v26  ;;  %v4901_v39 = vsel %vm472_vm0, %v4803_v45, 0.0  ;;  %v22076_v55 = vld [vmem:[#allocation157_spill] sm:$0xff] }
 0x5d2   :  { %v4902_v29 = vsel %vm472_vm0, %v4806_v60, 0.0  ;;  %v5010_v59 = vmul.f32 %v17422_v42, %v17422_v42  ;;  %v5013_v51 = vmul.f32 %v17425_v61, %v17425_v61  ;;  %v17669_v11 = vmul.f32 %v22076_v55, %v22076_v55  ;;  %v22078_v60 = vld [vmem:[#allocation159_spill] sm:$0xff]  ;;  %v22079_v61 = vld [vmem:[#allocation160_spill] sm:$0xff]  ;;  %v22080_v45 = vld [vmem:[#allocation129_spill] sm:$0xff] }
 0x5d3   :  { %v4858_v8 = vadd.f32 %v4857_v32, %v22075_v21  ;;  %v4903_v10 = vadd.f32 %v4902_v29, %v4901_v39  ;;  %v17673_v26 = vmul.f32 %v22077_v15, %v22077_v15  ;;  %v4880_v5 = vadd.f32 %v4879_v37, %v17467_v40  ;;  %v22081_v39 = vld [vmem:[#allocation161_spill] sm:$0xff] }
 0x5d4   :  { %v4904_v18 = vsel %vm472_vm0, %v4809_v47, 0.0  ;;  %v17679_v42 = vmul.f32 %v22078_v60, %v22078_v60  ;;  %v17683_v41 = vmul.f32 %v22079_v61, %v22079_v61  ;;  %v17688_v29 = vmul.f32 %v22081_v39, %v22081_v39  ;;  %v22085_v39 = vld [vmem:[#allocation132_spill] sm:$0xff] }
 0x5d5   :  { %v4859_v58 = vadd.f32 %v4858_v8, %v22080_v45  ;;  %v4905_v32 = vadd.f32 %v4904_v18, %v4903_v10  ;;  %v17692_v40 = vmul.f32 %v17443_v49, %v17443_v49  ;;  %v4881_v47 = vadd.f32 %v4880_v5, %v17471_v2  ;;  %v22082_v10 = vld [vmem:[#allocation130_spill] sm:$0xff] }
 0x5d6   :  { %v4906_v37 = vsel %vm472_vm0, %v4812_v24, 0.0  ;;  %v17698_v21 = vmul.f32 %v17446_v9, %v17446_v9  ;;  %v17702_v8 = vmul.f32 %v17449_v54, %v17449_v54  ;;  %v17707_v18 = vmul.f32 %v17452_v14, %v17452_v14  ;;  %v22083_v24 = vld [vmem:[#allocation131_spill] sm:$0xff]  ;;  %v22084_v54 = vld [vmem:[#allocation142_spill] sm:$0xff] }
 0x5d7   :  { %v4860_v55 = vadd.f32 %v4859_v58, %v22082_v10  ;;  %v4907_v15 = vadd.f32 %v4906_v37, %v4905_v32  ;;  %v17711_v49 = vmul.f32 %v17455_v46, %v17455_v46  ;;  %v4882_v2 = vadd.f32 %v4881_v47, %v17475_v57  ;;  %v22086_v47 = vld [vmem:[#allocation143_spill] sm:$0xff] }
 0x5d8   :  { %v4908_v9 = vsel %vm472_vm0, %v4815_v27, 0.0  ;;  %v5052_v61 = vadd.f32 %v5051_v20, %v22084_v54  ;;  %v5074_v45 = vadd.f32 %v5073_v43, %v17531_v52  ;;  %v4910_v14 = vsel %vm472_vm0, %v4818_v0, 0.0  ;;  %v22087_v43 = vld [vmem:[#allocation133_spill] sm:$0xff] }
 0x5d9   :  { %v4861_v5 = vadd.f32 %v4860_v55, %v22083_v24  ;;  %v4909_v60 = vadd.f32 %v4908_v9, %v4907_v15  ;;  %v4883_v58 = vadd.f32 %v4882_v2, %v17479_v48  ;;  %v5096_v32 = vsel %vm472_vm0, %v4998_v30, 0.0  ;;  %v22088_v30 = vld [vmem:[#allocation144_spill] sm:$0xff]  ;;  %v22090_v54 = vld [vmem:[#allocation145_spill] sm:$0xff] }
 0x5da   :  { %v5097_v46 = vsel %vm472_vm0, %v5001_v33, 0.0  ;;  %v5053_v27 = vadd.f32 %v5052_v61, %v22086_v47  ;;  %v5075_v10 = vadd.f32 %v5074_v45, %v17537_v22  ;;  %v4912_v20 = vsel %vm472_vm0, %v4821_v23, 0.0 }
 0x5db   :  { %v4862_v37 = vadd.f32 %v4861_v5, %v22085_v39  ;;  %v4911_v57 = vadd.f32 %v4910_v14, %v4909_v60  ;;  %v4884_v55 = vadd.f32 %v4883_v58, %v17483_v34  ;;  %v5098_v52 = vadd.f32 %v5097_v46, %v5096_v32  ;;  %v22089_v5 = vld [vmem:[#allocation134_spill] sm:$0xff]  ;;  %v22091_v14 = vld [vmem:[#allocation135_spill] sm:$0xff]  ;;  %v22093_v39 = vld [vmem:[#allocation117_spill] sm:$0xff] }
 0x5dc   :  { %v5099_v48 = vsel %vm472_vm0, %v5004_v50, 0.0  ;;  %v5054_v2 = vadd.f32 %v5053_v27, %v22088_v30  ;;  %v5076_v33 = vadd.f32 %v5075_v10, %v17541_v17  ;;  %v4914_v24 = vsel %vm472_vm0, %v17608_v7, 0.0  ;;  %v22092_v46 = vld [vmem:[#allocation146_spill] sm:$0xff]  ;;  %v22095_v10 = vld [vmem:[#allocation136_spill] sm:$0xff] }
 0x5dd   :  { %v4863_v0 = vadd.f32 %v4862_v37, %v22087_v43  ;;  %v4913_v15 = vadd.f32 %v4912_v20, %v4911_v57  ;;  %v4885_v9 = vadd.f32 %v4884_v55, %v17487_v12  ;;  %v5100_v22 = vadd.f32 %v5099_v48, %v5098_v52  ;;  %v22094_v57 = vld [vmem:[#allocation162_spill] sm:$0xff]  ;;  %v22096_v20 = vld [vmem:[#allocation147_spill] sm:$0xff] }
 0x5de   :  { %v5101_v34 = vsel %vm472_vm0, %v5007_v19, 0.0  ;;  %v5055_v50 = vadd.f32 %v5054_v2, %v22090_v54  ;;  %v5077_v61 = vadd.f32 %v5076_v33, %v17545_v4  ;;  %v4916_v17 = vsel %vm472_vm0, %v17612_v62, 0.0  ;;  %v22097_v52 = vld [vmem:[#allocation118_spill] sm:$0xff]  ;;  %v22098_v43 = vld [vmem:[#allocation163_spill] sm:$0xff] }
 0x5df   :  { %v4864_v23 = vadd.f32 %v4863_v0, %v22089_v5  ;;  %v4915_v60 = vadd.f32 %v4914_v24, %v4913_v15  ;;  %v4886_v45 = vadd.f32 %v4885_v9, %v17491_v31  ;;  %v5102_v58 = vadd.f32 %v5101_v34, %v5100_v22  ;;  %v22101_v34 = vld [vmem:[#allocation164_spill] sm:$0xff]  ;;  %v22102_v54 = vld [vmem:[#allocation138_spill] sm:$0xff] }
 0x5e0   :  { %v5103_v12 = vsel %vm472_vm0, %v5010_v59, 0.0  ;;  %v5056_v19 = vadd.f32 %v5055_v50, %v22092_v46  ;;  %v5078_v37 = vadd.f32 %v5077_v61, %v22093_v39  ;;  %v4918_v4 = vsel %vm472_vm0, %v17616_v16, 0.0  ;;  %v22099_v16 = vld [vmem:[#allocation137_spill] sm:$0xff] }
 0x5e1   :  { %v4865_v7 = vadd.f32 %v4864_v23, %v22091_v14  ;;  %v4917_v32 = vadd.f32 %v4916_v17, %v4915_v60  ;;  %v4887_v47 = vadd.f32 %v4886_v45, %v22094_v57  ;;  %v5104_v27 = vadd.f32 %v5103_v12, %v5102_v58  ;;  %v22104_v58 = vld [vmem:[#allocation165_spill] sm:$0xff] }
 0x5e2   :  { %v5105_v31 = vsel %vm472_vm0, %v5013_v51, 0.0  ;;  %v5057_v59 = vadd.f32 %v5056_v19, %v22096_v20  ;;  %v5079_v48 = vadd.f32 %v5078_v37, %v22097_v52  ;;  %v4920_v15 = vsel %vm472_vm0, %v17620_v6, 0.0  ;;  %v22100_v51 = vld [vmem:[#allocation148_spill] sm:$0xff]  ;;  %v22107_v37 = vld [vmem:[#allocation105_spill] sm:$0xff] }
 0x5e3   :  { %v4866_v62 = vadd.f32 %v4865_v7, %v22095_v10  ;;  %v4919_v55 = vadd.f32 %v4918_v4, %v4917_v32  ;;  %v4888_v0 = vadd.f32 %v4887_v47, %v22098_v43  ;;  %v5106_v30 = vadd.f32 %v5105_v31, %v5104_v27  ;;  %v22105_v7 = vld [vmem:[#allocation139_spill] sm:$0xff]  ;;  %v22108_v4 = vld [vmem:[#allocation140_spill] sm:$0xff]  ;;  %v22111_v52 = vld [vmem:[#allocation141_spill] sm:$0xff] }
 0x5e4   :  { %v5107_v2 = vsel %vm472_vm0, %v17669_v11, 0.0  ;;  %v5058_v24 = vadd.f32 %v5057_v59, %v22100_v51  ;;  %v5080_v22 = vadd.f32 %v5079_v48, %v17557_v56  ;;  %v4922_v23 = vsel %vm472_vm0, %v17624_v63, 0.0  ;;  %v22103_v11 = vld [vmem:[#allocation149_spill] sm:$0xff] }
 0x5e5   :  { %v4867_v33 = vadd.f32 %v4866_v62, %v22099_v16  ;;  %v4921_v9 = vadd.f32 %v4920_v15, %v4919_v55  ;;  %v4889_v5 = vadd.f32 %v4888_v0, %v22101_v34  ;;  %v5108_v60 = vadd.f32 %v5107_v2, %v5106_v30  ;;  %v22110_v55 = vld [vmem:[#allocation108_spill] sm:$0xff]  ;;  %v22113_v15 = vld [vmem:[#allocation119_spill] sm:$0xff] }
 0x5e6   :  { %v5109_v6 = vsel %vm472_vm0, %v17673_v26, 0.0  ;;  %v5059_v45 = vadd.f32 %v5058_v24, %v22103_v11  ;;  %v5081_v17 = vadd.f32 %v5080_v22, %v17561_v44  ;;  %v4924_v56 = vsel %vm472_vm0, %v17628_v1, 0.0  ;;  %v22106_v26 = vld [vmem:[#allocation150_spill] sm:$0xff]  ;;  %v22114_v2 = vld [vmem:[#allocation115_spill] sm:$0xff]  ;;  %v22115_v24 = vld [vmem:[#allocation153_spill] sm:$0xff] }
 0x5e7   :  { %v4868_v50 = vadd.f32 %v4867_v33, %v22102_v54  ;;  %v4923_v61 = vadd.f32 %v4922_v23, %v4921_v9  ;;  %v4890_v12 = vadd.f32 %v4889_v5, %v22104_v58  ;;  %v5110_v14 = vadd.f32 %v5109_v6, %v5108_v60  ;;  %v22116_v34 = vld [vmem:[#allocation116_spill] sm:$0xff] }
 0x5e8   :  { %v5111_v63 = vsel %vm472_vm0, %v17679_v42, 0.0  ;;  %v5060_v19 = vadd.f32 %v5059_v45, %v22106_v26  ;;  %v5082_v39 = vadd.f32 %v5081_v17, %v17565_v38  ;;  %v4926_v44 = vsel %vm472_vm0, %v17632_v35, 0.0  ;;  %v22109_v42 = vld [vmem:[#allocation151_spill] sm:$0xff] }
 0x5e9   :  { %v4869_v32 = vadd.f32 %v4868_v50, %v22105_v7  ;;  %v4925_v46 = vadd.f32 %v4924_v56, %v4923_v61  ;;  %v4891_v57 = vadd.f32 %v4890_v12, %v22107_v37  ;;  %v5112_v47 = vadd.f32 %v5111_v63, %v5110_v14  ;;  %v22117_v50 = vld [vmem:[#allocation154_spill] sm:$0xff]  ;;  %v22119_v56 = vld [vmem:[#allocation155_spill] sm:$0xff]  ;;  %v22120_v63 = vld [vmem:[#allocation121_spill] sm:$0xff] }
 0x5ea   :  { %v5113_v1 = vsel %vm472_vm0, %v17683_v41, 0.0  ;;  %v5061_v10 = vadd.f32 %v5060_v19, %v22109_v42  ;;  %v5083_v62 = vadd.f32 %v5082_v39, %v17569_v36  ;;  %v4928_v38 = vsel %vm472_vm0, %v17636_v13, 0.0  ;;  %v22112_v41 = vld [vmem:[#allocation152_spill] sm:$0xff]  ;;  %v22121_v7 = vld [vmem:[#allocation106_spill] sm:$0xff] }
 0x5eb   :  { %v4870_v27 = vadd.f32 %v4869_v32, %v22108_v4  ;;  %v4927_v31 = vadd.f32 %v4926_v44, %v4925_v46  ;;  %v4892_v20 = vadd.f32 %v4891_v57, %v22110_v55  ;;  %v5114_v59 = vadd.f32 %v5113_v1, %v5112_v47  ;;  %v22122_v46 = vld [vmem:[#allocation104_spill] sm:$0xff]  ;;  %v22124_v44 = vld [vmem:[#allocation122_spill] sm:$0xff]  ;;  %v22125_v1 = vld [vmem:[#allocation107_spill] sm:$0xff] }
 0x5ec   :  { %v5115_v35 = vsel %vm472_vm0, %v17688_v29, 0.0  ;;  %v5062_v0 = vadd.f32 %v5061_v10, %v22112_v41  ;;  %v5084_v30 = vadd.f32 %v5083_v62, %v22113_v15  ;;  %v4930_v36 = vsel %vm472_vm0, %v17640_v25, 0.0 }
 0x5ed   :  { %v4871_v48 = vadd.f32 %v4870_v27, %v22111_v52  ;;  %v4929_v43 = vadd.f32 %v4928_v38, %v4927_v31  ;;  %v4893_v16 = vadd.f32 %v4892_v20, %v22114_v2  ;;  %v5116_v33 = vadd.f32 %v5115_v35, %v5114_v59 }
 0x5ee   :  { %v5117_v13 = vsel %vm472_vm0, %v17692_v40, 0.0  ;;  %v5063_v29 = vadd.f32 %v5062_v0, %v22115_v24  ;;  %v5085_v22 = vadd.f32 %v5084_v30, %v17577_v3  ;;  %v4932_v23 = vsel %vm472_vm0, %v17644_v28, 0.0  ;;  %v22118_v40 = vld [vmem:[#allocation120_spill] sm:$0xff] }
 0x5ef   :  { %v4872_v9 = vrot.slane %v4871_v48, 4  ;;  %v4931_v51 = vadd.f32 %v4930_v36, %v4929_v43  ;;  %v4894_v5 = vadd.f32 %v4893_v16, %v22116_v34  ;;  %v5118_v60 = vadd.f32 %v5117_v13, %v5116_v33 }
 0x5f0   :  { %v5119_v6 = vsel %vm472_vm0, %v17698_v21, 0.0  ;;  %v5064_v61 = vadd.f32 %v5063_v29, %v22117_v50  ;;  %v5086_v11 = vadd.f32 %v5085_v22, %v22118_v40  ;;  %v4934_v17 = vsel %vm472_vm0, %v17648_v53, 0.0  ;;  %v22123_v53 = vld [vmem:[#allocation156_spill] sm:$0xff] }
 0x5f1   :  { %v4873_v25 = vadd.f32 %v4872_v9, %v4871_v48  ;;  %v4933_v54 = vadd.f32 %v4932_v23, %v4931_v51  ;;  %v4895_v45 = vrot.slane %v4894_v5, 4  ;;  %v5120_v3 = vadd.f32 %v5119_v6, %v5118_v60 }
 0x5f2   :  { %v5121_v58 = vsel %vm472_vm0, %v17702_v8, 0.0  ;;  %v5065_v14 = vadd.f32 %v5064_v61, %v22119_v56  ;;  %v5087_v21 = vadd.f32 %v5086_v11, %v22120_v63  ;;  %v5048_v32 = vmul.f32 %v22121_v7, %v22121_v7  ;;  %v5769_v56 = vld [vmem:[%s22129_s0 + $0x8] sm:$0xff]  ;;  %v5772_v63 = vld [vmem:[%s22129_s0 + $0x20] sm:$0xff]  ;;  %v5774_v7 = vld [vmem:[%s22129_s0 + $0x30] sm:$0xff] }
 0x5f3   :  { %v4874_v12 = vrot.slane %v4873_v25, 2  ;;  %v4935_v28 = vadd.f32 %v4934_v17, %v4933_v54  ;;  %v5046_v26 = vmul.f32 %v22122_v46, %v22122_v46  ;;  %v4896_v19 = vadd.f32 %v4895_v45, %v4894_v5  ;;  %v22126_v17 = vld [vmem:[#allocation111_spill] sm:$0xff]  ;;  %v5776_v46 = vld [vmem:[%s22129_s0 + $0x40] sm:$0xff] }
 0x5f4   :  { %v5122_v39 = vadd.f32 %v5121_v58, %v5120_v3  ;;  %v5066_v57 = vadd.f32 %v5065_v14, %v22123_v53  ;;  %v5088_v47 = vadd.f32 %v5087_v21, %v22124_v44  ;;  %v5123_v8 = vsel %vm472_vm0, %v17707_v18, 0.0  ;;  %v5771_v14 = vld [vmem:[%s22129_s0 + $0x18] sm:$0xff]  ;;  %v5773_v21 = vld [vmem:[%s22129_s0 + $0x28] sm:$0xff] }
 0x5f5   :  { %v4936_v37 = vrot.slane %v4935_v28, 4  ;;  %v5049_v4 = vmul.f32 %v22125_v1, %v22125_v1  ;;  %v5125_v31 = vsel %vm472_vm0, %v17711_v49, 0.0  ;;  %v4897_v42 = vrot.slane %v4896_v19, 2  ;;  %v5781_v53 = vld [vmem:[%s22129_s0 + $0x68] sm:$0xff]  ;;  %v5783_v44 = vld [vmem:[%s22129_s0 + $0x78] sm:$0xff]  ;;  %v9109_v1 = vld [vmem:[%s21389_s12 + $0x10] sm:$0xff] }
 0x5f6   :  { %v5124_v27 = vadd.f32 %v5123_v8, %v5122_v39  ;;  %v4875_v10 = vadd.f32 %v4874_v12, %v4873_v25  ;;  %v5067_v55 = vrot.slane %v5066_v57, 4  ;;  %v5089_v20 = vadd.f32 %v5088_v47, %v5048_v32  ;;  %v5768_v12 = vld [vmem:[%s22129_s0] sm:$0xff]  ;;  %v5775_v32 = vld [vmem:[%s22129_s0 + $0x38] sm:$0xff]  ;;  %v5785_v8 = vld [vmem:[%s22129_s0 + $0x88] sm:$0xff] }
 0x5f7   :  { %v4937_v62 = vadd.f32 %v4936_v37, %v4935_v28  ;;  %v5127_v52 = vsel %vm472_vm0, %v5046_v26, 0.0  ;;  %v4898_v48 = vadd.f32 %v4897_v42, %v4896_v19  ;;  %v5129_v15 = vsel %vm472_vm0, %v5049_v4, 0.0  ;;  %v5770_v28 = vld [vmem:[%s22129_s0 + $0x10] sm:$0xff]  ;;  %5788 = vperm.xlu0 %13482, %v5768_v12   ;;  %v5777_v26 = vld [vmem:[%s22129_s0 + $0x48] sm:$0xff]  ;;  %v5779_v39 = vld [vmem:[%s22129_s0 + $0x58] sm:$0xff] }
 0x5f8   :  { %v5126_v38 = vadd.f32 %v5125_v31, %v5124_v27  ;;  %v5068_v59 = vadd.f32 %v5067_v55, %v5066_v57  ;;  %v5090_v35 = vrot.slane %v5089_v20, 4  ;;  %v4876_v30 = vrot.slane %v4875_v10, 1  ;;  %5798 = vperm.xlu1 %13483, %v5770_v28   ;;  %v5778_v19 = vld [vmem:[%s22129_s0 + $0x50] sm:$0xff]  ;;  %v5780_v37 = vld [vmem:[%s22129_s0 + $0x60] sm:$0xff]  ;;  %v9110_v4 = vld [vmem:[%s21389_s12 + $0x18] sm:$0xff] }
 0x5f9   :  { %v4938_v43 = vrot.slane %v4937_v62, 2  ;;  %v4899_v36 = vrot.slane %v4898_v48, 1  ;;  %v22127_v3 = vmov 0.0   ;;  %v22128_v58 = vmov 0.0|0.0   ;;  %v5782_v57 = vld [vmem:[%s22129_s0 + $0x70] sm:$0xff]  ;;  %v5784_v47 = vld [vmem:[%s22129_s0 + $0x80] sm:$0xff] }
 0x5fa   :  { %v5128_v18 = vadd.f32 %v5127_v52, %v5126_v38  ;;  %v5069_v41 = vrot.slane %v5068_v59, 2  ;;  %v5091_v0 = vadd.f32 %v5090_v35, %v5089_v20  ;;  %v4877_v24 = vadd.f32 %v4876_v30, %v4875_v10  ;;  %v9107_v27 = vld [vmem:[%s21389_s12] sm:$0xff]  ;;  %v9108_v31 = vld [vmem:[%s21389_s12 + $0x8] sm:$0xff]  ;;  %v9114_v55 = vld [vmem:[%s21389_s12 + $0x38] sm:$0xff] }
 0x5fb   :  { %v4939_v33 = vadd.f32 %v4938_v43, %v4937_v62  ;;  %v4900_v22 = vadd.f32 %v4899_v36, %v4898_v48  ;;  %5793 = vperm.xlu0 %13482, %v5769_v56   ;;  %v9111_v42 = vld [vmem:[%s21389_s12 + $0x20] sm:$0xff]  ;;  %v9112_v10 = vld [vmem:[%s21389_s12 + $0x28] sm:$0xff]  ;;  %v9113_v62 = vld [vmem:[%s21389_s12 + $0x30] sm:$0xff] }
 0x5fc   :  { %v5130_v2 = vadd.f32 %v5129_v15, %v5128_v18  ;;  %v5070_v49 = vadd.f32 %v5069_v41, %v5068_v59  ;;  %v5092_v16 = vrot.slane %v5091_v0, 2  ;;  %5803 = vperm.xlu1 %13483, %v5771_v14   ;;  %v9115_v20 = vld [vmem:[%s21389_s12 + $0x40] sm:$0xff]  ;;  %v9116_v38 = vld [vmem:[%s21389_s12 + $0x48] sm:$0xff]  ;;  %v9117_v59 = vld [vmem:[%s21389_s12 + $0x50] sm:$0xff] }
 0x5fd   :  { %v4940_v23 = vrot.slane %v4939_v33, 1  ;;  %v9118_v35 = vld [vmem:[%s21389_s12 + $0x58] sm:$0xff]  ;;  %v9119_v52 = vld [vmem:[%s21389_s12 + $0x60] sm:$0xff]  ;;  %v9120_v48 = vld [vmem:[%s21389_s12 + $0x68] sm:$0xff] }
 0x5fe   :  { %v5131_v13 = vrot.slane %v5130_v2, 4  ;;  %v5071_v9 = vrot.slane %v5070_v49, 1  ;;  %v5093_v51 = vadd.f32 %v5092_v16, %v5091_v0  ;;  %v10694_v43 = vld [vmem:[%s21390_s18] sm:$0xff]  ;;  %v10695_v18 = vld [vmem:[%s21390_s18 + $0x8] sm:$0xff]  ;;  %v22130_v15 = vld [vmem:[#allocation113_spill] sm:$0xff] }
 0x5ff   :  { %v4941_v61 = vadd.f32 %v4940_v23, %v4939_v33  ;;  %5808 = vperm.xlu0 %13482, %v5772_v63   ;;  %v5283_v30 = vmul.f32 %v22130_v15, %v22130_v15  ;;  %v13815_v12 = vld [vmem:[%s22133_s7 + $0x164] ss:$8 sps:$4 sm:$0xff]   ;;  %v13813_v28 = vld [vmem:[%s22133_s7 + $0x160] ss:$8 sps:$4 sm:$0xff]   ;;  %v13818_v56 = vld [vmem:[%s22133_s7 + $0x174] ss:$8 sps:$4 sm:$0xff]  }
 0x600   :  { %v5132_v29 = vadd.f32 %v5131_v13, %v5130_v2  ;;  %v5094_v34 = vrot.slane %v5093_v51, 1  ;;  %v5072_v5 = vadd.f32 %v5071_v9, %v5070_v49  ;;  %5813 = vperm.xlu1 %13483, %v5773_v21   ;;  %v13816_v14 = vld [vmem:[%s22133_s7 + $0x170] ss:$8 sps:$4 sm:$0xff]   ;;  %v13821_v63 = vld [vmem:[%s22133_s7 + $0x184] ss:$8 sps:$4 sm:$0xff]  }
 0x601   :  { %v5284_v36 = vmul.f32 4536.0, %v5283_v30  ;;  %v13819_v21 = vld [vmem:[%s22133_s7 + $0x180] ss:$8 sps:$4 sm:$0xff]  }
 0x602   :  { %v5133_v60 = vrot.slane %v5132_v29, 2  ;;  %v5095_v6 = vadd.f32 %v5094_v34, %v5093_v51  ;;  %v5137_v25 = vadd.f32 %v5072_v5, %v4877_v24  ;;  %v5287_v24 = vld [vmem:[%s21391_s2] sm:$0x1]  ;;  %v22131_v34 = vld [vmem:[#allocation112_spill] sm:$0xff] }
 0x603   :  { %5818 = vperm.xlu0 %13482, %v5774_v7   ;;  %v22132_v5 = vld [vmem:[#allocation110_spill] sm:$0xff]  ;;  %v13824_v7 = vld [vmem:[%s22133_s7 + $0x194] ss:$8 sps:$4 sm:$0xff]  }
 0x604   :  { %v5134_v54 = vadd.f32 %v5133_v60, %v5132_v29  ;;  %v5138_v50 = vadd.f32 %v5095_v6, %v4900_v22  ;;  %5823 = vperm.xlu1 %13483, %v5775_v32   ;;  %v5291_v60 = vld [vmem:[%s21392_s3] sm:$0x1]  ;;  %v13822_v32 = vld [vmem:[%s22133_s7 + $0x190] ss:$8 sps:$4 sm:$0xff]  }
 0x606   :  { %v5135_v40 = vrot.slane %v5134_v54, 1  ;;  %5207 = vmatprep.mubr.f32.mxu0 %v5138_v50  ;;  %v13806_v50 = vld [vmem:[%s22133_s7 + $0x134] ss:$8 sps:$4 sm:$0xff]  }
 0x607   :  { %5208 = vmatmul.mubr.f32.vlgmr.msra.gmra.mrb[74].mxu0 %v5137_v25  ;;  %5828 = vperm.xlu0 %13482, %v5776_v46   ;;  %v13803_v25 = vld [vmem:[%s22133_s7 + $0x124] ss:$8 sps:$4 sm:$0xff]  }
 0x608   :  { %v5136_v11 = vadd.f32 %v5135_v40, %v5134_v54  ;;  %5833 = vperm.xlu1 %13483, %v5777_v26   ;;  %v13801_v54 = vld [vmem:[%s22133_s7 + $0x120] ss:$8 sps:$4 sm:$0xff]   ;;  %v13809_v40 = vld [vmem:[%s22133_s7 + $0x144] ss:$8 sps:$4 sm:$0xff]  }
 0x609   :  { %v13827_v46 = vld [vmem:[%s22133_s7 + $0x1a4] ss:$8 sps:$4 sm:$0xff]   ;;  %v13825_v26 = vld [vmem:[%s22133_s7 + $0x1a0] ss:$8 sps:$4 sm:$0xff]  }
 0x60a   :  { %v5139_v45 = vadd.f32 %v5136_v11, %v4941_v61  ;;  %v13804_v61 = vld [vmem:[%s22133_s7 + $0x130] ss:$8 sps:$4 sm:$0xff]   ;;  %v13807_v11 = vld [vmem:[%s22133_s7 + $0x140] ss:$8 sps:$4 sm:$0xff]  }
 0x60b   :  { %5838 = vperm.xlu0 %13482, %v5778_v19   ;;  %v13830_v19 = vld [vmem:[%s22133_s7 + $0x1b4] ss:$8 sps:$4 sm:$0xff]  }
 0x60c   :  { %12260 = vmatmul.mubr.msk.f32.vlgmr.msra.gmra.mrb[78].mxu1 %vm472_vm0, %v5139_v45  ;;  %5843 = vperm.xlu1 %13483, %v5779_v39   ;;  %v13812_v45 = vld [vmem:[%s22133_s7 + $0x154] ss:$8 sps:$4 sm:$0xff]   ;;  %v13828_v39 = vld [vmem:[%s22133_s7 + $0x1b0] ss:$8 sps:$4 sm:$0xff]  }
 0x60d   :  { %12457 = vmatpush1.bf16.msra.mxu1 %v22126_v17  ;;  %5361 = vmatprep.mubr.f32.mxu1 %v22127_v3 }
 0x60e   :  { %12458 = vmatprep.subr.bf16.mxu1 %v22128_v58 }
 0x60f   :  { %5848 = vperm.xlu0 %13482, %v5780_v37   ;;  %v13833_v37 = vld [vmem:[%s22133_s7 + $0x1c4] ss:$8 sps:$4 sm:$0xff]  }
 0x610   :  { %5853 = vperm.xlu1 %13483, %v5781_v53   ;;  %v13831_v53 = vld [vmem:[%s22133_s7 + $0x1c0] ss:$8 sps:$4 sm:$0xff]  }
 0x613   :  { %5858 = vperm.xlu0 %13482, %v5782_v57   ;;  %v13836_v57 = vld [vmem:[%s22133_s7 + $0x1d4] ss:$8 sps:$4 sm:$0xff]  }
 0x614   :  { %5863 = vperm.xlu1 %13483, %v5783_v44   ;;  %v13834_v44 = vld [vmem:[%s22133_s7 + $0x1d0] ss:$8 sps:$4 sm:$0xff]  }
 0x617   :  { %5868 = vperm.xlu0 %13482, %v5784_v47   ;;  %v13839_v47 = vld [vmem:[%s22133_s7 + $0x1e4] ss:$8 sps:$4 sm:$0xff]  }
 0x618   :  { %5873 = vperm.xlu1 %13483, %v5785_v8   ;;  %v13837_v8 = vld [vmem:[%s22133_s7 + $0x1e0] ss:$8 sps:$4 sm:$0xff]  }
 0x61b   :  { %9133 = vperm.xlu0 %13482, %v9109_v1   ;;  %v13842_v1 = vld [vmem:[%s22133_s7 + $0x1f4] ss:$8 sps:$4 sm:$0xff]  }
 0x61c   :  { %9138 = vperm.xlu1 %13483, %v9110_v4   ;;  %v13840_v4 = vld [vmem:[%s22133_s7 + $0x1f0] ss:$8 sps:$4 sm:$0xff]  }
 0x61f   :  { %9123 = vperm.xlu0 %13482, %v9107_v27   ;;  %v13845_v27 = vld [vmem:[%s22133_s7 + $0x204] ss:$8 sps:$4 sm:$0xff]  }
 0x620   :  { %9128 = vperm.xlu1 %13483, %v9108_v31   ;;  %v13843_v31 = vld [vmem:[%s22133_s7 + $0x200] ss:$8 sps:$4 sm:$0xff]  }
 0x623   :  { %9143 = vperm.xlu0 %13482, %v9111_v42   ;;  %v13848_v42 = vld [vmem:[%s22133_s7 + $0x214] ss:$8 sps:$4 sm:$0xff]  }
 0x624   :  { %9148 = vperm.xlu1 %13483, %v9112_v10   ;;  %v13846_v10 = vld [vmem:[%s22133_s7 + $0x210] ss:$8 sps:$4 sm:$0xff]  }
 0x627   :  { %9153 = vperm.xlu0 %13482, %v9113_v62   ;;  %v13851_v62 = vld [vmem:[%s22133_s7 + $0x224] ss:$8 sps:$4 sm:$0xff]  }
 0x628   :  { %9158 = vperm.xlu1 %13483, %v9114_v55  }
 0x62b   :  { %9163 = vperm.xlu0 %13482, %v9115_v20   ;;  %v22134_v20 = vld [vmem:[#allocation114_spill] sm:$0xff] }
 0x62c   :  { %9168 = vperm.xlu1 %13483, %v9116_v38  }
 0x62f   :  { %9173 = vperm.xlu0 %13482, %v9117_v59  }
 0x630   :  { %9178 = vperm.xlu1 %13483, %v9118_v35  }
 0x633   :  { %9183 = vperm.xlu0 %13482, %v9119_v52   ;;  %v22135_v52 = vld [vmem:[#allocation9_spill] sm:$0xff] }
 0x634   :  { %9188 = vperm.xlu1 %13483, %v9120_v48  }
 0x637   :  { %10698 = vperm.xlu0 %13482, %v10694_v43   ;;  %v22136_v43 = vld [vmem:[#allocation12_spill] sm:$0xff] }
 0x638   :  { %10703 = vperm.xlu1 %13483, %v10695_v18  }
 0x6da   :  { %v12176_v41 = vpop.f32.mrb[74].mxu0 }
 0x6db   :  { %v12177_v0 = vpop.f32.mrb[75].mxu0 }
 0x6dc   :  { %v12178_v2 = vadd.f32 %v12177_v0, %v12176_v41  ;;  %v22137_v41 = vld [vmem:[#allocation15_spill] sm:$0xff] }
 0x6df   :  { %v5279_v49 = vpop.f32.mrb[78].mxu1 }
 0x6e0   :  { %v5280_v16 = vadd.f32 %v12178_v2, %v5279_v49  ;;  %v12261_v33 = vpop.f32.mrb[79].mxu1  ;;  %v22139_v2 = vld [vmem:[#allocation21_spill] sm:$0xff] }
 0x6e1   :  { %v22141_v33 = vld [vmem:[#allocation4_spill] sm:$0xff] }
 0x6e2   :  { %v5285_v13 = vsub.f32 %v5280_v16, %v5284_v36  ;;  %v22140_v16 = vld [vmem:[#allocation24_spill] sm:$0xff] }
 0x6e4   :  { %v5286_v9 = vmul.f32 0.0015432099, %v5285_v13 }
 0x6e6   :  { %v5288_v51 = vadd.f32 1e-05, %v5286_v9  ;;  %v22142_v9 = vld [vmem:[#allocation7_spill] sm:$0xff] }
 0x6e8   :  { %14149 = vrsqrt.f32 %v5288_v51 }
 0x6f2   :  { %v14150_v29 = vpop.eup %14149 }
 0x6f3   :  { %v5290_v22 = vmul.f32 %v14150_v29, %v5287_v24  ;;  %v22143_v29 = vld [vmem:[#allocation27_spill] sm:$0xff] }
 0x6f5   :  { %11517 = vmatmul.mubr.msk.f32.vlgmr.msra.gmra.mrb[80].mxu1 %vm4590_vm2, %v5290_v22  ;;  %v5292_v23 = vmul.f32 %v5290_v22, %v22130_v15  ;;  %v22138_v15 = vld [vmem:[#allocation18_spill] sm:$0xff] }
 0x6f6   :  { %12460 = vmatpush3.bf16.msra.mxu1 %v22131_v34  ;;  %12266 = vmatprep.mubr.msk.f32.mxu1 %vm14340_vm1, %v22127_v3 }
 0x6f7   :  { %12462 = vmatprep.subr.bf16.mxu1 %v22132_v5  ;;  %v5293_v6 = vsub.f32 %v5291_v60, %v5292_v23  ;;  %v22145_v23 = vld [vmem:[#allocation33_spill] sm:$0xff] }
 0x6f9   :  { %12267 = vmatmul.mubr.msk.f32.vlgmr.msra.gmra.mrb[82].mxu1 %vm4590_vm2, %v5290_v22 }
 0x6fa   :  { %12464 = vmatpush1.bf16.msra.mxu1 %v22126_v17  ;;  %5505 = vmatprep.mubr.f32.mxu1 %v22127_v3  ;;  %v13810_v17 = vld [vmem:[%s22133_s7 + $0x150] ss:$8 sps:$4 sm:$0xff]  }
 0x6fb   :  { %12465 = vmatprep.subr.bf16.mxu1 %v22128_v58  ;;  %v22191_v58 = vld [vmem:[#allocation52_spill] sm:$0xff] }
 0x6fd   :  { %11519 = vmatmul.mubr.msk.f32.vlgmr.msra.gmra.mrb[84].mxu1 %vm4590_vm2, %v5293_v6 }
 0x6fe   :  { %12467 = vmatpush3.bf16.msra.mxu1 %v22131_v34  ;;  %12273 = vmatprep.mubr.msk.f32.mxu1 %vm14340_vm1, %v22127_v3  ;;  %v22144_v34 = vld [vmem:[#allocation30_spill] sm:$0xff] }
 0x6ff   :  { %6447 = vmatprep.subr.bf16.mxu1 %v13803_v25  ;;  %v22187_v3 = vld [vmem:[#allocation46_spill] sm:$0xff] }
 0x701   :  { %12274 = vmatmul.mubr.msk.f32.vlgmr.msra.gmra.mrb[86].mxu1 %vm4590_vm2, %v5293_v6  ;;  %v22146_v6 = vld [vmem:[#allocation36_spill] sm:$0xff] }
 0x702   :  { %6448 = vmatpush1.bf16.msra.mxu1 %v13801_v54 }
 0x703   :  { %6449 = vmatprep.subr.bf16.mxu1 %v13806_v50  ;;  %v22147_v50 = vld [vmem:[#allocation39_spill] sm:$0xff] }
 0x706   :  { %6450 = vmatpush1.bf16.msra.mxu1 %v13804_v61 }
 0x707   :  { %6451 = vmatprep.subr.bf16.mxu1 %v13809_v40  ;;  %v22148_v40 = vld [vmem:[#allocation42_spill] sm:$0xff] }
 0x70a   :  { %6452 = vmatpush1.bf16.msra.mxu1 %v13807_v11 }
 0x70b   :  { %6453 = vmatprep.subr.bf16.mxu1 %v13812_v45  ;;  %v22149_v45 = vld [vmem:[#allocation45_spill] sm:$0xff] }
 0x70e   :  { %6454 = vmatpush1.bf16.msra.mxu1 %v13810_v17 }
 0x70f   :  { %6455 = vmatprep.subr.bf16.mxu1 %v13815_v12  ;;  %v22150_v12 = vld [vmem:[#allocation48_spill] sm:$0xff] }
 0x712   :  { %6456 = vmatpush1.bf16.msra.mxu1 %v13813_v28 }
 0x713   :  { %6457 = vmatprep.subr.bf16.mxu1 %v13818_v56  ;;  %v22151_v56 = vld [vmem:[#allocation51_spill] sm:$0xff] }
 0x716   :  { %6458 = vmatpush1.bf16.msra.mxu1 %v13816_v14 }
 0x717   :  { %6459 = vmatprep.subr.bf16.mxu1 %v13821_v63  ;;  %v22152_v63 = vld [vmem:[#allocation54_spill] sm:$0xff] }
 0x71a   :  { %6460 = vmatpush1.bf16.msra.mxu1 %v13819_v21 }
 0x71b   :  { %6461 = vmatprep.subr.bf16.mxu1 %v13824_v7  ;;  %v22153_v7 = vld [vmem:[#allocation57_spill] sm:$0xff] }
 0x71e   :  { %6462 = vmatpush1.bf16.msra.mxu1 %v13822_v32 }
 0x71f   :  { %6463 = vmatprep.subr.bf16.mxu1 %v13827_v46  ;;  %v22154_v46 = vld [vmem:[#allocation60_spill] sm:$0xff] }
 0x722   :  { %6464 = vmatpush1.bf16.msra.mxu1 %v13825_v26 }
 0x723   :  { %6465 = vmatprep.subr.bf16.mxu1 %v13830_v19  ;;  %v22155_v19 = vld [vmem:[#allocation63_spill] sm:$0xff] }
 0x726   :  { %6466 = vmatpush1.bf16.msra.mxu1 %v13828_v39 }
 0x727   :  { %6467 = vmatprep.subr.bf16.mxu1 %v13833_v37  ;;  %v22156_v37 = vld [vmem:[#allocation66_spill] sm:$0xff] }
 0x72a   :  { %6468 = vmatpush1.bf16.msra.mxu1 %v13831_v53 }
 0x72b   :  { %6469 = vmatprep.subr.bf16.mxu1 %v13836_v57  ;;  %v22157_v57 = vld [vmem:[#allocation69_spill] sm:$0xff] }
 0x72e   :  { %6470 = vmatpush1.bf16.msra.mxu1 %v13834_v44 }
 0x72f   :  { %6471 = vmatprep.subr.bf16.mxu1 %v13839_v47  ;;  %v22158_v47 = vld [vmem:[#allocation72_spill] sm:$0xff] }
 0x732   :  { %6472 = vmatpush1.bf16.msra.mxu1 %v13837_v8 }
 0x733   :  { %6473 = vmatprep.subr.bf16.mxu1 %v13842_v1 }
 0x736   :  { %6474 = vmatpush1.bf16.msra.mxu1 %v13840_v4  ;;  %v22159_v4 = vld [vmem:[#allocation75_spill] sm:$0xff] }
 0x737   :  { %6475 = vmatprep.subr.bf16.mxu1 %v13845_v27 }
 0x73a   :  { %6476 = vmatpush1.bf16.msra.mxu1 %v13843_v31  ;;  %v22160_v31 = vld [vmem:[#allocation78_spill] sm:$0xff] }
 0x73b   :  { %6477 = vmatprep.subr.bf16.mxu1 %v13848_v42 }
 0x73e   :  { %6478 = vmatpush1.bf16.msra.mxu1 %v13846_v10  ;;  %v22161_v10 = vld [vmem:[#allocation81_spill] sm:$0xff] }
 0x73f   :  { %6550 = vmatprep.subr.bf16.mxu1 %v13851_v62 }
 0x7c8   :  { %v5363_v55 = vpop.f32.mrb[80].mxu1 }
 0x7c9   :  { %v5585_v38 = vrot.slane %v5363_v55, %v22134_v20  ;;  %v5365_v59 = vpop.f32.mrb[81].mxu1  ;;  %v22162_v55 = vld [vmem:[#allocation84_spill] sm:$0xff] }
 0x7ca   :  { %v18056_v35 = vrot.slane %v5365_v59, %v22134_v20 }
 0x7cb   :  { %v18059_v48 = vmul.f32 %v5585_v38, %v22135_v52  ;;  %v18062_v18 = vmul.f32 %v5585_v38, %v22136_v43  ;;  %v18065_v0 = vmul.f32 %v5585_v38, %v22137_v41  ;;  %v18068_v30 = vmul.f32 %v5585_v38, %v22138_v15  ;;  %v22163_v43 = vld [vmem:[#allocation87_spill] sm:$0xff]  ;;  %v22164_v15 = vld [vmem:[#allocation90_spill] sm:$0xff] }
 0x7cc   :  { %v18071_v49 = vmul.f32 %v5585_v38, %v22139_v2  ;;  %v18074_v36 = vmul.f32 %v5585_v38, %v22140_v16  ;;  %v18077_v13 = vmul.f32 %v5585_v38, %v22141_v33  ;;  %v18080_v51 = vmul.f32 %v5585_v38, %v22142_v9  ;;  %v18082_v24 = vpop.f32.mrb[82].mxu1  ;;  %v22165_v16 = vld [vmem:[#allocation93_spill] sm:$0xff]  ;;  %v22166_v9 = vld [vmem:[#allocation96_spill] sm:$0xff] }
 0x7cd   :  { %v18085_v22 = vmul.f32 %v5585_v38, %v22143_v29  ;;  %v18088_v5 = vmul.f32 %v5585_v38, %v22144_v34  ;;  %v18091_v60 = vmul.f32 %v5585_v38, %v22145_v23  ;;  %v18094_v25 = vmul.f32 %v5585_v38, %v22146_v6  ;;  %v12268_v54 = vpop.f32.mrb[83].mxu1  ;;  %v18156_v34 = vpop.permute.xlu0 %5788  ;;  %v22168_v23 = vld [vmem:[#allocation99_spill] sm:$0xff] }
 0x7ce   :  { %v18097_v61 = vmul.f32 %v5585_v38, %v22147_v50  ;;  %v18100_v11 = vmul.f32 %v5585_v38, %v22148_v40  ;;  %v18103_v17 = vmul.f32 %v5585_v38, %v22149_v45  ;;  %v18106_v28 = vmul.f32 %v5585_v38, %v22150_v12  ;;  %22167 = vst [vmem:[#allocation123_spill] sm:$0xff] %v18156_v34  ;;  %v22169_v54 = vld [vmem:[#allocation102_spill] sm:$0xff]  ;;  %v22171_v12 = vld [vmem:[#allocation13_spill] sm:$0xff] }
 0x7cf   :  { %v18109_v14 = vmul.f32 %v5585_v38, %v22151_v56  ;;  %v18112_v21 = vmul.f32 %v5585_v38, %v22152_v63  ;;  %v18115_v32 = vmul.f32 %v5585_v38, %v22153_v7  ;;  %v18118_v26 = vmul.f32 %v5585_v38, %v22154_v46  ;;  %v22170_v40 = vld [vmem:[#allocation10_spill] sm:$0xff]  ;;  %v18172_v63 = vpop.permute.xlu1 %5798  ;;  %v22173_v7 = vld [vmem:[#allocation16_spill] sm:$0xff] }
 0x7d0   :  { %v18121_v39 = vmul.f32 %v5585_v38, %v22155_v19  ;;  %v18124_v53 = vmul.f32 %v5585_v38, %v22156_v37  ;;  %v18127_v44 = vmul.f32 %v5585_v38, %v22157_v57  ;;  %v18130_v8 = vmul.f32 %v5585_v38, %v22158_v47  ;;  %v5507_v1 = vpop.f32.mrb[84].mxu1  ;;  %22172 = vst [vmem:[#allocation124_spill] sm:$0xff] %v18172_v63  ;;  %v22174_v19 = vld [vmem:[#allocation19_spill] sm:$0xff]  ;;  %v22176_v47 = vld [vmem:[#allocation2_spill] sm:$0xff] }
 0x7d1   :  { %v18133_v27 = vmul.f32 %v5585_v38, %v22159_v4  ;;  %v18136_v42 = vmul.f32 %v5585_v38, %v22160_v31  ;;  %v18139_v62 = vmul.f32 %v5585_v38, %v22161_v10  ;;  %v18142_v59 = vmul.f32 %v5585_v38, %v22162_v55  ;;  %v5509_v52 = vpop.f32.mrb[85].mxu1  ;;  %v22178_v10 = vld [vmem:[#allocation5_spill] sm:$0xff]  ;;  %v22193_v63 = vld [vmem:[#allocation55_spill] sm:$0xff]  ;;  %v22195_v34 = vld [vmem:[#allocation58_spill] sm:$0xff] }
 0x7d2   :  { %v18145_v41 = vmul.f32 %v5585_v38, %v22163_v43  ;;  %v18148_v2 = vmul.f32 %v5585_v38, %v22164_v15  ;;  %v18151_v33 = vmul.f32 %v5585_v38, %v22165_v16  ;;  %v18154_v29 = vmul.f32 %v5585_v38, %v22166_v9  ;;  %v22179_v43 = vld [vmem:[#allocation25_spill] sm:$0xff]  ;;  %v22180_v16 = vld [vmem:[#allocation28_spill] sm:$0xff] }
 0x7d3   :  { %v18159_v6 = vmul.f32 %v5585_v38, %v22168_v23  ;;  %v18162_v50 = vmul.f32 %v5585_v38, %v22169_v54  ;;  %v18166_v45 = vmul.f32 %v18056_v35, %v22170_v40  ;;  %v18170_v56 = vmul.f32 %v18056_v35, %v22171_v12  ;;  %v22175_v38 = vld [vmem:[#allocation22_spill] sm:$0xff]  ;;  %v22181_v23 = vld [vmem:[#allocation31_spill] sm:$0xff] }
 0x7d4   :  { %v18176_v46 = vmul.f32 %v18056_v35, %v22173_v7  ;;  %v18180_v37 = vmul.f32 %v18056_v35, %v22174_v19  ;;  %v18184_v57 = vmul.f32 %v18056_v35, %v22175_v38  ;;  %v18188_v4 = vmul.f32 %v18056_v35, %v22176_v47  ;;  %v18190_v31 = vpop.f32.mrb[86].mxu1  ;;  %v22182_v12 = vld [vmem:[#allocation34_spill] sm:$0xff]  ;;  %v22183_v19 = vld [vmem:[#allocation37_spill] sm:$0xff]  ;;  %v22184_v47 = vld [vmem:[#allocation40_spill] sm:$0xff] }
 0x7d5   :  { %22177 = vst [vmem:[#allocation125_spill] sm:$0xff] %v18190_v31  ;;  %v18194_v55 = vmul.f32 %v18056_v35, %v22178_v10  ;;  %v18198_v15 = vmul.f32 %v18056_v35, %v22179_v43  ;;  %v18202_v9 = vmul.f32 %v18056_v35, %v22180_v16  ;;  %v18206_v54 = vmul.f32 %v18056_v35, %v22181_v23  ;;  %v12275_v40 = vpop.f32.mrb[87].mxu1  ;;  %v22185_v43 = vld [vmem:[#allocation43_spill] sm:$0xff]  ;;  %v22197_v31 = vld [vmem:[#allocation61_spill] sm:$0xff] }
 0x7d6   :  { %v18210_v7 = vmul.f32 %v18056_v35, %v22182_v12  ;;  %v18214_v38 = vmul.f32 %v18056_v35, %v22183_v19  ;;  %v18218_v10 = vmul.f32 %v18056_v35, %v22184_v47  ;;  %v18222_v16 = vmul.f32 %v18056_v35, %v22185_v43  ;;  %v22189_v40 = vld [vmem:[#allocation49_spill] sm:$0xff] }
 0x7d7   :  { %v18226_v23 = vmul.f32 %v18056_v35, %v22187_v3  ;;  %v18230_v12 = vmul.f32 %v18056_v35, %v22189_v40  ;;  %v18234_v19 = vmul.f32 %v18056_v35, %v22191_v58  ;;  %v18238_v47 = vmul.f32 %v18056_v35, %v22193_v63 }
 0x7d8   :  { %22186 = vst [vmem:[#allocation126_spill] sm:$0xff] %v18222_v16  ;;  %v18242_v43 = vmul.f32 %v18056_v35, %v22195_v34  ;;  %v18246_v3 = vmul.f32 %v18056_v35, %v22197_v31 }
 0x7d9   :  { %22188 = vst [vmem:[#allocation127_spill] sm:$0xff] %v18226_v23  ;;  %22190 = vst [vmem:[#allocation128_spill] sm:$0xff] %v18230_v12  ;;  %v22199_v23 = vld [vmem:[#allocation64_spill] sm:$0xff]  ;;  %v22201_v12 = vld [vmem:[#allocation67_spill] sm:$0xff] }
 0x7da   :  { %22192 = vst [vmem:[#allocation109_spill] sm:$0xff] %v18234_v19  ;;  %22194 = vst [vmem:[#allocation157_spill] sm:$0xff] %v18238_v47  ;;  %v18250_v40 = vmul.f32 %v18056_v35, %v22199_v23  ;;  %v18254_v58 = vmul.f32 %v18056_v35, %v22201_v12  ;;  %v22203_v19 = vld [vmem:[#allocation70_spill] sm:$0xff]  ;;  %v22205_v47 = vld [vmem:[#allocation73_spill] sm:$0xff]  ;;  %v18274_v12 = vpop.permute.xlu1 %5803 }
 0x7db   :  { %22196 = vst [vmem:[#allocation158_spill] sm:$0xff] %v18242_v43  ;;  %22198 = vst [vmem:[#allocation159_spill] sm:$0xff] %v18246_v3  ;;  %v18258_v63 = vmul.f32 %v18056_v35, %v22203_v19  ;;  %v18262_v34 = vmul.f32 %v18056_v35, %v22205_v47  ;;  %v22207_v43 = vld [vmem:[#allocation76_spill] sm:$0xff]  ;;  %v22209_v3 = vld [vmem:[#allocation79_spill] sm:$0xff] }
 0x7dc   :  { %22200 = vst [vmem:[#allocation160_spill] sm:$0xff] %v18250_v40  ;;  %22202 = vst [vmem:[#allocation129_spill] sm:$0xff] %v18254_v58  ;;  %v18266_v31 = vmul.f32 %v18056_v35, %v22207_v43  ;;  %v18270_v23 = vmul.f32 %v18056_v35, %v22209_v3  ;;  %v18272_v40 = vpop.permute.xlu0 %5793  ;;  %v22213_v58 = vld [vmem:[#allocation82_spill] sm:$0xff] }
 0x7dd   :  { %22204 = vst [vmem:[#allocation161_spill] sm:$0xff] %v18258_v63  ;;  %22206 = vst [vmem:[#allocation130_spill] sm:$0xff] %v18262_v34  ;;  %v18278_v19 = vmul.f32 %v18056_v35, %v22213_v58  ;;  %v22215_v63 = vld [vmem:[#allocation85_spill] sm:$0xff]  ;;  %v22217_v34 = vld [vmem:[#allocation88_spill] sm:$0xff] }
 0x7de   :  { %22208 = vst [vmem:[#allocation131_spill] sm:$0xff] %v18266_v31  ;;  %22210 = vst [vmem:[#allocation142_spill] sm:$0xff] %v18270_v23  ;;  %v18282_v47 = vmul.f32 %v18056_v35, %v22215_v63  ;;  %v18286_v43 = vmul.f32 %v18056_v35, %v22217_v34  ;;  %v22219_v31 = vld [vmem:[#allocation91_spill] sm:$0xff]  ;;  %v22221_v23 = vld [vmem:[#allocation94_spill] sm:$0xff] }
 0x7df   :  { %22211 = vst [vmem:[#allocation132_spill] sm:$0xff] %v18272_v40  ;;  %22212 = vst [vmem:[#allocation143_spill] sm:$0xff] %v18274_v12  ;;  %v18290_v3 = vmul.f32 %v18056_v35, %v22219_v31  ;;  %v18294_v40 = vmul.f32 %v18056_v35, %v22221_v23  ;;  %v22223_v12 = vld [vmem:[#allocation97_spill] sm:$0xff]  ;;  %v5593_v31 = vrot.slane %v18082_v24, %v22134_v20 }
 0x7e0   :  { %22214 = vst [vmem:[#allocation133_spill] sm:$0xff] %v18278_v19  ;;  %22216 = vst [vmem:[#allocation144_spill] sm:$0xff] %v18282_v47  ;;  %v18298_v58 = vmul.f32 %v18056_v35, %v22223_v12  ;;  %v22225_v19 = vld [vmem:[#allocation100_spill] sm:$0xff]  ;;  %v22227_v47 = vld [vmem:[#allocation103_spill] sm:$0xff]  ;;  %v18314_v23 = vrot.slane %v5509_v52, %v22134_v20 }
 0x7e1   :  { %22218 = vst [vmem:[#allocation134_spill] sm:$0xff] %v18286_v43  ;;  %22220 = vst [vmem:[#allocation145_spill] sm:$0xff] %v18290_v3  ;;  %v18302_v63 = vmul.f32 %v18056_v35, %v22225_v19  ;;  %v18306_v34 = vmul.f32 %v18056_v35, %v22227_v47  ;;  %v18311_v3 = vrot.slane %v5507_v1, %v22134_v20  ;;  %v22233_v19 = vld [vmem:[#allocation14_spill] sm:$0xff]  ;;  %v22235_v35 = vld [vmem:[#allocation17_spill] sm:$0xff] }
 0x7e2   :  { %22222 = vst [vmem:[#allocation135_spill] sm:$0xff] %v18294_v40  ;;  %22224 = vst [vmem:[#allocation146_spill] sm:$0xff] %v18298_v58  ;;  %v22229_v40 = vld [vmem:[#allocation8_spill] sm:$0xff]  ;;  %v22231_v58 = vld [vmem:[#allocation11_spill] sm:$0xff]  ;;  %v18326_v47 = vmul.f32 %v5593_v31, %v22235_v35 }
 0x7e3   :  { %22226 = vst [vmem:[#allocation117_spill] sm:$0xff] %v18302_v63  ;;  %22228 = vst [vmem:[#allocation162_spill] sm:$0xff] %v18306_v34  ;;  %v18317_v12 = vmul.f32 %v5593_v31, %v22229_v40  ;;  %v18320_v43 = vmul.f32 %v5593_v31, %v22231_v58  ;;  %v18323_v63 = vmul.f32 %v5593_v31, %v22233_v19  ;;  %v22237_v34 = vld [vmem:[#allocation20_spill] sm:$0xff]  ;;  %v22239_v1 = vld [vmem:[#allocation23_spill] sm:$0xff]  ;;  %v18340_v58 = vpop.permute.xlu0 %5808 }
 0x7e4   :  { %22236 = vst [vmem:[#allocation163_spill] sm:$0xff] %v18326_v47  ;;  %v18329_v24 = vmul.f32 %v5593_v31, %v22237_v34  ;;  %v18332_v16 = vmul.f32 %v5593_v31, %v22239_v1  ;;  %v22241_v52 = vld [vmem:[#allocation3_spill] sm:$0xff]  ;;  %v22243_v40 = vld [vmem:[#allocation6_spill] sm:$0xff]  ;;  %22245 = vst [vmem:[#allocation149_spill] sm:$0xff] %v18340_v58 }
 0x7e5   :  { %22230 = vst [vmem:[#allocation136_spill] sm:$0xff] %v18317_v12  ;;  %22232 = vst [vmem:[#allocation147_spill] sm:$0xff] %v18320_v43  ;;  %v18335_v20 = vmul.f32 %v5593_v31, %v22241_v52  ;;  %v18338_v12 = vmul.f32 %v5593_v31, %v22243_v40  ;;  %v18342_v43 = vpop.permute.xlu1 %5813  ;;  %v22247_v19 = vld [vmem:[#allocation26_spill] sm:$0xff]  ;;  %v22249_v35 = vld [vmem:[#allocation29_spill] sm:$0xff] }
 0x7e6   :  { %22234 = vst [vmem:[#allocation118_spill] sm:$0xff] %v18323_v63  ;;  %22238 = vst [vmem:[#allocation137_spill] sm:$0xff] %v18329_v24  ;;  %v18345_v63 = vmul.f32 %v5593_v31, %v22247_v19  ;;  %v18348_v47 = vmul.f32 %v5593_v31, %v22249_v35  ;;  %v22251_v34 = vld [vmem:[#allocation32_spill] sm:$0xff]  ;;  %v22253_v1 = vld [vmem:[#allocation35_spill] sm:$0xff] }
 0x7e7   :  { %22240 = vst [vmem:[#allocation148_spill] sm:$0xff] %v18332_v16  ;;  %22242 = vst [vmem:[#allocation164_spill] sm:$0xff] %v18335_v20  ;;  %v18351_v24 = vmul.f32 %v5593_v31, %v22251_v34  ;;  %v18354_v16 = vmul.f32 %v5593_v31, %v22253_v1  ;;  %v22255_v52 = vld [vmem:[#allocation38_spill] sm:$0xff]  ;;  %v22257_v40 = vld [vmem:[#allocation41_spill] sm:$0xff] }
 0x7e8   :  { %22244 = vst [vmem:[#allocation138_spill] sm:$0xff] %v18338_v12  ;;  %22246 = vst [vmem:[#allocation165_spill] sm:$0xff] %v18342_v43  ;;  %v18357_v20 = vmul.f32 %v5593_v31, %v22255_v52  ;;  %v18360_v12 = vmul.f32 %v5593_v31, %v22257_v40  ;;  %v22259_v58 = vld [vmem:[#allocation44_spill] sm:$0xff]  ;;  %v22261_v19 = vld [vmem:[#allocation47_spill] sm:$0xff] }
 0x7e9   :  { %22248 = vst [vmem:[#allocation139_spill] sm:$0xff] %v18345_v63  ;;  %22250 = vst [vmem:[#allocation150_spill] sm:$0xff] %v18348_v47  ;;  %v18363_v43 = vmul.f32 %v5593_v31, %v22259_v58  ;;  %v18366_v63 = vmul.f32 %v5593_v31, %v22261_v19  ;;  %v22263_v35 = vld [vmem:[#allocation50_spill] sm:$0xff]  ;;  %v22265_v34 = vld [vmem:[#allocation53_spill] sm:$0xff] }
 0x7ea   :  { %22252 = vst [vmem:[#allocation105_spill] sm:$0xff] %v18351_v24  ;;  %22254 = vst [vmem:[#allocation140_spill] sm:$0xff] %v18354_v16  ;;  %v18369_v47 = vmul.f32 %v5593_v31, %v22263_v35  ;;  %v18372_v24 = vmul.f32 %v5593_v31, %v22265_v34  ;;  %v22267_v1 = vld [vmem:[#allocation56_spill] sm:$0xff]  ;;  %v22269_v52 = vld [vmem:[#allocation59_spill] sm:$0xff] }
 0x7eb   :  { %22256 = vst [vmem:[#allocation151_spill] sm:$0xff] %v18357_v20  ;;  %22258 = vst [vmem:[#allocation108_spill] sm:$0xff] %v18360_v12  ;;  %v18375_v16 = vmul.f32 %v5593_v31, %v22267_v1  ;;  %v18378_v20 = vmul.f32 %v5593_v31, %v22269_v52  ;;  %v22271_v40 = vld [vmem:[#allocation62_spill] sm:$0xff]  ;;  %v22273_v58 = vld [vmem:[#allocation65_spill] sm:$0xff] }
 0x7ec   :  { %22260 = vst [vmem:[#allocation141_spill] sm:$0xff] %v18363_v43  ;;  %22262 = vst [vmem:[#allocation152_spill] sm:$0xff] %v18366_v63  ;;  %v18381_v12 = vmul.f32 %v5593_v31, %v22271_v40  ;;  %v18384_v43 = vmul.f32 %v5593_v31, %v22273_v58  ;;  %v22275_v19 = vld [vmem:[#allocation68_spill] sm:$0xff]  ;;  %v22277_v35 = vld [vmem:[#allocation71_spill] sm:$0xff] }
 0x7ed   :  { %22264 = vst [vmem:[#allocation119_spill] sm:$0xff] %v18369_v47  ;;  %22266 = vst [vmem:[#allocation115_spill] sm:$0xff] %v18372_v24  ;;  %v18387_v63 = vmul.f32 %v5593_v31, %v22275_v19  ;;  %v18390_v47 = vmul.f32 %v5593_v31, %v22277_v35  ;;  %v22279_v34 = vld [vmem:[#allocation74_spill] sm:$0xff]  ;;  %v22281_v1 = vld [vmem:[#allocation77_spill] sm:$0xff] }
 0x7ee   :  { %22268 = vst [vmem:[#allocation153_spill] sm:$0xff] %v18375_v16  ;;  %22270 = vst [vmem:[#allocation116_spill] sm:$0xff] %v18378_v20  ;;  %v18393_v24 = vmul.f32 %v5593_v31, %v22279_v34  ;;  %v18396_v16 = vmul.f32 %v5593_v31, %v22281_v1  ;;  %v22283_v52 = vld [vmem:[#allocation80_spill] sm:$0xff]  ;;  %v22285_v40 = vld [vmem:[#allocation83_spill] sm:$0xff]  ;;  %v18416_v1 = vpop.permute.xlu0 %5818 }
 0x7ef   :  { %22272 = vst [vmem:[#allocation154_spill] sm:$0xff] %v18381_v12  ;;  %22274 = vst [vmem:[#allocation120_spill] sm:$0xff] %v18384_v43  ;;  %v18399_v20 = vmul.f32 %v5593_v31, %v22283_v52  ;;  %v18402_v12 = vmul.f32 %v5593_v31, %v22285_v40  ;;  %v22287_v58 = vld [vmem:[#allocation86_spill] sm:$0xff]  ;;  %v22289_v19 = vld [vmem:[#allocation89_spill] sm:$0xff] }
 0x7f0   :  { %22276 = vst [vmem:[#allocation155_spill] sm:$0xff] %v18387_v63  ;;  %22278 = vst [vmem:[#allocation121_spill] sm:$0xff] %v18390_v47  ;;  %v18405_v43 = vmul.f32 %v5593_v31, %v22287_v58  ;;  %v18408_v63 = vmul.f32 %v5593_v31, %v22289_v19  ;;  %v22291_v35 = vld [vmem:[#allocation92_spill] sm:$0xff]  ;;  %v22293_v34 = vld [vmem:[#allocation95_spill] sm:$0xff]  ;;  %v18428_v58 = vadd.f32 %v18311_v3, %v18059_v48 }
 0x7f1   :  { %22280 = vst [vmem:[#allocation106_spill] sm:$0xff] %v18393_v24  ;;  %22282 = vst [vmem:[#allocation104_spill] sm:$0xff] %v18396_v16  ;;  %v18411_v47 = vmul.f32 %v5593_v31, %v22291_v35  ;;  %v18414_v24 = vmul.f32 %v5593_v31, %v22293_v34  ;;  %v18418_v16 = vpop.permute.xlu1 %5823  ;;  %v22297_v52 = vld [vmem:[#allocation98_spill] sm:$0xff]  ;;  %v22299_v40 = vld [vmem:[#allocation101_spill] sm:$0xff]  ;;  %v18432_v19 = vadd.f32 %v18311_v3, %v18062_v18 }
 0x7f2   :  { %22284 = vst [vmem:[#allocation156_spill] sm:$0xff] %v18399_v20  ;;  %22286 = vst [vmem:[#allocation122_spill] sm:$0xff] %v18402_v12  ;;  %v18421_v20 = vmul.f32 %v5593_v31, %v22297_v52  ;;  %v18424_v12 = vmul.f32 %v5593_v31, %v22299_v40  ;;  %v18436_v35 = vadd.f32 %v18311_v3, %v18065_v0  ;;  %v18514_v52 = vpop.permute.xlu0 %5828 }
 0x7f3   :  { %22288 = vst [vmem:[#allocation107_spill] sm:$0xff] %v18405_v43  ;;  %22290 = vst [vmem:[#allocation111_spill] sm:$0xff] %v18408_v63  ;;  %v18440_v34 = vadd.f32 %v18311_v3, %v18068_v30  ;;  %v18444_v31 = vadd.f32 %v18311_v3, %v18071_v49  ;;  %v18448_v48 = vadd.f32 %v18311_v3, %v18074_v36 }
 0x7f4   :  { %22292 = vst [vmem:[#allocation113_spill] sm:$0xff] %v18411_v47  ;;  %22294 = vst [vmem:[#allocation112_spill] sm:$0xff] %v18414_v24  ;;  %v18452_v18 = vadd.f32 %v18311_v3, %v18077_v13  ;;  %v18456_v0 = vadd.f32 %v18311_v3, %v18080_v51  ;;  %v18460_v30 = vadd.f32 %v18311_v3, %v18085_v22 }
 0x7f5   :  { %22295 = vst [vmem:[#allocation110_spill] sm:$0xff] %v18416_v1  ;;  %22296 = vst [vmem:[#allocation9_spill] sm:$0xff] %v18418_v16  ;;  %v18464_v49 = vadd.f32 %v18311_v3, %v18088_v5  ;;  %v18468_v36 = vadd.f32 %v18311_v3, %v18091_v60  ;;  %v18472_v13 = vadd.f32 %v18311_v3, %v18094_v25  ;;  %v22346_v16 = vld [vmem:[#allocation128_spill] sm:$0xff]  ;;  %v22348_v1 = vld [vmem:[#allocation109_spill] sm:$0xff] }
 0x7f6   :  { %22298 = vst [vmem:[#allocation12_spill] sm:$0xff] %v18421_v20  ;;  %22300 = vst [vmem:[#allocation15_spill] sm:$0xff] %v18424_v12  ;;  %v18476_v51 = vadd.f32 %v18311_v3, %v18097_v61  ;;  %v18480_v22 = vadd.f32 %v18311_v3, %v18100_v11  ;;  %v18484_v5 = vadd.f32 %v18311_v3, %v18103_v17  ;;  %v22351_v20 = vld [vmem:[#allocation125_spill] sm:$0xff] }
 0x7f7   :  { %22301 = vst [vmem:[#allocation18_spill] sm:$0xff] %v18428_v58  ;;  %22302 = vst [vmem:[#allocation21_spill] sm:$0xff] %v18436_v35  ;;  %v18488_v60 = vadd.f32 %v18311_v3, %v18106_v28  ;;  %v18492_v25 = vadd.f32 %v18311_v3, %v18109_v14  ;;  %v18496_v61 = vadd.f32 %v18311_v3, %v18112_v21  ;;  %v18516_v21 = vpop.permute.xlu1 %5833  ;;  %v22355_v58 = vld [vmem:[#allocation158_spill] sm:$0xff]  ;;  %v22386_v35 = vld [vmem:[#allocation132_spill] sm:$0xff] }
 0x7f8   :  { %22303 = vst [vmem:[#allocation24_spill] sm:$0xff] %v18440_v34  ;;  %22304 = vst [vmem:[#allocation4_spill] sm:$0xff] %v18444_v31  ;;  %v18500_v11 = vadd.f32 %v18115_v32, %v18311_v3  ;;  %v18504_v17 = vadd.f32 %v18118_v26, %v18311_v3  ;;  %v18508_v28 = vadd.f32 %v18121_v39, %v18311_v3  ;;  %v22377_v31 = vld [vmem:[#allocation162_spill] sm:$0xff] }
 0x7f9   :  { %22305 = vst [vmem:[#allocation7_spill] sm:$0xff] %v18448_v48  ;;  %22306 = vst [vmem:[#allocation27_spill] sm:$0xff] %v18452_v18  ;;  %v18512_v14 = vadd.f32 %v18124_v53, %v18311_v3  ;;  %v18520_v32 = vadd.f32 %v18127_v44, %v18311_v3  ;;  %v18524_v26 = vadd.f32 %v18130_v8, %v18311_v3  ;;  %v5762_v43 = vmax.f32 %v18492_v25, 0.0  ;;  %v22359_v25 = vld [vmem:[#allocation161_spill] sm:$0xff]  ;;  %v22373_v18 = vld [vmem:[#allocation146_spill] sm:$0xff] }
 0x7fa   :  { %22307 = vst [vmem:[#allocation30_spill] sm:$0xff] %v18456_v0  ;;  %22308 = vst [vmem:[#allocation33_spill] sm:$0xff] %v18460_v30  ;;  %v18528_v39 = vadd.f32 %v18133_v27, %v18311_v3  ;;  %v18532_v53 = vadd.f32 %v18136_v42, %v18311_v3  ;;  %v18536_v40 = vadd.f32 %v18139_v62, %v18311_v3  ;;  %v22369_v30 = vld [vmem:[#allocation145_spill] sm:$0xff]  ;;  %v22371_v0 = vld [vmem:[#allocation135_spill] sm:$0xff]  ;;  %v5765_v34 = vmax.f32 %v18496_v61, 0.0 }
 0x7fb   :  { %22309 = vst [vmem:[#allocation36_spill] sm:$0xff] %v18464_v49  ;;  %22310 = vst [vmem:[#allocation39_spill] sm:$0xff] %v18468_v36  ;;  %v18540_v44 = vadd.f32 %v18142_v59, %v18311_v3  ;;  %v18544_v8 = vadd.f32 %v18145_v41, %v18311_v3  ;;  %v18548_v27 = vadd.f32 %v18148_v2, %v18311_v3  ;;  %v22365_v36 = vld [vmem:[#allocation144_spill] sm:$0xff]  ;;  %v22367_v49 = vld [vmem:[#allocation134_spill] sm:$0xff]  ;;  %v22385_v61 = vmax.f32 %v18432_v19, 0.0 }
 0x7fc   :  { %22311 = vst [vmem:[#allocation42_spill] sm:$0xff] %v18472_v13  ;;  %22312 = vst [vmem:[#allocation45_spill] sm:$0xff] %v18476_v51  ;;  %v18552_v42 = vadd.f32 %v18151_v33, %v18311_v3  ;;  %v18556_v62 = vadd.f32 %v18154_v29, %v18311_v3  ;;  %v18560_v59 = vadd.f32 %v18159_v6, %v18311_v3  ;;  %v22362_v51 = vld [vmem:[#allocation142_spill] sm:$0xff]  ;;  %v22363_v13 = vld [vmem:[#allocation133_spill] sm:$0xff] }
 0x7fd   :  { %22313 = vst [vmem:[#allocation48_spill] sm:$0xff] %v18480_v22  ;;  %22314 = vst [vmem:[#allocation51_spill] sm:$0xff] %v18484_v5  ;;  %v18564_v41 = vadd.f32 %v18162_v50, %v18311_v3  ;;  %v18568_v2 = vadd.f32 %v18314_v23, %v18166_v45  ;;  %v18572_v33 = vadd.f32 %v18314_v23, %v18170_v56  ;;  %v18614_v3 = vpop.permute.xlu0 %5838  ;;  %v22360_v5 = vld [vmem:[#allocation130_spill] sm:$0xff]  ;;  %v22361_v22 = vld [vmem:[#allocation131_spill] sm:$0xff] }
 0x7fe   :  { %22315 = vst [vmem:[#allocation54_spill] sm:$0xff] %v18488_v60  ;;  %22316 = vst [vmem:[#allocation57_spill] sm:$0xff] %v18514_v52  ;;  %v18576_v29 = vadd.f32 %v18314_v23, %v18176_v46  ;;  %v18580_v6 = vadd.f32 %v18314_v23, %v18180_v37  ;;  %v18584_v50 = vadd.f32 %v18314_v23, %v18184_v57  ;;  %v22344_v52 = vld [vmem:[#allocation127_spill] sm:$0xff]  ;;  %v22375_v48 = vld [vmem:[#allocation117_spill] sm:$0xff] }
 0x7ff   :  { %22317 = vst [vmem:[#allocation60_spill] sm:$0xff] %v18516_v21  ;;  %22318 = vst [vmem:[#allocation63_spill] sm:$0xff] %v18532_v53  ;;  %v18588_v45 = vadd.f32 %v18314_v23, %v18188_v4  ;;  %v18592_v56 = vadd.f32 %v18314_v23, %v18194_v55  ;;  %v18596_v46 = vadd.f32 %v18314_v23, %v18198_v15  ;;  %v18616_v15 = vpop.permute.xlu1 %5843  ;;  %v22342_v21 = vld [vmem:[#allocation126_spill] sm:$0xff]  ;;  %v22397_v19 = vld [vmem:[#allocation137_spill] sm:$0xff] }
 0x800   :  { %22319 = vst [vmem:[#allocation66_spill] sm:$0xff] %v18536_v40  ;;  %22320 = vst [vmem:[#allocation69_spill] sm:$0xff] %v18540_v44  ;;  %v18600_v37 = vadd.f32 %v18314_v23, %v18202_v9  ;;  %v18604_v57 = vadd.f32 %v18314_v23, %v18206_v54  ;;  %v18608_v4 = vadd.f32 %v18314_v23, %v18210_v7 }
 0x801   :  { %22321 = vst [vmem:[#allocation72_spill] sm:$0xff] %v18544_v8  ;;  %22322 = vst [vmem:[#allocation75_spill] sm:$0xff] %v18548_v27  ;;  %v18612_v55 = vadd.f32 %v18314_v23, %v18214_v38  ;;  %v18620_v9 = vadd.f32 %v18314_v23, %v18218_v10  ;;  %v18624_v54 = vadd.f32 %v18314_v23, %v22342_v21  ;;  %v22350_v21 = vld [vmem:[#allocation114_spill] sm:$0xff]  ;;  %v22426_v27 = vld [vmem:[#allocation111_spill] sm:$0xff] }
 0x802   :  { %22323 = vst [vmem:[#allocation78_spill] sm:$0xff] %v18552_v42  ;;  %22324 = vst [vmem:[#allocation81_spill] sm:$0xff] %v18556_v62  ;;  %v18628_v7 = vadd.f32 %v18314_v23, %v22344_v52  ;;  %v18632_v38 = vadd.f32 %v18314_v23, %v22346_v16  ;;  %v18645_v24 = vrot.slane %v22351_v20, %v22350_v21  ;;  %v18663_v21 = vpop.permute.xlu0 %5848  ;;  %v22356_v52 = vld [vmem:[#allocation159_spill] sm:$0xff]  ;;  %v22357_v16 = vld [vmem:[#allocation160_spill] sm:$0xff] }
 0x803   :  { %22325 = vst [vmem:[#allocation84_spill] sm:$0xff] %v18560_v59  ;;  %22326 = vst [vmem:[#allocation87_spill] sm:$0xff] %v18564_v41  ;;  %v18669_v12 = vadd.f32 %v22355_v58, %v18314_v23  ;;  %v18673_v20 = vadd.f32 %v22356_v52, %v18314_v23  ;;  %v18677_v47 = vadd.f32 %v22357_v16, %v18314_v23  ;;  %v22383_v59 = vld [vmem:[#allocation123_spill] sm:$0xff]  ;;  %v22423_v42 = vld [vmem:[#allocation156_spill] sm:$0xff] }
 0x804   :  { %22327 = vst [vmem:[#allocation90_spill] sm:$0xff] %v18568_v2  ;;  %22328 = vst [vmem:[#allocation93_spill] sm:$0xff] %v18572_v33  ;;  %v18685_v60 = vadd.f32 %v22359_v25, %v18314_v23  ;;  %v18689_v58 = vadd.f32 %v22360_v5, %v18314_v23  ;;  %v18693_v52 = vadd.f32 %v22361_v22, %v18314_v23  ;;  %v22419_v33 = vld [vmem:[#allocation155_spill] sm:$0xff]  ;;  %v22427_v8 = vld [vmem:[#allocation113_spill] sm:$0xff] }
 0x805   :  { %22329 = vst [vmem:[#allocation96_spill] sm:$0xff] %v18576_v29  ;;  %22330 = vst [vmem:[#allocation99_spill] sm:$0xff] %v18580_v6  ;;  %v18697_v16 = vadd.f32 %v22362_v51, %v18314_v23  ;;  %v18705_v25 = vadd.f32 %v22365_v36, %v18314_v23  ;;  %v18709_v5 = vadd.f32 %v22367_v49, %v18314_v23 }
 0x806   :  { %22331 = vst [vmem:[#allocation102_spill] sm:$0xff] %v18584_v50  ;;  %22332 = vst [vmem:[#allocation10_spill] sm:$0xff] %v18588_v45  ;;  %v18713_v22 = vadd.f32 %v22369_v30, %v18314_v23  ;;  %v18717_v51 = vadd.f32 %v22371_v0, %v18314_v23  ;;  %v18725_v36 = vadd.f32 %v22375_v48, %v18314_v23  ;;  %v22414_v45 = vld [vmem:[#allocation115_spill] sm:$0xff] }
 0x807   :  { %22333 = vst [vmem:[#allocation13_spill] sm:$0xff] %v18592_v56  ;;  %22334 = vst [vmem:[#allocation16_spill] sm:$0xff] %v18596_v46  ;;  %v18729_v49 = vadd.f32 %v22377_v31, %v18314_v23  ;;  %v22411_v46 = vld [vmem:[#allocation152_spill] sm:$0xff]  ;;  %v22413_v56 = vld [vmem:[#allocation119_spill] sm:$0xff] }
 0x808   :  { %22335 = vst [vmem:[#allocation19_spill] sm:$0xff] %v18600_v37  ;;  %22336 = vst [vmem:[#allocation22_spill] sm:$0xff] %v18604_v57  ;;  %v22407_v57 = vld [vmem:[#allocation108_spill] sm:$0xff]  ;;  %v22409_v37 = vld [vmem:[#allocation141_spill] sm:$0xff] }
 0x809   :  { %22337 = vst [vmem:[#allocation2_spill] sm:$0xff] %v18608_v4  ;;  %22338 = vst [vmem:[#allocation5_spill] sm:$0xff] %v18612_v55  ;;  %v22405_v55 = vld [vmem:[#allocation140_spill] sm:$0xff]  ;;  %v22406_v4 = vld [vmem:[#allocation151_spill] sm:$0xff] }
 0x80a   :  { %22339 = vst [vmem:[#allocation25_spill] sm:$0xff] %v18614_v3  ;;  %22340 = vst [vmem:[#allocation28_spill] sm:$0xff] %v18616_v15  ;;  %v18636_v3 = vadd.f32 %v18314_v23, %v22348_v1  ;;  %v22349_v15 = vld [vmem:[#allocation157_spill] sm:$0xff] }
 0x80b   :  { %22341 = vst [vmem:[#allocation31_spill] sm:$0xff] %v18620_v9  ;;  %22343 = vst [vmem:[#allocation34_spill] sm:$0xff] %v18624_v54  ;;  %v18640_v10 = vadd.f32 %v18314_v23, %v22349_v15  ;;  %v18665_v15 = vpop.permute.xlu1 %5853  ;;  %v22358_v1 = vld [vmem:[#allocation129_spill] sm:$0xff]  ;;  %v22403_v54 = vld [vmem:[#allocation150_spill] sm:$0xff] }
 0x80c   :  { %22345 = vst [vmem:[#allocation37_spill] sm:$0xff] %v18628_v7  ;;  %22347 = vst [vmem:[#allocation40_spill] sm:$0xff] %v18632_v38  ;;  %v18681_v63 = vadd.f32 %v22358_v1, %v18314_v23  ;;  %v18701_v1 = vadd.f32 %v22363_v13, %v18314_v23  ;;  %v18721_v13 = vadd.f32 %v22373_v18, %v18314_v23  ;;  %v5763_v48 = vmax.f32 %v18636_v3, 0.0  ;;  %v22381_v18 = vld [vmem:[#allocation18_spill] sm:$0xff]  ;;  %v22402_v38 = vld [vmem:[#allocation139_spill] sm:$0xff] }
 0x80d   :  { %22352 = vst [vmem:[#allocation43_spill] sm:$0xff] %v18645_v24  ;;  %22353 = vst [vmem:[#allocation46_spill] sm:$0xff] %v18663_v21  ;;  %v18739_v24 = vpop.permute.xlu0 %5858  ;;  %v5766_v30 = vmax.f32 %v18640_v10, 0.0  ;;  %v22404_v9 = vld [vmem:[#allocation105_spill] sm:$0xff] }
 0x80e   :  { %22354 = vst [vmem:[#allocation49_spill] sm:$0xff] %v18665_v15  ;;  %22364 = vst [vmem:[#allocation52_spill] sm:$0xff] %v18701_v1 }
 0x80f   :  { %22366 = vst [vmem:[#allocation55_spill] sm:$0xff] %v18705_v25  ;;  %22368 = vst [vmem:[#allocation58_spill] sm:$0xff] %v18709_v5  ;;  %v18741_v23 = vpop.permute.xlu1 %5863 }
 0x810   :  { %22370 = vst [vmem:[#allocation61_spill] sm:$0xff] %v18713_v22  ;;  %22372 = vst [vmem:[#allocation64_spill] sm:$0xff] %v18717_v51  ;;  %v22425_v51 = vld [vmem:[#allocation107_spill] sm:$0xff]  ;;  %v22428_v22 = vld [vmem:[#allocation112_spill] sm:$0xff] }
 0x811   :  { %22374 = vst [vmem:[#allocation67_spill] sm:$0xff] %v18721_v13  ;;  %22376 = vst [vmem:[#allocation70_spill] sm:$0xff] %v18725_v36  ;;  %v18767_v41 = vpop.permute.xlu0 %5868  ;;  %v22401_v36 = vld [vmem:[#allocation138_spill] sm:$0xff] }
 0x812   :  { %22378 = vst [vmem:[#allocation73_spill] sm:$0xff] %v18729_v49  ;;  %22379 = vst [vmem:[#allocation76_spill] sm:$0xff] %v18739_v24  ;;  %v18782_v24 = vmul.f32 %v22386_v35, %v22385_v61  ;;  %v18785_v0 = vmul.f32 %v18767_v41, %v5762_v43  ;;  %v18792_v10 = vmul.f32 %v18767_v41, %v5763_v48  ;;  %v22395_v48 = vld [vmem:[#allocation118_spill] sm:$0xff]  ;;  %v22398_v43 = vld [vmem:[#allocation148_spill] sm:$0xff] }
 0x813   :  { %22380 = vst [vmem:[#allocation79_spill] sm:$0xff] %v18741_v23  ;;  %v18769_v15 = vpop.permute.xlu1 %5873  ;;  %v22382_v23 = vmax.f32 %v22381_v18, 0.0  ;;  %v22424_v13 = vld [vmem:[#allocation122_spill] sm:$0xff] }
 0x814   :  { %22387 = vst [vmem:[#allocation85_spill] sm:$0xff] %v18782_v24  ;;  %22388 = vst [vmem:[#allocation88_spill] sm:$0xff] %v18785_v0  ;;  %v18788_v7 = vmul.f32 %v18769_v15, %v5765_v34  ;;  %v18795_v18 = vmul.f32 %v18769_v15, %v5766_v30  ;;  %v22392_v0 = vld [vmem:[#allocation136_spill] sm:$0xff]  ;;  %v22393_v21 = vld [vmem:[#allocation43_spill] sm:$0xff] }
 0x815   :  { %v18777_v31 = vmul.f32 %v22383_v59, %v22382_v23  ;;  %22390 = vst [vmem:[#allocation94_spill] sm:$0xff] %v18792_v10  ;;  %v22394_v34 = vld [vmem:[#allocation147_spill] sm:$0xff]  ;;  %v18829_v61 = vadd.f32 %v22393_v21, %v22397_v19  ;;  %v22399_v10 = vld [vmem:[#allocation164_spill] sm:$0xff]  ;;  %v18849_v19 = vadd.f32 %v22393_v21, %v22403_v54  ;;  %v18869_v54 = vadd.f32 %v22393_v21, %v22409_v37  ;;  %v22417_v24 = vld [vmem:[#allocation154_spill] sm:$0xff] }
 0x816   :  { %22389 = vst [vmem:[#allocation91_spill] sm:$0xff] %v18788_v7  ;;  %22391 = vst [vmem:[#allocation97_spill] sm:$0xff] %v18795_v18  ;;  %v18813_v18 = vadd.f32 %v22393_v21, %v22392_v0  ;;  %v18817_v3 = vadd.f32 %v22393_v21, %v22394_v34  ;;  %v18821_v7 = vadd.f32 %v22393_v21, %v22395_v48  ;;  %v22396_v30 = vld [vmem:[#allocation163_spill] sm:$0xff] }
 0x817   :  { %22384 = vst [vmem:[#allocation82_spill] sm:$0xff] %v18777_v31  ;;  %v18825_v23 = vadd.f32 %v22393_v21, %v22396_v30  ;;  %v18833_v0 = vadd.f32 %v22393_v21, %v22398_v43  ;;  %v18837_v34 = vadd.f32 %v22393_v21, %v22399_v10  ;;  %v18841_v48 = vadd.f32 %v22393_v21, %v22401_v36  ;;  %v22418_v31 = vld [vmem:[#allocation120_spill] sm:$0xff] }
 0x818   :  { %v18845_v30 = vadd.f32 %v22393_v21, %v22402_v38  ;;  %v18853_v43 = vadd.f32 %v22393_v21, %v22404_v9  ;;  %v18857_v10 = vadd.f32 %v22393_v21, %v22405_v55  ;;  %v18861_v36 = vadd.f32 %v22393_v21, %v22406_v4  ;;  %22410 = vst [vmem:[#allocation8_spill] sm:$0xff] %v18869_v54  ;;  %v22415_v4 = vld [vmem:[#allocation153_spill] sm:$0xff] }
 0x819   :  { %22400 = vst [vmem:[#allocation100_spill] sm:$0xff] %v18837_v34  ;;  %v18865_v38 = vadd.f32 %v22393_v21, %v22407_v57  ;;  %v18873_v9 = vadd.f32 %v22393_v21, %v22411_v46  ;;  %v5710_v55 = vadd.f32 %v22393_v21, %v22413_v56  ;;  %v5713_v50 = vadd.f32 %v22393_v21, %v22414_v45  ;;  %v22416_v57 = vld [vmem:[#allocation116_spill] sm:$0xff]  ;;  %v22420_v45 = vld [vmem:[#allocation121_spill] sm:$0xff] }
 0x81a   :  { %v5980_v6 = vadd.f32 %v22415_v4, %v22393_v21  ;;  %v5983_v29 = vadd.f32 %v22416_v57, %v22393_v21  ;;  %v18885_v37 = vadd.f32 %v22417_v24, %v22393_v21  ;;  %v18889_v46 = vadd.f32 %v22418_v31, %v22393_v21  ;;  %v22421_v4 = vld [vmem:[#allocation106_spill] sm:$0xff]  ;;  %v22422_v57 = vld [vmem:[#allocation104_spill] sm:$0xff] }
 0x81b   :  { %22408 = vst [vmem:[#allocation103_spill] sm:$0xff] %v18865_v38  ;;  %22412 = vst [vmem:[#allocation11_spill] sm:$0xff] %v18873_v9  ;;  %v18893_v56 = vadd.f32 %v22419_v33, %v22393_v21  ;;  %v18897_v2 = vadd.f32 %v22420_v45, %v22393_v21  ;;  %v18901_v62 = vadd.f32 %v22421_v4, %v22393_v21  ;;  %v5719_v25 = vmax.f32 %v18817_v3, 0.0 }
 0x81c   :  { %v18905_v24 = vadd.f32 %v22422_v57, %v22393_v21  ;;  %v18909_v31 = vadd.f32 %v22423_v42, %v22393_v21  ;;  %v18913_v33 = vadd.f32 %v22424_v13, %v22393_v21  ;;  %v18917_v45 = vadd.f32 %v22425_v51, %v22393_v21  ;;  %v22429_v13 = vld [vmem:[#allocation12_spill] sm:$0xff]  ;;  %v22431_v51 = vld [vmem:[#allocation15_spill] sm:$0xff] }
 0x81d   :  { %v18921_v4 = vadd.f32 %v22426_v27, %v22393_v21  ;;  %v18925_v57 = vadd.f32 %v22427_v8, %v22393_v21  ;;  %v18929_v42 = vadd.f32 %v22428_v22, %v22393_v21  ;;  %v18934_v44 = vadd.f32 %v22429_v13, %v22393_v21 }
 0x81e   :  { %v18938_v40 = vadd.f32 %v22431_v51, %v22393_v21  ;;  %v5716_v27 = vmax.f32 %v18813_v18, 0.0  ;;  %v5764_v8 = vmax.f32 %v5710_v55, 0.0  ;;  %v5767_v49 = vmax.f32 %v5713_v50, 0.0  ;;  %v22445_v50 = vld [vmem:[#allocation143_spill] sm:$0xff] }
 0x81f   :  { %22430 = vst [vmem:[#allocation14_spill] sm:$0xff] %v18934_v44  ;;  %v6028_v34 = vmax.f32 %v5980_v6, 0.0  ;;  %v6031_v13 = vmax.f32 %v5983_v29, 0.0  ;;  %v18973_v51 = vmul.f32 %v22386_v35, %v5719_v25  ;;  %v22439_v18 = vmax.f32 %v18669_v12, 0.0  ;;  %v22449_v12 = vld [vmem:[#allocation149_spill] sm:$0xff] }
 0x820   :  { %22432 = vst [vmem:[#allocation17_spill] sm:$0xff] %v18938_v40  ;;  %v18970_v3 = vmul.f32 %v22383_v59, %v5716_v27  ;;  %v18976_v22 = vmul.f32 %v18767_v41, %v5764_v8  ;;  %v18979_v5 = vmul.f32 %v18769_v15, %v5767_v49  ;;  %v22440_v25 = vmax.f32 %v18673_v20, 0.0  ;;  %v13849_v20 = vld [vmem:[%s22133_s7 + $0x220] ss:$8 sps:$4 sm:$0xff]  }
 0x821   :  { %22434 = vst [vmem:[#allocation23_spill] sm:$0xff] %v18973_v51  ;;  %v18982_v29 = vmul.f32 %v6028_v34, %v22383_v59  ;;  %v18985_v6 = vmul.f32 %v6031_v13, %v22386_v35  ;;  %v6075_v27 = vmul.f32 %v22439_v18, %v22383_v59  ;;  %v22441_v49 = vmax.f32 %v18500_v11, 0.0 }
 0x822   :  { %22433 = vst [vmem:[#allocation20_spill] sm:$0xff] %v18970_v3  ;;  %22435 = vst [vmem:[#allocation3_spill] sm:$0xff] %v18976_v22  ;;  %v6078_v55 = vmul.f32 %v22440_v25, %v22386_v35  ;;  %v22442_v8 = vmax.f32 %v18504_v17, 0.0  ;;  %v22443_v25 = vld [vmem:[#allocation124_spill] sm:$0xff]  ;;  %v22444_v41 = vmax.f32 %v18677_v47, 0.0  ;;  %v22446_v11 = vmax.f32 %v18681_v63, 0.0 }
 0x823   :  { %22436 = vst [vmem:[#allocation6_spill] sm:$0xff] %v18979_v5  ;;  %22437 = vst [vmem:[#allocation26_spill] sm:$0xff] %v18982_v29  ;;  %v6074_v34 = vmul.f32 %v22441_v49, %v22383_v59  ;;  %v22447_v17 = vmax.f32 %v18508_v28, 0.0  ;;  %v22450_v21 = vmax.f32 %v18685_v60, 0.0  ;;  %v13854_v47 = vld [vmem:[%s22133_s7 + $0x234] ss:$8 sps:$4 sm:$0xff]  }
 0x824   :  { %22438 = vst [vmem:[#allocation29_spill] sm:$0xff] %v18985_v6  ;;  %v6077_v13 = vmul.f32 %v22442_v8, %v22386_v35  ;;  %v6150_v18 = vpack.c.bf16 %v6078_v55, %v6075_v27  ;;  %v6081_v15 = vmul.f32 %v22444_v41, %v22443_v25  ;;  %v6084_v49 = vmul.f32 %v22446_v11, %v22445_v50  ;;  %v22452_v41 = vld [vmem:[#allocation165_spill] sm:$0xff]  ;;  %v22478_v5 = vld [vmem:[#allocation58_spill] sm:$0xff] }
 0x825   :  { %v6080_v8 = vmul.f32 %v22447_v17, %v22443_v25  ;;  %v22448_v55 = vmax.f32 %v18512_v14, 0.0  ;;  %v6087_v53 = vmul.f32 %v22450_v21, %v22449_v12  ;;  %v22455_v11 = vmax.f32 %v18524_v26, 0.0  ;;  %v22457_v17 = vld [vmem:[#allocation110_spill] sm:$0xff] }
 0x826   :  { %v6149_v1 = vpack.c.bf16 %v6077_v13, %v6074_v34  ;;  %6479 = vmatprep.mubr.bf16.mxu1 %v6150_v18  ;;  %v19026_v63 = vpack.c.bf16 %v6084_v49, %v6081_v15  ;;  %v22453_v34 = vmax.f32 %v18689_v58, 0.0  ;;  %v22454_v13 = vmax.f32 %v18520_v32, 0.0  ;;  %v22459_v49 = vld [vmem:[#allocation9_spill] sm:$0xff] }
 0x827   :  { %v6083_v27 = vmul.f32 %v22448_v55, %v22445_v50  ;;  %v6089_v60 = vmul.f32 %v22455_v11, %v22452_v41  ;;  %v22458_v18 = vmax.f32 %v18693_v52, 0.0  ;;  %v22460_v55 = vmax.f32 %v18697_v16, 0.0  ;;  %v22464_v52 = vld [vmem:[#allocation63_spill] sm:$0xff]  ;;  %v13852_v16 = vld [vmem:[%s22133_s7 + $0x230] ss:$8 sps:$4 sm:$0xff]  }
 0x828   :  { %22451 = vst [vmem:[#allocation32_spill] sm:$0xff] %v19026_v63  ;;  %v6090_v28 = vmul.f32 %v22453_v34, %v22452_v41  ;;  %v6086_v14 = vmul.f32 %v22454_v13, %v22449_v12  ;;  %6480 = vmatmul.mubr.bf16.vlgmr.msra.gmra.mrb[88].mxu1 %v6149_v1  ;;  %v22461_v34 = vmax.f32 %v18528_v39, 0.0  ;;  %v22467_v39 = vld [vmem:[#allocation57_spill] sm:$0xff]  ;;  %v22470_v13 = vld [vmem:[#allocation60_spill] sm:$0xff] }
 0x829   :  { %v19037_v21 = vpack.c.bf16 %v6083_v27, %v6080_v8  ;;  %v6093_v15 = vmul.f32 %v22458_v18, %v22457_v17  ;;  %v6096_v58 = vmul.f32 %v22460_v55, %v22459_v49  ;;  %6489 = vmatprep.mubr.bf16.mxu1 %v19026_v63  ;;  %6551 = vmatpush1.bf16.msra.mxu1 %v13849_v20  ;;  %v22465_v8 = vmax.f32 %v22464_v52, 0.0  ;;  %v22468_v18 = vld [vmem:[#allocation52_spill] sm:$0xff]  ;;  %v22471_v20 = vld [vmem:[#allocation55_spill] sm:$0xff] }
 0x82a   :  { %v6092_v32 = vmul.f32 %v22461_v34, %v22457_v17  ;;  %v19050_v26 = vpack.c.bf16 %v6090_v28, %v6087_v53  ;;  %v19052_v1 = vpack.c.bf16 %v6089_v60, %v6086_v14  ;;  %v22469_v55 = vmax.f32 %v22468_v18, 0.0  ;;  %6552 = vmatprep.subr.bf16.mxu1 %v13854_v47  ;;  %v22473_v14 = vld [vmem:[#allocation66_spill] sm:$0xff]  ;;  %v22481_v47 = vld [vmem:[#allocation61_spill] sm:$0xff] }
 0x82b   :  { %22456 = vst [vmem:[#allocation35_spill] sm:$0xff] %v19037_v21  ;;  %v6095_v27 = vmul.f32 %v22465_v8, %v22459_v49  ;;  %v19060_v11 = vpack.c.bf16 %v6096_v58, %v6093_v15  ;;  %v22472_v53 = vmax.f32 %v22471_v20, 0.0  ;;  %v22474_v60 = vmax.f32 %v22473_v14, 0.0  ;;  %v13857_v8 = vld [vmem:[%s22133_s7 + $0x4] ss:$8 sps:$4 sm:$0xff]   ;;  %v22475_v15 = vld [vmem:[#allocation69_spill] sm:$0xff] }
 0x82c   :  { %22462 = vst [vmem:[#allocation38_spill] sm:$0xff] %v19050_v26  ;;  %22463 = vst [vmem:[#allocation41_spill] sm:$0xff] %v19052_v1  ;;  %v6099_v34 = vmul.f32 %v22469_v55, %v22467_v39  ;;  %v22476_v58 = vmax.f32 %v22475_v15, 0.0  ;;  %v22477_v55 = vld [vmem:[#allocation25_spill] sm:$0xff]  ;;  %v22479_v63 = vmax.f32 %v22478_v5, 0.0  ;;  %v22482_v3 = vmax.f32 %v22481_v47, 0.0 }
 0x82d   :  { %22466 = vst [vmem:[#allocation44_spill] sm:$0xff] %v19060_v11  ;;  %v6102_v28 = vmul.f32 %v22472_v53, %v22470_v13  ;;  %v6098_v52 = vmul.f32 %v22474_v60, %v22467_v39  ;;  %v19074_v22 = vpack.c.bf16 %v6095_v27, %v6092_v32  ;;  %v22480_v53 = vld [vmem:[#allocation28_spill] sm:$0xff]  ;;  %v22485_v32 = vld [vmem:[#allocation75_spill] sm:$0xff]  ;;  %v22487_v15 = vld [vmem:[#allocation46_spill] sm:$0xff]  ;;  %6553 = vmatpush1.bf16.msra.mxu1 %v13852_v16  ;;  %v22498_v16 = vmax.f32 %v18889_v46, 0.0 }
 0x82e   :  { %v6101_v18 = vmul.f32 %v22476_v58, %v22470_v13  ;;  %v6105_v20 = vmul.f32 %v22479_v63, %v22477_v55  ;;  %v6108_v51 = vmul.f32 %v22482_v3, %v22480_v53  ;;  %v22483_v60 = vld [vmem:[#allocation72_spill] sm:$0xff]  ;;  %v22486_v27 = vmax.f32 %v22485_v32, 0.0  ;;  %v22490_v3 = vld [vmem:[#allocation49_spill] sm:$0xff]  ;;  %6854 = vmatprep.subr.bf16.mxu1 %v13857_v8 }
 0x82f   :  { %v19085_v14 = vpack.c.bf16 %v6102_v28, %v6099_v34  ;;  %v22484_v29 = vmax.f32 %v22483_v60, 0.0  ;;  %v22488_v58 = vld [vmem:[#allocation64_spill] sm:$0xff]  ;;  %v22491_v34 = vld [vmem:[#allocation67_spill] sm:$0xff]  ;;  %v22493_v60 = vld [vmem:[#allocation78_spill] sm:$0xff]  ;;  %v22501_v8 = vmax.f32 %v18901_v62, 0.0  ;;  %v22504_v62 = vmax.f32 %v18913_v33, 0.0 }
 0x830   :  { %v6107_v40 = vmul.f32 %v22486_v27, %v22480_v53  ;;  %v22489_v44 = vmax.f32 %v22488_v58, 0.0  ;;  %v19096_v5 = vpack.c.bf16 %v6101_v18, %v6098_v52  ;;  %v19098_v63 = vpack.c.bf16 %v6108_v51, %v6105_v20  ;;  %v22495_v32 = vld [vmem:[#allocation81_spill] sm:$0xff]  ;;  %6490 = vmatmul.mubr.bf16.gmra.mrb[92].mxu1 %v19037_v21  ;;  %v22509_v33 = vld [vmem:[#allocation90_spill] sm:$0xff] }
 0x831   :  { %v6104_v6 = vmul.f32 %v22484_v29, %v22477_v55  ;;  %v22492_v28 = vmax.f32 %v22491_v34, 0.0  ;;  %v22494_v29 = vmax.f32 %v22493_v60, 0.0  ;;  %v22496_v27 = vmax.f32 %v22495_v32, 0.0  ;;  %6499 = vmatprep.mubr.bf16.mxu1 %v19050_v26 }
 0x832   :  { %v6111_v9 = vmul.f32 %v22489_v44, %v22487_v15  ;;  %v22497_v44 = vmax.f32 %v18885_v37, 0.0  ;;  %v6085_v52 = vmul.f32 %v22498_v16, %v22445_v50  ;;  %v22499_v20 = vmax.f32 %v18893_v56, 0.0 }
 0x833   :  { %v6114_v47 = vmul.f32 %v22492_v28, %v22490_v3  ;;  %v6110_v54 = vmul.f32 %v22494_v29, %v22487_v15  ;;  %v19106_v38 = vpack.c.bf16 %v6107_v40, %v6104_v6  ;;  %v6113_v58 = vmul.f32 %v22496_v27, %v22490_v3 }
 0x834   :  { %v6082_v51 = vmul.f32 %v22497_v44, %v22443_v25  ;;  %v6088_v40 = vmul.f32 %v22499_v20, %v22449_v12  ;;  %v22500_v6 = vmax.f32 %v18897_v2, 0.0  ;;  %v6094_v28 = vmul.f32 %v22501_v8, %v22457_v17  ;;  %v22514_v8 = vld [vmem:[#allocation85_spill] sm:$0xff] }
 0x835   :  { %v19117_v18 = vpack.c.bf16 %v6114_v47, %v6111_v9  ;;  %v19129_v37 = vpack.c.bf16 %v6113_v58, %v6110_v54  ;;  %v22502_v9 = vmax.f32 %v18905_v24, 0.0  ;;  %v22503_v56 = vmax.f32 %v18909_v31, 0.0 }
 0x836   :  { %v6091_v34 = vmul.f32 %v22500_v6, %v22452_v41  ;;  %v19131_v46 = vpack.c.bf16 %v6085_v52, %v6082_v51  ;;  %v6103_v29 = vmul.f32 %v22504_v62, %v22470_v13  ;;  %v22505_v54 = vmax.f32 %v18917_v45, 0.0 }
 0x837   :  { %v6097_v47 = vmul.f32 %v22502_v9, %v22459_v49  ;;  %v6100_v60 = vmul.f32 %v22503_v56, %v22467_v39  ;;  %v22506_v24 = vmax.f32 %v18921_v4, 0.0  ;;  %v22507_v31 = vmax.f32 %v18925_v57, 0.0  ;;  %v22511_v4 = vld [vmem:[#allocation93_spill] sm:$0xff]  ;;  %v22513_v57 = vld [vmem:[#allocation82_spill] sm:$0xff] }
 0x838   :  { %v19140_v2 = vpack.c.bf16 %v6091_v34, %v6088_v40  ;;  %v6106_v32 = vmul.f32 %v22505_v54, %v22477_v55  ;;  %v22508_v51 = vmax.f32 %v18929_v42, 0.0  ;;  %v22510_v52 = vmax.f32 %v22509_v33, 0.0  ;;  %v22515_v42 = vld [vmem:[#allocation96_spill] sm:$0xff]  ;;  %v22525_v33 = vld [vmem:[#allocation10_spill] sm:$0xff]  ;;  %6500 = vmatmul.mubr.bf16.gmra.mrb[96].mxu1 %v19052_v1 }
 0x839   :  { %v6109_v27 = vmul.f32 %v22506_v24, %v22480_v53  ;;  %v19151_v58 = vpack.c.bf16 %v6097_v47, %v6094_v28  ;;  %v6112_v44 = vmul.f32 %v22507_v31, %v22487_v15  ;;  %v19164_v45 = vpack.c.bf16 %v6103_v29, %v6100_v60  ;;  %v22519_v29 = vld [vmem:[#allocation21_spill] sm:$0xff]  ;;  %v22521_v24 = vld [vmem:[#allocation24_spill] sm:$0xff]  ;;  %6509 = vmatprep.mubr.bf16.mxu1 %v19060_v11  ;;  %v22548_v1 = vld [vmem:[#allocation2_spill] sm:$0xff] }
 0x83a   :  { %v6115_v16 = vmul.f32 %v22508_v51, %v22490_v3  ;;  %v19162_v20 = vmul.f32 %v22383_v59, %v22510_v52  ;;  %v22512_v6 = vmax.f32 %v22511_v4, 0.0  ;;  %v22516_v47 = vmax.f32 %v22515_v42, 0.0  ;;  %v22517_v59 = vld [vmem:[#allocation99_spill] sm:$0xff]  ;;  %v22527_v42 = vld [vmem:[#allocation4_spill] sm:$0xff] }
 0x83b   :  { %v19166_v40 = vpack.c.bf16 %v6109_v27, %v6106_v32  ;;  %v22518_v62 = vmax.f32 %v22517_v59, 0.0  ;;  %v22520_v54 = vmax.f32 %v22519_v29, 0.0  ;;  %v22522_v27 = vmax.f32 %v22521_v24, 0.0  ;;  %v22531_v24 = vld [vmem:[#allocation13_spill] sm:$0xff] }
 0x83c   :  { %v19171_v34 = vmul.f32 %v22386_v35, %v22512_v6  ;;  %v19175_v9 = vpack.c.bf16 %v6115_v16, %v6112_v44  ;;  %v5883_v56 = vmul.f32 %v22443_v25, %v22516_v47  ;;  %v22523_v44 = vld [vmem:[#allocation102_spill] sm:$0xff]  ;;  %v22526_v52 = vmax.f32 %v22525_v33, 0.0  ;;  %v22533_v33 = vld [vmem:[#allocation16_spill] sm:$0xff] }
 0x83d   :  { %v5886_v60 = vmul.f32 %v22445_v50, %v22518_v62  ;;  %v5882_v32 = vmul.f32 %v22443_v25, %v22520_v54  ;;  %v5885_v31 = vmul.f32 %v22445_v50, %v22522_v27  ;;  %v22524_v51 = vmax.f32 %v22523_v44, 0.0  ;;  %v22529_v62 = vld [vmem:[#allocation7_spill] sm:$0xff] }
 0x83e   :  { %v5892_v4 = vmul.f32 %v22452_v41, %v22526_v52  ;;  %v22528_v47 = vmax.f32 %v22527_v42, 0.0  ;;  %v22530_v29 = vmax.f32 %v22529_v62, 0.0  ;;  %v22532_v27 = vmax.f32 %v22531_v24, 0.0 }
 0x83f   :  { %v5889_v16 = vmul.f32 %v22449_v12, %v22524_v51  ;;  %v19197_v6 = vpack.c.bf16 %v5886_v60, %v5883_v56  ;;  %v19208_v28 = vpack.c.bf16 %v5885_v31, %v5882_v32  ;;  %v22534_v52 = vmax.f32 %v22533_v33, 0.0  ;;  %v22535_v60 = vld [vmem:[#allocation27_spill] sm:$0xff] }
 0x840   :  { %v5888_v59 = vmul.f32 %v22449_v12, %v22528_v47  ;;  %v5891_v54 = vmul.f32 %v22452_v41, %v22530_v29  ;;  %v5895_v44 = vmul.f32 %v22457_v17, %v22532_v27  ;;  %v22536_v42 = vmax.f32 %v22535_v60, 0.0  ;;  %v22537_v29 = vld [vmem:[#allocation30_spill] sm:$0xff]  ;;  %v22539_v32 = vld [vmem:[#allocation19_spill] sm:$0xff]  ;;  %6510 = vmatmul.mubr.bf16.gmra.mrb[100].mxu1 %v19074_v22 }
 0x841   :  { %v19210_v51 = vpack.c.bf16 %v5892_v4, %v5889_v16  ;;  %v5898_v56 = vmul.f32 %v22459_v49, %v22534_v52  ;;  %v22538_v24 = vmax.f32 %v22537_v29, 0.0  ;;  %v22540_v31 = vmax.f32 %v22539_v32, 0.0  ;;  %v22541_v4 = vld [vmem:[#allocation22_spill] sm:$0xff]  ;;  %6519 = vmatprep.mubr.bf16.mxu1 %v19085_v14 }
 0x842   :  { %v5894_v47 = vmul.f32 %v22457_v17, %v22536_v42  ;;  %v19219_v62 = vpack.c.bf16 %v5891_v54, %v5888_v59  ;;  %v22542_v33 = vmax.f32 %v22541_v4, 0.0  ;;  %v22544_v42 = vld [vmem:[#allocation33_spill] sm:$0xff]  ;;  %v22546_v54 = vld [vmem:[#allocation36_spill] sm:$0xff]  ;;  %v22549_v32 = vmax.f32 %v22548_v1, 0.0 }
 0x843   :  { %v5897_v27 = vmul.f32 %v22459_v49, %v22538_v24  ;;  %v5901_v16 = vmul.f32 %v22467_v39, %v22540_v31  ;;  %v19231_v60 = vpack.c.bf16 %v5898_v56, %v5895_v44  ;;  %v22545_v35 = vmax.f32 %v22544_v42, 0.0  ;;  %v22552_v56 = vld [vmem:[#allocation39_spill] sm:$0xff] }
 0x844   :  { %v5904_v52 = vmul.f32 %v22470_v13, %v22542_v33  ;;  %v22547_v29 = vmax.f32 %v22546_v54, 0.0  ;;  %v5907_v31 = vmul.f32 %v22477_v55, %v22549_v32  ;;  %v22550_v33 = vld [vmem:[#allocation5_spill] sm:$0xff]  ;;  %v22553_v42 = vmax.f32 %v22552_v56, 0.0  ;;  %v22555_v54 = vld [vmem:[#allocation42_spill] sm:$0xff] }
 0x845   :  { %22543 = vst [vmem:[#allocation47_spill] sm:$0xff] %v19231_v60  ;;  %v5900_v59 = vmul.f32 %v22467_v39, %v22545_v35  ;;  %v19242_v26 = vpack.c.bf16 %v5897_v27, %v5894_v47  ;;  %v22551_v11 = vmax.f32 %v22550_v33, 0.0  ;;  %v22557_v60 = vld [vmem:[#allocation31_spill] sm:$0xff]  ;;  %v22559_v27 = vld [vmem:[#allocation34_spill] sm:$0xff] }
 0x846   :  { %v5903_v24 = vmul.f32 %v22470_v13, %v22547_v29  ;;  %v19244_v4 = vpack.c.bf16 %v5904_v52, %v5901_v16  ;;  %v5906_v35 = vmul.f32 %v22477_v55, %v22553_v42  ;;  %v22556_v29 = vmax.f32 %v22555_v54, 0.0 }
 0x847   :  { %v5910_v44 = vmul.f32 %v22480_v53, %v22551_v11  ;;  %v22558_v32 = vmax.f32 %v22557_v60, 0.0  ;;  %v22560_v16 = vmax.f32 %v22559_v27, 0.0  ;;  %v22561_v11 = vld [vmem:[#allocation45_spill] sm:$0xff]  ;;  %v22566_v27 = vmax.f32 %v18825_v23, 0.0 }
 0x848   :  { %v19252_v21 = vpack.c.bf16 %v5903_v24, %v5900_v59  ;;  %v5909_v1 = vmul.f32 %v22480_v53, %v22556_v29  ;;  %v22562_v56 = vmax.f32 %v22561_v11, 0.0  ;;  %v22563_v59 = vld [vmem:[#allocation48_spill] sm:$0xff]  ;;  %v22565_v29 = vmax.f32 %v18821_v7, 0.0  ;;  %6520 = vmatmul.mubr.bf16.gmra.mrb[104].mxu1 %v19096_v5 }
 0x849   :  { %v5913_v47 = vmul.f32 %v22487_v15, %v22558_v32  ;;  %v5916_v52 = vmul.f32 %v22490_v3, %v22560_v16  ;;  %v19263_v33 = vpack.c.bf16 %v5910_v44, %v5907_v31  ;;  %v22564_v24 = vmax.f32 %v22563_v59, 0.0  ;;  %v22569_v59 = vld [vmem:[#allocation100_spill] sm:$0xff]  ;;  %6529 = vmatprep.mubr.bf16.mxu1 %v19098_v63 }
 0x84a   :  { %22554 = vst [vmem:[#allocation50_spill] sm:$0xff] %v19252_v21  ;;  %v5912_v42 = vmul.f32 %v22487_v15, %v22562_v56  ;;  %v5884_v60 = vmul.f32 %v22443_v25, %v22565_v29  ;;  %v19274_v21 = vpack.c.bf16 %v5909_v1, %v5906_v35  ;;  %v5887_v31 = vmul.f32 %v22445_v50, %v22566_v27  ;;  %v22581_v29 = vld [vmem:[#allocation76_spill] sm:$0xff] }
 0x84b   :  { %v5915_v54 = vmul.f32 %v22490_v3, %v22564_v24  ;;  %v19276_v32 = vpack.c.bf16 %v5916_v52, %v5913_v47  ;;  %v22567_v44 = vmax.f32 %v18829_v61, 0.0  ;;  %v22568_v56 = vmax.f32 %v18833_v0, 0.0  ;;  %v22579_v24 = vld [vmem:[#allocation37_spill] sm:$0xff]  ;;  %v22582_v27 = vld [vmem:[#allocation40_spill] sm:$0xff] }
 0x84c   :  { %v22570_v25 = vmax.f32 %v22569_v59, 0.0  ;;  %v22571_v1 = vmax.f32 %v18841_v48, 0.0  ;;  %v19295_v47 = vpack.c.bf16 %v5887_v31, %v5884_v60  ;;  %v22572_v61 = vmax.f32 %v18845_v30, 0.0  ;;  %v22584_v31 = vld [vmem:[#allocation79_spill] sm:$0xff] }
 0x84d   :  { %v5890_v16 = vmul.f32 %v22449_v12, %v22567_v44  ;;  %v19284_v11 = vpack.c.bf16 %v5915_v54, %v5912_v42  ;;  %v5893_v7 = vmul.f32 %v22452_v41, %v22568_v56  ;;  %v22573_v12 = vmax.f32 %v18849_v19, 0.0  ;;  %v22587_v56 = vld [vmem:[#allocation54_spill] sm:$0xff] }
 0x84e   :  { %v5896_v35 = vmul.f32 %v22457_v17, %v22570_v25  ;;  %v5899_v23 = vmul.f32 %v22459_v49, %v22571_v1  ;;  %v5902_v50 = vmul.f32 %v22467_v39, %v22572_v61  ;;  %v22574_v41 = vmax.f32 %v18853_v43, 0.0  ;;  %v22577_v43 = vld [vmem:[#allocation103_spill] sm:$0xff]  ;;  %v22589_v25 = vld [vmem:[#allocation8_spill] sm:$0xff] }
 0x84f   :  { %v5905_v0 = vmul.f32 %v22470_v13, %v22573_v12  ;;  %v19307_v17 = vpack.c.bf16 %v5893_v7, %v5890_v16  ;;  %v22575_v49 = vmax.f32 %v18857_v10, 0.0  ;;  %v22576_v39 = vmax.f32 %v18861_v36, 0.0  ;;  %v22585_v36 = vld [vmem:[#allocation51_spill] sm:$0xff] }
 0x850   :  { %v5908_v52 = vmul.f32 %v22477_v55, %v22574_v41  ;;  %v19309_v48 = vpack.c.bf16 %v5899_v23, %v5896_v35  ;;  %v22578_v55 = vmax.f32 %v22577_v43, 0.0  ;;  %v22580_v54 = vmax.f32 %v22579_v24, 0.0  ;;  %v22591_v61 = vld [vmem:[#allocation11_spill] sm:$0xff]  ;;  %6530 = vmatmul.mubr.bf16.gmra.mrb[108].mxu1 %v19106_v38 }
 0x851   :  { %v5911_v30 = vmul.f32 %v22480_v53, %v22575_v49  ;;  %v5914_v19 = vmul.f32 %v22487_v15, %v22576_v39  ;;  %v19318_v13 = vpack.c.bf16 %v5905_v0, %v5902_v50  ;;  %v22583_v10 = vmax.f32 %v22582_v27, 0.0  ;;  %v22593_v0 = vld [vmem:[#allocation70_spill] sm:$0xff]  ;;  %v22599_v24 = vld [vmem:[#allocation87_spill] sm:$0xff]  ;;  %6539 = vmatprep.mubr.bf16.mxu1 %v19117_v18 }
 0x852   :  { %v5917_v42 = vmul.f32 %v22490_v3, %v22578_v55  ;;  %v5919_v60 = vmul.f32 %v22581_v29, %v22580_v54  ;;  %v22586_v15 = vmax.f32 %v22585_v36, 0.0  ;;  %v22588_v7 = vmax.f32 %v22587_v56, 0.0 }
 0x853   :  { %v5922_v53 = vmul.f32 %v22584_v31, %v22583_v10  ;;  %v19329_v44 = vpack.c.bf16 %v5911_v30, %v5908_v52  ;;  %v22590_v3 = vmax.f32 %v22589_v25, 0.0  ;;  %v22592_v50 = vmax.f32 %v22591_v61, 0.0  ;;  %v22595_v30 = vld [vmem:[#allocation73_spill] sm:$0xff]  ;;  %v22601_v10 = vld [vmem:[#allocation14_spill] sm:$0xff]  ;;  %v22607_v61 = vld [vmem:[#allocation88_spill] sm:$0xff] }
 0x854   :  { %v5918_v16 = vmul.f32 %v22581_v29, %v22586_v15  ;;  %v5921_v59 = vmul.f32 %v22584_v31, %v22588_v7  ;;  %v19340_v1 = vpack.c.bf16 %v5917_v42, %v5914_v19  ;;  %v22594_v41 = vmax.f32 %v22593_v0, 0.0  ;;  %v22597_v19 = vld [vmem:[#allocation84_spill] sm:$0xff]  ;;  %v22603_v15 = vld [vmem:[#allocation17_spill] sm:$0xff]  ;;  %v22605_v7 = vld [vmem:[#allocation94_spill] sm:$0xff] }
 0x855   :  { %v5920_v35 = vmul.f32 %v22581_v29, %v22590_v3  ;;  %v19342_v23 = vpack.c.bf16 %v5922_v53, %v5919_v60  ;;  %v5923_v12 = vmul.f32 %v22584_v31, %v22592_v50  ;;  %v22596_v39 = vmax.f32 %v22595_v30, 0.0  ;;  %v22608_v50 = vld [vmem:[#allocation91_spill] sm:$0xff]  ;;  %v22610_v30 = vld [vmem:[#allocation29_spill] sm:$0xff] }
 0x856   :  { %v19350_v52 = vmul.f32 %v22594_v41, %v22581_v29  ;;  %v19352_v49 = vpack.c.bf16 %v5921_v59, %v5918_v16  ;;  %v22598_v55 = vmax.f32 %v22597_v19, 0.0  ;;  %v22600_v54 = vmax.f32 %v22599_v24, 0.0  ;;  %v22606_v59 = vld [vmem:[#allocation97_spill] sm:$0xff]  ;;  %v13855_v0 = vld [vmem:[%s22133_s7] ss:$8 sps:$4 sm:$0xff]  }
 0x857   :  { %v19357_v43 = vmul.f32 %v22596_v39, %v22584_v31  ;;  %v19369_v27 = vpack.c.bf16 %v5923_v12, %v5920_v35  ;;  %v22602_v53 = vmax.f32 %v22601_v10, 0.0  ;;  %v22604_v16 = vmax.f32 %v22603_v15, 0.0  ;;  %v13860_v41 = vld [vmem:[%s22133_s7 + $0x14] ss:$8 sps:$4 sm:$0xff]   ;;  %v22611_v39 = vld [vmem:[#allocation26_spill] sm:$0xff] }
 0x858   :  { %v19362_v42 = vmul.f32 %v22598_v55, %v22581_v29  ;;  %v19367_v60 = vmul.f32 %v22600_v54, %v22584_v31  ;;  %v6147_v25 = vpack.c.bf16 %v22606_v59, %v22605_v7  ;;  %v6146_v12 = vpack.c.bf16 %v22608_v50, %v22607_v61  ;;  %6540 = vmatmul.mubr.bf16.gmra.mrb[112].mxu1 %v19129_v37  ;;  %v13858_v55 = vld [vmem:[%s22133_s7 + $0x10] ss:$8 sps:$4 sm:$0xff]   ;;  %v13863_v24 = vld [vmem:[%s22133_s7 + $0x24] ss:$8 sps:$4 sm:$0xff]   ;;  %v13861_v54 = vld [vmem:[%s22133_s7 + $0x20] ss:$8 sps:$4 sm:$0xff]  }
 0x859   :  { %v19374_v36 = vmul.f32 %v22602_v53, %v22581_v29  ;;  %v19379_v56 = vmul.f32 %v22604_v16, %v22584_v31  ;;  %v6171_v3 = vpack.c.bf16 %v19357_v43, %v19350_v52  ;;  %v22609_v31 = vmov 0   ;;  %v13866_v10 = vld [vmem:[%s22133_s7 + $0x34] ss:$8 sps:$4 sm:$0xff]   ;;  %v13864_v53 = vld [vmem:[%s22133_s7 + $0x30] ss:$8 sps:$4 sm:$0xff]   ;;  %v8430_v59 = vld [vmem:[%s21393_s10 + $0x40] sm:$0xff] }
 0x85a   :  { %v6170_v35 = vpack.c.bf16 %v19367_v60, %v19362_v42  ;;  %6582 = vmatprep.mubr.bf16.mxu1 %v22609_v31  ;;  %v22612_v19 = vpack.c.bf16 %v22610_v30, %v22611_v39  ;;  %v13869_v15 = vld [vmem:[%s22133_s7 + $0x44] ss:$8 sps:$4 sm:$0xff]   ;;  %v13867_v16 = vld [vmem:[%s22133_s7 + $0x40] ss:$8 sps:$4 sm:$0xff]   ;;  %v14032_v43 = vld [vmem:[%s22133_s7 + $0x4d0] ss:$8 sps:$4 sm:$0xff]  }
 0x85b   :  { %v6172_v29 = vpack.c.bf16 %v19379_v56, %v19374_v36  ;;  %v13875_v30 = vld [vmem:[%s22133_s7 + $0x64] ss:$8 sps:$4 sm:$0xff]   ;;  %v13873_v39 = vld [vmem:[%s22133_s7 + $0x60] ss:$8 sps:$4 sm:$0xff]   ;;  %v14064_v36 = vld [vmem:[%s22133_s7 + $0x574] ss:$8 sps:$4 sm:$0xff]  }
 0x85c   :  { %v14029_v52 = vld [vmem:[%s22133_s7 + $0x4c0] ss:$8 sps:$4 sm:$0xff]   ;;  %v14037_v42 = vld [vmem:[%s22133_s7 + $0x4e4] ss:$8 sps:$4 sm:$0xff]   ;;  %v8432_v50 = vld [vmem:[%s21393_s10 + $0x50] sm:$0xff] }
 0x85d   :  { %v14035_v60 = vld [vmem:[%s22133_s7 + $0x4e0] ss:$8 sps:$4 sm:$0xff]   ;;  %v14067_v56 = vld [vmem:[%s22133_s7 + $0x584] ss:$8 sps:$4 sm:$0xff]  }
 0x860   :  { %11593 = vmatmul.mubr.msk.bf16.vlgmr.msra.gmra.mrb[88].mxu1 %vm472_vm0, %v22612_v19  ;;  %v13878_v19 = vld [vmem:[%s22133_s7 + $0x74] ss:$8 sps:$4 sm:$0xff]  }
 0x861   :  { %6855 = vmatpush1.bf16.msra.mxu1 %v13855_v0  ;;  %6592 = vmatprep.mubr.bf16.mxu1 %v22609_v31  ;;  %v13872_v0 = vld [vmem:[%s22133_s7 + $0x54] ss:$8 sps:$4 sm:$0xff]  }
 0x862   :  { %6856 = vmatprep.subr.bf16.mxu1 %v13860_v41  ;;  %v13870_v41 = vld [vmem:[%s22133_s7 + $0x50] ss:$8 sps:$4 sm:$0xff]  }
 0x865   :  { %6857 = vmatpush1.bf16.msra.mxu1 %v13858_v55  ;;  %v13876_v55 = vld [vmem:[%s22133_s7 + $0x70] ss:$8 sps:$4 sm:$0xff]  }
 0x866   :  { %6858 = vmatprep.subr.bf16.mxu1 %v13863_v24  ;;  %v13881_v24 = vld [vmem:[%s22133_s7 + $0x84] ss:$8 sps:$4 sm:$0xff]  }
 0x868   :  { %11594 = vmatmul.mubr.msk.bf16.gmra.mrb[92].mxu1 %vm472_vm0, %v19131_v46 }
 0x869   :  { %6859 = vmatpush1.bf16.msra.mxu1 %v13861_v54  ;;  %6602 = vmatprep.mubr.bf16.mxu1 %v22609_v31  ;;  %v13879_v54 = vld [vmem:[%s22133_s7 + $0x80] ss:$8 sps:$4 sm:$0xff]  }
 0x86a   :  { %6860 = vmatprep.subr.bf16.mxu1 %v13866_v10  ;;  %v13884_v10 = vld [vmem:[%s22133_s7 + $0x94] ss:$8 sps:$4 sm:$0xff]  }
 0x86d   :  { %6861 = vmatpush1.bf16.msra.mxu1 %v13864_v53  ;;  %v13882_v53 = vld [vmem:[%s22133_s7 + $0x90] ss:$8 sps:$4 sm:$0xff]  }
 0x86e   :  { %6862 = vmatprep.subr.bf16.mxu1 %v13869_v15  ;;  %v13887_v15 = vld [vmem:[%s22133_s7 + $0xa4] ss:$8 sps:$4 sm:$0xff]  }
 0x870   :  { %11595 = vmatmul.mubr.msk.bf16.gmra.mrb[96].mxu1 %vm472_vm0, %v19140_v2 }
 0x871   :  { %6863 = vmatpush1.bf16.msra.mxu1 %v13867_v16  ;;  %6612 = vmatprep.mubr.bf16.mxu1 %v22609_v31  ;;  %v13885_v16 = vld [vmem:[%s22133_s7 + $0xa0] ss:$8 sps:$4 sm:$0xff]  }
 0x872   :  { %6864 = vmatprep.subr.bf16.mxu1 %v13872_v0  ;;  %v13890_v0 = vld [vmem:[%s22133_s7 + $0xb4] ss:$8 sps:$4 sm:$0xff]  }
 0x875   :  { %6865 = vmatpush1.bf16.msra.mxu1 %v13870_v41  ;;  %v13888_v41 = vld [vmem:[%s22133_s7 + $0xb0] ss:$8 sps:$4 sm:$0xff]  }
 0x876   :  { %6866 = vmatprep.subr.bf16.mxu1 %v13875_v30  ;;  %v13893_v30 = vld [vmem:[%s22133_s7 + $0xc4] ss:$8 sps:$4 sm:$0xff]  }
 0x878   :  { %11596 = vmatmul.mubr.msk.bf16.gmra.mrb[100].mxu1 %vm472_vm0, %v19151_v58 }
 0x879   :  { %6867 = vmatpush1.bf16.msra.mxu1 %v13873_v39  ;;  %6622 = vmatprep.mubr.bf16.mxu1 %v22609_v31  ;;  %v13891_v39 = vld [vmem:[%s22133_s7 + $0xc0] ss:$8 sps:$4 sm:$0xff]  }
 0x87a   :  { %6868 = vmatprep.subr.bf16.mxu1 %v13878_v19  ;;  %v13896_v19 = vld [vmem:[%s22133_s7 + $0xd4] ss:$8 sps:$4 sm:$0xff]  }
 0x87d   :  { %6869 = vmatpush1.bf16.msra.mxu1 %v13876_v55  ;;  %v22613_v55 = vpack.c.bf16 %v19171_v34, %v19162_v20  ;;  %v13902_v20 = vld [vmem:[%s22133_s7 + $0xf4] ss:$8 sps:$4 sm:$0xff]   ;;  %v13900_v34 = vld [vmem:[%s22133_s7 + $0xf0] ss:$8 sps:$4 sm:$0xff]  }
 0x87e   :  { %6870 = vmatprep.subr.bf16.mxu1 %v13881_v24  ;;  %v13894_v24 = vld [vmem:[%s22133_s7 + $0xd0] ss:$8 sps:$4 sm:$0xff]  }
 0x880   :  { %11597 = vmatmul.mubr.msk.bf16.gmra.mrb[104].mxu1 %vm472_vm0, %v19164_v45 }
 0x881   :  { %6871 = vmatpush1.bf16.msra.mxu1 %v13879_v54  ;;  %6632 = vmatprep.mubr.bf16.mxu1 %v22609_v31  ;;  %v13899_v54 = vld [vmem:[%s22133_s7 + $0xe4] ss:$8 sps:$4 sm:$0xff]  }
 0x882   :  { %6872 = vmatprep.subr.bf16.mxu1 %v13884_v10  ;;  %v13897_v10 = vld [vmem:[%s22133_s7 + $0xe0] ss:$8 sps:$4 sm:$0xff]  }
 0x885   :  { %6873 = vmatpush1.bf16.msra.mxu1 %v13882_v53  ;;  %v13905_v53 = vld [vmem:[%s22133_s7 + $0x104] ss:$8 sps:$4 sm:$0xff]  }
 0x886   :  { %6874 = vmatprep.subr.bf16.mxu1 %v13887_v15  ;;  %v13903_v15 = vld [vmem:[%s22133_s7 + $0x100] ss:$8 sps:$4 sm:$0xff]  }
 0x888   :  { %11598 = vmatmul.mubr.msk.bf16.gmra.mrb[108].mxu1 %vm472_vm0, %v19166_v40 }
 0x889   :  { %6875 = vmatpush1.bf16.msra.mxu1 %v13885_v16  ;;  %6642 = vmatprep.mubr.bf16.mxu1 %v22609_v31  ;;  %v13908_v16 = vld [vmem:[%s22133_s7 + $0x114] ss:$8 sps:$4 sm:$0xff]  }
 0x88a   :  { %6876 = vmatprep.subr.bf16.mxu1 %v13890_v0  ;;  %v22614_v0 = vpack.c.bf16 %v22514_v8, %v22513_v57  ;;  %v22615_v57 = vld [vmem:[#allocation47_spill] sm:$0xff]  ;;  %v22616_v8 = vld [vmem:[#allocation50_spill] sm:$0xff] }
 0x88d   :  { %6877 = vmatpush1.bf16.msra.mxu1 %v13888_v41  ;;  %v13906_v41 = vld [vmem:[%s22133_s7 + $0x110] ss:$8 sps:$4 sm:$0xff]  }
 0x88e   :  { %6878 = vmatprep.subr.bf16.mxu1 %v13893_v30  ;;  %v13911_v30 = vld [vmem:[%s22133_s7 + $0x244] ss:$8 sps:$4 sm:$0xff]  }
 0x890   :  { %11599 = vmatmul.mubr.msk.bf16.gmra.mrb[112].mxu1 %vm472_vm0, %v19175_v9 }
 0x891   :  { %6879 = vmatpush1.bf16.msra.mxu1 %v13891_v39  ;;  %6886 = vmatprep.mubr.bf16.mxu1 %v22613_v55  ;;  %v13909_v39 = vld [vmem:[%s22133_s7 + $0x240] ss:$8 sps:$4 sm:$0xff]  }
 0x892   :  { %6880 = vmatprep.subr.bf16.mxu1 %v13896_v19  ;;  %v13914_v19 = vld [vmem:[%s22133_s7 + $0x254] ss:$8 sps:$4 sm:$0xff]   ;;  %v22617_v55 = vld [vmem:[#allocation23_spill] sm:$0xff] }
 0x895   :  { %6881 = vmatpush1.bf16.msra.mxu1 %v13894_v24  ;;  %v22618_v24 = vld [vmem:[#allocation20_spill] sm:$0xff] }
 0x896   :  { %6882 = vmatprep.subr.bf16.mxu1 %v13899_v54  ;;  %v22619_v54 = vpack.c.bf16 %v22617_v55, %v22618_v24  ;;  %v13932_v55 = vld [vmem:[%s22133_s7 + $0x2b4] ss:$8 sps:$4 sm:$0xff]   ;;  %v13930_v24 = vld [vmem:[%s22133_s7 + $0x2b0] ss:$8 sps:$4 sm:$0xff]  }
 0x899   :  { %6883 = vmatpush1.bf16.msra.mxu1 %v13897_v10  ;;  %v13912_v10 = vld [vmem:[%s22133_s7 + $0x250] ss:$8 sps:$4 sm:$0xff]  }
 0x89a   :  { %6884 = vmatprep.subr.bf16.mxu1 %v13902_v20  ;;  %v13917_v20 = vld [vmem:[%s22133_s7 + $0x264] ss:$8 sps:$4 sm:$0xff]  }
 0x89d   :  { %6885 = vmatpush1.bf16.msra.mxu1 %v13900_v34  ;;  %v13915_v34 = vld [vmem:[%s22133_s7 + $0x260] ss:$8 sps:$4 sm:$0xff]  }
 0x89e   :  { %6957 = vmatprep.subr.bf16.mxu1 %v13905_v53  ;;  %v13920_v53 = vld [vmem:[%s22133_s7 + $0x274] ss:$8 sps:$4 sm:$0xff]  }
 0x8a0   :  { %6887 = vmatmul.mubr.bf16.vlgmr.msra.gmra.mrb[88].mxu1 %v22614_v0  ;;  %v13921_v0 = vld [vmem:[%s22133_s7 + $0x280] ss:$8 sps:$4 sm:$0xff]  }
 0x8a1   :  { %6896 = vmatprep.mubr.bf16.mxu1 %v19197_v6  ;;  %6958 = vmatpush1.bf16.msra.mxu1 %v13903_v15  ;;  %v13918_v15 = vld [vmem:[%s22133_s7 + $0x270] ss:$8 sps:$4 sm:$0xff]  }
 0x8a2   :  { %6959 = vmatprep.subr.bf16.mxu1 %v13908_v16  ;;  %v13923_v16 = vld [vmem:[%s22133_s7 + $0x284] ss:$8 sps:$4 sm:$0xff]  }
 0x8a5   :  { %6960 = vmatpush1.bf16.msra.mxu1 %v13906_v41  ;;  %v13926_v41 = vld [vmem:[%s22133_s7 + $0x294] ss:$8 sps:$4 sm:$0xff]  }
 0x8a6   :  { %7280 = vmatprep.subr.bf16.mxu1 %v13911_v30  ;;  %v13924_v30 = vld [vmem:[%s22133_s7 + $0x290] ss:$8 sps:$4 sm:$0xff]  }
 0x8a8   :  { %6897 = vmatmul.mubr.bf16.gmra.mrb[92].mxu1 %v19208_v28 }
 0x8a9   :  { %6906 = vmatprep.mubr.bf16.mxu1 %v19210_v51 }
 0x8b0   :  { %6907 = vmatmul.mubr.bf16.gmra.mrb[96].mxu1 %v19219_v62 }
 0x8b1   :  { %6916 = vmatprep.mubr.bf16.mxu1 %v22615_v57 }
 0x8b8   :  { %6917 = vmatmul.mubr.bf16.gmra.mrb[100].mxu1 %v19242_v26 }
 0x8b9   :  { %6926 = vmatprep.mubr.bf16.mxu1 %v19244_v4 }
 0x8c0   :  { %6927 = vmatmul.mubr.bf16.gmra.mrb[104].mxu1 %v22616_v8 }
 0x8c1   :  { %6936 = vmatprep.mubr.bf16.mxu1 %v19263_v33 }
 0x8c8   :  { %6937 = vmatmul.mubr.bf16.gmra.mrb[108].mxu1 %v19274_v21 }
 0x8c9   :  { %6946 = vmatprep.mubr.bf16.mxu1 %v19276_v32 }
 0x8d0   :  { %6947 = vmatmul.mubr.bf16.gmra.mrb[112].mxu1 %v19284_v11 }
 0x8d1   :  { %6989 = vmatprep.mubr.bf16.mxu1 %v22609_v31 }
 0x8d8   :  { %11636 = vmatmul.mubr.msk.bf16.vlgmr.msra.gmra.mrb[88].mxu1 %vm472_vm0, %v22619_v54  ;;  %v13935_v54 = vld [vmem:[%s22133_s7 + $0x2c4] ss:$8 sps:$4 sm:$0xff]  }
 0x8d9   :  { %7281 = vmatpush1.bf16.msra.mxu1 %v13909_v39  ;;  %6999 = vmatprep.mubr.bf16.mxu1 %v22609_v31  ;;  %v13929_v39 = vld [vmem:[%s22133_s7 + $0x2a4] ss:$8 sps:$4 sm:$0xff]  }
 0x8da   :  { %7282 = vmatprep.subr.bf16.mxu1 %v13914_v19  ;;  %v13927_v19 = vld [vmem:[%s22133_s7 + $0x2a0] ss:$8 sps:$4 sm:$0xff]  }
 0x8dd   :  { %7283 = vmatpush1.bf16.msra.mxu1 %v13912_v10  ;;  %v13933_v10 = vld [vmem:[%s22133_s7 + $0x2c0] ss:$8 sps:$4 sm:$0xff]  }
 0x8de   :  { %7284 = vmatprep.subr.bf16.mxu1 %v13917_v20  ;;  %v13938_v20 = vld [vmem:[%s22133_s7 + $0x2d4] ss:$8 sps:$4 sm:$0xff]  }
 0x8e0   :  { %11637 = vmatmul.mubr.msk.bf16.gmra.mrb[92].mxu1 %vm472_vm0, %v19295_v47 }
 0x8e1   :  { %7285 = vmatpush1.bf16.msra.mxu1 %v13915_v34  ;;  %7009 = vmatprep.mubr.bf16.mxu1 %v22609_v31  ;;  %v13936_v34 = vld [vmem:[%s22133_s7 + $0x2d0] ss:$8 sps:$4 sm:$0xff]  }
 0x8e2   :  { %7286 = vmatprep.subr.bf16.mxu1 %v13920_v53  ;;  %v13941_v53 = vld [vmem:[%s22133_s7 + $0x2e4] ss:$8 sps:$4 sm:$0xff]  }
 0x8e5   :  { %7287 = vmatpush1.bf16.msra.mxu1 %v13918_v15  ;;  %v13939_v15 = vld [vmem:[%s22133_s7 + $0x2e0] ss:$8 sps:$4 sm:$0xff]  }
 0x8e6   :  { %7288 = vmatprep.subr.bf16.mxu1 %v13923_v16  ;;  %v13944_v16 = vld [vmem:[%s22133_s7 + $0x2f4] ss:$8 sps:$4 sm:$0xff]  }
 0x8e8   :  { %11638 = vmatmul.mubr.msk.bf16.gmra.mrb[96].mxu1 %vm472_vm0, %v19307_v17 }
 0x8e9   :  { %7289 = vmatpush1.bf16.msra.mxu1 %v13921_v0  ;;  %7019 = vmatprep.mubr.bf16.mxu1 %v22609_v31  ;;  %v13942_v0 = vld [vmem:[%s22133_s7 + $0x2f0] ss:$8 sps:$4 sm:$0xff]  }
 0x8ea   :  { %7290 = vmatprep.subr.bf16.mxu1 %v13926_v41  ;;  %v13947_v41 = vld [vmem:[%s22133_s7 + $0x304] ss:$8 sps:$4 sm:$0xff]  }
 0x8ed   :  { %7291 = vmatpush1.bf16.msra.mxu1 %v13924_v30  ;;  %v13945_v30 = vld [vmem:[%s22133_s7 + $0x300] ss:$8 sps:$4 sm:$0xff]  }
 0x8ee   :  { %7292 = vmatprep.subr.bf16.mxu1 %v13929_v39  ;;  %v13950_v39 = vld [vmem:[%s22133_s7 + $0x314] ss:$8 sps:$4 sm:$0xff]  }
 0x8f0   :  { %11639 = vmatmul.mubr.msk.bf16.gmra.mrb[100].mxu1 %vm472_vm0, %v19309_v48 }
 0x8f1   :  { %7293 = vmatpush1.bf16.msra.mxu1 %v13927_v19  ;;  %7029 = vmatprep.mubr.bf16.mxu1 %v22609_v31  ;;  %v13948_v19 = vld [vmem:[%s22133_s7 + $0x310] ss:$8 sps:$4 sm:$0xff]  }
 0x8f2   :  { %7294 = vmatprep.subr.bf16.mxu1 %v13932_v55  ;;  %v13953_v55 = vld [vmem:[%s22133_s7 + $0x324] ss:$8 sps:$4 sm:$0xff]  }
 0x8f5   :  { %7295 = vmatpush1.bf16.msra.mxu1 %v13930_v24  ;;  %v13951_v24 = vld [vmem:[%s22133_s7 + $0x320] ss:$8 sps:$4 sm:$0xff]  }
 0x8f6   :  { %7296 = vmatprep.subr.bf16.mxu1 %v13935_v54  ;;  %v13956_v54 = vld [vmem:[%s22133_s7 + $0x334] ss:$8 sps:$4 sm:$0xff]  }
 0x8f8   :  { %11640 = vmatmul.mubr.msk.bf16.gmra.mrb[104].mxu1 %vm472_vm0, %v19318_v13 }
 0x8f9   :  { %7297 = vmatpush1.bf16.msra.mxu1 %v13933_v10  ;;  %7039 = vmatprep.mubr.bf16.mxu1 %v22609_v31  ;;  %v13959_v10 = vld [vmem:[%s22133_s7 + $0x344] ss:$8 sps:$4 sm:$0xff]  }
 0x8fa   :  { %7298 = vmatprep.subr.bf16.mxu1 %v13938_v20  ;;  %v13957_v20 = vld [vmem:[%s22133_s7 + $0x340] ss:$8 sps:$4 sm:$0xff]  }
 0x8fd   :  { %7299 = vmatpush1.bf16.msra.mxu1 %v13936_v34  ;;  %v13962_v34 = vld [vmem:[%s22133_s7 + $0x354] ss:$8 sps:$4 sm:$0xff]  }
 0x8fe   :  { %7300 = vmatprep.subr.bf16.mxu1 %v13941_v53  ;;  %v13960_v53 = vld [vmem:[%s22133_s7 + $0x350] ss:$8 sps:$4 sm:$0xff]  }
 0x900   :  { %11641 = vmatmul.mubr.msk.bf16.gmra.mrb[108].mxu1 %vm472_vm0, %v19329_v44 }
 0x901   :  { %7301 = vmatpush1.bf16.msra.mxu1 %v13939_v15  ;;  %7049 = vmatprep.mubr.bf16.mxu1 %v22609_v31  ;;  %v13965_v15 = vld [vmem:[%s22133_s7 + $0x364] ss:$8 sps:$4 sm:$0xff]  }
 0x902   :  { %7302 = vmatprep.subr.bf16.mxu1 %v13944_v16  ;;  %v13968_v16 = vld [vmem:[%s22133_s7 + $0x374] ss:$8 sps:$4 sm:$0xff]  }
 0x905   :  { %7303 = vmatpush1.bf16.msra.mxu1 %v13942_v0  ;;  %v13966_v0 = vld [vmem:[%s22133_s7 + $0x370] ss:$8 sps:$4 sm:$0xff]  }
 0x906   :  { %7304 = vmatprep.subr.bf16.mxu1 %v13947_v41  ;;  %v13971_v41 = vld [vmem:[%s22133_s7 + $0x384] ss:$8 sps:$4 sm:$0xff]  }
 0x908   :  { %11642 = vmatmul.mubr.msk.bf16.gmra.mrb[112].mxu1 %vm472_vm0, %v19340_v1 }
 0x909   :  { %7305 = vmatpush1.bf16.msra.mxu1 %v13945_v30  ;;  %7312 = vmatprep.mubr.bf16.mxu1 %v19197_v6  ;;  %v13954_v6 = vld [vmem:[%s22133_s7 + $0x330] ss:$8 sps:$4 sm:$0xff]   ;;  %v13969_v30 = vld [vmem:[%s22133_s7 + $0x380] ss:$8 sps:$4 sm:$0xff]  }
 0x90a   :  { %7306 = vmatprep.subr.bf16.mxu1 %v13950_v39  ;;  %v13972_v39 = vld [vmem:[%s22133_s7 + $0x390] ss:$8 sps:$4 sm:$0xff]  }
 0x90d   :  { %7307 = vmatpush1.bf16.msra.mxu1 %v13948_v19  ;;  %v13977_v19 = vld [vmem:[%s22133_s7 + $0x3a4] ss:$8 sps:$4 sm:$0xff]  }
 0x90e   :  { %7308 = vmatprep.subr.bf16.mxu1 %v13953_v55  ;;  %v13975_v55 = vld [vmem:[%s22133_s7 + $0x3a0] ss:$8 sps:$4 sm:$0xff]  }
 0x911   :  { %7309 = vmatpush1.bf16.msra.mxu1 %v13951_v24  ;;  %v13980_v24 = vld [vmem:[%s22133_s7 + $0x3b4] ss:$8 sps:$4 sm:$0xff]  }
 0x912   :  { %7310 = vmatprep.subr.bf16.mxu1 %v13956_v54  ;;  %v13978_v54 = vld [vmem:[%s22133_s7 + $0x3b0] ss:$8 sps:$4 sm:$0xff]  }
 0x915   :  { %7311 = vmatpush1.bf16.msra.mxu1 %v13954_v6  ;;  %v13983_v6 = vld [vmem:[%s22133_s7 + $0x3c4] ss:$8 sps:$4 sm:$0xff]  }
 0x916   :  { %7383 = vmatprep.subr.bf16.mxu1 %v13959_v10  ;;  %v13981_v10 = vld [vmem:[%s22133_s7 + $0x3c0] ss:$8 sps:$4 sm:$0xff]  }
 0x918   :  { %7313 = vmatmul.mubr.bf16.vlgmr.msra.gmra.mrb[88].mxu1 %v19208_v28  ;;  %v13963_v28 = vld [vmem:[%s22133_s7 + $0x360] ss:$8 sps:$4 sm:$0xff]  }
 0x919   :  { %7322 = vmatprep.mubr.bf16.mxu1 %v19210_v51  ;;  %7384 = vmatpush1.bf16.msra.mxu1 %v13957_v20  ;;  %v13986_v20 = vld [vmem:[%s22133_s7 + $0x3d4] ss:$8 sps:$4 sm:$0xff]  }
 0x91a   :  { %7385 = vmatprep.subr.bf16.mxu1 %v13962_v34  ;;  %v13984_v34 = vld [vmem:[%s22133_s7 + $0x3d0] ss:$8 sps:$4 sm:$0xff]  }
 0x91d   :  { %7386 = vmatpush1.bf16.msra.mxu1 %v13960_v53  ;;  %v13989_v53 = vld [vmem:[%s22133_s7 + $0x3e4] ss:$8 sps:$4 sm:$0xff]  }
 0x91e   :  { %7734 = vmatprep.subr.bf16.mxu1 %v13965_v15  ;;  %v13987_v15 = vld [vmem:[%s22133_s7 + $0x3e0] ss:$8 sps:$4 sm:$0xff]  }
 0x920   :  { %7323 = vmatmul.mubr.bf16.gmra.mrb[92].mxu1 %v19219_v62 }
 0x921   :  { %7332 = vmatprep.mubr.bf16.mxu1 %v22615_v57 }
 0x928   :  { %7333 = vmatmul.mubr.bf16.gmra.mrb[96].mxu1 %v19242_v26 }
 0x929   :  { %7342 = vmatprep.mubr.bf16.mxu1 %v19244_v4 }
 0x930   :  { %7343 = vmatmul.mubr.bf16.gmra.mrb[100].mxu1 %v22616_v8 }
 0x931   :  { %7352 = vmatprep.mubr.bf16.mxu1 %v19263_v33 }
 0x938   :  { %7353 = vmatmul.mubr.bf16.gmra.mrb[104].mxu1 %v19274_v21 }
 0x939   :  { %7362 = vmatprep.mubr.bf16.mxu1 %v19276_v32 }
 0x940   :  { %7363 = vmatmul.mubr.bf16.gmra.mrb[108].mxu1 %v19284_v11 }
 0x941   :  { %7372 = vmatprep.mubr.bf16.mxu1 %v19342_v23 }
 0x948   :  { %7373 = vmatmul.mubr.bf16.gmra.mrb[112].mxu1 %v19352_v49 }
 0x949   :  { %7415 = vmatprep.mubr.bf16.mxu1 %v22609_v31 }
 0x950   :  { %11715 = vmatmul.mubr.msk.bf16.vlgmr.msra.gmra.mrb[88].mxu1 %vm472_vm0, %v19295_v47  ;;  %v13974_v47 = vld [vmem:[%s22133_s7 + $0x394] ss:$8 sps:$4 sm:$0xff]  }
 0x951   :  { %7735 = vmatpush1.bf16.msra.mxu1 %v13963_v28  ;;  %7425 = vmatprep.mubr.bf16.mxu1 %v22609_v31  ;;  %v13992_v28 = vld [vmem:[%s22133_s7 + $0x3f4] ss:$8 sps:$4 sm:$0xff]  }
 0x952   :  { %7736 = vmatprep.subr.bf16.mxu1 %v13968_v16  ;;  %v13990_v16 = vld [vmem:[%s22133_s7 + $0x3f0] ss:$8 sps:$4 sm:$0xff]  }
 0x955   :  { %7737 = vmatpush1.bf16.msra.mxu1 %v13966_v0  ;;  %v13995_v0 = vld [vmem:[%s22133_s7 + $0x404] ss:$8 sps:$4 sm:$0xff]  }
 0x956   :  { %7738 = vmatprep.subr.bf16.mxu1 %v13971_v41  ;;  %v13993_v41 = vld [vmem:[%s22133_s7 + $0x400] ss:$8 sps:$4 sm:$0xff]  }
 0x958   :  { %11716 = vmatmul.mubr.msk.bf16.gmra.mrb[92].mxu1 %vm472_vm0, %v19307_v17 }
 0x959   :  { %7739 = vmatpush1.bf16.msra.mxu1 %v13969_v30  ;;  %7435 = vmatprep.mubr.bf16.mxu1 %v22609_v31  ;;  %v13998_v30 = vld [vmem:[%s22133_s7 + $0x414] ss:$8 sps:$4 sm:$0xff]  }
 0x95a   :  { %7740 = vmatprep.subr.bf16.mxu1 %v13974_v47  ;;  %v13996_v47 = vld [vmem:[%s22133_s7 + $0x410] ss:$8 sps:$4 sm:$0xff]  }
 0x95d   :  { %7741 = vmatpush1.bf16.msra.mxu1 %v13972_v39  ;;  %v14001_v39 = vld [vmem:[%s22133_s7 + $0x424] ss:$8 sps:$4 sm:$0xff]  }
 0x95e   :  { %7742 = vmatprep.subr.bf16.mxu1 %v13977_v19  ;;  %v13999_v19 = vld [vmem:[%s22133_s7 + $0x420] ss:$8 sps:$4 sm:$0xff]  }
 0x960   :  { %11717 = vmatmul.mubr.msk.bf16.gmra.mrb[96].mxu1 %vm472_vm0, %v19309_v48 }
 0x961   :  { %7743 = vmatpush1.bf16.msra.mxu1 %v13975_v55  ;;  %7445 = vmatprep.mubr.bf16.mxu1 %v22609_v31  ;;  %v14004_v55 = vld [vmem:[%s22133_s7 + $0x434] ss:$8 sps:$4 sm:$0xff]  }
 0x962   :  { %7744 = vmatprep.subr.bf16.mxu1 %v13980_v24  ;;  %v22620_v24 = vld [vmem:[#allocation32_spill] sm:$0xff] }
 0x965   :  { %7745 = vmatpush1.bf16.msra.mxu1 %v13978_v54  ;;  %v14002_v54 = vld [vmem:[%s22133_s7 + $0x430] ss:$8 sps:$4 sm:$0xff]  }
 0x966   :  { %7746 = vmatprep.subr.bf16.mxu1 %v13983_v6  ;;  %v14007_v6 = vld [vmem:[%s22133_s7 + $0x444] ss:$8 sps:$4 sm:$0xff]  }
 0x968   :  { %11718 = vmatmul.mubr.msk.bf16.gmra.mrb[100].mxu1 %vm472_vm0, %v19318_v13 }
 0x969   :  { %7747 = vmatpush1.bf16.msra.mxu1 %v13981_v10  ;;  %7455 = vmatprep.mubr.bf16.mxu1 %v22609_v31  ;;  %v14005_v10 = vld [vmem:[%s22133_s7 + $0x440] ss:$8 sps:$4 sm:$0xff]  }
 0x96a   :  { %7748 = vmatprep.subr.bf16.mxu1 %v13986_v20  ;;  %v14010_v20 = vld [vmem:[%s22133_s7 + $0x454] ss:$8 sps:$4 sm:$0xff]  }
 0x96d   :  { %7749 = vmatpush1.bf16.msra.mxu1 %v13984_v34  ;;  %v14008_v34 = vld [vmem:[%s22133_s7 + $0x450] ss:$8 sps:$4 sm:$0xff]  }
 0x96e   :  { %7750 = vmatprep.subr.bf16.mxu1 %v13989_v53  ;;  %v14013_v53 = vld [vmem:[%s22133_s7 + $0x464] ss:$8 sps:$4 sm:$0xff]  }
 0x970   :  { %11719 = vmatmul.mubr.msk.bf16.gmra.mrb[104].mxu1 %vm472_vm0, %v19329_v44 }
 0x971   :  { %7751 = vmatpush1.bf16.msra.mxu1 %v13987_v15  ;;  %7465 = vmatprep.mubr.bf16.mxu1 %v22609_v31  ;;  %v14011_v15 = vld [vmem:[%s22133_s7 + $0x460] ss:$8 sps:$4 sm:$0xff]  }
 0x972   :  { %7752 = vmatprep.subr.bf16.mxu1 %v13992_v28  ;;  %v14016_v28 = vld [vmem:[%s22133_s7 + $0x474] ss:$8 sps:$4 sm:$0xff]  }
 0x975   :  { %7753 = vmatpush1.bf16.msra.mxu1 %v13990_v16  ;;  %v22621_v16 = vld [vmem:[#allocation35_spill] sm:$0xff] }
 0x976   :  { %7754 = vmatprep.subr.bf16.mxu1 %v13995_v0  ;;  %v22622_v0 = vld [vmem:[#allocation38_spill] sm:$0xff] }
 0x978   :  { %11720 = vmatmul.mubr.msk.bf16.gmra.mrb[108].mxu1 %vm472_vm0, %v19340_v1 }
 0x979   :  { %7755 = vmatpush1.bf16.msra.mxu1 %v13993_v41  ;;  %7475 = vmatprep.mubr.bf16.mxu1 %v22609_v31  ;;  %v14014_v41 = vld [vmem:[%s22133_s7 + $0x470] ss:$8 sps:$4 sm:$0xff]  }
 0x97a   :  { %7756 = vmatprep.subr.bf16.mxu1 %v13998_v30  ;;  %v14019_v30 = vld [vmem:[%s22133_s7 + $0x484] ss:$8 sps:$4 sm:$0xff]  }
 0x97d   :  { %7757 = vmatpush1.bf16.msra.mxu1 %v13996_v47  ;;  %v22623_v47 = vld [vmem:[#allocation41_spill] sm:$0xff] }
 0x97e   :  { %7758 = vmatprep.subr.bf16.mxu1 %v14001_v39  ;;  %v22624_v39 = vld [vmem:[#allocation44_spill] sm:$0xff] }
 0x980   :  { %11721 = vmatmul.mubr.msk.bf16.gmra.mrb[112].mxu1 %vm472_vm0, %v19369_v27 }
 0x981   :  { %7759 = vmatpush1.bf16.msra.mxu1 %v13999_v19  ;;  %7766 = vmatprep.mubr.bf16.mxu1 %v22620_v24  ;;  %v14041_v19 = vld [vmem:[%s22133_s7 + $0x500] ss:$8 sps:$4 sm:$0xff]   ;;  %v14049_v24 = vld [vmem:[%s22133_s7 + $0x524] ss:$8 sps:$4 sm:$0xff]  }
 0x982   :  { %7760 = vmatprep.subr.bf16.mxu1 %v14004_v55  ;;  %v14044_v55 = vld [vmem:[%s22133_s7 + $0x510] ss:$8 sps:$4 sm:$0xff]  }
 0x985   :  { %7761 = vmatpush1.bf16.msra.mxu1 %v14002_v54  ;;  %v14047_v54 = vld [vmem:[%s22133_s7 + $0x520] ss:$8 sps:$4 sm:$0xff]  }
 0x986   :  { %7762 = vmatprep.subr.bf16.mxu1 %v14007_v6  ;;  %v14050_v6 = vld [vmem:[%s22133_s7 + $0x530] ss:$8 sps:$4 sm:$0xff]  }
 0x989   :  { %7763 = vmatpush1.bf16.msra.mxu1 %v14005_v10  ;;  %v14055_v10 = vld [vmem:[%s22133_s7 + $0x544] ss:$8 sps:$4 sm:$0xff]  }
 0x98a   :  { %7764 = vmatprep.subr.bf16.mxu1 %v14010_v20  ;;  %v14053_v20 = vld [vmem:[%s22133_s7 + $0x540] ss:$8 sps:$4 sm:$0xff]  }
 0x98d   :  { %7765 = vmatpush1.bf16.msra.mxu1 %v14008_v34  ;;  %v14056_v34 = vld [vmem:[%s22133_s7 + $0x550] ss:$8 sps:$4 sm:$0xff]  }
 0x98e   :  { %7837 = vmatprep.subr.bf16.mxu1 %v14013_v53  ;;  %v14061_v53 = vld [vmem:[%s22133_s7 + $0x564] ss:$8 sps:$4 sm:$0xff]  }
 0x990   :  { %7767 = vmatmul.mubr.bf16.vlgmr.msra.gmra.mrb[88].mxu1 %v22621_v16  ;;  %v14068_v16 = vld [vmem:[%s22133_s7 + $0x590] ss:$8 sps:$4 sm:$0xff]  }
 0x991   :  { %7776 = vmatprep.mubr.bf16.mxu1 %v22622_v0  ;;  %7838 = vmatpush1.bf16.msra.mxu1 %v14011_v15  ;;  %v14059_v15 = vld [vmem:[%s22133_s7 + $0x560] ss:$8 sps:$4 sm:$0xff]   ;;  %v22625_v0 = vmov 0.0|0.0  }
 0x992   :  { %7839 = vmatprep.subr.bf16.mxu1 %v14016_v28  ;;  %v14070_v28 = vld [vmem:[%s22133_s7 + $0x594] ss:$8 sps:$4 sm:$0xff]  }
 0x995   :  { %7840 = vmatpush1.bf16.msra.mxu1 %v14014_v41  ;;  %v8435_v41 = vld [vmem:[%s21393_s10 + $0x68] sm:$0xff] }
 0x996   :  { %8188 = vmatprep.subr.bf16.mxu1 %v14019_v30 }
 0x998   :  { %7777 = vmatmul.mubr.bf16.gmra.mrb[92].mxu1 %v22623_v47  ;;  %v8436_v47 = vld [vmem:[%s21393_s10 + $0x70] sm:$0xff] }
 0x999   :  { %7786 = vmatprep.mubr.bf16.mxu1 %v22624_v39  ;;  %v8437_v39 = vld [vmem:[%s21393_s10 + $0x78] sm:$0xff] }
 0x9a0   :  { %7787 = vmatmul.mubr.bf16.gmra.mrb[96].mxu1 %v19074_v22  ;;  %v14017_v22 = vld [vmem:[%s22133_s7 + $0x480] ss:$8 sps:$4 sm:$0xff]  }
 0x9a1   :  { %7796 = vmatprep.mubr.bf16.mxu1 %v19085_v14  ;;  %v14020_v14 = vld [vmem:[%s22133_s7 + $0x490] ss:$8 sps:$4 sm:$0xff]  }
 0x9a8   :  { %7797 = vmatmul.mubr.bf16.gmra.mrb[100].mxu1 %v19096_v5  ;;  %v14025_v5 = vld [vmem:[%s22133_s7 + $0x4a4] ss:$8 sps:$4 sm:$0xff]  }
 0x9a9   :  { %7806 = vmatprep.mubr.bf16.mxu1 %v19098_v63  ;;  %v14023_v63 = vld [vmem:[%s22133_s7 + $0x4a0] ss:$8 sps:$4 sm:$0xff]  }
 0x9b0   :  { %7807 = vmatmul.mubr.bf16.gmra.mrb[104].mxu1 %v19106_v38  ;;  %v14022_v38 = vld [vmem:[%s22133_s7 + $0x494] ss:$8 sps:$4 sm:$0xff]  }
 0x9b1   :  { %7816 = vmatprep.mubr.bf16.mxu1 %v19117_v18  ;;  %v14028_v18 = vld [vmem:[%s22133_s7 + $0x4b4] ss:$8 sps:$4 sm:$0xff]  }
 0x9b8   :  { %7817 = vmatmul.mubr.bf16.gmra.mrb[108].mxu1 %v19129_v37  ;;  %v14026_v37 = vld [vmem:[%s22133_s7 + $0x4b0] ss:$8 sps:$4 sm:$0xff]  }
 0x9b9   :  { %7826 = vmatprep.mubr.bf16.mxu1 %v6171_v3  ;;  %v14038_v3 = vld [vmem:[%s22133_s7 + $0x4f0] ss:$8 sps:$4 sm:$0xff]  }
 0x9c0   :  { %7827 = vmatmul.mubr.bf16.gmra.mrb[112].mxu1 %v6170_v35  ;;  %v14043_v35 = vld [vmem:[%s22133_s7 + $0x504] ss:$8 sps:$4 sm:$0xff]  }
 0x9c1   :  { %7869 = vmatprep.mubr.bf16.mxu1 %v22609_v31 }
 0x9c8   :  { %11794 = vmatmul.mubr.msk.bf16.vlgmr.msra.gmra.mrb[88].mxu1 %vm472_vm0, %v19131_v46  ;;  %v14031_v46 = vld [vmem:[%s22133_s7 + $0x4c4] ss:$8 sps:$4 sm:$0xff]  }
 0x9c9   :  { %8189 = vmatpush1.bf16.msra.mxu1 %v14017_v22  ;;  %7879 = vmatprep.mubr.bf16.mxu1 %v22609_v31  ;;  %v20085_v22 = vpack.c.bf16 %v8437_v39, %v8436_v47 }
 0x9ca   :  { %8190 = vmatprep.subr.bf16.mxu1 %v14022_v38  ;;  %v8438_v38 = vld [vmem:[%s21393_s10 + $0x80] sm:$0xff] }
 0x9cd   :  { %8191 = vmatpush1.bf16.msra.mxu1 %v14020_v14  ;;  %v8439_v14 = vld [vmem:[%s21393_s10 + $0x88] sm:$0xff] }
 0x9ce   :  { %8192 = vmatprep.subr.bf16.mxu1 %v14025_v5  ;;  %v20094_v5 = vpack.c.bf16 %v8439_v14, %v8438_v38 }
 0x9d0   :  { %11795 = vmatmul.mubr.msk.bf16.gmra.mrb[92].mxu1 %vm472_vm0, %v19140_v2  ;;  %v14034_v2 = vld [vmem:[%s22133_s7 + $0x4d4] ss:$8 sps:$4 sm:$0xff]  }
 0x9d1   :  { %8193 = vmatpush1.bf16.msra.mxu1 %v14023_v63  ;;  %7889 = vmatprep.mubr.bf16.mxu1 %v22609_v31  ;;  %v8440_v63 = vld [vmem:[%s21393_s10 + $0x90] sm:$0xff] }
 0x9d2   :  { %8194 = vmatprep.subr.bf16.mxu1 %v14028_v18  ;;  %v8441_v18 = vld [vmem:[%s21393_s10 + $0x98] sm:$0xff] }
 0x9d5   :  { %8195 = vmatpush1.bf16.msra.mxu1 %v14026_v37  ;;  %v20105_v37 = vpack.c.bf16 %v8441_v18, %v8440_v63 }
 0x9d6   :  { %8196 = vmatprep.subr.bf16.mxu1 %v14031_v46  ;;  %v8442_v46 = vld [vmem:[%s21393_s10 + $0xa0] sm:$0xff] }
 0x9d8   :  { %11796 = vmatmul.mubr.msk.bf16.gmra.mrb[96].mxu1 %vm472_vm0, %v19151_v58  ;;  %v14040_v58 = vld [vmem:[%s22133_s7 + $0x4f4] ss:$8 sps:$4 sm:$0xff]  }
 0x9d9   :  { %8197 = vmatpush1.bf16.msra.mxu1 %v14029_v52  ;;  %7899 = vmatprep.mubr.bf16.mxu1 %v22609_v31  ;;  %v8443_v52 = vld [vmem:[%s21393_s10 + $0xa8] sm:$0xff] }
 0x9da   :  { %8198 = vmatprep.subr.bf16.mxu1 %v14034_v2  ;;  %v8444_v2 = vld [vmem:[%s21393_s10 + $0xb0] sm:$0xff] }
 0x9dd   :  { %8199 = vmatpush1.bf16.msra.mxu1 %v14032_v43  ;;  %v20118_v43 = vpack.c.bf16 %v8443_v52, %v8442_v46 }
 0x9de   :  { %8200 = vmatprep.subr.bf16.mxu1 %v14037_v42  ;;  %v8445_v42 = vld [vmem:[%s21393_s10 + $0xb8] sm:$0xff] }
 0x9e0   :  { %11797 = vmatmul.mubr.msk.bf16.gmra.mrb[100].mxu1 %vm472_vm0, %v19164_v45  ;;  %v14046_v45 = vld [vmem:[%s22133_s7 + $0x514] ss:$8 sps:$4 sm:$0xff]  }
 0x9e1   :  { %8201 = vmatpush1.bf16.msra.mxu1 %v14035_v60  ;;  %7909 = vmatprep.mubr.bf16.mxu1 %v22609_v31  ;;  %v20124_v60 = vpack.c.bf16 %v8445_v42, %v8444_v2 }
 0x9e2   :  { %8202 = vmatprep.subr.bf16.mxu1 %v14040_v58  ;;  %v8446_v58 = vld [vmem:[%s21393_s10 + $0xc0] sm:$0xff] }
 0x9e5   :  { %8203 = vmatpush1.bf16.msra.mxu1 %v14038_v3  ;;  %v8447_v3 = vld [vmem:[%s21393_s10 + $0xc8] sm:$0xff] }
 0x9e6   :  { %8204 = vmatprep.subr.bf16.mxu1 %v14043_v35  ;;  %v20134_v35 = vpack.c.bf16 %v8447_v3, %v8446_v58 }
 0x9e8   :  { %11798 = vmatmul.mubr.msk.bf16.gmra.mrb[104].mxu1 %vm472_vm0, %v19166_v40  ;;  %v14052_v40 = vld [vmem:[%s22133_s7 + $0x534] ss:$8 sps:$4 sm:$0xff]  }
 0x9e9   :  { %8205 = vmatpush1.bf16.msra.mxu1 %v14041_v19  ;;  %7919 = vmatprep.mubr.bf16.mxu1 %v22609_v31  ;;  %v8448_v19 = vld [vmem:[%s21393_s10 + $0xd0] sm:$0xff] }
 0x9ea   :  { %8206 = vmatprep.subr.bf16.mxu1 %v14046_v45  ;;  %v8449_v45 = vld [vmem:[%s21393_s10 + $0xd8] sm:$0xff] }
 0x9ed   :  { %8207 = vmatpush1.bf16.msra.mxu1 %v14044_v55  ;;  %v8451_v55 = vld [vmem:[%s21394_s11 + $0x8] sm:$0xff] }
 0x9ee   :  { %8208 = vmatprep.subr.bf16.mxu1 %v14049_v24  ;;  %v8453_v24 = vld [vmem:[%s21394_s11 + $0x18] sm:$0xff] }
 0x9f0   :  { %11799 = vmatmul.mubr.msk.bf16.gmra.mrb[108].mxu1 %vm472_vm0, %v19175_v9  ;;  %v14058_v9 = vld [vmem:[%s22133_s7 + $0x554] ss:$8 sps:$4 sm:$0xff]  }
 0x9f1   :  { %8209 = vmatpush1.bf16.msra.mxu1 %v14047_v54  ;;  %7929 = vmatprep.mubr.bf16.mxu1 %v22609_v31  ;;  %v20150_v54 = vpack.c.bf16 %v8449_v45, %v8448_v19 }
 0x9f2   :  { %8210 = vmatprep.subr.bf16.mxu1 %v14052_v40  ;;  %v20153_v40 = vpack.c.bf16 %v8453_v24, %v8451_v55 }
 0x9f5   :  { %8211 = vmatpush1.bf16.msra.mxu1 %v14050_v6 }
 0x9f6   :  { %8212 = vmatprep.subr.bf16.mxu1 %v14055_v10 }
 0x9f8   :  { %11800 = vmatmul.mubr.msk.bf16.gmra.mrb[112].mxu1 %vm472_vm0, %v6172_v29  ;;  %v14065_v29 = vld [vmem:[%s22133_s7 + $0x580] ss:$8 sps:$4 sm:$0xff]  }
 0x9f9   :  { %8213 = vmatpush1.bf16.msra.mxu1 %v14053_v20  ;;  %8220 = vmatprep.mubr.bf16.mxu1 %v19210_v51  ;;  %v14062_v51 = vld [vmem:[%s22133_s7 + $0x570] ss:$8 sps:$4 sm:$0xff]  }
 0x9fa   :  { %8214 = vmatprep.subr.bf16.mxu1 %v14058_v9 }
 0x9fd   :  { %8215 = vmatpush1.bf16.msra.mxu1 %v14056_v34 }
 0x9fe   :  { %8216 = vmatprep.subr.bf16.mxu1 %v14061_v53 }
 0xa01   :  { %8217 = vmatpush1.bf16.msra.mxu1 %v14059_v15 }
 0xa02   :  { %8218 = vmatprep.subr.bf16.mxu1 %v14064_v36 }
 0xa05   :  { %8219 = vmatpush1.bf16.msra.mxu1 %v14062_v51 }
 0xa06   :  { %8291 = vmatprep.subr.bf16.mxu1 %v14067_v56 }
 0xa08   :  { %8221 = vmatmul.mubr.bf16.vlgmr.msra.gmra.mrb[88].mxu1 %v19219_v62 }
 0xa09   :  { %8230 = vmatprep.mubr.bf16.mxu1 %v22615_v57  ;;  %8292 = vmatpush1.bf16.msra.mxu1 %v14065_v29 }
 0xa0a   :  { %8293 = vmatprep.subr.bf16.mxu1 %v14070_v28 }
 0xa0d   :  { %8294 = vmatpush1.bf16.msra.mxu1 %v14068_v16 }
 0xa0e   :  { %12576 = vmatprep.subr.bf16.mxu1 %v22625_v0 }
 0xa10   :  { %8231 = vmatmul.mubr.bf16.gmra.mrb[92].mxu1 %v19242_v26  ;;  %v22627_v26 = vld [vmem:[#allocation3_spill] sm:$0xff] }
 0xa11   :  { %8240 = vmatprep.mubr.bf16.mxu1 %v19244_v4  ;;  %v22629_v4 = vmov 0.0  }
 0xa18   :  { %8241 = vmatmul.mubr.bf16.gmra.mrb[96].mxu1 %v22616_v8  ;;  %v8434_v8 = vld [vmem:[%s21393_s10 + $0x60] sm:$0xff] }
 0xa19   :  { %8250 = vmatprep.mubr.bf16.mxu1 %v19263_v33  ;;  %v8422_v33 = vld [vmem:[%s21393_s10] sm:$0xff]  ;;  %v20074_v30 = vpack.c.bf16 %v8435_v41, %v8434_v8 }
 0xa20   :  { %8251 = vmatmul.mubr.bf16.gmra.mrb[100].mxu1 %v19274_v21  ;;  %v22626_v21 = vld [vmem:[#allocation6_spill] sm:$0xff] }
 0xa21   :  { %8260 = vmatprep.mubr.bf16.mxu1 %v19276_v32  ;;  %v22628_v62 = vpack.c.bf16 %v22626_v21, %v22627_v26  ;;  %v8423_v32 = vld [vmem:[%s21393_s10 + $0x8] sm:$0xff] }
 0xa28   :  { %8261 = vmatmul.mubr.bf16.gmra.mrb[104].mxu1 %v19284_v11  ;;  %v20015_v11 = vpack.c.bf16 %v8423_v32, %v8422_v33 }
 0xa29   :  { %8270 = vmatprep.mubr.bf16.mxu1 %v19342_v23 }
 0xa2a   :  { %12470 = vmatpush1.bf16.msra.mxu0 %v20015_v11 }
 0xa2b   :  { %12471 = vmatprep.subr.bf16.mxu0 %v22625_v0 }
 0xa30   :  { %8271 = vmatmul.mubr.bf16.gmra.mrb[108].mxu1 %v19352_v49  ;;  %v8428_v49 = vld [vmem:[%s21393_s10 + $0x30] sm:$0xff] }
 0xa31   :  { %8280 = vmatprep.mubr.bf16.mxu1 %v6147_v25  ;;  %v8431_v25 = vld [vmem:[%s21393_s10 + $0x48] sm:$0xff] }
 0xa32   :  { %v20054_v61 = vpack.c.bf16 %v8431_v25, %v8430_v59 }
 0xa38   :  { %8281 = vmatmul.mubr.bf16.gmra.mrb[112].mxu1 %v6146_v12  ;;  %v8433_v12 = vld [vmem:[%s21393_s10 + $0x58] sm:$0xff] }
 0xa39   :  { %8323 = vmatprep.mubr.bf16.mxu1 %v22609_v31  ;;  %v20065_v57 = vpack.c.bf16 %v8433_v12, %v8432_v50 }
 0xa40   :  { %11873 = vmatmul.mubr.msk.bf16.vlgmr.msra.gmra.mrb[88].mxu1 %vm472_vm0, %v19307_v17  ;;  %v8424_v17 = vld [vmem:[%s21393_s10 + $0x10] sm:$0xff] }
 0xa41   :  { %8333 = vmatprep.mubr.bf16.mxu1 %v22609_v31 }
 0xa48   :  { %11874 = vmatmul.mubr.msk.bf16.gmra.mrb[92].mxu1 %vm472_vm0, %v19309_v48  ;;  %v8425_v48 = vld [vmem:[%s21393_s10 + $0x18] sm:$0xff] }
 0xa49   :  { %8343 = vmatprep.mubr.bf16.mxu1 %v22609_v31 }
 0xa50   :  { %11875 = vmatmul.mubr.msk.bf16.gmra.mrb[96].mxu1 %vm472_vm0, %v19318_v13  ;;  %v20025_v13 = vpack.c.bf16 %v8425_v48, %v8424_v17 }
 0xa51   :  { %8353 = vmatprep.mubr.bf16.mxu1 %v22609_v31 }
 0xa52   :  { %12473 = vmatpush1.bf16.msra.mxu0 %v20025_v13 }
 0xa53   :  { %12474 = vmatprep.subr.bf16.mxu0 %v22625_v0 }
 0xa58   :  { %11876 = vmatmul.mubr.msk.bf16.gmra.mrb[100].mxu1 %vm472_vm0, %v19329_v44  ;;  %v8426_v44 = vld [vmem:[%s21393_s10 + $0x20] sm:$0xff] }
 0xa59   :  { %8363 = vmatprep.mubr.bf16.mxu1 %v22609_v31 }
 0xa60   :  { %11877 = vmatmul.mubr.msk.bf16.gmra.mrb[104].mxu1 %vm472_vm0, %v19340_v1  ;;  %v8427_v1 = vld [vmem:[%s21393_s10 + $0x28] sm:$0xff] }
 0xa61   :  { %8373 = vmatprep.mubr.bf16.mxu1 %v22609_v31  ;;  %v20034_v23 = vpack.c.bf16 %v8427_v1, %v8426_v44 }
 0xa63   :  { %12476 = vmatpush1.bf16.msra.mxu0 %v20034_v23 }
 0xa64   :  { %12477 = vmatprep.subr.bf16.mxu0 %v22625_v0 }
 0xa68   :  { %11878 = vmatmul.mubr.msk.bf16.gmra.mrb[108].mxu1 %vm472_vm0, %v19369_v27  ;;  %v8429_v27 = vld [vmem:[%s21393_s10 + $0x38] sm:$0xff] }
 0xa69   :  { %8383 = vmatprep.mubr.bf16.mxu1 %v22609_v31  ;;  %v20045_v7 = vpack.c.bf16 %v8429_v27, %v8428_v49 }
 0xa6b   :  { %12479 = vmatpush1.bf16.msra.mxu0 %v20045_v7 }
 0xa6c   :  { %12480 = vmatprep.subr.bf16.mxu0 %v22625_v0 }
 0xa6f   :  { %12482 = vmatpush1.bf16.msra.mxu0 %v20054_v61 }
 0xa70   :  { %11879 = vmatmul.mubr.msk.bf16.gmra.mrb[112].mxu1 %vm472_vm0, %v22628_v62  ;;  %12483 = vmatprep.subr.bf16.mxu0 %v22625_v0 }
 0xa71   :  { %12292 = vmatprep.mubr.msk.f32.mxu1 %vm14340_vm1, %v22629_v4 }
 0xa73   :  { %12485 = vmatpush1.bf16.msra.mxu0 %v20065_v57 }
 0xa74   :  { %12486 = vmatprep.subr.bf16.mxu0 %v22625_v0 }
 0xa77   :  { %12488 = vmatpush1.bf16.msra.mxu0 %v20074_v30 }
 0xa78   :  { %12489 = vmatprep.subr.bf16.mxu0 %v22625_v0 }
 0xa7b   :  { %12491 = vmatpush1.bf16.msra.mxu0 %v20085_v22 }
 0xa7c   :  { %12492 = vmatprep.subr.bf16.mxu0 %v22625_v0 }
 0xa7f   :  { %12494 = vmatpush1.bf16.msra.mxu0 %v20094_v5 }
 0xa80   :  { %12495 = vmatprep.subr.bf16.mxu0 %v22625_v0 }
 0xa83   :  { %12497 = vmatpush1.bf16.msra.mxu0 %v20105_v37 }
 0xa84   :  { %12498 = vmatprep.subr.bf16.mxu0 %v22625_v0 }
 0xa87   :  { %12500 = vmatpush1.bf16.msra.mxu0 %v20118_v43 }
 0xa88   :  { %12501 = vmatprep.subr.bf16.mxu0 %v22625_v0 }
 0xa8b   :  { %12503 = vmatpush1.bf16.msra.mxu0 %v20124_v60 }
 0xa8c   :  { %12504 = vmatprep.subr.bf16.mxu0 %v22625_v0 }
 0xa8f   :  { %12506 = vmatpush1.bf16.msra.mxu0 %v20134_v35 }
 0xa90   :  { %12507 = vmatprep.subr.bf16.mxu0 %v22625_v0 }
 0xa93   :  { %12509 = vmatpush1.bf16.msra.mxu0 %v20150_v54 }
 0xa94   :  { %12511 = vmatprep.subr.bf16.mxu0 %v20153_v40 }
 0xb13   :  { %v20157_v6 = vpop.f32.mrb[88].mxu1 }
 0xb14   :  { %v20159_v10 = vpop.f32.mrb[89].mxu1 }
 0xb15   :  { %v20161_v20 = vpop.f32.mrb[90].mxu1  ;;  %v8478_v53 = vsel %vm8477_vm3, %v20159_v10, 0.0 }
 0xb16   :  { %v8458_v9 = vadd.f32 %v20161_v20, %v20157_v6  ;;  %v20165_v34 = vpop.f32.mrb[91].mxu1 }
 0xb17   :  { %v8479_v15 = vsel %vm8477_vm3, %v20165_v34, 0.0 }
 0xb18   :  { %v8480_v36 = vadd.f32 %v8479_v15, %v8478_v53 }
 0xb1b   :  { %v20171_v51 = vpop.f32.mrb[92].mxu1 }
 0xb1c   :  { %v8459_v56 = vadd.f32 %v8458_v9, %v20171_v51  ;;  %v20174_v29 = vpop.f32.mrb[93].mxu1 }
 0xb1d   :  { %v8481_v28 = vsel %vm8477_vm3, %v20174_v29, 0.0  ;;  %v20178_v16 = vpop.f32.mrb[94].mxu1 }
 0xb1e   :  { %v8482_v21 = vadd.f32 %v8481_v28, %v8480_v36  ;;  %v8460_v26 = vadd.f32 %v8459_v56, %v20178_v16  ;;  %v20181_v62 = vpop.f32.mrb[95].mxu1 }
 0xb1f   :  { %v8483_v33 = vsel %vm8477_vm3, %v20181_v62, 0.0 }
 0xb20   :  { %v8484_v32 = vadd.f32 %v8483_v33, %v8482_v21 }
 0xb23   :  { %v20185_v17 = vpop.f32.mrb[96].mxu1 }
 0xb24   :  { %v8461_v48 = vadd.f32 %v8460_v26, %v20185_v17  ;;  %v20188_v44 = vpop.f32.mrb[97].mxu1 }
 0xb25   :  { %v8485_v1 = vsel %vm8477_vm3, %v20188_v44, 0.0  ;;  %v20192_v49 = vpop.f32.mrb[98].mxu1 }
 0xb26   :  { %v8486_v27 = vadd.f32 %v8485_v1, %v8484_v32  ;;  %v8462_v59 = vadd.f32 %v8461_v48, %v20192_v49  ;;  %v20195_v25 = vpop.f32.mrb[99].mxu1 }
 0xb27   :  { %v8487_v50 = vsel %vm8477_vm3, %v20195_v25, 0.0 }
 0xb28   :  { %v8488_v12 = vadd.f32 %v8487_v50, %v8486_v27 }
 0xb2b   :  { %v20199_v8 = vpop.f32.mrb[100].mxu1 }
 0xb2c   :  { %22630 = vst [vmem:[#allocation53_spill] sm:$0xff] %v20199_v8  ;;  %v8463_v41 = vadd.f32 %v8462_v59, %v20199_v8  ;;  %v20202_v47 = vpop.f32.mrb[101].mxu1 }
 0xb2d   :  { %v8489_v39 = vsel %vm8477_vm3, %v20202_v47, 0.0  ;;  %v20206_v38 = vpop.f32.mrb[102].mxu1 }
 0xb2e   :  { %22631 = vst [vmem:[#allocation56_spill] sm:$0xff] %v20206_v38  ;;  %v8490_v14 = vadd.f32 %v8489_v39, %v8488_v12  ;;  %v8464_v63 = vadd.f32 %v8463_v41, %v20206_v38  ;;  %v20209_v18 = vpop.f32.mrb[103].mxu1 }
 0xb2f   :  { %22632 = vst [vmem:[#allocation59_spill] sm:$0xff] %v20209_v18  ;;  %v8491_v46 = vsel %vm8477_vm3, %v20209_v18, 0.0 }
 0xb30   :  { %v8492_v52 = vadd.f32 %v8491_v46, %v8490_v14 }
 0xb33   :  { %v20213_v2 = vpop.f32.mrb[104].mxu1 }
 0xb34   :  { %22633 = vst [vmem:[#allocation62_spill] sm:$0xff] %v20213_v2  ;;  %v8465_v42 = vadd.f32 %v8464_v63, %v20213_v2  ;;  %v20216_v58 = vpop.f32.mrb[105].mxu1 }
 0xb35   :  { %22634 = vst [vmem:[#allocation65_spill] sm:$0xff] %v20216_v58  ;;  %v8493_v3 = vsel %vm8477_vm3, %v20216_v58, 0.0  ;;  %v20220_v19 = vpop.f32.mrb[106].mxu1 }
 0xb36   :  { %22635 = vst [vmem:[#allocation68_spill] sm:$0xff] %v20220_v19  ;;  %v8494_v45 = vadd.f32 %v8493_v3, %v8492_v52  ;;  %v8466_v55 = vadd.f32 %v8465_v42, %v20220_v19  ;;  %v20223_v24 = vpop.f32.mrb[107].mxu1 }
 0xb37   :  { %22636 = vst [vmem:[#allocation71_spill] sm:$0xff] %v20223_v24  ;;  %v8495_v9 = vsel %vm8477_vm3, %v20223_v24, 0.0 }
 0xb38   :  { %v8496_v53 = vadd.f32 %v8495_v9, %v8494_v45 }
 0xb3b   :  { %v20227_v15 = vpop.f32.mrb[108].mxu1 }
 0xb3c   :  { %22637 = vst [vmem:[#allocation74_spill] sm:$0xff] %v20227_v15  ;;  %v8467_v36 = vadd.f32 %v8466_v55, %v20227_v15  ;;  %v20230_v56 = vpop.f32.mrb[109].mxu1 }
 0xb3d   :  { %22638 = vst [vmem:[#allocation77_spill] sm:$0xff] %v20230_v56  ;;  %v8497_v28 = vsel %vm8477_vm3, %v20230_v56, 0.0  ;;  %v20234_v21 = vpop.f32.mrb[110].mxu1 }
 0xb3e   :  { %22639 = vst [vmem:[#allocation80_spill] sm:$0xff] %v20234_v21  ;;  %v8498_v26 = vadd.f32 %v8497_v28, %v8496_v53  ;;  %v8468_v33 = vadd.f32 %v8467_v36, %v20234_v21  ;;  %v20237_v32 = vpop.f32.mrb[111].mxu1 }
 0xb3f   :  { %22640 = vst [vmem:[#allocation83_spill] sm:$0xff] %v20237_v32  ;;  %v8499_v48 = vsel %vm8477_vm3, %v20237_v32, 0.0 }
 0xb40   :  { %v8500_v1 = vadd.f32 %v8499_v48, %v8498_v26  ;;  %v8452_v48 = vld [vmem:[%s21394_s11 + $0x10] sm:$0xff] }
 0xb43   :  { %v20241_v27 = vpop.f32.mrb[112].mxu1 }
 0xb44   :  { %22641 = vst [vmem:[#allocation86_spill] sm:$0xff] %v20241_v27  ;;  %v8469_v59 = vadd.f32 %v8468_v33, %v20241_v27  ;;  %v20244_v50 = vpop.f32.mrb[113].mxu1  ;;  %v8450_v33 = vld [vmem:[%s21394_s11] sm:$0xff] }
 0xb45   :  { %22642 = vst [vmem:[#allocation89_spill] sm:$0xff] %v20244_v50  ;;  %v8501_v12 = vsel %vm8477_vm3, %v20244_v50, 0.0  ;;  %v20248_v41 = vpop.f32.mrb[114].mxu1 }
 0xb46   :  { %v8502_v39 = vadd.f32 %v8501_v12, %v8500_v1  ;;  %v8470_v14 = vadd.f32 %v8469_v59, %v20248_v41  ;;  %v20251_v63 = vpop.f32.mrb[115].mxu1  ;;  %v8455_v59 = vld [vmem:[%s21394_s11 + $0x28] sm:$0xff]  ;;  %v8457_v12 = vld [vmem:[%s21394_s11 + $0x38] sm:$0xff] }
 0xb47   :  { %22643 = vst [vmem:[#allocation92_spill] sm:$0xff] %v20251_v63  ;;  %v8503_v46 = vsel %vm8477_vm3, %v20251_v63, 0.0 }
 0xb48   :  { %v8471_v52 = vrot.slane %v8470_v14, 4  ;;  %v8504_v42 = vadd.f32 %v8503_v46, %v8502_v39 }
 0xb4a   :  { %v8472_v3 = vadd.f32 %v8471_v52, %v8470_v14  ;;  %v8505_v45 = vrot.slane %v8504_v42, 4  ;;  %v20267_v14 = vpack.c.bf16 %v8452_v48, %v8450_v33  ;;  %v20269_v52 = vpack.c.bf16 %v8457_v12, %v8455_v59 }
 0xb4c   :  { %v8473_v55 = vrot.slane %v8472_v3, 2  ;;  %v8506_v9 = vadd.f32 %v8505_v45, %v8504_v42  ;;  %v8454_v42 = vld [vmem:[%s21394_s11 + $0x20] sm:$0xff] }
 0xb4e   :  { %v8474_v53 = vadd.f32 %v8473_v55, %v8472_v3  ;;  %v8507_v36 = vrot.slane %v8506_v9, 2  ;;  %v8456_v3 = vld [vmem:[%s21394_s11 + $0x30] sm:$0xff] }
 0xb4f   :  { %v20281_v45 = vpack.c.bf16 %v8456_v3, %v8454_v42 }
 0xb50   :  { %v8508_v28 = vadd.f32 %v8507_v36, %v8506_v9  ;;  %v8475_v26 = vrot.slane %v8474_v53, 1 }
 0xb52   :  { %v8509_v1 = vrot.slane %v8508_v28, 1  ;;  %v8476_v46 = vadd.f32 %v8475_v26, %v8474_v53 }
 0xb54   :  { %v8510_v39 = vadd.f32 %v8509_v1, %v8508_v28 }
 0xb56   :  { %11880 = vmatprep.mubr.msk.f32.mxu0 %vm8477_vm3, %v8510_v39 }
 0xb57   :  { %8579 = vmatmul.mubr.f32.vlgmr.msra.gmra.mrb[76].mxu0 %v8476_v46 }
 0xb58   :  { %12513 = vmatpush1.bf16.msra.mxu0 %v20267_v14  ;;  %8652 = vmatprep.mubr.f32.mxu0 %v22629_v4 }
 0xb59   :  { %12515 = vmatprep.subr.bf16.mxu0 %v20269_v52 }
 0xb5c   :  { %12517 = vmatpush1.bf16.msra.mxu0 %v20281_v45 }
 0xb5d   :  { %12518 = vmatprep.subr.bf16.mxu0 %v22625_v0 }
 0xc2a   :  { %v8580_v55 = vpop.f32.mrb[76].mxu0 }
 0xc2b   :  { %v20285_v9 = vmul.f32 0.010204081, %v8580_v55  ;;  %v8582_v53 = vpop.f32.mrb[77].mxu0 }
 0xc2d   :  { %11881 = vmatmul.mubr.msk.f32.vlgmr.msra.gmra.mrb[78].mxu0 %vm472_vm0, %v20285_v9 }
 0xc2e   :  { %12520 = vmatpush1.bf16.msra.mxu0 %v20015_v11 }
 0xc2f   :  { %12521 = vmatprep.subr.bf16.mxu0 %v22625_v0 }
 0xc32   :  { %12523 = vmatpush1.bf16.msra.mxu0 %v20025_v13  ;;  %v22644_v13 = vld [vmem:[#allocation114_spill] sm:$0xff] }
 0xc33   :  { %12524 = vmatprep.subr.bf16.mxu0 %v22625_v0 }
 0xc36   :  { %12526 = vmatpush1.bf16.msra.mxu0 %v20034_v23 }
 0xc37   :  { %12527 = vmatprep.subr.bf16.mxu0 %v22625_v0 }
 0xc3a   :  { %12529 = vmatpush1.bf16.msra.mxu0 %v20045_v7 }
 0xc3b   :  { %12530 = vmatprep.subr.bf16.mxu0 %v22625_v0 }
 0xc3e   :  { %12532 = vmatpush1.bf16.msra.mxu0 %v20054_v61 }
 0xc3f   :  { %12533 = vmatprep.subr.bf16.mxu0 %v22625_v0 }
 0xc42   :  { %12535 = vmatpush1.bf16.msra.mxu0 %v20065_v57 }
 0xc43   :  { %12536 = vmatprep.subr.bf16.mxu0 %v22625_v0 }
 0xc46   :  { %12538 = vmatpush1.bf16.msra.mxu0 %v20074_v30 }
 0xc47   :  { %12539 = vmatprep.subr.bf16.mxu0 %v22625_v0 }
 0xc4a   :  { %12541 = vmatpush1.bf16.msra.mxu0 %v20085_v22 }
 0xc4b   :  { %12542 = vmatprep.subr.bf16.mxu0 %v22625_v0 }
 0xc4e   :  { %12544 = vmatpush1.bf16.msra.mxu0 %v20094_v5 }
 0xc4f   :  { %12545 = vmatprep.subr.bf16.mxu0 %v22625_v0 }
 0xc52   :  { %12547 = vmatpush1.bf16.msra.mxu0 %v20105_v37 }
 0xc53   :  { %12548 = vmatprep.subr.bf16.mxu0 %v22625_v0 }
 0xc56   :  { %12550 = vmatpush1.bf16.msra.mxu0 %v20118_v43 }
 0xc57   :  { %12551 = vmatprep.subr.bf16.mxu0 %v22625_v0 }
 0xc5a   :  { %12553 = vmatpush1.bf16.msra.mxu0 %v20124_v60 }
 0xc5b   :  { %12554 = vmatprep.subr.bf16.mxu0 %v22625_v0 }
 0xc5e   :  { %12556 = vmatpush1.bf16.msra.mxu0 %v20134_v35 }
 0xc5f   :  { %12557 = vmatprep.subr.bf16.mxu0 %v22625_v0 }
 0xc62   :  { %12559 = vmatpush1.bf16.msra.mxu0 %v20150_v54 }
 0xc63   :  { %12561 = vmatprep.subr.bf16.mxu0 %v20153_v40 }
 0xd00   :  { %v8654_v11 = vpop.f32.mrb[78].mxu0 }
 0xd01   :  { %v8662_v23 = vrot.slane %v8654_v11, %v22644_v13  ;;  %v8656_v7 = vpop.f32.mrb[79].mxu0 }
 0xd02   :  { %v8666_v61 = vrot.slane %v8656_v7, %v22644_v13 }
 0xd03   :  { %v8667_v57 = vsub.f32 %v20157_v6, %v8662_v23  ;;  %v8669_v30 = vsub.f32 %v20161_v20, %v8662_v23  ;;  %v8671_v22 = vsub.f32 %v20171_v51, %v8662_v23  ;;  %v8673_v5 = vsub.f32 %v20178_v16, %v8662_v23 }
 0xd04   :  { %v8668_v37 = vsub.f32 %v20159_v10, %v8666_v61  ;;  %v8670_v43 = vsub.f32 %v20165_v34, %v8666_v61  ;;  %v8672_v60 = vsub.f32 %v20174_v29, %v8666_v61  ;;  %v8674_v35 = vsub.f32 %v20181_v62, %v8666_v61 }
 0xd05   :  { %v8676_v54 = vsub.f32 %v20188_v44, %v8666_v61  ;;  %v8678_v36 = vsub.f32 %v20195_v25, %v8666_v61  ;;  %v8680_v28 = vsub.f32 %v20202_v47, %v8666_v61  ;;  %v8682_v26 = vsub.f32 %v20209_v18, %v8666_v61 }
 0xd06   :  { %v8684_v33 = vsub.f32 %v20216_v58, %v8666_v61  ;;  %v8686_v48 = vsub.f32 %v20223_v24, %v8666_v61  ;;  %v8688_v1 = vsub.f32 %v20230_v56, %v8666_v61  ;;  %v8690_v59 = vsub.f32 %v20237_v32, %v8666_v61 }
 0xd07   :  { %v8692_v12 = vsub.f32 %v20244_v50, %v8666_v61  ;;  %v8694_v39 = vsub.f32 %v20251_v63, %v8666_v61  ;;  %v8696_v46 = vmul.f32 %v8668_v37, %v8668_v37  ;;  %v8698_v42 = vmul.f32 %v8670_v43, %v8670_v43 }
 0xd08   :  { %v8700_v3 = vmul.f32 %v8672_v60, %v8672_v60  ;;  %v8702_v55 = vmul.f32 %v8674_v35, %v8674_v35  ;;  %v8704_v53 = vmul.f32 %v8676_v54, %v8676_v54  ;;  %v8706_v58 = vmul.f32 %v8678_v36, %v8678_v36 }
 0xd09   :  { %v8742_v11 = vsel %vm8477_vm3, %v8696_v46, 0.0  ;;  %v8743_v7 = vsel %vm8477_vm3, %v8698_v42, 0.0  ;;  %v8708_v56 = vmul.f32 %v8680_v28, %v8680_v28  ;;  %v8675_v61 = vsub.f32 %v20185_v17, %v8662_v23 }
 0xd0a   :  { %v8744_v0 = vadd.f32 %v8743_v7, %v8742_v11  ;;  %v8745_v24 = vsel %vm8477_vm3, %v8700_v3, 0.0  ;;  %v8747_v32 = vsel %vm8477_vm3, %v8702_v55, 0.0  ;;  %v8749_v50 = vsel %vm8477_vm3, %v8704_v53, 0.0 }
 0xd0b   :  { %v8677_v37 = vsub.f32 %v20192_v49, %v8662_v23  ;;  %v8679_v43 = vsub.f32 %v20199_v8, %v8662_v23  ;;  %v8681_v60 = vsub.f32 %v20206_v38, %v8662_v23  ;;  %v8683_v54 = vsub.f32 %v20213_v2, %v8662_v23 }
 0xd0c   :  { %v8746_v18 = vadd.f32 %v8745_v24, %v8744_v0  ;;  %v8685_v36 = vsub.f32 %v20220_v19, %v8662_v23  ;;  %v8687_v28 = vsub.f32 %v20227_v15, %v8662_v23  ;;  %v8689_v0 = vsub.f32 %v20234_v21, %v8662_v23 }
 0xd0d   :  { %v8691_v24 = vsub.f32 %v20241_v27, %v8662_v23  ;;  %v8693_v46 = vsub.f32 %v20248_v41, %v8662_v23  ;;  %v8695_v42 = vmul.f32 %v8667_v57, %v8667_v57  ;;  %v8697_v55 = vmul.f32 %v8669_v30, %v8669_v30 }
 0xd0e   :  { %v8748_v35 = vadd.f32 %v8747_v32, %v8746_v18  ;;  %v8710_v53 = vmul.f32 %v8682_v26, %v8682_v26  ;;  %v8751_v11 = vsel %vm8477_vm3, %v8706_v58, 0.0  ;;  %v8712_v18 = vmul.f32 %v8684_v33, %v8684_v33 }
 0xd0f   :  { %v8753_v32 = vsel %vm8477_vm3, %v8708_v56, 0.0  ;;  %v8699_v63 = vmul.f32 %v8671_v22, %v8671_v22  ;;  %v8723_v19 = vadd.f32 %v8697_v55, %v8695_v42  ;;  %v8714_v15 = vmul.f32 %v8686_v48, %v8686_v48 }
 0xd10   :  { %v8750_v3 = vadd.f32 %v8749_v50, %v8748_v35  ;;  %v8755_v21 = vsel %vm8477_vm3, %v8710_v53, 0.0  ;;  %v8701_v38 = vmul.f32 %v8673_v5, %v8673_v5  ;;  %v8716_v23 = vmul.f32 %v8688_v1, %v8688_v1 }
 0xd11   :  { %v8724_v27 = vadd.f32 %v8723_v19, %v8699_v63  ;;  %v8757_v50 = vsel %vm8477_vm3, %v8712_v18, 0.0  ;;  %v8703_v57 = vmul.f32 %v8675_v61, %v8675_v61  ;;  %v8718_v58 = vmul.f32 %v8690_v59, %v8690_v59 }
 0xd12   :  { %v8752_v7 = vadd.f32 %v8751_v11, %v8750_v3  ;;  %v8759_v33 = vsel %vm8477_vm3, %v8714_v15, 0.0  ;;  %v8705_v35 = vmul.f32 %v8677_v37, %v8677_v37  ;;  %v8720_v42 = vmul.f32 %v8692_v12, %v8692_v12 }
 0xd13   :  { %v8725_v30 = vadd.f32 %v8724_v27, %v8701_v38  ;;  %v8761_v48 = vsel %vm8477_vm3, %v8716_v23, 0.0  ;;  %v8707_v3 = vmul.f32 %v8679_v43, %v8679_v43  ;;  %v8722_v19 = vmul.f32 %v8694_v39, %v8694_v39 }
 0xd14   :  { %v8754_v2 = vadd.f32 %v8753_v32, %v8752_v7  ;;  %v8711_v38 = vmul.f32 %v8683_v54, %v8683_v54  ;;  %v8713_v61 = vmul.f32 %v8685_v36, %v8685_v36  ;;  %v8715_v53 = vmul.f32 %v8687_v28, %v8687_v28 }
 0xd15   :  { %v8726_v56 = vadd.f32 %v8725_v30, %v8703_v57  ;;  %v8767_v59 = vsel %vm8477_vm3, %v8722_v19, 0.0  ;;  %v8717_v7 = vmul.f32 %v8689_v0, %v8689_v0  ;;  %v8719_v32 = vmul.f32 %v8691_v24, %v8691_v24 }
 0xd16   :  { %v8756_v8 = vadd.f32 %v8755_v21, %v8754_v2  ;;  %v8763_v2 = vsel %vm8477_vm3, %v8718_v58, 0.0  ;;  %v8709_v21 = vmul.f32 %v8681_v60, %v8681_v60  ;;  %v8848_v0 = vmul.f32 %v20285_v9, %v20285_v9 }
 0xd17   :  { %v8727_v55 = vadd.f32 %v8726_v56, %v8705_v35 }
 0xd18   :  { %v8758_v26 = vadd.f32 %v8757_v50, %v8756_v8  ;;  %v8765_v8 = vsel %vm8477_vm3, %v8720_v42, 0.0  ;;  %v8721_v50 = vmul.f32 %v8693_v46, %v8693_v46  ;;  %v8849_v24 = vmul.f32 686.0, %v8848_v0 }
 0xd19   :  { %v8728_v63 = vadd.f32 %v8727_v55, %v8707_v3 }
 0xd1a   :  { %v8760_v22 = vadd.f32 %v8759_v33, %v8758_v26 }
 0xd1b   :  { %v8729_v27 = vadd.f32 %v8728_v63, %v8709_v21  ;;  %v8856_v21 = vld [vmem:[%s21397_s9] sm:$0x1]  ;;  %v20384_v63 = vld [vmem:[%s21395_s13 + $0x70] sm:$0xff]  }
 0xd1c   :  { %v8762_v5 = vadd.f32 %v8761_v48, %v8760_v22 }
 0xd1d   :  { %v8730_v12 = vadd.f32 %v8729_v27, %v8711_v38  ;;  %v20427_v38 = vld [vmem:[%s21395_s13 + $0xa0] sm:$0xff]   ;;  %v20434_v27 = vld [vmem:[%s21395_s13 + $0xa8] sm:$0xff]  }
 0xd1e   :  { %v8764_v1 = vadd.f32 %v8763_v2, %v8762_v5  ;;  %v8852_v5 = vld [vmem:[%s21396_s8] sm:$0x1] }
 0xd1f   :  { %v8731_v43 = vadd.f32 %v8730_v12, %v8713_v61  ;;  %v20455_v61 = vld [vmem:[%s21395_s13 + $0xc0] sm:$0xff]   ;;  %v20463_v12 = vld [vmem:[%s21395_s13 + $0xc8] sm:$0xff]  }
 0xd20   :  { %v8766_v15 = vadd.f32 %v8765_v8, %v8764_v1  ;;  %v20420_v8 = vld [vmem:[%s21395_s13 + $0x98] sm:$0xff]  }
 0xd21   :  { %v8732_v39 = vadd.f32 %v8731_v43, %v8715_v53  ;;  %v20476_v53 = vld [vmem:[%s21395_s13 + $0xd8] sm:$0xff]   ;;  %v20481_v43 = vpop.permute.xlu0 %9133 }
 0xd22   :  { %v8768_v37 = vadd.f32 %v8767_v59, %v8766_v15  ;;  %v20441_v15 = vld [vmem:[%s21395_s13 + $0xb0] sm:$0xff]   ;;  %v20449_v59 = vld [vmem:[%s21395_s13 + $0xb8] sm:$0xff]   ;;  %22646 = vst [vmem:[#allocation98_spill] sm:$0xff] %v20476_v53 }
 0xd23   :  { %v8733_v60 = vadd.f32 %v8732_v39, %v8717_v7 }
 0xd24   :  { %v8769_v11 = vrot.slane %v8768_v37, 4 }
 0xd25   :  { %v8734_v57 = vadd.f32 %v8733_v60, %v8719_v32  ;;  %v9124_v32 = vpop.permute.xlu0 %9123 }
 0xd26   :  { %v8770_v18 = vadd.f32 %v8769_v11, %v8768_v37  ;;  %v20469_v37 = vld [vmem:[%s21395_s13 + $0xd0] sm:$0xff]   ;;  %v20483_v11 = vpop.permute.xlu1 %9138 }
 0xd27   :  { %v8735_v54 = vadd.f32 %v8734_v57, %v8721_v50  ;;  %22645 = vst [vmem:[#allocation95_spill] sm:$0xff] %v20469_v37 }
 0xd28   :  { %v8771_v23 = vrot.slane %v8770_v18, 2 }
 0xd29   :  { %v8736_v58 = vrot.slane %v8735_v54, 4 }
 0xd2a   :  { %v8772_v30 = vadd.f32 %v8771_v23, %v8770_v18 }
 0xd2b   :  { %v8737_v35 = vadd.f32 %v8736_v58, %v8735_v54  ;;  %v9129_v54 = vpop.permute.xlu1 %9128 }
 0xd2c   :  { %v8773_v26 = vrot.slane %v8772_v30, 1 }
 0xd2d   :  { %v8738_v36 = vrot.slane %v8737_v35, 2 }
 0xd2e   :  { %v8774_v33 = vadd.f32 %v8773_v26, %v8772_v30 }
 0xd2f   :  { %v8739_v28 = vadd.f32 %v8738_v36, %v8737_v35 }
 0xd30   :  { %11882 = vmatprep.mubr.msk.f32.mxu0 %vm8477_vm3, %v8774_v33 }
 0xd31   :  { %v8740_v56 = vrot.slane %v8739_v28, 1 }
 0xd33   :  { %v8741_v22 = vadd.f32 %v8740_v56, %v8739_v28 }
 0xd35   :  { %8843 = vmatmul.mubr.f32.vlgmr.msra.gmra.mrb[80].mxu0 %v8741_v22  ;;  %v22648_v22 = vld [vmem:[#allocation53_spill] sm:$0xff] }
 0xd36   :  { %12563 = vmatpush1.bf16.msra.mxu0 %v20267_v14  ;;  %8926 = vmatprep.mubr.f32.mxu0 %v22629_v4 }
 0xd37   :  { %12565 = vmatprep.subr.bf16.mxu0 %v20269_v52 }
 0xd3a   :  { %12567 = vmatpush1.bf16.msra.mxu0 %v20281_v45 }
 0xd3b   :  { %12569 = vmatprep.subr.bf16.mxu0 %v20153_v40 }
 0xe08   :  { %v8844_v46 = vpop.f32.mrb[80].mxu0 }
 0xe09   :  { %v8850_v42 = vsub.f32 %v8844_v46, %v8849_v24  ;;  %v8846_v48 = vpop.f32.mrb[81].mxu0 }
 0xe0a   :  { %v22654_v48 = vld [vmem:[#allocation77_spill] sm:$0xff] }
 0xe0b   :  { %v8851_v3 = vmul.f32 0.010204081, %v8850_v42 }
 0xe0d   :  { %v8853_v55 = vadd.f32 1e-05, %v8851_v3 }
 0xe0f   :  { %14151 = vrsqrt.f32 %v8853_v55  ;;  %v22655_v55 = vld [vmem:[#allocation83_spill] sm:$0xff] }
 0xe19   :  { %v14152_v19 = vpop.eup %14151 }
 0xe1a   :  { %v8855_v2 = vmul.f32 %v14152_v19, %v8852_v5  ;;  %v22656_v19 = vld [vmem:[#allocation74_spill] sm:$0xff] }
 0xe1c   :  { %11883 = vmatmul.mubr.msk.f32.vlgmr.msra.gmra.mrb[82].mxu0 %vm472_vm0, %v8855_v2  ;;  %v8857_v40 = vmul.f32 %v8855_v2, %v20285_v9  ;;  %v20413_v9 = vld [vmem:[%s21395_s13 + $0x90] sm:$0xff]  }
 0xe1d   :  { %12571 = vmatpush1.bf16.msra.mxu0 %v20267_v14  ;;  %9000 = vmatprep.mubr.f32.mxu0 %v22629_v4  ;;  %v20392_v14 = vld [vmem:[%s21395_s13 + $0x78] sm:$0xff]  }
 0xe1e   :  { %12573 = vmatprep.subr.bf16.mxu0 %v20269_v52  ;;  %v8858_v1 = vsub.f32 %v8856_v21, %v8857_v40  ;;  %v20399_v52 = vld [vmem:[%s21395_s13 + $0x80] sm:$0xff]   ;;  %v22657_v40 = vld [vmem:[#allocation80_spill] sm:$0xff] }
 0xe21   :  { %12575 = vmatpush1.bf16.msra.mxu0 %v20281_v45  ;;  %v20406_v45 = vld [vmem:[%s21395_s13 + $0x88] sm:$0xff]  }
 0xe22   :  { %9377 = vmatprep.subr.bf16.mxu0 %v22609_v31 }
 0xe24   :  { %11884 = vmatmul.mubr.msk.f32.vlgmr.msra.gmra.mrb[84].mxu0 %vm472_vm0, %v8858_v1 }
 0xe25   :  { %9378 = vmatpush1.bf16.msra.mxu0 %v20384_v63 }
 0xe26   :  { %9379 = vmatprep.subr.bf16.mxu0 %v22609_v31 }
 0xe29   :  { %9380 = vmatpush1.bf16.msra.mxu0 %v20392_v14 }
 0xe2a   :  { %9381 = vmatprep.subr.bf16.mxu0 %v22609_v31 }
 0xe2d   :  { %9382 = vmatpush1.bf16.msra.mxu0 %v20399_v52 }
 0xe2e   :  { %9383 = vmatprep.subr.bf16.mxu0 %v22609_v31 }
 0xe31   :  { %9384 = vmatpush1.bf16.msra.mxu0 %v20406_v45 }
 0xe32   :  { %9385 = vmatprep.subr.bf16.mxu0 %v22609_v31 }
 0xe35   :  { %9386 = vmatpush1.bf16.msra.mxu0 %v20413_v9 }
 0xe36   :  { %9387 = vmatprep.subr.bf16.mxu0 %v22609_v31 }
 0xe39   :  { %9388 = vmatpush1.bf16.msra.mxu0 %v20420_v8 }
 0xe3a   :  { %9389 = vmatprep.subr.bf16.mxu0 %v22609_v31 }
 0xe3d   :  { %9390 = vmatpush1.bf16.msra.mxu0 %v20427_v38 }
 0xe3e   :  { %9391 = vmatprep.subr.bf16.mxu0 %v22609_v31 }
 0xe41   :  { %9392 = vmatpush1.bf16.msra.mxu0 %v20434_v27 }
 0xe42   :  { %9393 = vmatprep.subr.bf16.mxu0 %v22609_v31 }
 0xe45   :  { %9394 = vmatpush1.bf16.msra.mxu0 %v20441_v15 }
 0xe46   :  { %9395 = vmatprep.subr.bf16.mxu0 %v22609_v31 }
 0xe49   :  { %9396 = vmatpush1.bf16.msra.mxu0 %v20449_v59 }
 0xe4a   :  { %9397 = vmatprep.subr.bf16.mxu0 %v22609_v31 }
 0xe4d   :  { %9398 = vmatpush1.bf16.msra.mxu0 %v20455_v61 }
 0xe4e   :  { %9399 = vmatprep.subr.bf16.mxu0 %v22609_v31 }
 0xe51   :  { %9400 = vmatpush1.bf16.msra.mxu0 %v20463_v12 }
 0xe52   :  { %9401 = vmatprep.subr.bf16.mxu0 %v22609_v31 }
 0xe55   :  { %9402 = vmatpush1.bf16.msra.mxu0 %v20469_v37 }
 0xe56   :  { %9403 = vmatprep.subr.bf16.mxu0 %v22609_v31 }
 0xe59   :  { %9404 = vmatpush1.bf16.msra.mxu0 %v20476_v53 }
 0xe5a   :  { %9505 = vmatprep.subr.bf16.mxu0 %v22609_v31 }
 0xeef   :  { %v8928_v7 = vpop.f32.mrb[82].mxu0 }
 0xef0   :  { %v9010_v39 = vrot.slane %v8928_v7, %v22644_v13  ;;  %v8930_v18 = vpop.f32.mrb[83].mxu0 }
 0xef1   :  { %v9014_v60 = vrot.slane %v8930_v18, %v22644_v13  ;;  %v22658_v18 = vld [vmem:[#allocation89_spill] sm:$0xff] }
 0xef2   :  { %v9019_v23 = vmul.f32 %v9010_v39, %v20171_v51  ;;  %v9021_v50 = vmul.f32 %v9010_v39, %v20178_v16  ;;  %v9015_v57 = vmul.f32 %v9010_v39, %v20157_v6  ;;  %v9017_v30 = vmul.f32 %v9010_v39, %v20161_v20  ;;  %v22647_v20 = vld [vmem:[#allocation59_spill] sm:$0xff] }
 0xef3   :  { %v9020_v26 = vmul.f32 %v9014_v60, %v20174_v29  ;;  %v9022_v58 = vmul.f32 %v9014_v60, %v20181_v62  ;;  %v9016_v33 = vmul.f32 %v9014_v60, %v20159_v10  ;;  %v9018_v35 = vmul.f32 %v9014_v60, %v20165_v34  ;;  %v22649_v62 = vld [vmem:[#allocation56_spill] sm:$0xff]  ;;  %v22650_v10 = vld [vmem:[#allocation65_spill] sm:$0xff] }
 0xef4   :  { %v9024_v36 = vmul.f32 %v9014_v60, %v20188_v44  ;;  %v9026_v28 = vmul.f32 %v9014_v60, %v20195_v25  ;;  %v9023_v51 = vmul.f32 %v9010_v39, %v20185_v17  ;;  %v9025_v16 = vmul.f32 %v9010_v39, %v20192_v49  ;;  %v22651_v44 = vld [vmem:[#allocation71_spill] sm:$0xff]  ;;  %v22652_v25 = vld [vmem:[#allocation62_spill] sm:$0xff]  ;;  %v22653_v49 = vld [vmem:[#allocation68_spill] sm:$0xff] }
 0xef5   :  { %v9028_v6 = vmul.f32 %v9014_v60, %v20202_v47  ;;  %v9030_v56 = vmul.f32 %v9014_v60, %v22647_v20  ;;  %v20502_v29 = vmul.f32 %v9010_v39, %v22648_v22  ;;  %v20505_v0 = vmul.f32 %v9010_v39, %v22649_v62  ;;  %v20519_v47 = vpop.permute.xlu0 %9143  ;;  %v22659_v22 = vld [vmem:[#allocation92_spill] sm:$0xff] }
 0xef6   :  { %v20508_v34 = vmul.f32 %v9014_v60, %v22650_v10  ;;  %v20511_v24 = vmul.f32 %v9014_v60, %v22651_v44  ;;  %v20514_v17 = vmul.f32 %v9010_v39, %v22652_v25  ;;  %v20517_v46 = vmul.f32 %v9010_v39, %v22653_v49  ;;  %v22660_v10 = vld [vmem:[#allocation86_spill] sm:$0xff]  ;;  %v9149_v25 = vpop.permute.xlu1 %9148 }
 0xef7   :  { %v9002_v42 = vpop.f32.mrb[84].mxu0  ;;  %v20522_v3 = vmul.f32 %v9014_v60, %v22654_v48  ;;  %v20525_v5 = vmul.f32 %v9014_v60, %v22655_v55  ;;  %v20528_v2 = vmul.f32 %v9010_v39, %v22656_v19  ;;  %v20531_v21 = vmul.f32 %v9010_v39, %v22657_v40 }
 0xef8   :  { %v20534_v1 = vrot.slane %v9002_v42, %v22644_v13  ;;  %v9004_v7 = vpop.f32.mrb[85].mxu0  ;;  %v20537_v20 = vmul.f32 %v9014_v60, %v22658_v18  ;;  %v20540_v62 = vmul.f32 %v9014_v60, %v22659_v22  ;;  %v20543_v44 = vmul.f32 %v9010_v39, %v22660_v10 }
 0xef9   :  { %v20546_v49 = vrot.slane %v9004_v7, %v22644_v13  ;;  %v20549_v48 = vmul.f32 %v9010_v39, %v20248_v41  ;;  %v9154_v4 = vpop.permute.xlu0 %9153 }
 0xefa   :  { %v9055_v42 = vadd.f32 %v20534_v1, %v9019_v23  ;;  %v9057_v55 = vadd.f32 %v20534_v1, %v9021_v50  ;;  %v9051_v19 = vadd.f32 %v20534_v1, %v9015_v57  ;;  %v9053_v40 = vadd.f32 %v20534_v1, %v9017_v30 }
 0xefb   :  { %v9056_v60 = vadd.f32 %v20546_v49, %v9020_v26  ;;  %v9058_v18 = vadd.f32 %v20546_v49, %v9022_v58  ;;  %v9052_v22 = vadd.f32 %v20546_v49, %v9016_v33  ;;  %v9054_v7 = vadd.f32 %v20546_v49, %v9018_v35  ;;  %v9159_v33 = vpop.permute.xlu1 %9158 }
 0xefc   :  { %v9083_v10 = vmax.f32 %v9055_v42, 0.0  ;;  %v9085_v13 = vmax.f32 %v9057_v55, 0.0  ;;  %v9079_v41 = vmax.f32 %v9051_v19, 0.0  ;;  %v9081_v39 = vmax.f32 %v9053_v40, 0.0 }
 0xefd   :  { %v9084_v23 = vmax.f32 %v9056_v60, 0.0  ;;  %v9086_v53 = vmax.f32 %v9058_v18, 0.0  ;;  %v9080_v50 = vmax.f32 %v9052_v22, 0.0  ;;  %v9082_v37 = vmax.f32 %v9054_v7, 0.0  ;;  %v20574_v7 = vld [vmem:[%s21395_s13] sm:$0xff]  }
 0xefe   :  { %v9195_v57 = vmul.f32 %v20481_v43, %v9083_v10  ;;  %v9197_v30 = vmul.f32 %v20483_v11, %v9085_v13  ;;  %v20561_v26 = vmul.f32 %v9124_v32, %v9079_v41  ;;  %v20563_v58 = vmul.f32 %v9129_v54, %v9081_v39 }
 0xeff   :  { %v9196_v35 = vmul.f32 %v20481_v43, %v9084_v23  ;;  %v9198_v42 = vmul.f32 %v20483_v11, %v9086_v53  ;;  %v9192_v55 = vmul.f32 %v9124_v32, %v9080_v50  ;;  %v9194_v19 = vmul.f32 %v9129_v54, %v9082_v37 }
 0xf00   :  { %v9221_v40 = vpack.c.bf16 %v9197_v30, %v9195_v57  ;;  %v9219_v60 = vpack.c.bf16 %v20563_v58, %v20561_v26  ;;  %v9060_v18 = vadd.f32 %v20546_v49, %v9024_v36  ;;  %v9062_v22 = vadd.f32 %v20546_v49, %v9026_v28  ;;  %v9164_v36 = vpop.permute.xlu0 %9163  ;;  %v20769_v26 = vld [vmem:[%s21395_s13 + $0xf8] sm:$0xff]   ;;  %v20776_v58 = vld [vmem:[%s21395_s13 + $0x100] sm:$0xff]  }
 0xf01   :  { %v9222_v13 = vpack.c.bf16 %v9198_v42, %v9196_v35  ;;  %v9220_v10 = vpack.c.bf16 %v9194_v19, %v9192_v55  ;;  %v9059_v43 = vadd.f32 %v20534_v1, %v9023_v51  ;;  %v9061_v53 = vadd.f32 %v20534_v1, %v9025_v16 }
 0xf02   :  { %v9088_v37 = vmax.f32 %v9060_v18, 0.0  ;;  %v9090_v11 = vmax.f32 %v9062_v22, 0.0  ;;  %v9064_v32 = vadd.f32 %v20546_v49, %v9028_v6  ;;  %v9066_v54 = vadd.f32 %v20546_v49, %v9030_v56  ;;  %v9169_v6 = vpop.permute.xlu1 %9168  ;;  %v20591_v56 = vld [vmem:[%s21395_s13 + $0x8] sm:$0xff]  }
 0xf03   :  { %11927 = vmatprep.mubr.msk.bf16.mxu0 %vm8477_vm3, %v9222_v13  ;;  %v9087_v28 = vmax.f32 %v9059_v43, 0.0  ;;  %v9089_v41 = vmax.f32 %v9061_v53, 0.0  ;;  %v9063_v39 = vadd.f32 %v20534_v1, %v20502_v29  ;;  %v9065_v23 = vadd.f32 %v20534_v1, %v20505_v0 }
 0xf04   :  { %9410 = vmatmul.mubr.bf16.vlgmr.msra.gmra.mrb[88].mxu0 %v9221_v40  ;;  %v9200_v51 = vmul.f32 %v20519_v47, %v9088_v37  ;;  %v9202_v16 = vmul.f32 %v9149_v25, %v9090_v11  ;;  %v9092_v50 = vmax.f32 %v9064_v32, 0.0  ;;  %v9094_v57 = vmax.f32 %v9066_v54, 0.0  ;;  %v9174_v37 = vpop.permute.xlu0 %9173 }
 0xf05   :  { %9506 = vmatpush1.bf16.msra.mxu0 %v20574_v7  ;;  %11942 = vmatprep.mubr.msk.bf16.mxu0 %vm8477_vm3, %v9220_v10  ;;  %v9199_v29 = vmul.f32 %v20519_v47, %v9087_v28  ;;  %v9201_v30 = vmul.f32 %v9149_v25, %v9089_v41  ;;  %v9091_v0 = vmax.f32 %v9063_v39, 0.0  ;;  %v9093_v35 = vmax.f32 %v9065_v23, 0.0 }
 0xf06   :  { %9507 = vmatprep.subr.bf16.mxu0 %v22609_v31  ;;  %v20595_v42 = vpack.c.bf16 %v9202_v16, %v9200_v51  ;;  %v9204_v55 = vmul.f32 %v9154_v4, %v9092_v50  ;;  %v9206_v19 = vmul.f32 %v9159_v33, %v9094_v57  ;;  %v9068_v40 = vadd.f32 %v20546_v49, %v20508_v34  ;;  %v9179_v28 = vpop.permute.xlu1 %9178  ;;  %v20632_v57 = vld [vmem:[%s21395_s13 + $0x18] sm:$0xff]  }
 0xf07   :  { %v20599_v18 = vpack.c.bf16 %v9201_v30, %v9199_v29  ;;  %v9203_v22 = vmul.f32 %v9154_v4, %v9091_v0  ;;  %v9205_v13 = vmul.f32 %v9159_v33, %v9093_v35  ;;  %v9070_v10 = vadd.f32 %v20546_v49, %v20511_v24  ;;  %v20613_v4 = vld [vmem:[%s21395_s13 + $0x10] sm:$0xff]  }
 0xf08   :  { %v20603_v47 = vpack.c.bf16 %v9206_v19, %v9204_v55  ;;  %v9096_v25 = vmax.f32 %v9068_v40, 0.0  ;;  %v9067_v43 = vadd.f32 %v20534_v1, %v20514_v17  ;;  %v9069_v53 = vadd.f32 %v20534_v1, %v20517_v46  ;;  %v9184_v35 = vpop.permute.xlu0 %9183  ;;  %v20905_v55 = vld [vmem:[%s21395_s13 + $0x190] sm:$0xff]  }
 0xf09   :  { %9508 = vmatpush1.bf16.msra.mxu0 %v20591_v56  ;;  %v20615_v34 = vpack.c.bf16 %v9205_v13, %v9203_v22  ;;  %v9098_v24 = vmax.f32 %v9070_v10, 0.0  ;;  %v9072_v33 = vadd.f32 %v20546_v49, %v20522_v3  ;;  %v9074_v17 = vadd.f32 %v20546_v49, %v20525_v5 }
 0xf0a   :  { %9509 = vmatprep.subr.bf16.mxu0 %v22609_v31  ;;  %v9208_v46 = vmul.f32 %v9164_v36, %v9096_v25  ;;  %v9095_v11 = vmax.f32 %v9067_v43, 0.0  ;;  %v9097_v32 = vmax.f32 %v9069_v53, 0.0  ;;  %v9071_v54 = vadd.f32 %v20534_v1, %v20528_v2  ;;  %v9189_v25 = vpop.permute.xlu1 %9188 }
 0xf0b   :  { %v9210_v41 = vmul.f32 %v9169_v6, %v9098_v24  ;;  %v9100_v39 = vmax.f32 %v9072_v33, 0.0  ;;  %v9102_v23 = vmax.f32 %v9074_v17, 0.0  ;;  %v9073_v51 = vadd.f32 %v20534_v1, %v20531_v21  ;;  %v20678_v24 = vld [vmem:[%s21395_s13 + $0x28] sm:$0xff]   ;;  %v20687_v17 = vld [vmem:[%s21395_s13 + $0x30] sm:$0xff]   ;;  %v20884_v33 = vld [vmem:[%s21395_s13 + $0x178] sm:$0xff]  }
 0xf0c   :  { %v9207_v16 = vmul.f32 %v9164_v36, %v9095_v11  ;;  %v9209_v3 = vmul.f32 %v9169_v6, %v9097_v32  ;;  %v9099_v50 = vmax.f32 %v9071_v54, 0.0  ;;  %v9076_v5 = vadd.f32 %v20546_v49, %v20537_v20  ;;  %v20701_v11 = vld [vmem:[%s21395_s13 + $0x40] sm:$0xff]   ;;  %v20708_v32 = vld [vmem:[%s21395_s13 + $0x48] sm:$0xff]   ;;  %v20715_v54 = vld [vmem:[%s21395_s13 + $0x50] sm:$0xff]  }
 0xf0d   :  { %9510 = vmatpush1.bf16.msra.mxu0 %v20613_v4  ;;  %v20634_v2 = vpack.c.bf16 %v9210_v41, %v9208_v46  ;;  %v20636_v29 = vmul.f32 %v9174_v37, %v9100_v39  ;;  %v20638_v30 = vmul.f32 %v9179_v28, %v9102_v23  ;;  %v9101_v21 = vmax.f32 %v9073_v51, 0.0  ;;  %v20694_v46 = vld [vmem:[%s21395_s13 + $0x38] sm:$0xff]   ;;  %v20729_v41 = vld [vmem:[%s21395_s13 + $0x60] sm:$0xff]   ;;  %v20736_v39 = vld [vmem:[%s21395_s13 + $0x68] sm:$0xff]  }
 0xf0e   :  { %9511 = vmatprep.subr.bf16.mxu0 %v22609_v31  ;;  %v20641_v36 = vpack.c.bf16 %v9209_v3, %v9207_v16  ;;  %v20643_v6 = vmul.f32 %v9174_v37, %v9099_v50  ;;  %v9078_v20 = vadd.f32 %v20546_v49, %v20540_v62  ;;  %v9104_v0 = vmax.f32 %v9076_v5, 0.0  ;;  %v20661_v62 = vld [vmem:[%s21395_s13 + $0x20] sm:$0xff]   ;;  %v20755_v51 = vld [vmem:[%s21395_s13 + $0xe8] sm:$0xff]   ;;  %v20762_v16 = vld [vmem:[%s21395_s13 + $0xf0] sm:$0xff]  }
 0xf0f   :  { %v20649_v19 = vmul.f32 %v9179_v28, %v9101_v21  ;;  %v9075_v40 = vadd.f32 %v20534_v1, %v20543_v44  ;;  %v9077_v22 = vadd.f32 %v20534_v1, %v20549_v48  ;;  %v20722_v28 = vld [vmem:[%s21395_s13 + $0x58] sm:$0xff]   ;;  %v20743_v23 = vld [vmem:[%s21395_s13 + $0xe0] sm:$0xff]   ;;  %v20790_v3 = vld [vmem:[%s21395_s13 + $0x110] sm:$0xff]  }
 0xf10   :  { %22661 = vst [vmem:[#allocation101_spill] sm:$0xff] %v20643_v6  ;;  %v9106_v13 = vmax.f32 %v9078_v20, 0.0  ;;  %v20655_v10 = vmul.f32 %v9184_v35, %v9104_v0  ;;  %v20797_v50 = vld [vmem:[%s21395_s13 + $0x118] sm:$0xff]   ;;  %v20804_v5 = vld [vmem:[%s21395_s13 + $0x120] sm:$0xff]   ;;  %v20811_v21 = vld [vmem:[%s21395_s13 + $0x128] sm:$0xff]  }
 0xf11   :  { %22662 = vst [vmem:[#allocation126_spill] sm:$0xff] %v20649_v19  ;;  %9512 = vmatpush1.bf16.msra.mxu0 %v20632_v57  ;;  %v9103_v43 = vmax.f32 %v9075_v40, 0.0  ;;  %v9105_v53 = vmax.f32 %v9077_v22, 0.0  ;;  %v20818_v20 = vld [vmem:[%s21395_s13 + $0x130] sm:$0xff]   ;;  %v20825_v0 = vld [vmem:[%s21395_s13 + $0x138] sm:$0xff]   ;;  %v20839_v40 = vld [vmem:[%s21395_s13 + $0x148] sm:$0xff]  }
 0xf12   :  { %22663 = vst [vmem:[#allocation127_spill] sm:$0xff] %v20655_v10  ;;  %9513 = vmatprep.subr.bf16.mxu0 %v22609_v31  ;;  %v20666_v44 = vmul.f32 %v9189_v25, %v9106_v13  ;;  %v20846_v22 = vld [vmem:[%s21395_s13 + $0x150] sm:$0xff]   ;;  %v20856_v13 = vld [vmem:[%s21395_s13 + $0x158] sm:$0xff]   ;;  %v20891_v37 = vld [vmem:[%s21395_s13 + $0x180] sm:$0xff]  }
 0xf13   :  { %v20668_v1 = vmul.f32 %v9184_v35, %v9103_v43  ;;  %v20670_v48 = vmul.f32 %v9189_v25, %v9105_v53  ;;  %v20832_v35 = vld [vmem:[%s21395_s13 + $0x140] sm:$0xff]   ;;  %v20870_v43 = vld [vmem:[%s21395_s13 + $0x168] sm:$0xff]   ;;  %v20877_v53 = vld [vmem:[%s21395_s13 + $0x170] sm:$0xff]  }
 0xf14   :  { %22664 = vst [vmem:[#allocation128_spill] sm:$0xff] %v20666_v44  ;;  %v20863_v25 = vld [vmem:[%s21395_s13 + $0x160] sm:$0xff]   ;;  %v20898_v49 = vld [vmem:[%s21395_s13 + $0x188] sm:$0xff]   ;;  %v20933_v44 = vld [vmem:[%s21395_s13 + $0x1b0] sm:$0xff]  }
 0xf15   :  { %22665 = vst [vmem:[#allocation109_spill] sm:$0xff] %v20668_v1  ;;  %22666 = vst [vmem:[#allocation157_spill] sm:$0xff] %v20670_v48  ;;  %9514 = vmatpush1.bf16.msra.mxu0 %v20661_v62  ;;  %v20912_v1 = vld [vmem:[%s21395_s13 + $0x198] sm:$0xff]   ;;  %v20919_v48 = vld [vmem:[%s21395_s13 + $0x1a0] sm:$0xff]  }
 0xf16   :  { %9515 = vmatprep.subr.bf16.mxu0 %v22609_v31  ;;  %v20926_v10 = vld [vmem:[%s21395_s13 + $0x1a8] sm:$0xff]   ;;  %22667 = vst [vmem:[#allocation125_spill] sm:$0xff] %v20933_v44  ;;  %v20940_v6 = vld [vmem:[%s21395_s13 + $0x1b8] sm:$0xff]   ;;  %v20947_v19 = vld [vmem:[%s21395_s13 + $0x1c0] sm:$0xff]  }
 0xf17   :  { %22668 = vst [vmem:[#allocation158_spill] sm:$0xff] %v20940_v6  ;;  %22669 = vst [vmem:[#allocation159_spill] sm:$0xff] %v20947_v19 }
 0xf19   :  { %9516 = vmatpush1.bf16.msra.mxu0 %v20678_v24 }
 0xf1a   :  { %9517 = vmatprep.subr.bf16.mxu0 %v22609_v31 }
 0xf1d   :  { %9518 = vmatpush1.bf16.msra.mxu0 %v20687_v17 }
 0xf1e   :  { %9519 = vmatprep.subr.bf16.mxu0 %v22609_v31 }
 0xf21   :  { %9520 = vmatpush1.bf16.msra.mxu0 %v20694_v46 }
 0xf22   :  { %9521 = vmatprep.subr.bf16.mxu0 %v22609_v31 }
 0xf25   :  { %9522 = vmatpush1.bf16.msra.mxu0 %v20701_v11 }
 0xf26   :  { %9523 = vmatprep.subr.bf16.mxu0 %v22609_v31 }
 0xf29   :  { %9524 = vmatpush1.bf16.msra.mxu0 %v20708_v32 }
 0xf2a   :  { %9525 = vmatprep.subr.bf16.mxu0 %v22609_v31 }
 0xf2d   :  { %9526 = vmatpush1.bf16.msra.mxu0 %v20715_v54 }
 0xf2e   :  { %9527 = vmatprep.subr.bf16.mxu0 %v22609_v31 }
 0xf31   :  { %9528 = vmatpush1.bf16.msra.mxu0 %v20722_v28 }
 0xf32   :  { %9529 = vmatprep.subr.bf16.mxu0 %v22609_v31 }
 0xf35   :  { %9530 = vmatpush1.bf16.msra.mxu0 %v20729_v41 }
 0xf36   :  { %9531 = vmatprep.subr.bf16.mxu0 %v22609_v31 }
 0xf39   :  { %9532 = vmatpush1.bf16.msra.mxu0 %v20736_v39 }
 0xf3a   :  { %9662 = vmatprep.subr.bf16.mxu0 %v22609_v31 }
 0xf3c   :  { %9538 = vmatmul.mubr.bf16.vlgmr.msra.gmra.mrb[88].mxu0 %v9219_v60  ;;  %v20783_v60 = vld [vmem:[%s21395_s13 + $0x108] sm:$0xff]  }
 0xf3d   :  { %9663 = vmatpush1.bf16.msra.mxu0 %v20743_v23  ;;  %11985 = vmatprep.mubr.msk.bf16.mxu0 %vm8477_vm3, %v20595_v42 }
 0xf3e   :  { %9664 = vmatprep.subr.bf16.mxu0 %v22609_v31 }
 0xf41   :  { %9665 = vmatpush1.bf16.msra.mxu0 %v20755_v51 }
 0xf42   :  { %9666 = vmatprep.subr.bf16.mxu0 %v22609_v31 }
 0xf45   :  { %9667 = vmatpush1.bf16.msra.mxu0 %v20762_v16 }
 0xf46   :  { %9668 = vmatprep.subr.bf16.mxu0 %v22609_v31 }
 0xf49   :  { %9669 = vmatpush1.bf16.msra.mxu0 %v20769_v26 }
 0xf4a   :  { %9670 = vmatprep.subr.bf16.mxu0 %v22609_v31 }
 0xf4d   :  { %9671 = vmatpush1.bf16.msra.mxu0 %v20776_v58 }
 0xf4e   :  { %9672 = vmatprep.subr.bf16.mxu0 %v22609_v31 }
 0xf51   :  { %9673 = vmatpush1.bf16.msra.mxu0 %v20783_v60 }
 0xf52   :  { %9674 = vmatprep.subr.bf16.mxu0 %v22609_v31 }
 0xf55   :  { %9675 = vmatpush1.bf16.msra.mxu0 %v20790_v3 }
 0xf56   :  { %9676 = vmatprep.subr.bf16.mxu0 %v22609_v31 }
 0xf59   :  { %9677 = vmatpush1.bf16.msra.mxu0 %v20797_v50 }
 0xf5a   :  { %9678 = vmatprep.subr.bf16.mxu0 %v22609_v31 }
 0xf5d   :  { %9679 = vmatpush1.bf16.msra.mxu0 %v20804_v5 }
 0xf5e   :  { %9680 = vmatprep.subr.bf16.mxu0 %v22609_v31 }
 0xf61   :  { %9681 = vmatpush1.bf16.msra.mxu0 %v20811_v21 }
 0xf62   :  { %9682 = vmatprep.subr.bf16.mxu0 %v22609_v31 }
 0xf65   :  { %9683 = vmatpush1.bf16.msra.mxu0 %v20818_v20 }
 0xf66   :  { %9684 = vmatprep.subr.bf16.mxu0 %v22609_v31 }
 0xf69   :  { %9685 = vmatpush1.bf16.msra.mxu0 %v20825_v0 }
 0xf6a   :  { %9686 = vmatprep.subr.bf16.mxu0 %v22609_v31 }
 0xf6d   :  { %9687 = vmatpush1.bf16.msra.mxu0 %v20832_v35 }
 0xf6e   :  { %9688 = vmatprep.subr.bf16.mxu0 %v22609_v31 }
 0xf71   :  { %9689 = vmatpush1.bf16.msra.mxu0 %v20839_v40 }
 0xf72   :  { %9821 = vmatprep.subr.bf16.mxu0 %v22609_v31 }
 0xf74   :  { %9695 = vmatmul.mubr.bf16.vlgmr.msra.gmra.mrb[88].mxu0 %v20599_v18 }
 0xf75   :  { %9822 = vmatpush1.bf16.msra.mxu0 %v20846_v22  ;;  %12028 = vmatprep.mubr.msk.bf16.mxu0 %vm8477_vm3, %v20603_v47 }
 0xf76   :  { %9823 = vmatprep.subr.bf16.mxu0 %v22609_v31 }
 0xf79   :  { %9824 = vmatpush1.bf16.msra.mxu0 %v20856_v13 }
 0xf7a   :  { %9825 = vmatprep.subr.bf16.mxu0 %v22609_v31 }
 0xf7d   :  { %9826 = vmatpush1.bf16.msra.mxu0 %v20863_v25 }
 0xf7e   :  { %9827 = vmatprep.subr.bf16.mxu0 %v22609_v31 }
 0xf81   :  { %9828 = vmatpush1.bf16.msra.mxu0 %v20870_v43 }
 0xf82   :  { %9829 = vmatprep.subr.bf16.mxu0 %v22609_v31 }
 0xf85   :  { %9830 = vmatpush1.bf16.msra.mxu0 %v20877_v53 }
 0xf86   :  { %9831 = vmatprep.subr.bf16.mxu0 %v22609_v31 }
 0xf89   :  { %9832 = vmatpush1.bf16.msra.mxu0 %v20884_v33 }
 0xf8a   :  { %9833 = vmatprep.subr.bf16.mxu0 %v22609_v31 }
 0xf8d   :  { %9834 = vmatpush1.bf16.msra.mxu0 %v20891_v37 }
 0xf8e   :  { %9835 = vmatprep.subr.bf16.mxu0 %v22609_v31 }
 0xf91   :  { %9836 = vmatpush1.bf16.msra.mxu0 %v20898_v49 }
 0xf92   :  { %9837 = vmatprep.subr.bf16.mxu0 %v22609_v31 }
 0xf95   :  { %9838 = vmatpush1.bf16.msra.mxu0 %v20905_v55 }
 0xf96   :  { %9839 = vmatprep.subr.bf16.mxu0 %v22609_v31 }
 0xf99   :  { %9840 = vmatpush1.bf16.msra.mxu0 %v20912_v1 }
 0xf9a   :  { %9841 = vmatprep.subr.bf16.mxu0 %v22609_v31 }
 0xf9d   :  { %9842 = vmatpush1.bf16.msra.mxu0 %v20919_v48 }
 0xf9e   :  { %9843 = vmatprep.subr.bf16.mxu0 %v22609_v31 }
 0xfa1   :  { %9844 = vmatpush1.bf16.msra.mxu0 %v20926_v10 }
 0xfa2   :  { %9845 = vmatprep.subr.bf16.mxu0 %v22609_v31 }
 0xfa5   :  { %9846 = vmatpush1.bf16.msra.mxu0 %v20933_v44  ;;  %v20957_v44 = vld [vmem:[%s21395_s13 + $0x1c8] sm:$0xff]  }
 0xfa6   :  { %9847 = vmatprep.subr.bf16.mxu0 %v22609_v31  ;;  %22670 = vst [vmem:[#allocation160_spill] sm:$0xff] %v20957_v44 }
 0xfa9   :  { %9848 = vmatpush1.bf16.msra.mxu0 %v20940_v6  ;;  %v20964_v6 = vld [vmem:[%s21395_s13 + $0x1d0] sm:$0xff]  }
 0xfaa   :  { %9980 = vmatprep.subr.bf16.mxu0 %v22609_v31  ;;  %22671 = vst [vmem:[#allocation129_spill] sm:$0xff] %v20964_v6 }
 0xfac   :  { %9854 = vmatmul.mubr.bf16.vlgmr.msra.gmra.mrb[88].mxu0 %v20615_v34 }
 0xfad   :  { %9981 = vmatpush1.bf16.msra.mxu0 %v20947_v19  ;;  %12071 = vmatprep.mubr.msk.bf16.mxu0 %vm8477_vm3, %v20634_v2  ;;  %v20971_v19 = vld [vmem:[%s21395_s13 + $0x1d8] sm:$0xff]  }
 0xfae   :  { %9982 = vmatprep.subr.bf16.mxu0 %v22609_v31  ;;  %22672 = vst [vmem:[#allocation161_spill] sm:$0xff] %v20971_v19 }
 0xfb1   :  { %9983 = vmatpush1.bf16.msra.mxu0 %v20957_v44  ;;  %v20978_v44 = vld [vmem:[%s21395_s13 + $0x1e0] sm:$0xff]  }
 0xfb2   :  { %9984 = vmatprep.subr.bf16.mxu0 %v22609_v31  ;;  %22673 = vst [vmem:[#allocation130_spill] sm:$0xff] %v20978_v44 }
 0xfb5   :  { %9985 = vmatpush1.bf16.msra.mxu0 %v20964_v6  ;;  %v20985_v6 = vld [vmem:[%s21395_s13 + $0x1e8] sm:$0xff]  }
 0xfb6   :  { %9986 = vmatprep.subr.bf16.mxu0 %v22609_v31  ;;  %22674 = vst [vmem:[#allocation131_spill] sm:$0xff] %v20985_v6 }
 0xfb9   :  { %9987 = vmatpush1.bf16.msra.mxu0 %v20971_v19  ;;  %v20992_v19 = vld [vmem:[%s21395_s13 + $0x1f0] sm:$0xff]  }
 0xfba   :  { %9988 = vmatprep.subr.bf16.mxu0 %v22609_v31  ;;  %22675 = vst [vmem:[#allocation142_spill] sm:$0xff] %v20992_v19 }
 0xfbd   :  { %9989 = vmatpush1.bf16.msra.mxu0 %v20978_v44  ;;  %v20999_v44 = vld [vmem:[%s21395_s13 + $0x1f8] sm:$0xff]  }
 0xfbe   :  { %9990 = vmatprep.subr.bf16.mxu0 %v22609_v31  ;;  %22676 = vst [vmem:[#allocation133_spill] sm:$0xff] %v20999_v44 }
 0xfc1   :  { %9991 = vmatpush1.bf16.msra.mxu0 %v20985_v6  ;;  %v21006_v6 = vld [vmem:[%s21395_s13 + $0x200] sm:$0xff]  }
 0xfc2   :  { %9992 = vmatprep.subr.bf16.mxu0 %v22609_v31  ;;  %22677 = vst [vmem:[#allocation144_spill] sm:$0xff] %v21006_v6 }
 0xfc5   :  { %9993 = vmatpush1.bf16.msra.mxu0 %v20992_v19  ;;  %v21013_v19 = vld [vmem:[%s21395_s13 + $0x208] sm:$0xff]  }
 0xfc6   :  { %9994 = vmatprep.subr.bf16.mxu0 %v22609_v31  ;;  %22678 = vst [vmem:[#allocation134_spill] sm:$0xff] %v21013_v19 }
 0xfc9   :  { %9995 = vmatpush1.bf16.msra.mxu0 %v20999_v44  ;;  %v21020_v44 = vld [vmem:[%s21395_s13 + $0x210] sm:$0xff]  }
 0xfca   :  { %9996 = vmatprep.subr.bf16.mxu0 %v22609_v31  ;;  %22679 = vst [vmem:[#allocation145_spill] sm:$0xff] %v21020_v44 }
 0xfcd   :  { %9997 = vmatpush1.bf16.msra.mxu0 %v21006_v6  ;;  %v21027_v6 = vld [vmem:[%s21395_s13 + $0x218] sm:$0xff]  }
 0xfce   :  { %9998 = vmatprep.subr.bf16.mxu0 %v22609_v31 }
 0xfd1   :  { %9999 = vmatpush1.bf16.msra.mxu0 %v21013_v19  ;;  %v21034_v19 = vld [vmem:[%s21395_s13 + $0x220] sm:$0xff]  }
 0xfd2   :  { %10000 = vmatprep.subr.bf16.mxu0 %v22609_v31 }
 0xfd5   :  { %10001 = vmatpush1.bf16.msra.mxu0 %v21020_v44  ;;  %v21041_v44 = vld [vmem:[%s21395_s13 + $0x228] sm:$0xff]  }
 0xfd6   :  { %10002 = vmatprep.subr.bf16.mxu0 %v22609_v31 }
 0xfd9   :  { %10003 = vmatpush1.bf16.msra.mxu0 %v21027_v6 }
 0xfda   :  { %10004 = vmatprep.subr.bf16.mxu0 %v22609_v31 }
 0xfdd   :  { %10005 = vmatpush1.bf16.msra.mxu0 %v21034_v19 }
 0xfde   :  { %10006 = vmatprep.subr.bf16.mxu0 %v22609_v31 }
 0xfe1   :  { %10007 = vmatpush1.bf16.msra.mxu0 %v21041_v44 }
 0xfe2   :  { %10023 = vmatprep.subr.bf16.mxu0 %v22609_v31 }
 0xfe4   :  { %10013 = vmatmul.mubr.bf16.vlgmr.msra.gmra.mrb[88].mxu0 %v20641_v36 }
 0xfe5   :  { %10024 = vmatpush1.bf16.msra.mxu0 %v20384_v63  ;;  %12072 = vmatprep.mubr.msk.bf16.mxu0 %vm8477_vm3, %v20603_v47  ;;  %v22680_v63 = vld [vmem:[#allocation95_spill] sm:$0xff] }
 0xfe6   :  { %10025 = vmatprep.subr.bf16.mxu0 %v22609_v31 }
 0xfe9   :  { %10026 = vmatpush1.bf16.msra.mxu0 %v20392_v14  ;;  %v22681_v14 = vld [vmem:[#allocation98_spill] sm:$0xff] }
 0xfea   :  { %10027 = vmatprep.subr.bf16.mxu0 %v22609_v31 }
 0xfed   :  { %10028 = vmatpush1.bf16.msra.mxu0 %v20399_v52  ;;  %v10240_v52 = vld [vmem:[%s21398_s16] sm:$0xff] }
 0xfee   :  { %10029 = vmatprep.subr.bf16.mxu0 %v22609_v31 }
 0xff1   :  { %10030 = vmatpush1.bf16.msra.mxu0 %v20406_v45  ;;  %v10241_v45 = vld [vmem:[%s21398_s16 + $0x8] sm:$0xff] }
 0xff2   :  { %10031 = vmatprep.subr.bf16.mxu0 %v22609_v31 }
 0xff5   :  { %10032 = vmatpush1.bf16.msra.mxu0 %v20413_v9  ;;  %v10242_v9 = vld [vmem:[%s21398_s16 + $0x10] sm:$0xff] }
 0xff6   :  { %10033 = vmatprep.subr.bf16.mxu0 %v22609_v31 }
 0xff9   :  { %10034 = vmatpush1.bf16.msra.mxu0 %v20420_v8  ;;  %v21142_v8 = vpack.c.bf16 %v10241_v45, %v10240_v52 }
 0xffa   :  { %10035 = vmatprep.subr.bf16.mxu0 %v22609_v31 }
 0xffb   :  { %12578 = vmatpush3.bf16.msra.mxu1 %v21142_v8 }
 0xffd   :  { %10036 = vmatpush1.bf16.msra.mxu0 %v20427_v38  ;;  %v10243_v38 = vld [vmem:[%s21398_s16 + $0x18] sm:$0xff] }
 0xffe   :  { %10037 = vmatprep.subr.bf16.mxu0 %v22609_v31 }
0x1001   :  { %10038 = vmatpush1.bf16.msra.mxu0 %v20434_v27  ;;  %v21148_v27 = vpack.c.bf16 %v10243_v38, %v10242_v9  ;;  %v10250_v38 = vld [vmem:[%s21399_s17 + $0x10] sm:$0xff] }
0x1002   :  { %10039 = vmatprep.subr.bf16.mxu0 %v22609_v31 }
0x1005   :  { %10040 = vmatpush1.bf16.msra.mxu0 %v20441_v15  ;;  %v22682_v15 = vmov 0.0|0.0  }
0x1006   :  { %10041 = vmatprep.subr.bf16.mxu0 %v22609_v31  ;;  %12579 = vmatprep.subr.bf16.mxu1 %v22682_v15 }
0x1007   :  { %12581 = vmatpush3.bf16.msra.mxu1 %v21148_v27 }
0x1008   :  { %12582 = vmatprep.subr.bf16.mxu1 %v22682_v15 }
0x1009   :  { %10042 = vmatpush1.bf16.msra.mxu0 %v20449_v59  ;;  %v10244_v59 = vld [vmem:[%s21398_s16 + $0x20] sm:$0xff] }
0x100a   :  { %10043 = vmatprep.subr.bf16.mxu0 %v22609_v31 }
0x100d   :  { %10044 = vmatpush1.bf16.msra.mxu0 %v20455_v61  ;;  %v10245_v61 = vld [vmem:[%s21398_s16 + $0x28] sm:$0xff] }
0x100e   :  { %10045 = vmatprep.subr.bf16.mxu0 %v22609_v31 }
0x1011   :  { %10046 = vmatpush1.bf16.msra.mxu0 %v20463_v12  ;;  %v21160_v12 = vpack.c.bf16 %v10245_v61, %v10244_v59  ;;  %v10251_v59 = vld [vmem:[%s21399_s17 + $0x18] sm:$0xff] }
0x1012   :  { %10047 = vmatprep.subr.bf16.mxu0 %v22609_v31  ;;  %v21284_v61 = vpack.c.bf16 %v10251_v59, %v10250_v38 }
0x1013   :  { %12584 = vmatpush3.bf16.msra.mxu1 %v21160_v12 }
0x1014   :  { %12585 = vmatprep.subr.bf16.mxu1 %v22682_v15 }
0x1015   :  { %10048 = vmatpush1.bf16.msra.mxu0 %v22680_v63  ;;  %v10249_v63 = vld [vmem:[%s21399_s17 + $0x8] sm:$0xff] }
0x1016   :  { %10049 = vmatprep.subr.bf16.mxu0 %v22609_v31 }
0x1019   :  { %10050 = vmatpush1.bf16.msra.mxu0 %v22681_v14 }
0x101a   :  { %10064 = vmatprep.subr.bf16.mxu0 %v22609_v31 }
0x101c   :  { %10056 = vmatmul.mubr.bf16.vlgmr.msra.gmra.mrb[92].mxu0 %v20615_v34 }
0x101d   :  { %10065 = vmatpush1.bf16.msra.mxu0 %v20574_v7  ;;  %12073 = vmatprep.mubr.msk.bf16.mxu0 %vm8477_vm3, %v20595_v42  ;;  %v22683_v7 = vpack.c.bf16 %v20638_v30, %v20636_v29  ;;  %v22685_v29 = vld [vmem:[#allocation158_spill] sm:$0xff] }
0x101e   :  { %10066 = vmatprep.subr.bf16.mxu0 %v22609_v31  ;;  %v22686_v30 = vld [vmem:[#allocation126_spill] sm:$0xff] }
0x1021   :  { %10067 = vmatpush1.bf16.msra.mxu0 %v20591_v56 }
0x1022   :  { %10068 = vmatprep.subr.bf16.mxu0 %v22609_v31 }
0x1025   :  { %10069 = vmatpush1.bf16.msra.mxu0 %v20613_v4 }
0x1026   :  { %10070 = vmatprep.subr.bf16.mxu0 %v22609_v31 }
0x1029   :  { %10071 = vmatpush1.bf16.msra.mxu0 %v20632_v57 }
0x102a   :  { %10072 = vmatprep.subr.bf16.mxu0 %v22609_v31 }
0x102d   :  { %10073 = vmatpush1.bf16.msra.mxu0 %v20661_v62  ;;  %v22690_v62 = vld [vmem:[#allocation128_spill] sm:$0xff] }
0x102e   :  { %10074 = vmatprep.subr.bf16.mxu0 %v22609_v31 }
0x1031   :  { %10075 = vmatpush1.bf16.msra.mxu0 %v20678_v24  ;;  %v22695_v24 = vld [vmem:[#allocation161_spill] sm:$0xff] }
0x1032   :  { %10076 = vmatprep.subr.bf16.mxu0 %v22609_v31 }
0x1035   :  { %10077 = vmatpush1.bf16.msra.mxu0 %v20687_v17  ;;  %v22697_v17 = vld [vmem:[#allocation131_spill] sm:$0xff] }
0x1036   :  { %10078 = vmatprep.subr.bf16.mxu0 %v22609_v31 }
0x1039   :  { %10079 = vmatpush1.bf16.msra.mxu0 %v20694_v46  ;;  %v22698_v46 = vld [vmem:[#allocation142_spill] sm:$0xff] }
0x103a   :  { %10080 = vmatprep.subr.bf16.mxu0 %v22609_v31 }
0x103d   :  { %10081 = vmatpush1.bf16.msra.mxu0 %v20701_v11  ;;  %v22699_v11 = vld [vmem:[#allocation133_spill] sm:$0xff] }
0x103e   :  { %10082 = vmatprep.subr.bf16.mxu0 %v22609_v31 }
0x1041   :  { %10083 = vmatpush1.bf16.msra.mxu0 %v20708_v32  ;;  %v22700_v32 = vld [vmem:[#allocation144_spill] sm:$0xff] }
0x1042   :  { %10084 = vmatprep.subr.bf16.mxu0 %v22609_v31 }
0x1045   :  { %10085 = vmatpush1.bf16.msra.mxu0 %v20715_v54  ;;  %v22701_v54 = vld [vmem:[#allocation134_spill] sm:$0xff] }
0x1046   :  { %10086 = vmatprep.subr.bf16.mxu0 %v22609_v31 }
0x1049   :  { %10087 = vmatpush1.bf16.msra.mxu0 %v20722_v28  ;;  %v22702_v28 = vld [vmem:[#allocation145_spill] sm:$0xff] }
0x104a   :  { %10088 = vmatprep.subr.bf16.mxu0 %v22609_v31 }
0x104d   :  { %10089 = vmatpush1.bf16.msra.mxu0 %v20729_v41  ;;  %v22703_v41 = vmov 0.0  }
0x104e   :  { %10090 = vmatprep.subr.bf16.mxu0 %v22609_v31 }
0x1051   :  { %10091 = vmatpush1.bf16.msra.mxu0 %v20736_v39  ;;  %v22704_v39 = vld [vmem:[#allocation157_spill] sm:$0xff] }
0x1052   :  { %10105 = vmatprep.subr.bf16.mxu0 %v22609_v31 }
0x1054   :  { %10097 = vmatmul.mubr.bf16.vlgmr.msra.gmra.mrb[92].mxu0 %v20599_v18 }
0x1055   :  { %10106 = vmatpush1.bf16.msra.mxu0 %v20743_v23  ;;  %12074 = vmatprep.mubr.msk.bf16.mxu0 %vm8477_vm3, %v20634_v2  ;;  %v22684_v2 = vld [vmem:[#allocation125_spill] sm:$0xff] }
0x1056   :  { %10107 = vmatprep.subr.bf16.mxu0 %v22609_v31  ;;  %v22705_v23 = vld [vmem:[#allocation109_spill] sm:$0xff] }
0x1059   :  { %10108 = vmatpush1.bf16.msra.mxu0 %v20755_v51  ;;  %v22706_v51 = vpack.c.bf16 %v22704_v39, %v22705_v23 }
0x105a   :  { %10109 = vmatprep.subr.bf16.mxu0 %v22609_v31 }
0x105d   :  { %10110 = vmatpush1.bf16.msra.mxu0 %v20762_v16 }
0x105e   :  { %10111 = vmatprep.subr.bf16.mxu0 %v22609_v31 }
0x1061   :  { %10112 = vmatpush1.bf16.msra.mxu0 %v20769_v26 }
0x1062   :  { %10113 = vmatprep.subr.bf16.mxu0 %v22609_v31 }
0x1065   :  { %10114 = vmatpush1.bf16.msra.mxu0 %v20776_v58 }
0x1066   :  { %10115 = vmatprep.subr.bf16.mxu0 %v22609_v31 }
0x1069   :  { %10116 = vmatpush1.bf16.msra.mxu0 %v20783_v60 }
0x106a   :  { %10117 = vmatprep.subr.bf16.mxu0 %v22609_v31 }
0x106d   :  { %10118 = vmatpush1.bf16.msra.mxu0 %v20790_v3 }
0x106e   :  { %10119 = vmatprep.subr.bf16.mxu0 %v22609_v31 }
0x1071   :  { %10120 = vmatpush1.bf16.msra.mxu0 %v20797_v50 }
0x1072   :  { %10121 = vmatprep.subr.bf16.mxu0 %v22609_v31 }
0x1075   :  { %10122 = vmatpush1.bf16.msra.mxu0 %v20804_v5 }
0x1076   :  { %10123 = vmatprep.subr.bf16.mxu0 %v22609_v31 }
0x1079   :  { %10124 = vmatpush1.bf16.msra.mxu0 %v20811_v21 }
0x107a   :  { %10125 = vmatprep.subr.bf16.mxu0 %v22609_v31 }
0x107d   :  { %10126 = vmatpush1.bf16.msra.mxu0 %v20818_v20 }
0x107e   :  { %10127 = vmatprep.subr.bf16.mxu0 %v22609_v31 }
0x1081   :  { %10128 = vmatpush1.bf16.msra.mxu0 %v20825_v0 }
0x1082   :  { %10129 = vmatprep.subr.bf16.mxu0 %v22609_v31 }
0x1085   :  { %10130 = vmatpush1.bf16.msra.mxu0 %v20832_v35 }
0x1086   :  { %10131 = vmatprep.subr.bf16.mxu0 %v22609_v31 }
0x1089   :  { %10132 = vmatpush1.bf16.msra.mxu0 %v20839_v40 }
0x108a   :  { %10151 = vmatprep.subr.bf16.mxu0 %v22609_v31 }
0x108c   :  { %10138 = vmatmul.mubr.bf16.vlgmr.msra.gmra.mrb[92].mxu0 %v20641_v36  ;;  %v22687_v36 = vld [vmem:[#allocation101_spill] sm:$0xff] }
0x108d   :  { %10152 = vmatpush1.bf16.msra.mxu0 %v20846_v22  ;;  %12075 = vmatprep.mubr.msk.bf16.mxu0 %vm8477_vm3, %v22683_v7 }
0x108e   :  { %10153 = vmatprep.subr.bf16.mxu0 %v22609_v31 }
0x1091   :  { %10154 = vmatpush1.bf16.msra.mxu0 %v20856_v13 }
0x1092   :  { %10155 = vmatprep.subr.bf16.mxu0 %v22609_v31 }
0x1095   :  { %10156 = vmatpush1.bf16.msra.mxu0 %v20863_v25 }
0x1096   :  { %10157 = vmatprep.subr.bf16.mxu0 %v22609_v31 }
0x1099   :  { %10158 = vmatpush1.bf16.msra.mxu0 %v20870_v43 }
0x109a   :  { %10159 = vmatprep.subr.bf16.mxu0 %v22609_v31 }
0x109d   :  { %10160 = vmatpush1.bf16.msra.mxu0 %v20877_v53  ;;  %v10248_v53 = vld [vmem:[%s21399_s17] sm:$0xff] }
0x109e   :  { %10161 = vmatprep.subr.bf16.mxu0 %v22609_v31  ;;  %v21271_v45 = vpack.c.bf16 %v10249_v63, %v10248_v53  ;;  %v14144_v53 = vld [vmem:[%s21402_s19 + $0x8] sm:$0xff]   ;;  %v14145_v63 = vld [vmem:[%s21402_s19 + $0x30] sm:$0xff]  }
0x10a1   :  { %10162 = vmatpush1.bf16.msra.mxu0 %v20884_v33  ;;  %v22696_v33 = vld [vmem:[#allocation130_spill] sm:$0xff] }
0x10a2   :  { %10163 = vmatprep.subr.bf16.mxu0 %v22609_v31 }
0x10a5   :  { %10164 = vmatpush1.bf16.msra.mxu0 %v20891_v37  ;;  %v22694_v37 = vld [vmem:[#allocation129_spill] sm:$0xff] }
0x10a6   :  { %10165 = vmatprep.subr.bf16.mxu0 %v22609_v31 }
0x10a9   :  { %10166 = vmatpush1.bf16.msra.mxu0 %v20898_v49  ;;  %v22691_v49 = vld [vmem:[#allocation127_spill] sm:$0xff] }
0x10aa   :  { %10167 = vmatprep.subr.bf16.mxu0 %v22609_v31 }
0x10ad   :  { %10168 = vmatpush1.bf16.msra.mxu0 %v20905_v55  ;;  %v22688_v55 = vpack.c.bf16 %v22686_v30, %v22687_v36 }
0x10ae   :  { %10169 = vmatprep.subr.bf16.mxu0 %v22609_v31 }
0x10b1   :  { %10170 = vmatpush1.bf16.msra.mxu0 %v20912_v1  ;;  %v22692_v1 = vpack.c.bf16 %v22690_v62, %v22691_v49 }
0x10b2   :  { %10171 = vmatprep.subr.bf16.mxu0 %v22609_v31 }
0x10b5   :  { %10172 = vmatpush1.bf16.msra.mxu0 %v20919_v48  ;;  %v22693_v48 = vld [vmem:[#allocation160_spill] sm:$0xff] }
0x10b6   :  { %10173 = vmatprep.subr.bf16.mxu0 %v22609_v31 }
0x10b7   :  { %v21196_v56 = vpop.f32.mrb[88].mxu0 }
0x10b8   :  { %v10016_v42 = vpop.f32.mrb[89].mxu0  ;;  %v10253_v47 = vsel %vm10252_vm4, %v21196_v56, 0.0 }
0x10b9   :  { %v21198_v18 = vpop.f32.mrb[90].mxu0  ;;  %10174 = vmatpush1.bf16.msra.mxu0 %v20926_v10  ;;  %v22689_v10 = vld [vmem:[#allocation159_spill] sm:$0xff] }
0x10ba   :  { %v10254_v4 = vsel %vm10252_vm4, %v21198_v18, 0.0  ;;  %v10019_v34 = vpop.f32.mrb[91].mxu0  ;;  %10175 = vmatprep.subr.bf16.mxu0 %v22609_v31 }
0x10bb   :  { %v10255_v57 = vadd.f32 %v10254_v4, %v10253_v47  ;;  %v22707_v34 = vld [vmem:[#allocation114_spill] sm:$0xff] }
0x10bd   :  { %10176 = vmatpush1.bf16.msra.mxu0 %v22684_v2 }
0x10be   :  { %10177 = vmatprep.subr.bf16.mxu0 %v22609_v31 }
0x10c1   :  { %10178 = vmatpush1.bf16.msra.mxu0 %v22685_v29 }
0x10c2   :  { %10197 = vmatprep.subr.bf16.mxu0 %v22609_v31 }
0x10c4   :  { %10184 = vmatmul.mubr.bf16.vlgmr.msra.gmra.mrb[92].mxu0 %v22688_v55 }
0x10c5   :  { %10198 = vmatpush1.bf16.msra.mxu0 %v22689_v10  ;;  %12076 = vmatprep.mubr.msk.bf16.mxu0 %vm8477_vm3, %v22692_v1 }
0x10c6   :  { %10199 = vmatprep.subr.bf16.mxu0 %v22609_v31 }
0x10c9   :  { %10200 = vmatpush1.bf16.msra.mxu0 %v22693_v48 }
0x10ca   :  { %10201 = vmatprep.subr.bf16.mxu0 %v22609_v31 }
0x10cd   :  { %10202 = vmatpush1.bf16.msra.mxu0 %v22694_v37 }
0x10ce   :  { %10203 = vmatprep.subr.bf16.mxu0 %v22609_v31 }
0x10d1   :  { %10204 = vmatpush1.bf16.msra.mxu0 %v22695_v24 }
0x10d2   :  { %10205 = vmatprep.subr.bf16.mxu0 %v22609_v31 }
0x10d5   :  { %10206 = vmatpush1.bf16.msra.mxu0 %v22696_v33 }
0x10d6   :  { %10207 = vmatprep.subr.bf16.mxu0 %v22609_v31 }
0x10d9   :  { %10208 = vmatpush1.bf16.msra.mxu0 %v22697_v17 }
0x10da   :  { %10209 = vmatprep.subr.bf16.mxu0 %v22609_v31 }
0x10dd   :  { %10210 = vmatpush1.bf16.msra.mxu0 %v22698_v46 }
0x10de   :  { %10211 = vmatprep.subr.bf16.mxu0 %v22609_v31 }
0x10e1   :  { %10212 = vmatpush1.bf16.msra.mxu0 %v22699_v11 }
0x10e2   :  { %10213 = vmatprep.subr.bf16.mxu0 %v22609_v31 }
0x10e5   :  { %10214 = vmatpush1.bf16.msra.mxu0 %v22700_v32 }
0x10e6   :  { %10215 = vmatprep.subr.bf16.mxu0 %v22609_v31 }
0x10e9   :  { %10216 = vmatpush1.bf16.msra.mxu0 %v22701_v54 }
0x10ea   :  { %10217 = vmatprep.subr.bf16.mxu0 %v22609_v31 }
0x10ed   :  { %10218 = vmatpush1.bf16.msra.mxu0 %v22702_v28 }
0x10ee   :  { %10219 = vmatprep.subr.bf16.mxu0 %v22609_v31 }
0x10f1   :  { %10220 = vmatpush1.bf16.msra.mxu0 %v21027_v6  ;;  %v10246_v6 = vld [vmem:[%s21398_s16 + $0x30] sm:$0xff] }
0x10f2   :  { %10221 = vmatprep.subr.bf16.mxu0 %v22609_v31 }
0x10f5   :  { %10222 = vmatpush1.bf16.msra.mxu0 %v21034_v19  ;;  %v10247_v19 = vld [vmem:[%s21398_s16 + $0x38] sm:$0xff] }
0x10f6   :  { %10223 = vmatprep.subr.bf16.mxu0 %v22609_v31  ;;  %v12586_v31 = vpack.c.bf16 %v10247_v19, %v10246_v6 }
0x10f8   :  { %12587 = vmatpush3.bf16.msra.mxu1 %v12586_v31 }
0x10f9   :  { %10224 = vmatpush1.bf16.msra.mxu0 %v21041_v44  ;;  %12588 = vmatprep.subr.bf16.mxu1 %v22682_v15  ;;  %v10256_v44 = vrot.slane %v10255_v57, 4 }
0x10fa   :  { %12359 = vmatprep.subr.bf16.mxu0 %v22703_v41 }
0x10fb   :  { %v10257_v16 = vadd.f32 %v10256_v44, %v10255_v57 }
0x10fc   :  { %10230 = vmatmul.mubr.bf16.vlgmr.msra.gmra.mrb[92].mxu0 %v22706_v51 }
0x10fd   :  { %12367 = vmatprep.mubr.msk.bf16.mxu0 %vm14340_vm1, %v22703_v41  ;;  %v10258_v21 = vrot.slane %v10257_v16, 2 }
0x10ff   :  { %v10259_v35 = vadd.f32 %v10258_v21, %v10257_v16 }
0x1101   :  { %v10260_v13 = vrot.slane %v10259_v35, 1 }
0x1103   :  { %v10261_v14 = vadd.f32 %v10260_v13, %v10259_v35 }
0x11cf   :  { %v21257_v26 = vpop.f32.mrb[92].mxu0 }
0x11d0   :  { %v10233_v58 = vpop.f32.mrb[93].mxu0  ;;  %v10262_v3 = vsel %vm10252_vm4, %v21257_v26, 0.0 }
0x11d1   :  { %v21259_v60 = vpop.f32.mrb[94].mxu0 }
0x11d2   :  { %v10263_v50 = vsel %vm10252_vm4, %v21259_v60, 0.0  ;;  %v10236_v5 = vpop.f32.mrb[95].mxu0 }
0x11d3   :  { %v10264_v20 = vadd.f32 %v10263_v50, %v10262_v3 }
0x11d5   :  { %v10265_v0 = vrot.slane %v10264_v20, 4 }
0x11d7   :  { %v10266_v40 = vadd.f32 %v10265_v0, %v10264_v20  ;;  %v10527_v20 = vld [vmem:[%s21400_s14] sm:$0x1] }
0x11d9   :  { %v10267_v22 = vrot.slane %v10266_v40, 2 }
0x11db   :  { %v10268_v25 = vadd.f32 %v10267_v22, %v10266_v40  ;;  %v10531_v22 = vld [vmem:[%s21401_s15] sm:$0x1] }
0x11dd   :  { %v10269_v43 = vrot.slane %v10268_v25, 1 }
0x11df   :  { %v10270_v52 = vadd.f32 %v10269_v43, %v10268_v25  ;;  %v14142_v25 = vld [vmem:[%s21402_s19] sm:$0xff]   ;;  %v14143_v43 = vld [vmem:[%s21402_s19 + $0x28] sm:$0xff]  }
0x11e0   :  { %12360 = vmatpush3.bf16.msra.mxu0 %v14142_v25 }
0x11e1   :  { %v10271_v9 = vadd.f32 %v10270_v52, %v10261_v14  ;;  %12361 = vmatprep.subr.bf16.mxu0 %v22703_v41  ;;  %v14146_v14 = vld [vmem:[%s21402_s19 + $0x10] sm:$0xff]   ;;  %v14147_v52 = vld [vmem:[%s21402_s19 + $0x38] sm:$0xff]  }
0x11e3   :  { %12293 = vmatmul.mubr.msk.f32.vlgmr.msra.gmra.mrb[116].mxu1 %vm10252_vm4, %v10271_v9 }
0x11e4   :  { %12590 = vmatpush3.bf16.msra.mxu1 %v21271_v45  ;;  %12303 = vmatprep.mubr.msk.f32.mxu1 %vm14340_vm1, %v22703_v41 }
0x11e5   :  { %12591 = vmatprep.subr.bf16.mxu1 %v22682_v15  ;;  %12362 = vmatpush3.bf16.msra.mxu0 %v14144_v53 }
0x11e6   :  { %12363 = vmatprep.subr.bf16.mxu0 %v22703_v41 }
0x11e8   :  { %12593 = vmatpush3.bf16.msra.mxu1 %v21284_v61 }
0x11e9   :  { %12594 = vmatprep.subr.bf16.mxu1 %v22682_v15  ;;  %12364 = vmatpush3.bf16.msra.mxu0 %v14146_v14 }
0x11ea   :  { %12365 = vmatprep.subr.bf16.mxu0 %v22703_v41 }
0x12b6   :  { %v10341_v7 = vpop.f32.mrb[116].mxu1 }
0x12b7   :  { %v21288_v42 = vmul.f32 0.125, %v10341_v7  ;;  %v12294_v47 = vpop.f32.mrb[117].mxu1 }
0x12b9   :  { %12304 = vmatmul.mubr.msk.f32.vlgmr.msra.gmra.mrb[118].mxu1 %vm472_vm0, %v21288_v42  ;;  %v10523_v44 = vmul.f32 %v21288_v42, %v21288_v42 }
0x12ba   :  { %12596 = vmatpush3.bf16.msra.mxu1 %v21142_v8  ;;  %12322 = vmatprep.mubr.msk.f32.mxu1 %vm14340_vm1, %v22703_v41 }
0x12bb   :  { %12597 = vmatprep.subr.bf16.mxu1 %v22682_v15  ;;  %v10524_v16 = vmul.f32 56.0, %v10523_v44 }
0x12be   :  { %12599 = vmatpush3.bf16.msra.mxu1 %v21148_v27 }
0x12bf   :  { %12600 = vmatprep.subr.bf16.mxu1 %v22682_v15 }
0x12c2   :  { %12602 = vmatpush3.bf16.msra.mxu1 %v21160_v12 }
0x12c3   :  { %12603 = vmatprep.subr.bf16.mxu1 %v22682_v15 }
0x12c6   :  { %12605 = vmatpush3.bf16.msra.mxu1 %v12586_v31 }
0x12c7   :  { %12606 = vmatprep.subr.bf16.mxu1 %v22682_v15 }
0x138c   :  { %v10415_v4 = vpop.f32.mrb[118].mxu1 }
0x138d   :  { %v10422_v57 = vrot.slane %v10415_v4, %v22707_v34  ;;  %v12305_v8 = vpop.f32.mrb[119].mxu1 }
0x138f   :  { %v10423_v2 = vsub.f32 %v21196_v56, %v10422_v57  ;;  %v10424_v29 = vsub.f32 %v21198_v18, %v10422_v57  ;;  %v10436_v30 = vsub.f32 %v21257_v26, %v10422_v57  ;;  %v10437_v27 = vsub.f32 %v21259_v60, %v10422_v57 }
0x1391   :  { %v10425_v36 = vmul.f32 %v10423_v2, %v10423_v2  ;;  %v10426_v55 = vmul.f32 %v10424_v29, %v10424_v29  ;;  %v10438_v12 = vmul.f32 %v10436_v30, %v10436_v30  ;;  %v10439_v10 = vmul.f32 %v10437_v27, %v10437_v27 }
0x1393   :  { %v10427_v62 = vsel %vm10252_vm4, %v10425_v36, 0.0  ;;  %v10428_v49 = vsel %vm10252_vm4, %v10426_v55, 0.0  ;;  %v10440_v1 = vsel %vm10252_vm4, %v10438_v12, 0.0  ;;  %v10441_v48 = vsel %vm10252_vm4, %v10439_v10, 0.0  ;;  %v10699_v10 = vpop.permute.xlu0 %10698 }
0x1394   :  { %v10429_v37 = vadd.f32 %v10428_v49, %v10427_v62  ;;  %v10442_v24 = vadd.f32 %v10441_v48, %v10440_v1 }
0x1396   :  { %v10430_v33 = vrot.slane %v10429_v37, 4  ;;  %v10443_v17 = vrot.slane %v10442_v24, 4 }
0x1398   :  { %v10431_v46 = vadd.f32 %v10430_v33, %v10429_v37  ;;  %v10444_v11 = vadd.f32 %v10443_v17, %v10442_v24  ;;  %v12100_v37 = vld [vmem:[%s21403_s20] ss:$0 sm:$0xff] }
0x139a   :  { %v10432_v32 = vrot.slane %v10431_v46, 2  ;;  %v10445_v54 = vrot.slane %v10444_v11, 2 }
0x139c   :  { %v10433_v28 = vadd.f32 %v10432_v32, %v10431_v46  ;;  %v10446_v39 = vadd.f32 %v10445_v54, %v10444_v11 }
0x139e   :  { %v10434_v23 = vrot.slane %v10433_v28, 1  ;;  %v10447_v51 = vrot.slane %v10446_v39, 1 }
0x13a0   :  { %v10435_v6 = vadd.f32 %v10434_v23, %v10433_v28  ;;  %v10448_v19 = vadd.f32 %v10447_v51, %v10446_v39 }
0x13a2   :  { %v10449_v31 = vadd.f32 %v10448_v19, %v10435_v6 }
0x13a4   :  { %12323 = vmatmul.mubr.msk.f32.vlgmr.msra.gmra.mrb[120].mxu1 %vm10252_vm4, %v10449_v31 }
0x13a5   :  { %12608 = vmatpush3.bf16.msra.mxu1 %v21271_v45  ;;  %12333 = vmatprep.mubr.msk.f32.mxu1 %vm14340_vm1, %v22703_v41 }
0x13a6   :  { %12609 = vmatprep.subr.bf16.mxu1 %v22682_v15 }
0x13a9   :  { %12611 = vmatpush3.bf16.msra.mxu1 %v21284_v61 }
0x13aa   :  { %12612 = vmatprep.subr.bf16.mxu1 %v22682_v15 }
0x1477   :  { %v10519_v58 = vpop.f32.mrb[120].mxu1 }
0x1478   :  { %v10525_v3 = vsub.f32 %v10519_v58, %v10524_v16  ;;  %v12324_v50 = vpop.f32.mrb[121].mxu1 }
0x147a   :  { %v10526_v5 = vmul.f32 0.125, %v10525_v3 }
0x147c   :  { %v10528_v21 = vadd.f32 1e-05, %v10526_v5 }
0x147e   :  { %14153 = vrsqrt.f32 %v10528_v21 }
0x1488   :  { %v14154_v0 = vpop.eup %14153 }
0x1489   :  { %v10530_v35 = vmul.f32 %v14154_v0, %v10527_v20 }
0x148b   :  { %12334 = vmatmul.mubr.msk.f32.vlgmr.msra.gmra.mrb[122].mxu1 %vm472_vm0, %v10530_v35  ;;  %v10532_v40 = vmul.f32 %v10530_v35, %v21288_v42 }
0x148c   :  { %12614 = vmatpush3.bf16.msra.mxu1 %v21271_v45  ;;  %12344 = vmatprep.mubr.msk.f32.mxu1 %vm14340_vm1, %v22703_v41  ;;  %v14148_v45 = vld [vmem:[%s21402_s19 + $0x18] sm:$0xff]  }
0x148d   :  { %12615 = vmatprep.subr.bf16.mxu1 %v22682_v15  ;;  %v10533_v13 = vsub.f32 %v10531_v22, %v10532_v40  ;;  %v14141_v15 = vld [vmem:[%s21402_s19 + $0x20] sm:$0xff]   ;;  %12366 = vmatpush3.bf16.msra.mxu0 %v14148_v45 }
0x1490   :  { %12617 = vmatpush3.bf16.msra.mxu1 %v21284_v61 }
0x1491   :  { %12347 = vmatprep.subr.bf16.mxu1 %v22703_v41 }
0x1493   :  { %12345 = vmatmul.mubr.msk.f32.vlgmr.msra.gmra.mrb[124].mxu1 %vm472_vm0, %v10533_v13 }
0x1494   :  { %12355 = vmatprep.mubr.msk.bf16.mxu1 %vm14340_vm1, %v22703_v41  ;;  %12348 = vmatpush3.bf16.msra.mxu1 %v14141_v15 }
0x1495   :  { %12349 = vmatprep.subr.bf16.mxu1 %v22703_v41 }
0x1498   :  { %12350 = vmatpush3.bf16.msra.mxu1 %v14143_v43 }
0x1499   :  { %12351 = vmatprep.subr.bf16.mxu1 %v22703_v41 }
0x149c   :  { %12352 = vmatpush3.bf16.msra.mxu1 %v14145_v63 }
0x149d   :  { %12353 = vmatprep.subr.bf16.mxu1 %v22703_v41 }
0x14a0   :  { %12354 = vmatpush3.bf16.msra.mxu1 %v14147_v52 }
0x155e   :  { %v10603_v9 = vpop.f32.mrb[122].mxu1 }
0x155f   :  { %v10683_v38 = vrot.slane %v10603_v9, %v22707_v34  ;;  %v12335_v59 = vpop.f32.mrb[123].mxu1 }
0x1561   :  { %v10684_v61 = vmul.f32 %v10683_v38, %v21196_v56  ;;  %v10685_v7 = vmul.f32 %v10683_v38, %v21198_v18  ;;  %v10708_v42 = vmul.f32 %v10683_v38, %v21257_v26  ;;  %v10709_v47 = vmul.f32 %v10683_v38, %v21259_v60  ;;  %v10704_v56 = vpop.permute.xlu1 %10703 }
0x1566   :  { %v10676_v4 = vpop.f32.mrb[124].mxu1 }
0x1567   :  { %v10689_v57 = vrot.slane %v10676_v4, %v22707_v34  ;;  %v12346_v8 = vpop.f32.mrb[125].mxu1 }
0x1569   :  { %v10690_v2 = vadd.f32 %v10689_v57, %v10684_v61  ;;  %v10691_v41 = vadd.f32 %v10689_v57, %v10685_v7  ;;  %v10710_v29 = vadd.f32 %v10708_v42, %v10689_v57  ;;  %v10711_v30 = vadd.f32 %v10709_v47, %v10689_v57 }
0x156b   :  { %v10692_v27 = vmax.f32 %v10690_v2, 0.0  ;;  %v10693_v36 = vmax.f32 %v10691_v41, 0.0  ;;  %v10712_v55 = vmax.f32 %v10710_v29, 0.0  ;;  %v10713_v12 = vmax.f32 %v10711_v30, 0.0 }
0x156d   :  { %v10706_v62 = vmul.f32 %v10699_v10, %v10692_v27  ;;  %v10707_v18 = vmul.f32 %v10704_v56, %v10693_v36  ;;  %v10714_v49 = vmul.f32 %v10712_v55, %v10699_v10  ;;  %v10715_v26 = vmul.f32 %v10713_v12, %v10704_v56 }
0x156f   :  { %v10725_v1 = vpack.c.bf16 %v10715_v26, %v10714_v49  ;;  %v10716_v60 = vpack.c.bf16 %v10707_v18, %v10706_v62 }
0x1571   :  { %12356 = vmatmul.mubr.msk.bf16.vlgmr.msra.gmra.mrb[128].mxu1 %vm10252_vm4, %v10725_v1  ;;  %12368 = vmatmul.mubr.msk.bf16.vlgmr.msra.gmra.mrb[96].mxu0 %vm10252_vm4, %v10716_v60 }
0x1644   :  { %v10796_v34 = vpop.f32.mrb[128].mxu1  ;;  %v10864_v48 = vpop.f32.mrb[96].mxu0 }
0x1645   :  { %v10865_v24 = vadd.f32 %v10864_v48, %v10796_v34  ;;  %v12357_v33 = vpop.f32.mrb[129].mxu1  ;;  %v12369_v17 = vpop.f32.mrb[97].mxu0 }
0x1646   :  { %v10799_v46 = vpop.f32.mrb[130].mxu1  ;;  %v10867_v11 = vpop.f32.mrb[98].mxu0 }
0x1647   :  { %v10878_v32 = vadd.f32 %v12100_v37, %v10865_v24  ;;  %v10868_v54 = vadd.f32 %v10867_v11, %v10799_v46  ;;  %v12358_v28 = vpop.f32.mrb[131].mxu1  ;;  %v12370_v39 = vpop.f32.mrb[99].mxu0 }
0x1649   :  { %10881 = vst.msk [vmem:[%s21404_s21] sm:$0xff] %vm10880_vm5, %v10878_v32  ;;  %v10879_v23 = vadd.f32 %v12100_v37, %v10868_v54 }
0x164b   :  { %10882 = vst.msk [vmem:[%s21404_s21 + $0x8] sm:$0xff] %vm10880_vm5, %v10879_v23 }

</bundles_post_ra>
